<compile_context>
chip_gen: v7x
topology: tpu7x:2x2x1
jax: 0.10.0
libtpu: 0.0.40
codegen_flags: <defaults>
</compile_context>

<pallas_src>
import jax
import jax.numpy as jnp
from jax.experimental import pallas as pl
from jax.experimental.pallas import tpu as pltpu

SEQ_LEN = 22          # frames per sample
IMG = 20              # input spatial size
HID = 128             # GRU hidden size
GP = 256              # lane-aligned width of one padded pool group (>= 144)


# ---------------------------------------------------------------------------
# Fused forward kernel: one batch element per grid step, everything in VMEM.
# ---------------------------------------------------------------------------
def _fused_kernel(x_ref, w1_ref, b1_ref, w2_ref, b2_ref,
                  wf1_ref, bf1_ref, wf2_ref, bf2_ref,
                  wih_ref, bih_ref, whh_ref, bhh_ref,
                  wcls_ref, bcls_ref, out_ref):
    f32 = jnp.float32
    x = x_ref[0]                                                    # (22, 400)

    # encoder: Conv2d(1,8,6,2) + ReLU as one expanded matmul
    y1 = jnp.maximum(
        jnp.dot(x, w1_ref[...], preferred_element_type=f32) + b1_ref[...], 0.0)

    # Conv2d(8,16,3,1) + ReLU; columns grouped by 2x2 max-pool candidate
    y2 = jnp.maximum(
        jnp.dot(y1, w2_ref[...], preferred_element_type=f32) + b2_ref[...], 0.0)

    # MaxPool2d(2): max over the 4 lane-aligned groups.  Result is already the
    # (C, H, W)-ordered flatten (plus zero padding) expected by fc1.
    pooled = jnp.maximum(
        jnp.maximum(y2[:, 0:GP], y2[:, GP:2 * GP]),
        jnp.maximum(y2[:, 2 * GP:3 * GP], y2[:, 3 * GP:4 * GP]))

    # fc: Linear(144,64)+ReLU, Dropout(identity), Linear(64,64)+ReLU
    h1 = jnp.maximum(
        jnp.dot(pooled, wf1_ref[...], preferred_element_type=f32)
        + bf1_ref[...], 0.0)
    h2 = jnp.maximum(
        jnp.dot(h1, wf2_ref[...], preferred_element_type=f32)
        + bf2_ref[...], 0.0)

    # GRU(64,128): input gates for all 22 steps in one matmul, then an
    # unrolled recurrence (T is static).  Gate order [r | z | n].
    xg = jnp.dot(h2, wih_ref[...], preferred_element_type=f32) + bih_ref[...]
    whh = whh_ref[...]
    bhh = bhh_ref[...]
    h = jnp.zeros((1, HID), f32)
    for t in range(SEQ_LEN):
        xg_t = xg[t:t + 1, :]
        hg = jnp.dot(h, whh, preferred_element_type=f32) + bhh
        r = jax.nn.sigmoid(xg_t[:, :HID] + hg[:, :HID])
        z = jax.nn.sigmoid(xg_t[:, HID:2 * HID] + hg[:, HID:2 * HID])
        n = jnp.tanh(xg_t[:, 2 * HID:] + r * hg[:, 2 * HID:])
        h = (1.0 - z) * n + z * h

    # classifier: Dropout(identity) + Linear(128,C) + Softmax(dim=1)
    logits = jnp.dot(h, wcls_ref[...], preferred_element_type=f32) + bcls_ref[...]
    m = jnp.max(logits, axis=1, keepdims=True)
    e = jnp.exp(logits - m)
    out_ref[0] = e / jnp.sum(e, axis=1, keepdims=True)


# ---------------------------------------------------------------------------
# One-time weight preparation (outside the per-call forward)
# ---------------------------------------------------------------------------
def im2col(x, k, stride):
    """x: (N, H, W, C) -> (N*OH*OW, k*k*C), patch element order (kh, kw, C)."""
    N, H, W, C = x.shape
    OH = (H - k) // stride + 1
    OW = (W - k) // stride + 1
    cols = []
    for kh in range(k):
        for kw in range(k):
            cols.append(x[:, kh:kh + stride * (OH - 1) + 1:stride,
                            kw:kw + stride * (OW - 1) + 1:stride, :])
    p = jnp.stack(cols, axis=3)                    # (N, OH, OW, k*k, C)
    return p.reshape(N * OH * OW, k * k * C), OH, OW


def prepare_params(params):
    """Fold im2col, max-pool grouping and the (C,H,W) flatten into the weights."""
    # conv1: (8,1,6,6) -> (400, 512); y1 columns ordered (oh, ow, c_out).
    w1_mat = params['conv1_w'].transpose(2, 3, 1, 0).reshape(36, 8)
    eye1 = jnp.eye(IMG * IMG, dtype=jnp.float32).reshape(IMG * IMG, IMG, IMG, 1)
    e1, oh1, ow1 = im2col(eye1, 6, 2)                               # (400*64, 36)
    w1e = (e1.reshape(IMG * IMG, oh1 * ow1, 36) @ w1_mat
           ).reshape(IMG * IMG, oh1 * ow1 * 8)                      # (400, 512)
    b1e = jnp.tile(params['conv1_b'], oh1 * ow1).reshape(1, -1)

    # conv2: (16,8,3,3) -> (512, 4*GP); columns grouped by pool candidate
    # (dh, dw), ordered (c_out, ph, pw) within a group, zero-padded to GP.
    w2_mat = params['conv2_w'].transpose(2, 3, 1, 0).reshape(72, 16)
    n_in = oh1 * ow1 * 8                                            # 512
    eye2 = jnp.eye(n_in, dtype=jnp.float32).reshape(n_in, oh1, ow1, 8)
    e2, oh2, ow2 = im2col(eye2, 3, 1)                               # (512*36, 72)
    w2e = (e2.reshape(n_in, oh2 * ow2, 72) @ w2_mat
           ).reshape(n_in, oh2, ow2, 16)                            # (512,6,6,16)
    w2e = w2e.reshape(n_in, 3, 2, 3, 2, 16).transpose(0, 2, 4, 5, 1, 3)
    w2e = w2e.reshape(n_in, 4, 144)
    w2e = jnp.pad(w2e, ((0, 0), (0, 0), (0, GP - 144))).reshape(n_in, 4 * GP)
    b2e = jnp.tile(jnp.repeat(params['conv2_b'], 9), 4).reshape(4, 144)
    b2e = jnp.pad(b2e, ((0, 0), (0, GP - 144))).reshape(1, 4 * GP)

    # fc1 consumes the pooled (C,H,W) flatten; pad its input rows to GP.
    wf1 = jnp.pad(params['fc1_w'].T, ((0, GP - 144), (0, 0)))       # (256, 64)

    return dict(
        w1e=w1e, b1e=b1e, w2e=w2e, b2e=b2e,
        wf1=wf1, bf1=params['fc1_b'].reshape(1, -1),
        wf2=params['fc2_w'].T, bf2=params['fc2_b'].reshape(1, -1),
        wih=params['gru_w_ih'].T, bih=params['gru_b_ih'].reshape(1, -1),
        whh=params['gru_w_hh'].T, bhh=params['gru_b_hh'].reshape(1, -1),
        wcls=params['cls_w'].T, bcls=params['cls_b'].reshape(1, -1),
    )


# ---------------------------------------------------------------------------
# Forward pass: single fused pallas_call, grid over the batch.
# ---------------------------------------------------------------------------
@jax.jit
def widar_cnn_gru_forward(x, prep):
    """x: (B, 22, 20, 20) float32; prep: output of prepare_params."""
    B = x.shape[0]
    C = prep['wcls'].shape[1]
    xs = x.reshape(B, SEQ_LEN, IMG * IMG)

    weights = (prep['w1e'], prep['b1e'], prep['w2e'], prep['b2e'],
               prep['wf1'], prep['bf1'], prep['wf2'], prep['bf2'],
               prep['wih'], prep['bih'], prep['whh'], prep['bhh'],
               prep['wcls'], prep['bcls'])
    w_specs = [pl.BlockSpec(w.shape, lambda b: (0, 0)) for w in weights]

    out = pl.pallas_call(
        _fused_kernel,
        out_shape=jax.ShapeDtypeStruct((B, 1, C), jnp.float32),
        grid=(B,),
        in_specs=[pl.BlockSpec((1, SEQ_LEN, IMG * IMG), lambda b: (b, 0, 0))]
                 + w_specs,
        out_specs=pl.BlockSpec((1, 1, C), lambda b: (b, 0, 0)),
        compiler_params=pltpu.CompilerParams(
            dimension_semantics=("parallel",)),
    )(xs, *weights)
    return out.reshape(B, C)


# ---------------------------------------------------------------------------
# Deterministic parameter init (PyTorch-default-like uniform bounds)
# ---------------------------------------------------------------------------
def init_params(key, num_classes):
    keys = jax.random.split(key, 14)

    def u(k, shape, fan_in):
        bound = 1.0 / jnp.sqrt(jnp.float32(fan_in))
        return jax.random.uniform(k, shape, jnp.float32, -bound, bound)

    return dict(
        conv1_w=u(keys[0], (8, 1, 6, 6), 1 * 6 * 6),
        conv1_b=u(keys[1], (8,), 1 * 6 * 6),
        conv2_w=u(keys[2], (16, 8, 3, 3), 8 * 3 * 3),
        conv2_b=u(keys[3], (16,), 8 * 3 * 3),
        fc1_w=u(keys[4], (64, 144), 144),
        fc1_b=u(keys[5], (64,), 144),
        fc2_w=u(keys[6], (64, 64), 64),
        fc2_b=u(keys[7], (64,), 64),
        gru_w_ih=u(keys[8], (384, 64), 128),
        gru_b_ih=u(keys[9], (384,), 128),
        gru_w_hh=u(keys[10], (384, 128), 128),
        gru_b_hh=u(keys[11], (384,), 128),
        cls_w=u(keys[12], (num_classes, 128), 128),
        cls_b=u(keys[13], (num_classes,), 128),
    )


# ---------------------------------------------------------------------------
# Pure-JAX reference (for numerical validation)
# ---------------------------------------------------------------------------
def reference_forward(x, params):
    B = x.shape[0]
    N = B * 22
    xi = x.reshape(N, 1, 20, 20)
    y1 = jax.lax.conv_general_dilated(
        xi, params['conv1_w'], (2, 2), 'VALID',
        dimension_numbers=('NCHW', 'OIHW', 'NCHW'))
    y1 = jax.nn.relu(y1 + params['conv1_b'][None, :, None, None])
    y2 = jax.lax.conv_general_dilated(
        y1, params['conv2_w'], (1, 1), 'VALID',
        dimension_numbers=('NCHW', 'OIHW', 'NCHW'))
    y2 = jax.nn.relu(y2 + params['conv2_b'][None, :, None, None])
    y2p = y2.reshape(N, 16, 3, 2, 3, 2).max(axis=(3, 5))
    feat = y2p.reshape(N, 144)
    h1 = jax.nn.relu(feat @ params['fc1_w'].T + params['fc1_b'])
    h2 = jax.nn.relu(h1 @ params['fc2_w'].T + params['fc2_b'])
    seq = h2.reshape(B, 22, 64).transpose(1, 0, 2)

    def step(h, xt):
        g_x = xt @ params['gru_w_ih'].T + params['gru_b_ih']
        g_h = h @ params['gru_w_hh'].T + params['gru_b_hh']
        r = jax.nn.sigmoid(g_x[:, :128] + g_h[:, :128])
        z = jax.nn.sigmoid(g_x[:, 128:256] + g_h[:, 128:256])
        n = jnp.tanh(g_x[:, 256:] + r * g_h[:, 256:])
        return (1.0 - z) * n + z * h, None

    hT, _ = jax.lax.scan(step, jnp.zeros((B, 128), jnp.float32), seq)
    logits = hT @ params['cls_w'].T + params['cls_b']
    return jax.nn.softmax(logits, axis=1)


if __name__ == "__main__":
    num_classes = 6
    key = jax.random.PRNGKey(0)
    kx, kp = jax.random.split(key)
    x = jax.random.normal(kx, (2, 22, 20, 20), jnp.float32)
    params = init_params(kp, num_classes)
    prep = prepare_params(params)

    out = jax.block_until_ready(widar_cnn_gru_forward(x, prep))
    ref = jax.block_until_ready(reference_forward(x, params))

    assert out.shape == (2, num_classes), out.shape
    assert bool(jnp.allclose(jnp.sum(out, axis=1), 1.0, atol=1e-4))
    assert bool(jnp.allclose(out, ref, rtol=2e-3, atol=2e-3)), (out, ref)
    print("KERNEL_OK")
</pallas_src>

<mosaic_0001>
module attributes {stable_mosaic.version = 11 : i64} {
  func.func @_fused_kernel(%arg0: i32, %arg1: memref<1x22x400xf32, #tpu.memory_space<vmem>>, %arg2: memref<400x512xf32, #tpu.memory_space<vmem>>, %arg3: memref<1x512xf32, #tpu.memory_space<vmem>>, %arg4: memref<512x1024xf32, #tpu.memory_space<vmem>>, %arg5: memref<1x1024xf32, #tpu.memory_space<vmem>>, %arg6: memref<256x64xf32, #tpu.memory_space<vmem>>, %arg7: memref<1x64xf32, #tpu.memory_space<vmem>>, %arg8: memref<64x64xf32, #tpu.memory_space<vmem>>, %arg9: memref<1x64xf32, #tpu.memory_space<vmem>>, %arg10: memref<64x384xf32, #tpu.memory_space<vmem>>, %arg11: memref<1x384xf32, #tpu.memory_space<vmem>>, %arg12: memref<128x384xf32, #tpu.memory_space<vmem>>, %arg13: memref<1x384xf32, #tpu.memory_space<vmem>>, %arg14: memref<128x6xf32, #tpu.memory_space<vmem>>, %arg15: memref<1x6xf32, #tpu.memory_space<vmem>>, %arg16: memref<1x1x6xf32, #tpu.memory_space<vmem>>) attributes {dimension_semantics = [#tpu.dimension_semantics<parallel>], iteration_bounds = array<i64: 2>, scalar_prefetch = 0 : i64, scratch_operands = 0 : i64, tpu.core_type = #tpu.core_type<tc>, window_params = [{transform_indices = @transform_0, window_bounds = array<i64: 1, 22, 400>}, {pipeline_mode = #tpu.pipeline_mode<synchronous>, transform_indices = @transform_1, window_bounds = array<i64: 400, 512>}, {pipeline_mode = #tpu.pipeline_mode<synchronous>, transform_indices = @transform_2, window_bounds = array<i64: 1, 512>}, {pipeline_mode = #tpu.pipeline_mode<synchronous>, transform_indices = @transform_3, window_bounds = array<i64: 512, 1024>}, {pipeline_mode = #tpu.pipeline_mode<synchronous>, transform_indices = @transform_4, window_bounds = array<i64: 1, 1024>}, {pipeline_mode = #tpu.pipeline_mode<synchronous>, transform_indices = @transform_5, window_bounds = array<i64: 256, 64>}, {pipeline_mode = #tpu.pipeline_mode<synchronous>, transform_indices = @transform_6, window_bounds = array<i64: 1, 64>}, {pipeline_mode = #tpu.pipeline_mode<synchronous>, transform_indices = @transform_7, window_bounds = array<i64: 64, 64>}, {pipeline_mode = #tpu.pipeline_mode<synchronous>, transform_indices = @transform_8, window_bounds = array<i64: 1, 64>}, {pipeline_mode = #tpu.pipeline_mode<synchronous>, transform_indices = @transform_9, window_bounds = array<i64: 64, 384>}, {pipeline_mode = #tpu.pipeline_mode<synchronous>, transform_indices = @transform_10, window_bounds = array<i64: 1, 384>}, {pipeline_mode = #tpu.pipeline_mode<synchronous>, transform_indices = @transform_11, window_bounds = array<i64: 128, 384>}, {pipeline_mode = #tpu.pipeline_mode<synchronous>, transform_indices = @transform_12, window_bounds = array<i64: 1, 384>}, {pipeline_mode = #tpu.pipeline_mode<synchronous>, transform_indices = @transform_13, window_bounds = array<i64: 128, 6>}, {pipeline_mode = #tpu.pipeline_mode<synchronous>, transform_indices = @transform_14, window_bounds = array<i64: 1, 6>}, {transform_indices = @transform_15, window_bounds = array<i64: 1, 1, 6>}]} {
    %c0 = arith.constant 0 : index
    %c0_0 = arith.constant 0 : index
    %c0_1 = arith.constant 0 : index
    %0 = vector.load %arg1[%c0, %c0_0, %c0_1] : memref<1x22x400xf32, #tpu.memory_space<vmem>>, vector<1x22x400xf32>
    %1 = vector.shape_cast %0 : vector<1x22x400xf32> to vector<22x400xf32>
    %c0_2 = arith.constant 0 : index
    %c0_3 = arith.constant 0 : index
    %2 = vector.load %arg2[%c0_2, %c0_3] : memref<400x512xf32, #tpu.memory_space<vmem>>, vector<400x512xf32>
    %cst = arith.constant dense<0.000000e+00> : vector<22x512xf32>
    %3 = tpu.matmul %1, %2, %cst {dimension_numbers = #tpu.dot_dimension_numbers<[1], [0], [0], [1], [0, 0, 1, 1], [], []>} : vector<22x400xf32>, vector<400x512xf32>, vector<22x512xf32> -> vector<22x512xf32>
    %c0_4 = arith.constant 0 : index
    %c0_5 = arith.constant 0 : index
    %4 = vector.load %arg3[%c0_4, %c0_5] : memref<1x512xf32, #tpu.memory_space<vmem>>, vector<1x512xf32>
    %5 = vector.broadcast %4 : vector<1x512xf32> to vector<22x512xf32>
    %6 = arith.addf %3, %5 : vector<22x512xf32>
    %cst_6 = arith.constant 0.000000e+00 : f32
    %7 = vector.broadcast %cst_6 : f32 to vector<22x512xf32>
    %8 = arith.maximumf %6, %7 : vector<22x512xf32>
    %c0_7 = arith.constant 0 : index
    %c0_8 = arith.constant 0 : index
    %9 = vector.load %arg4[%c0_7, %c0_8] : memref<512x1024xf32, #tpu.memory_space<vmem>>, vector<512x1024xf32>
    %cst_9 = arith.constant dense<0.000000e+00> : vector<22x1024xf32>
    %10 = tpu.matmul %8, %9, %cst_9 {dimension_numbers = #tpu.dot_dimension_numbers<[1], [0], [0], [1], [0, 0, 1, 1], [], []>} : vector<22x512xf32>, vector<512x1024xf32>, vector<22x1024xf32> -> vector<22x1024xf32>
    %c0_10 = arith.constant 0 : index
    %c0_11 = arith.constant 0 : index
    %11 = vector.load %arg5[%c0_10, %c0_11] : memref<1x1024xf32, #tpu.memory_space<vmem>>, vector<1x1024xf32>
    %12 = vector.broadcast %11 : vector<1x1024xf32> to vector<22x1024xf32>
    %13 = arith.addf %10, %12 : vector<22x1024xf32>
    %cst_12 = arith.constant 0.000000e+00 : f32
    %14 = vector.broadcast %cst_12 : f32 to vector<22x1024xf32>
    %15 = arith.maximumf %13, %14 : vector<22x1024xf32>
    %16 = vector.extract_strided_slice %15 {offsets = [0, 0], sizes = [22, 256], strides = [1, 1]} : vector<22x1024xf32> to vector<22x256xf32>
    %17 = vector.extract_strided_slice %15 {offsets = [0, 256], sizes = [22, 256], strides = [1, 1]} : vector<22x1024xf32> to vector<22x256xf32>
    %18 = arith.maximumf %16, %17 : vector<22x256xf32>
    %19 = vector.extract_strided_slice %15 {offsets = [0, 512], sizes = [22, 256], strides = [1, 1]} : vector<22x1024xf32> to vector<22x256xf32>
    %20 = vector.extract_strided_slice %15 {offsets = [0, 768], sizes = [22, 256], strides = [1, 1]} : vector<22x1024xf32> to vector<22x256xf32>
    %21 = arith.maximumf %19, %20 : vector<22x256xf32>
    %22 = arith.maximumf %18, %21 : vector<22x256xf32>
    %c0_13 = arith.constant 0 : index
    %c0_14 = arith.constant 0 : index
    %23 = vector.load %arg6[%c0_13, %c0_14] : memref<256x64xf32, #tpu.memory_space<vmem>>, vector<256x64xf32>
    %cst_15 = arith.constant dense<0.000000e+00> : vector<22x64xf32>
    %24 = tpu.matmul %22, %23, %cst_15 {dimension_numbers = #tpu.dot_dimension_numbers<[1], [0], [0], [1], [0, 0, 1, 1], [], []>} : vector<22x256xf32>, vector<256x64xf32>, vector<22x64xf32> -> vector<22x64xf32>
    %c0_16 = arith.constant 0 : index
    %c0_17 = arith.constant 0 : index
    %25 = vector.load %arg7[%c0_16, %c0_17] : memref<1x64xf32, #tpu.memory_space<vmem>>, vector<1x64xf32>
    %26 = vector.broadcast %25 : vector<1x64xf32> to vector<22x64xf32>
    %27 = arith.addf %24, %26 : vector<22x64xf32>
    %cst_18 = arith.constant 0.000000e+00 : f32
    %28 = vector.broadcast %cst_18 : f32 to vector<22x64xf32>
    %29 = arith.maximumf %27, %28 : vector<22x64xf32>
    %c0_19 = arith.constant 0 : index
    %c0_20 = arith.constant 0 : index
    %30 = vector.load %arg8[%c0_19, %c0_20] : memref<64x64xf32, #tpu.memory_space<vmem>>, vector<64x64xf32>
    %cst_21 = arith.constant dense<0.000000e+00> : vector<22x64xf32>
    %31 = tpu.matmul %29, %30, %cst_21 {dimension_numbers = #tpu.dot_dimension_numbers<[1], [0], [0], [1], [0, 0, 1, 1], [], []>} : vector<22x64xf32>, vector<64x64xf32>, vector<22x64xf32> -> vector<22x64xf32>
    %c0_22 = arith.constant 0 : index
    %c0_23 = arith.constant 0 : index
    %32 = vector.load %arg9[%c0_22, %c0_23] : memref<1x64xf32, #tpu.memory_space<vmem>>, vector<1x64xf32>
    %33 = vector.broadcast %32 : vector<1x64xf32> to vector<22x64xf32>
    %34 = arith.addf %31, %33 : vector<22x64xf32>
    %cst_24 = arith.constant 0.000000e+00 : f32
    %35 = vector.broadcast %cst_24 : f32 to vector<22x64xf32>
    %36 = arith.maximumf %34, %35 : vector<22x64xf32>
    %c0_25 = arith.constant 0 : index
    %c0_26 = arith.constant 0 : index
    %37 = vector.load %arg10[%c0_25, %c0_26] : memref<64x384xf32, #tpu.memory_space<vmem>>, vector<64x384xf32>
    %cst_27 = arith.constant dense<0.000000e+00> : vector<22x384xf32>
    %38 = tpu.matmul %36, %37, %cst_27 {dimension_numbers = #tpu.dot_dimension_numbers<[1], [0], [0], [1], [0, 0, 1, 1], [], []>} : vector<22x64xf32>, vector<64x384xf32>, vector<22x384xf32> -> vector<22x384xf32>
    %c0_28 = arith.constant 0 : index
    %c0_29 = arith.constant 0 : index
    %39 = vector.load %arg11[%c0_28, %c0_29] : memref<1x384xf32, #tpu.memory_space<vmem>>, vector<1x384xf32>
    %40 = vector.broadcast %39 : vector<1x384xf32> to vector<22x384xf32>
    %41 = arith.addf %38, %40 : vector<22x384xf32>
    %c0_30 = arith.constant 0 : index
    %c0_31 = arith.constant 0 : index
    %42 = vector.load %arg12[%c0_30, %c0_31] : memref<128x384xf32, #tpu.memory_space<vmem>>, vector<128x384xf32>
    %c0_32 = arith.constant 0 : index
    %c0_33 = arith.constant 0 : index
    %43 = vector.load %arg13[%c0_32, %c0_33] : memref<1x384xf32, #tpu.memory_space<vmem>>, vector<1x384xf32>
    %cst_34 = arith.constant 0.000000e+00 : f32
    %44 = vector.broadcast %cst_34 : f32 to vector<1x128xf32>
    %45 = vector.extract_strided_slice %41 {offsets = [0, 0], sizes = [1, 384], strides = [1, 1]} : vector<22x384xf32> to vector<1x384xf32>
    %cst_35 = arith.constant dense<0.000000e+00> : vector<1x384xf32>
    %46 = tpu.matmul %44, %42, %cst_35 {dimension_numbers = #tpu.dot_dimension_numbers<[1], [0], [0], [1], [0, 0, 1, 1], [], []>} : vector<1x128xf32>, vector<128x384xf32>, vector<1x384xf32> -> vector<1x384xf32>
    %47 = arith.addf %46, %43 : vector<1x384xf32>
    %48 = vector.extract_strided_slice %45 {offsets = [0, 0], sizes = [1, 128], strides = [1, 1]} : vector<1x384xf32> to vector<1x128xf32>
    %49 = vector.extract_strided_slice %47 {offsets = [0, 0], sizes = [1, 128], strides = [1, 1]} : vector<1x384xf32> to vector<1x128xf32>
    %50 = arith.addf %48, %49 : vector<1x128xf32>
    %51 = arith.negf %50 : vector<1x128xf32>
    %52 = math.exp %51 : vector<1x128xf32>
    %cst_36 = arith.constant 1.000000e+00 : f32
    %53 = vector.broadcast %cst_36 : f32 to vector<1x128xf32>
    %54 = arith.addf %53, %52 : vector<1x128xf32>
    %55 = arith.divf %53, %54 : vector<1x128xf32>
    %56 = vector.extract_strided_slice %45 {offsets = [0, 128], sizes = [1, 128], strides = [1, 1]} : vector<1x384xf32> to vector<1x128xf32>
    %57 = vector.extract_strided_slice %47 {offsets = [0, 128], sizes = [1, 128], strides = [1, 1]} : vector<1x384xf32> to vector<1x128xf32>
    %58 = arith.addf %56, %57 : vector<1x128xf32>
    %59 = arith.negf %58 : vector<1x128xf32>
    %60 = math.exp %59 : vector<1x128xf32>
    %cst_37 = arith.constant 1.000000e+00 : f32
    %61 = vector.broadcast %cst_37 : f32 to vector<1x128xf32>
    %62 = arith.addf %61, %60 : vector<1x128xf32>
    %63 = arith.divf %61, %62 : vector<1x128xf32>
    %64 = vector.extract_strided_slice %45 {offsets = [0, 256], sizes = [1, 128], strides = [1, 1]} : vector<1x384xf32> to vector<1x128xf32>
    %65 = vector.extract_strided_slice %47 {offsets = [0, 256], sizes = [1, 128], strides = [1, 1]} : vector<1x384xf32> to vector<1x128xf32>
    %66 = arith.mulf %55, %65 : vector<1x128xf32>
    %67 = arith.addf %64, %66 : vector<1x128xf32>
    %68 = math.tanh %67 : vector<1x128xf32>
    %cst_38 = arith.constant 1.000000e+00 : f32
    %69 = vector.broadcast %cst_38 : f32 to vector<1x128xf32>
    %70 = arith.subf %69, %63 : vector<1x128xf32>
    %71 = arith.mulf %70, %68 : vector<1x128xf32>
    %72 = arith.mulf %63, %44 : vector<1x128xf32>
    %73 = arith.addf %71, %72 : vector<1x128xf32>
    %74 = vector.extract_strided_slice %41 {offsets = [1, 0], sizes = [1, 384], strides = [1, 1]} : vector<22x384xf32> to vector<1x384xf32>
    %cst_39 = arith.constant dense<0.000000e+00> : vector<1x384xf32>
    %75 = tpu.matmul %73, %42, %cst_39 {dimension_numbers = #tpu.dot_dimension_numbers<[1], [0], [0], [1], [0, 0, 1, 1], [], []>} : vector<1x128xf32>, vector<128x384xf32>, vector<1x384xf32> -> vector<1x384xf32>
    %76 = arith.addf %75, %43 : vector<1x384xf32>
    %77 = vector.extract_strided_slice %74 {offsets = [0, 0], sizes = [1, 128], strides = [1, 1]} : vector<1x384xf32> to vector<1x128xf32>
    %78 = vector.extract_strided_slice %76 {offsets = [0, 0], sizes = [1, 128], strides = [1, 1]} : vector<1x384xf32> to vector<1x128xf32>
    %79 = arith.addf %77, %78 : vector<1x128xf32>
    %80 = arith.negf %79 : vector<1x128xf32>
    %81 = math.exp %80 : vector<1x128xf32>
    %cst_40 = arith.constant 1.000000e+00 : f32
    %82 = vector.broadcast %cst_40 : f32 to vector<1x128xf32>
    %83 = arith.addf %82, %81 : vector<1x128xf32>
    %84 = arith.divf %82, %83 : vector<1x128xf32>
    %85 = vector.extract_strided_slice %74 {offsets = [0, 128], sizes = [1, 128], strides = [1, 1]} : vector<1x384xf32> to vector<1x128xf32>
    %86 = vector.extract_strided_slice %76 {offsets = [0, 128], sizes = [1, 128], strides = [1, 1]} : vector<1x384xf32> to vector<1x128xf32>
    %87 = arith.addf %85, %86 : vector<1x128xf32>
    %88 = arith.negf %87 : vector<1x128xf32>
    %89 = math.exp %88 : vector<1x128xf32>
    %cst_41 = arith.constant 1.000000e+00 : f32
    %90 = vector.broadcast %cst_41 : f32 to vector<1x128xf32>
    %91 = arith.addf %90, %89 : vector<1x128xf32>
    %92 = arith.divf %90, %91 : vector<1x128xf32>
    %93 = vector.extract_strided_slice %74 {offsets = [0, 256], sizes = [1, 128], strides = [1, 1]} : vector<1x384xf32> to vector<1x128xf32>
    %94 = vector.extract_strided_slice %76 {offsets = [0, 256], sizes = [1, 128], strides = [1, 1]} : vector<1x384xf32> to vector<1x128xf32>
    %95 = arith.mulf %84, %94 : vector<1x128xf32>
    %96 = arith.addf %93, %95 : vector<1x128xf32>
    %97 = math.tanh %96 : vector<1x128xf32>
    %cst_42 = arith.constant 1.000000e+00 : f32
    %98 = vector.broadcast %cst_42 : f32 to vector<1x128xf32>
    %99 = arith.subf %98, %92 : vector<1x128xf32>
    %100 = arith.mulf %99, %97 : vector<1x128xf32>
    %101 = arith.mulf %92, %73 : vector<1x128xf32>
    %102 = arith.addf %100, %101 : vector<1x128xf32>
    %103 = vector.extract_strided_slice %41 {offsets = [2, 0], sizes = [1, 384], strides = [1, 1]} : vector<22x384xf32> to vector<1x384xf32>
    %cst_43 = arith.constant dense<0.000000e+00> : vector<1x384xf32>
    %104 = tpu.matmul %102, %42, %cst_43 {dimension_numbers = #tpu.dot_dimension_numbers<[1], [0], [0], [1], [0, 0, 1, 1], [], []>} : vector<1x128xf32>, vector<128x384xf32>, vector<1x384xf32> -> vector<1x384xf32>
    %105 = arith.addf %104, %43 : vector<1x384xf32>
    %106 = vector.extract_strided_slice %103 {offsets = [0, 0], sizes = [1, 128], strides = [1, 1]} : vector<1x384xf32> to vector<1x128xf32>
    %107 = vector.extract_strided_slice %105 {offsets = [0, 0], sizes = [1, 128], strides = [1, 1]} : vector<1x384xf32> to vector<1x128xf32>
    %108 = arith.addf %106, %107 : vector<1x128xf32>
    %109 = arith.negf %108 : vector<1x128xf32>
    %110 = math.exp %109 : vector<1x128xf32>
    %cst_44 = arith.constant 1.000000e+00 : f32
    %111 = vector.broadcast %cst_44 : f32 to vector<1x128xf32>
    %112 = arith.addf %111, %110 : vector<1x128xf32>
    %113 = arith.divf %111, %112 : vector<1x128xf32>
    %114 = vector.extract_strided_slice %103 {offsets = [0, 128], sizes = [1, 128], strides = [1, 1]} : vector<1x384xf32> to vector<1x128xf32>
    %115 = vector.extract_strided_slice %105 {offsets = [0, 128], sizes = [1, 128], strides = [1, 1]} : vector<1x384xf32> to vector<1x128xf32>
    %116 = arith.addf %114, %115 : vector<1x128xf32>
    %117 = arith.negf %116 : vector<1x128xf32>
    %118 = math.exp %117 : vector<1x128xf32>
    %cst_45 = arith.constant 1.000000e+00 : f32
    %119 = vector.broadcast %cst_45 : f32 to vector<1x128xf32>
    %120 = arith.addf %119, %118 : vector<1x128xf32>
    %121 = arith.divf %119, %120 : vector<1x128xf32>
    %122 = vector.extract_strided_slice %103 {offsets = [0, 256], sizes = [1, 128], strides = [1, 1]} : vector<1x384xf32> to vector<1x128xf32>
    %123 = vector.extract_strided_slice %105 {offsets = [0, 256], sizes = [1, 128], strides = [1, 1]} : vector<1x384xf32> to vector<1x128xf32>
    %124 = arith.mulf %113, %123 : vector<1x128xf32>
    %125 = arith.addf %122, %124 : vector<1x128xf32>
    %126 = math.tanh %125 : vector<1x128xf32>
    %cst_46 = arith.constant 1.000000e+00 : f32
    %127 = vector.broadcast %cst_46 : f32 to vector<1x128xf32>
    %128 = arith.subf %127, %121 : vector<1x128xf32>
    %129 = arith.mulf %128, %126 : vector<1x128xf32>
    %130 = arith.mulf %121, %102 : vector<1x128xf32>
    %131 = arith.addf %129, %130 : vector<1x128xf32>
    %132 = vector.extract_strided_slice %41 {offsets = [3, 0], sizes = [1, 384], strides = [1, 1]} : vector<22x384xf32> to vector<1x384xf32>
    %cst_47 = arith.constant dense<0.000000e+00> : vector<1x384xf32>
    %133 = tpu.matmul %131, %42, %cst_47 {dimension_numbers = #tpu.dot_dimension_numbers<[1], [0], [0], [1], [0, 0, 1, 1], [], []>} : vector<1x128xf32>, vector<128x384xf32>, vector<1x384xf32> -> vector<1x384xf32>
    %134 = arith.addf %133, %43 : vector<1x384xf32>
    %135 = vector.extract_strided_slice %132 {offsets = [0, 0], sizes = [1, 128], strides = [1, 1]} : vector<1x384xf32> to vector<1x128xf32>
    %136 = vector.extract_strided_slice %134 {offsets = [0, 0], sizes = [1, 128], strides = [1, 1]} : vector<1x384xf32> to vector<1x128xf32>
    %137 = arith.addf %135, %136 : vector<1x128xf32>
    %138 = arith.negf %137 : vector<1x128xf32>
    %139 = math.exp %138 : vector<1x128xf32>
    %cst_48 = arith.constant 1.000000e+00 : f32
    %140 = vector.broadcast %cst_48 : f32 to vector<1x128xf32>
    %141 = arith.addf %140, %139 : vector<1x128xf32>
    %142 = arith.divf %140, %141 : vector<1x128xf32>
    %143 = vector.extract_strided_slice %132 {offsets = [0, 128], sizes = [1, 128], strides = [1, 1]} : vector<1x384xf32> to vector<1x128xf32>
    %144 = vector.extract_strided_slice %134 {offsets = [0, 128], sizes = [1, 128], strides = [1, 1]} : vector<1x384xf32> to vector<1x128xf32>
    %145 = arith.addf %143, %144 : vector<1x128xf32>
    %146 = arith.negf %145 : vector<1x128xf32>
    %147 = math.exp %146 : vector<1x128xf32>
    %cst_49 = arith.constant 1.000000e+00 : f32
    %148 = vector.broadcast %cst_49 : f32 to vector<1x128xf32>
    %149 = arith.addf %148, %147 : vector<1x128xf32>
    %150 = arith.divf %148, %149 : vector<1x128xf32>
    %151 = vector.extract_strided_slice %132 {offsets = [0, 256], sizes = [1, 128], strides = [1, 1]} : vector<1x384xf32> to vector<1x128xf32>
    %152 = vector.extract_strided_slice %134 {offsets = [0, 256], sizes = [1, 128], strides = [1, 1]} : vector<1x384xf32> to vector<1x128xf32>
    %153 = arith.mulf %142, %152 : vector<1x128xf32>
    %154 = arith.addf %151, %153 : vector<1x128xf32>
    %155 = math.tanh %154 : vector<1x128xf32>
    %cst_50 = arith.constant 1.000000e+00 : f32
    %156 = vector.broadcast %cst_50 : f32 to vector<1x128xf32>
    %157 = arith.subf %156, %150 : vector<1x128xf32>
    %158 = arith.mulf %157, %155 : vector<1x128xf32>
    %159 = arith.mulf %150, %131 : vector<1x128xf32>
    %160 = arith.addf %158, %159 : vector<1x128xf32>
    %161 = vector.extract_strided_slice %41 {offsets = [4, 0], sizes = [1, 384], strides = [1, 1]} : vector<22x384xf32> to vector<1x384xf32>
    %cst_51 = arith.constant dense<0.000000e+00> : vector<1x384xf32>
    %162 = tpu.matmul %160, %42, %cst_51 {dimension_numbers = #tpu.dot_dimension_numbers<[1], [0], [0], [1], [0, 0, 1, 1], [], []>} : vector<1x128xf32>, vector<128x384xf32>, vector<1x384xf32> -> vector<1x384xf32>
    %163 = arith.addf %162, %43 : vector<1x384xf32>
    %164 = vector.extract_strided_slice %161 {offsets = [0, 0], sizes = [1, 128], strides = [1, 1]} : vector<1x384xf32> to vector<1x128xf32>
    %165 = vector.extract_strided_slice %163 {offsets = [0, 0], sizes = [1, 128], strides = [1, 1]} : vector<1x384xf32> to vector<1x128xf32>
    %166 = arith.addf %164, %165 : vector<1x128xf32>
    %167 = arith.negf %166 : vector<1x128xf32>
    %168 = math.exp %167 : vector<1x128xf32>
    %cst_52 = arith.constant 1.000000e+00 : f32
    %169 = vector.broadcast %cst_52 : f32 to vector<1x128xf32>
    %170 = arith.addf %169, %168 : vector<1x128xf32>
    %171 = arith.divf %169, %170 : vector<1x128xf32>
    %172 = vector.extract_strided_slice %161 {offsets = [0, 128], sizes = [1, 128], strides = [1, 1]} : vector<1x384xf32> to vector<1x128xf32>
    %173 = vector.extract_strided_slice %163 {offsets = [0, 128], sizes = [1, 128], strides = [1, 1]} : vector<1x384xf32> to vector<1x128xf32>
    %174 = arith.addf %172, %173 : vector<1x128xf32>
    %175 = arith.negf %174 : vector<1x128xf32>
    %176 = math.exp %175 : vector<1x128xf32>
    %cst_53 = arith.constant 1.000000e+00 : f32
    %177 = vector.broadcast %cst_53 : f32 to vector<1x128xf32>
    %178 = arith.addf %177, %176 : vector<1x128xf32>
    %179 = arith.divf %177, %178 : vector<1x128xf32>
    %180 = vector.extract_strided_slice %161 {offsets = [0, 256], sizes = [1, 128], strides = [1, 1]} : vector<1x384xf32> to vector<1x128xf32>
    %181 = vector.extract_strided_slice %163 {offsets = [0, 256], sizes = [1, 128], strides = [1, 1]} : vector<1x384xf32> to vector<1x128xf32>
    %182 = arith.mulf %171, %181 : vector<1x128xf32>
    %183 = arith.addf %180, %182 : vector<1x128xf32>
    %184 = math.tanh %183 : vector<1x128xf32>
    %cst_54 = arith.constant 1.000000e+00 : f32
    %185 = vector.broadcast %cst_54 : f32 to vector<1x128xf32>
    %186 = arith.subf %185, %179 : vector<1x128xf32>
    %187 = arith.mulf %186, %184 : vector<1x128xf32>
    %188 = arith.mulf %179, %160 : vector<1x128xf32>
    %189 = arith.addf %187, %188 : vector<1x128xf32>
    %190 = vector.extract_strided_slice %41 {offsets = [5, 0], sizes = [1, 384], strides = [1, 1]} : vector<22x384xf32> to vector<1x384xf32>
    %cst_55 = arith.constant dense<0.000000e+00> : vector<1x384xf32>
    %191 = tpu.matmul %189, %42, %cst_55 {dimension_numbers = #tpu.dot_dimension_numbers<[1], [0], [0], [1], [0, 0, 1, 1], [], []>} : vector<1x128xf32>, vector<128x384xf32>, vector<1x384xf32> -> vector<1x384xf32>
    %192 = arith.addf %191, %43 : vector<1x384xf32>
    %193 = vector.extract_strided_slice %190 {offsets = [0, 0], sizes = [1, 128], strides = [1, 1]} : vector<1x384xf32> to vector<1x128xf32>
    %194 = vector.extract_strided_slice %192 {offsets = [0, 0], sizes = [1, 128], strides = [1, 1]} : vector<1x384xf32> to vector<1x128xf32>
    %195 = arith.addf %193, %194 : vector<1x128xf32>
    %196 = arith.negf %195 : vector<1x128xf32>
    %197 = math.exp %196 : vector<1x128xf32>
    %cst_56 = arith.constant 1.000000e+00 : f32
    %198 = vector.broadcast %cst_56 : f32 to vector<1x128xf32>
    %199 = arith.addf %198, %197 : vector<1x128xf32>
    %200 = arith.divf %198, %199 : vector<1x128xf32>
    %201 = vector.extract_strided_slice %190 {offsets = [0, 128], sizes = [1, 128], strides = [1, 1]} : vector<1x384xf32> to vector<1x128xf32>
    %202 = vector.extract_strided_slice %192 {offsets = [0, 128], sizes = [1, 128], strides = [1, 1]} : vector<1x384xf32> to vector<1x128xf32>
    %203 = arith.addf %201, %202 : vector<1x128xf32>
    %204 = arith.negf %203 : vector<1x128xf32>
    %205 = math.exp %204 : vector<1x128xf32>
    %cst_57 = arith.constant 1.000000e+00 : f32
    %206 = vector.broadcast %cst_57 : f32 to vector<1x128xf32>
    %207 = arith.addf %206, %205 : vector<1x128xf32>
    %208 = arith.divf %206, %207 : vector<1x128xf32>
    %209 = vector.extract_strided_slice %190 {offsets = [0, 256], sizes = [1, 128], strides = [1, 1]} : vector<1x384xf32> to vector<1x128xf32>
    %210 = vector.extract_strided_slice %192 {offsets = [0, 256], sizes = [1, 128], strides = [1, 1]} : vector<1x384xf32> to vector<1x128xf32>
    %211 = arith.mulf %200, %210 : vector<1x128xf32>
    %212 = arith.addf %209, %211 : vector<1x128xf32>
    %213 = math.tanh %212 : vector<1x128xf32>
    %cst_58 = arith.constant 1.000000e+00 : f32
    %214 = vector.broadcast %cst_58 : f32 to vector<1x128xf32>
    %215 = arith.subf %214, %208 : vector<1x128xf32>
    %216 = arith.mulf %215, %213 : vector<1x128xf32>
    %217 = arith.mulf %208, %189 : vector<1x128xf32>
    %218 = arith.addf %216, %217 : vector<1x128xf32>
    %219 = vector.extract_strided_slice %41 {offsets = [6, 0], sizes = [1, 384], strides = [1, 1]} : vector<22x384xf32> to vector<1x384xf32>
    %cst_59 = arith.constant dense<0.000000e+00> : vector<1x384xf32>
    %220 = tpu.matmul %218, %42, %cst_59 {dimension_numbers = #tpu.dot_dimension_numbers<[1], [0], [0], [1], [0, 0, 1, 1], [], []>} : vector<1x128xf32>, vector<128x384xf32>, vector<1x384xf32> -> vector<1x384xf32>
    %221 = arith.addf %220, %43 : vector<1x384xf32>
    %222 = vector.extract_strided_slice %219 {offsets = [0, 0], sizes = [1, 128], strides = [1, 1]} : vector<1x384xf32> to vector<1x128xf32>
    %223 = vector.extract_strided_slice %221 {offsets = [0, 0], sizes = [1, 128], strides = [1, 1]} : vector<1x384xf32> to vector<1x128xf32>
    %224 = arith.addf %222, %223 : vector<1x128xf32>
    %225 = arith.negf %224 : vector<1x128xf32>
    %226 = math.exp %225 : vector<1x128xf32>
    %cst_60 = arith.constant 1.000000e+00 : f32
    %227 = vector.broadcast %cst_60 : f32 to vector<1x128xf32>
    %228 = arith.addf %227, %226 : vector<1x128xf32>
    %229 = arith.divf %227, %228 : vector<1x128xf32>
    %230 = vector.extract_strided_slice %219 {offsets = [0, 128], sizes = [1, 128], strides = [1, 1]} : vector<1x384xf32> to vector<1x128xf32>
    %231 = vector.extract_strided_slice %221 {offsets = [0, 128], sizes = [1, 128], strides = [1, 1]} : vector<1x384xf32> to vector<1x128xf32>
    %232 = arith.addf %230, %231 : vector<1x128xf32>
    %233 = arith.negf %232 : vector<1x128xf32>
    %234 = math.exp %233 : vector<1x128xf32>
    %cst_61 = arith.constant 1.000000e+00 : f32
    %235 = vector.broadcast %cst_61 : f32 to vector<1x128xf32>
    %236 = arith.addf %235, %234 : vector<1x128xf32>
    %237 = arith.divf %235, %236 : vector<1x128xf32>
    %238 = vector.extract_strided_slice %219 {offsets = [0, 256], sizes = [1, 128], strides = [1, 1]} : vector<1x384xf32> to vector<1x128xf32>
    %239 = vector.extract_strided_slice %221 {offsets = [0, 256], sizes = [1, 128], strides = [1, 1]} : vector<1x384xf32> to vector<1x128xf32>
    %240 = arith.mulf %229, %239 : vector<1x128xf32>
    %241 = arith.addf %238, %240 : vector<1x128xf32>
    %242 = math.tanh %241 : vector<1x128xf32>
    %cst_62 = arith.constant 1.000000e+00 : f32
    %243 = vector.broadcast %cst_62 : f32 to vector<1x128xf32>
    %244 = arith.subf %243, %237 : vector<1x128xf32>
    %245 = arith.mulf %244, %242 : vector<1x128xf32>
    %246 = arith.mulf %237, %218 : vector<1x128xf32>
    %247 = arith.addf %245, %246 : vector<1x128xf32>
    %248 = vector.extract_strided_slice %41 {offsets = [7, 0], sizes = [1, 384], strides = [1, 1]} : vector<22x384xf32> to vector<1x384xf32>
    %cst_63 = arith.constant dense<0.000000e+00> : vector<1x384xf32>
    %249 = tpu.matmul %247, %42, %cst_63 {dimension_numbers = #tpu.dot_dimension_numbers<[1], [0], [0], [1], [0, 0, 1, 1], [], []>} : vector<1x128xf32>, vector<128x384xf32>, vector<1x384xf32> -> vector<1x384xf32>
    %250 = arith.addf %249, %43 : vector<1x384xf32>
    %251 = vector.extract_strided_slice %248 {offsets = [0, 0], sizes = [1, 128], strides = [1, 1]} : vector<1x384xf32> to vector<1x128xf32>
    %252 = vector.extract_strided_slice %250 {offsets = [0, 0], sizes = [1, 128], strides = [1, 1]} : vector<1x384xf32> to vector<1x128xf32>
    %253 = arith.addf %251, %252 : vector<1x128xf32>
    %254 = arith.negf %253 : vector<1x128xf32>
    %255 = math.exp %254 : vector<1x128xf32>
    %cst_64 = arith.constant 1.000000e+00 : f32
    %256 = vector.broadcast %cst_64 : f32 to vector<1x128xf32>
    %257 = arith.addf %256, %255 : vector<1x128xf32>
    %258 = arith.divf %256, %257 : vector<1x128xf32>
    %259 = vector.extract_strided_slice %248 {offsets = [0, 128], sizes = [1, 128], strides = [1, 1]} : vector<1x384xf32> to vector<1x128xf32>
    %260 = vector.extract_strided_slice %250 {offsets = [0, 128], sizes = [1, 128], strides = [1, 1]} : vector<1x384xf32> to vector<1x128xf32>
    %261 = arith.addf %259, %260 : vector<1x128xf32>
    %262 = arith.negf %261 : vector<1x128xf32>
    %263 = math.exp %262 : vector<1x128xf32>
    %cst_65 = arith.constant 1.000000e+00 : f32
    %264 = vector.broadcast %cst_65 : f32 to vector<1x128xf32>
    %265 = arith.addf %264, %263 : vector<1x128xf32>
    %266 = arith.divf %264, %265 : vector<1x128xf32>
    %267 = vector.extract_strided_slice %248 {offsets = [0, 256], sizes = [1, 128], strides = [1, 1]} : vector<1x384xf32> to vector<1x128xf32>
    %268 = vector.extract_strided_slice %250 {offsets = [0, 256], sizes = [1, 128], strides = [1, 1]} : vector<1x384xf32> to vector<1x128xf32>
    %269 = arith.mulf %258, %268 : vector<1x128xf32>
    %270 = arith.addf %267, %269 : vector<1x128xf32>
    %271 = math.tanh %270 : vector<1x128xf32>
    %cst_66 = arith.constant 1.000000e+00 : f32
    %272 = vector.broadcast %cst_66 : f32 to vector<1x128xf32>
    %273 = arith.subf %272, %266 : vector<1x128xf32>
    %274 = arith.mulf %273, %271 : vector<1x128xf32>
    %275 = arith.mulf %266, %247 : vector<1x128xf32>
    %276 = arith.addf %274, %275 : vector<1x128xf32>
    %277 = vector.extract_strided_slice %41 {offsets = [8, 0], sizes = [1, 384], strides = [1, 1]} : vector<22x384xf32> to vector<1x384xf32>
    %cst_67 = arith.constant dense<0.000000e+00> : vector<1x384xf32>
    %278 = tpu.matmul %276, %42, %cst_67 {dimension_numbers = #tpu.dot_dimension_numbers<[1], [0], [0], [1], [0, 0, 1, 1], [], []>} : vector<1x128xf32>, vector<128x384xf32>, vector<1x384xf32> -> vector<1x384xf32>
    %279 = arith.addf %278, %43 : vector<1x384xf32>
    %280 = vector.extract_strided_slice %277 {offsets = [0, 0], sizes = [1, 128], strides = [1, 1]} : vector<1x384xf32> to vector<1x128xf32>
    %281 = vector.extract_strided_slice %279 {offsets = [0, 0], sizes = [1, 128], strides = [1, 1]} : vector<1x384xf32> to vector<1x128xf32>
    %282 = arith.addf %280, %281 : vector<1x128xf32>
    %283 = arith.negf %282 : vector<1x128xf32>
    %284 = math.exp %283 : vector<1x128xf32>
    %cst_68 = arith.constant 1.000000e+00 : f32
    %285 = vector.broadcast %cst_68 : f32 to vector<1x128xf32>
    %286 = arith.addf %285, %284 : vector<1x128xf32>
    %287 = arith.divf %285, %286 : vector<1x128xf32>
    %288 = vector.extract_strided_slice %277 {offsets = [0, 128], sizes = [1, 128], strides = [1, 1]} : vector<1x384xf32> to vector<1x128xf32>
    %289 = vector.extract_strided_slice %279 {offsets = [0, 128], sizes = [1, 128], strides = [1, 1]} : vector<1x384xf32> to vector<1x128xf32>
    %290 = arith.addf %288, %289 : vector<1x128xf32>
    %291 = arith.negf %290 : vector<1x128xf32>
    %292 = math.exp %291 : vector<1x128xf32>
    %cst_69 = arith.constant 1.000000e+00 : f32
    %293 = vector.broadcast %cst_69 : f32 to vector<1x128xf32>
    %294 = arith.addf %293, %292 : vector<1x128xf32>
    %295 = arith.divf %293, %294 : vector<1x128xf32>
    %296 = vector.extract_strided_slice %277 {offsets = [0, 256], sizes = [1, 128], strides = [1, 1]} : vector<1x384xf32> to vector<1x128xf32>
    %297 = vector.extract_strided_slice %279 {offsets = [0, 256], sizes = [1, 128], strides = [1, 1]} : vector<1x384xf32> to vector<1x128xf32>
    %298 = arith.mulf %287, %297 : vector<1x128xf32>
    %299 = arith.addf %296, %298 : vector<1x128xf32>
    %300 = math.tanh %299 : vector<1x128xf32>
    %cst_70 = arith.constant 1.000000e+00 : f32
    %301 = vector.broadcast %cst_70 : f32 to vector<1x128xf32>
    %302 = arith.subf %301, %295 : vector<1x128xf32>
    %303 = arith.mulf %302, %300 : vector<1x128xf32>
    %304 = arith.mulf %295, %276 : vector<1x128xf32>
    %305 = arith.addf %303, %304 : vector<1x128xf32>
    %306 = vector.extract_strided_slice %41 {offsets = [9, 0], sizes = [1, 384], strides = [1, 1]} : vector<22x384xf32> to vector<1x384xf32>
    %cst_71 = arith.constant dense<0.000000e+00> : vector<1x384xf32>
    %307 = tpu.matmul %305, %42, %cst_71 {dimension_numbers = #tpu.dot_dimension_numbers<[1], [0], [0], [1], [0, 0, 1, 1], [], []>} : vector<1x128xf32>, vector<128x384xf32>, vector<1x384xf32> -> vector<1x384xf32>
    %308 = arith.addf %307, %43 : vector<1x384xf32>
    %309 = vector.extract_strided_slice %306 {offsets = [0, 0], sizes = [1, 128], strides = [1, 1]} : vector<1x384xf32> to vector<1x128xf32>
    %310 = vector.extract_strided_slice %308 {offsets = [0, 0], sizes = [1, 128], strides = [1, 1]} : vector<1x384xf32> to vector<1x128xf32>
    %311 = arith.addf %309, %310 : vector<1x128xf32>
    %312 = arith.negf %311 : vector<1x128xf32>
    %313 = math.exp %312 : vector<1x128xf32>
    %cst_72 = arith.constant 1.000000e+00 : f32
    %314 = vector.broadcast %cst_72 : f32 to vector<1x128xf32>
    %315 = arith.addf %314, %313 : vector<1x128xf32>
    %316 = arith.divf %314, %315 : vector<1x128xf32>
    %317 = vector.extract_strided_slice %306 {offsets = [0, 128], sizes = [1, 128], strides = [1, 1]} : vector<1x384xf32> to vector<1x128xf32>
    %318 = vector.extract_strided_slice %308 {offsets = [0, 128], sizes = [1, 128], strides = [1, 1]} : vector<1x384xf32> to vector<1x128xf32>
    %319 = arith.addf %317, %318 : vector<1x128xf32>
    %320 = arith.negf %319 : vector<1x128xf32>
    %321 = math.exp %320 : vector<1x128xf32>
    %cst_73 = arith.constant 1.000000e+00 : f32
    %322 = vector.broadcast %cst_73 : f32 to vector<1x128xf32>
    %323 = arith.addf %322, %321 : vector<1x128xf32>
    %324 = arith.divf %322, %323 : vector<1x128xf32>
    %325 = vector.extract_strided_slice %306 {offsets = [0, 256], sizes = [1, 128], strides = [1, 1]} : vector<1x384xf32> to vector<1x128xf32>
    %326 = vector.extract_strided_slice %308 {offsets = [0, 256], sizes = [1, 128], strides = [1, 1]} : vector<1x384xf32> to vector<1x128xf32>
    %327 = arith.mulf %316, %326 : vector<1x128xf32>
    %328 = arith.addf %325, %327 : vector<1x128xf32>
    %329 = math.tanh %328 : vector<1x128xf32>
    %cst_74 = arith.constant 1.000000e+00 : f32
    %330 = vector.broadcast %cst_74 : f32 to vector<1x128xf32>
    %331 = arith.subf %330, %324 : vector<1x128xf32>
    %332 = arith.mulf %331, %329 : vector<1x128xf32>
    %333 = arith.mulf %324, %305 : vector<1x128xf32>
    %334 = arith.addf %332, %333 : vector<1x128xf32>
    %335 = vector.extract_strided_slice %41 {offsets = [10, 0], sizes = [1, 384], strides = [1, 1]} : vector<22x384xf32> to vector<1x384xf32>
    %cst_75 = arith.constant dense<0.000000e+00> : vector<1x384xf32>
    %336 = tpu.matmul %334, %42, %cst_75 {dimension_numbers = #tpu.dot_dimension_numbers<[1], [0], [0], [1], [0, 0, 1, 1], [], []>} : vector<1x128xf32>, vector<128x384xf32>, vector<1x384xf32> -> vector<1x384xf32>
    %337 = arith.addf %336, %43 : vector<1x384xf32>
    %338 = vector.extract_strided_slice %335 {offsets = [0, 0], sizes = [1, 128], strides = [1, 1]} : vector<1x384xf32> to vector<1x128xf32>
    %339 = vector.extract_strided_slice %337 {offsets = [0, 0], sizes = [1, 128], strides = [1, 1]} : vector<1x384xf32> to vector<1x128xf32>
    %340 = arith.addf %338, %339 : vector<1x128xf32>
    %341 = arith.negf %340 : vector<1x128xf32>
    %342 = math.exp %341 : vector<1x128xf32>
    %cst_76 = arith.constant 1.000000e+00 : f32
    %343 = vector.broadcast %cst_76 : f32 to vector<1x128xf32>
    %344 = arith.addf %343, %342 : vector<1x128xf32>
    %345 = arith.divf %343, %344 : vector<1x128xf32>
    %346 = vector.extract_strided_slice %335 {offsets = [0, 128], sizes = [1, 128], strides = [1, 1]} : vector<1x384xf32> to vector<1x128xf32>
    %347 = vector.extract_strided_slice %337 {offsets = [0, 128], sizes = [1, 128], strides = [1, 1]} : vector<1x384xf32> to vector<1x128xf32>
    %348 = arith.addf %346, %347 : vector<1x128xf32>
    %349 = arith.negf %348 : vector<1x128xf32>
    %350 = math.exp %349 : vector<1x128xf32>
    %cst_77 = arith.constant 1.000000e+00 : f32
    %351 = vector.broadcast %cst_77 : f32 to vector<1x128xf32>
    %352 = arith.addf %351, %350 : vector<1x128xf32>
    %353 = arith.divf %351, %352 : vector<1x128xf32>
    %354 = vector.extract_strided_slice %335 {offsets = [0, 256], sizes = [1, 128], strides = [1, 1]} : vector<1x384xf32> to vector<1x128xf32>
    %355 = vector.extract_strided_slice %337 {offsets = [0, 256], sizes = [1, 128], strides = [1, 1]} : vector<1x384xf32> to vector<1x128xf32>
    %356 = arith.mulf %345, %355 : vector<1x128xf32>
    %357 = arith.addf %354, %356 : vector<1x128xf32>
    %358 = math.tanh %357 : vector<1x128xf32>
    %cst_78 = arith.constant 1.000000e+00 : f32
    %359 = vector.broadcast %cst_78 : f32 to vector<1x128xf32>
    %360 = arith.subf %359, %353 : vector<1x128xf32>
    %361 = arith.mulf %360, %358 : vector<1x128xf32>
    %362 = arith.mulf %353, %334 : vector<1x128xf32>
    %363 = arith.addf %361, %362 : vector<1x128xf32>
    %364 = vector.extract_strided_slice %41 {offsets = [11, 0], sizes = [1, 384], strides = [1, 1]} : vector<22x384xf32> to vector<1x384xf32>
    %cst_79 = arith.constant dense<0.000000e+00> : vector<1x384xf32>
    %365 = tpu.matmul %363, %42, %cst_79 {dimension_numbers = #tpu.dot_dimension_numbers<[1], [0], [0], [1], [0, 0, 1, 1], [], []>} : vector<1x128xf32>, vector<128x384xf32>, vector<1x384xf32> -> vector<1x384xf32>
    %366 = arith.addf %365, %43 : vector<1x384xf32>
    %367 = vector.extract_strided_slice %364 {offsets = [0, 0], sizes = [1, 128], strides = [1, 1]} : vector<1x384xf32> to vector<1x128xf32>
    %368 = vector.extract_strided_slice %366 {offsets = [0, 0], sizes = [1, 128], strides = [1, 1]} : vector<1x384xf32> to vector<1x128xf32>
    %369 = arith.addf %367, %368 : vector<1x128xf32>
    %370 = arith.negf %369 : vector<1x128xf32>
    %371 = math.exp %370 : vector<1x128xf32>
    %cst_80 = arith.constant 1.000000e+00 : f32
    %372 = vector.broadcast %cst_80 : f32 to vector<1x128xf32>
    %373 = arith.addf %372, %371 : vector<1x128xf32>
    %374 = arith.divf %372, %373 : vector<1x128xf32>
    %375 = vector.extract_strided_slice %364 {offsets = [0, 128], sizes = [1, 128], strides = [1, 1]} : vector<1x384xf32> to vector<1x128xf32>
    %376 = vector.extract_strided_slice %366 {offsets = [0, 128], sizes = [1, 128], strides = [1, 1]} : vector<1x384xf32> to vector<1x128xf32>
    %377 = arith.addf %375, %376 : vector<1x128xf32>
    %378 = arith.negf %377 : vector<1x128xf32>
    %379 = math.exp %378 : vector<1x128xf32>
    %cst_81 = arith.constant 1.000000e+00 : f32
    %380 = vector.broadcast %cst_81 : f32 to vector<1x128xf32>
    %381 = arith.addf %380, %379 : vector<1x128xf32>
    %382 = arith.divf %380, %381 : vector<1x128xf32>
    %383 = vector.extract_strided_slice %364 {offsets = [0, 256], sizes = [1, 128], strides = [1, 1]} : vector<1x384xf32> to vector<1x128xf32>
    %384 = vector.extract_strided_slice %366 {offsets = [0, 256], sizes = [1, 128], strides = [1, 1]} : vector<1x384xf32> to vector<1x128xf32>
    %385 = arith.mulf %374, %384 : vector<1x128xf32>
    %386 = arith.addf %383, %385 : vector<1x128xf32>
    %387 = math.tanh %386 : vector<1x128xf32>
    %cst_82 = arith.constant 1.000000e+00 : f32
    %388 = vector.broadcast %cst_82 : f32 to vector<1x128xf32>
    %389 = arith.subf %388, %382 : vector<1x128xf32>
    %390 = arith.mulf %389, %387 : vector<1x128xf32>
    %391 = arith.mulf %382, %363 : vector<1x128xf32>
    %392 = arith.addf %390, %391 : vector<1x128xf32>
    %393 = vector.extract_strided_slice %41 {offsets = [12, 0], sizes = [1, 384], strides = [1, 1]} : vector<22x384xf32> to vector<1x384xf32>
    %cst_83 = arith.constant dense<0.000000e+00> : vector<1x384xf32>
    %394 = tpu.matmul %392, %42, %cst_83 {dimension_numbers = #tpu.dot_dimension_numbers<[1], [0], [0], [1], [0, 0, 1, 1], [], []>} : vector<1x128xf32>, vector<128x384xf32>, vector<1x384xf32> -> vector<1x384xf32>
    %395 = arith.addf %394, %43 : vector<1x384xf32>
    %396 = vector.extract_strided_slice %393 {offsets = [0, 0], sizes = [1, 128], strides = [1, 1]} : vector<1x384xf32> to vector<1x128xf32>
    %397 = vector.extract_strided_slice %395 {offsets = [0, 0], sizes = [1, 128], strides = [1, 1]} : vector<1x384xf32> to vector<1x128xf32>
    %398 = arith.addf %396, %397 : vector<1x128xf32>
    %399 = arith.negf %398 : vector<1x128xf32>
    %400 = math.exp %399 : vector<1x128xf32>
    %cst_84 = arith.constant 1.000000e+00 : f32
    %401 = vector.broadcast %cst_84 : f32 to vector<1x128xf32>
    %402 = arith.addf %401, %400 : vector<1x128xf32>
    %403 = arith.divf %401, %402 : vector<1x128xf32>
    %404 = vector.extract_strided_slice %393 {offsets = [0, 128], sizes = [1, 128], strides = [1, 1]} : vector<1x384xf32> to vector<1x128xf32>
    %405 = vector.extract_strided_slice %395 {offsets = [0, 128], sizes = [1, 128], strides = [1, 1]} : vector<1x384xf32> to vector<1x128xf32>
    %406 = arith.addf %404, %405 : vector<1x128xf32>
    %407 = arith.negf %406 : vector<1x128xf32>
    %408 = math.exp %407 : vector<1x128xf32>
    %cst_85 = arith.constant 1.000000e+00 : f32
    %409 = vector.broadcast %cst_85 : f32 to vector<1x128xf32>
    %410 = arith.addf %409, %408 : vector<1x128xf32>
    %411 = arith.divf %409, %410 : vector<1x128xf32>
    %412 = vector.extract_strided_slice %393 {offsets = [0, 256], sizes = [1, 128], strides = [1, 1]} : vector<1x384xf32> to vector<1x128xf32>
    %413 = vector.extract_strided_slice %395 {offsets = [0, 256], sizes = [1, 128], strides = [1, 1]} : vector<1x384xf32> to vector<1x128xf32>
    %414 = arith.mulf %403, %413 : vector<1x128xf32>
    %415 = arith.addf %412, %414 : vector<1x128xf32>
    %416 = math.tanh %415 : vector<1x128xf32>
    %cst_86 = arith.constant 1.000000e+00 : f32
    %417 = vector.broadcast %cst_86 : f32 to vector<1x128xf32>
    %418 = arith.subf %417, %411 : vector<1x128xf32>
    %419 = arith.mulf %418, %416 : vector<1x128xf32>
    %420 = arith.mulf %411, %392 : vector<1x128xf32>
    %421 = arith.addf %419, %420 : vector<1x128xf32>
    %422 = vector.extract_strided_slice %41 {offsets = [13, 0], sizes = [1, 384], strides = [1, 1]} : vector<22x384xf32> to vector<1x384xf32>
    %cst_87 = arith.constant dense<0.000000e+00> : vector<1x384xf32>
    %423 = tpu.matmul %421, %42, %cst_87 {dimension_numbers = #tpu.dot_dimension_numbers<[1], [0], [0], [1], [0, 0, 1, 1], [], []>} : vector<1x128xf32>, vector<128x384xf32>, vector<1x384xf32> -> vector<1x384xf32>
    %424 = arith.addf %423, %43 : vector<1x384xf32>
    %425 = vector.extract_strided_slice %422 {offsets = [0, 0], sizes = [1, 128], strides = [1, 1]} : vector<1x384xf32> to vector<1x128xf32>
    %426 = vector.extract_strided_slice %424 {offsets = [0, 0], sizes = [1, 128], strides = [1, 1]} : vector<1x384xf32> to vector<1x128xf32>
    %427 = arith.addf %425, %426 : vector<1x128xf32>
    %428 = arith.negf %427 : vector<1x128xf32>
    %429 = math.exp %428 : vector<1x128xf32>
    %cst_88 = arith.constant 1.000000e+00 : f32
    %430 = vector.broadcast %cst_88 : f32 to vector<1x128xf32>
    %431 = arith.addf %430, %429 : vector<1x128xf32>
    %432 = arith.divf %430, %431 : vector<1x128xf32>
    %433 = vector.extract_strided_slice %422 {offsets = [0, 128], sizes = [1, 128], strides = [1, 1]} : vector<1x384xf32> to vector<1x128xf32>
    %434 = vector.extract_strided_slice %424 {offsets = [0, 128], sizes = [1, 128], strides = [1, 1]} : vector<1x384xf32> to vector<1x128xf32>
    %435 = arith.addf %433, %434 : vector<1x128xf32>
    %436 = arith.negf %435 : vector<1x128xf32>
    %437 = math.exp %436 : vector<1x128xf32>
    %cst_89 = arith.constant 1.000000e+00 : f32
    %438 = vector.broadcast %cst_89 : f32 to vector<1x128xf32>
    %439 = arith.addf %438, %437 : vector<1x128xf32>
    %440 = arith.divf %438, %439 : vector<1x128xf32>
    %441 = vector.extract_strided_slice %422 {offsets = [0, 256], sizes = [1, 128], strides = [1, 1]} : vector<1x384xf32> to vector<1x128xf32>
    %442 = vector.extract_strided_slice %424 {offsets = [0, 256], sizes = [1, 128], strides = [1, 1]} : vector<1x384xf32> to vector<1x128xf32>
    %443 = arith.mulf %432, %442 : vector<1x128xf32>
    %444 = arith.addf %441, %443 : vector<1x128xf32>
    %445 = math.tanh %444 : vector<1x128xf32>
    %cst_90 = arith.constant 1.000000e+00 : f32
    %446 = vector.broadcast %cst_90 : f32 to vector<1x128xf32>
    %447 = arith.subf %446, %440 : vector<1x128xf32>
    %448 = arith.mulf %447, %445 : vector<1x128xf32>
    %449 = arith.mulf %440, %421 : vector<1x128xf32>
    %450 = arith.addf %448, %449 : vector<1x128xf32>
    %451 = vector.extract_strided_slice %41 {offsets = [14, 0], sizes = [1, 384], strides = [1, 1]} : vector<22x384xf32> to vector<1x384xf32>
    %cst_91 = arith.constant dense<0.000000e+00> : vector<1x384xf32>
    %452 = tpu.matmul %450, %42, %cst_91 {dimension_numbers = #tpu.dot_dimension_numbers<[1], [0], [0], [1], [0, 0, 1, 1], [], []>} : vector<1x128xf32>, vector<128x384xf32>, vector<1x384xf32> -> vector<1x384xf32>
    %453 = arith.addf %452, %43 : vector<1x384xf32>
    %454 = vector.extract_strided_slice %451 {offsets = [0, 0], sizes = [1, 128], strides = [1, 1]} : vector<1x384xf32> to vector<1x128xf32>
    %455 = vector.extract_strided_slice %453 {offsets = [0, 0], sizes = [1, 128], strides = [1, 1]} : vector<1x384xf32> to vector<1x128xf32>
    %456 = arith.addf %454, %455 : vector<1x128xf32>
    %457 = arith.negf %456 : vector<1x128xf32>
    %458 = math.exp %457 : vector<1x128xf32>
    %cst_92 = arith.constant 1.000000e+00 : f32
    %459 = vector.broadcast %cst_92 : f32 to vector<1x128xf32>
    %460 = arith.addf %459, %458 : vector<1x128xf32>
    %461 = arith.divf %459, %460 : vector<1x128xf32>
    %462 = vector.extract_strided_slice %451 {offsets = [0, 128], sizes = [1, 128], strides = [1, 1]} : vector<1x384xf32> to vector<1x128xf32>
    %463 = vector.extract_strided_slice %453 {offsets = [0, 128], sizes = [1, 128], strides = [1, 1]} : vector<1x384xf32> to vector<1x128xf32>
    %464 = arith.addf %462, %463 : vector<1x128xf32>
    %465 = arith.negf %464 : vector<1x128xf32>
    %466 = math.exp %465 : vector<1x128xf32>
    %cst_93 = arith.constant 1.000000e+00 : f32
    %467 = vector.broadcast %cst_93 : f32 to vector<1x128xf32>
    %468 = arith.addf %467, %466 : vector<1x128xf32>
    %469 = arith.divf %467, %468 : vector<1x128xf32>
    %470 = vector.extract_strided_slice %451 {offsets = [0, 256], sizes = [1, 128], strides = [1, 1]} : vector<1x384xf32> to vector<1x128xf32>
    %471 = vector.extract_strided_slice %453 {offsets = [0, 256], sizes = [1, 128], strides = [1, 1]} : vector<1x384xf32> to vector<1x128xf32>
    %472 = arith.mulf %461, %471 : vector<1x128xf32>
    %473 = arith.addf %470, %472 : vector<1x128xf32>
    %474 = math.tanh %473 : vector<1x128xf32>
    %cst_94 = arith.constant 1.000000e+00 : f32
    %475 = vector.broadcast %cst_94 : f32 to vector<1x128xf32>
    %476 = arith.subf %475, %469 : vector<1x128xf32>
    %477 = arith.mulf %476, %474 : vector<1x128xf32>
    %478 = arith.mulf %469, %450 : vector<1x128xf32>
    %479 = arith.addf %477, %478 : vector<1x128xf32>
    %480 = vector.extract_strided_slice %41 {offsets = [15, 0], sizes = [1, 384], strides = [1, 1]} : vector<22x384xf32> to vector<1x384xf32>
    %cst_95 = arith.constant dense<0.000000e+00> : vector<1x384xf32>
    %481 = tpu.matmul %479, %42, %cst_95 {dimension_numbers = #tpu.dot_dimension_numbers<[1], [0], [0], [1], [0, 0, 1, 1], [], []>} : vector<1x128xf32>, vector<128x384xf32>, vector<1x384xf32> -> vector<1x384xf32>
    %482 = arith.addf %481, %43 : vector<1x384xf32>
    %483 = vector.extract_strided_slice %480 {offsets = [0, 0], sizes = [1, 128], strides = [1, 1]} : vector<1x384xf32> to vector<1x128xf32>
    %484 = vector.extract_strided_slice %482 {offsets = [0, 0], sizes = [1, 128], strides = [1, 1]} : vector<1x384xf32> to vector<1x128xf32>
    %485 = arith.addf %483, %484 : vector<1x128xf32>
    %486 = arith.negf %485 : vector<1x128xf32>
    %487 = math.exp %486 : vector<1x128xf32>
    %cst_96 = arith.constant 1.000000e+00 : f32
    %488 = vector.broadcast %cst_96 : f32 to vector<1x128xf32>
    %489 = arith.addf %488, %487 : vector<1x128xf32>
    %490 = arith.divf %488, %489 : vector<1x128xf32>
    %491 = vector.extract_strided_slice %480 {offsets = [0, 128], sizes = [1, 128], strides = [1, 1]} : vector<1x384xf32> to vector<1x128xf32>
    %492 = vector.extract_strided_slice %482 {offsets = [0, 128], sizes = [1, 128], strides = [1, 1]} : vector<1x384xf32> to vector<1x128xf32>
    %493 = arith.addf %491, %492 : vector<1x128xf32>
    %494 = arith.negf %493 : vector<1x128xf32>
    %495 = math.exp %494 : vector<1x128xf32>
    %cst_97 = arith.constant 1.000000e+00 : f32
    %496 = vector.broadcast %cst_97 : f32 to vector<1x128xf32>
    %497 = arith.addf %496, %495 : vector<1x128xf32>
    %498 = arith.divf %496, %497 : vector<1x128xf32>
    %499 = vector.extract_strided_slice %480 {offsets = [0, 256], sizes = [1, 128], strides = [1, 1]} : vector<1x384xf32> to vector<1x128xf32>
    %500 = vector.extract_strided_slice %482 {offsets = [0, 256], sizes = [1, 128], strides = [1, 1]} : vector<1x384xf32> to vector<1x128xf32>
    %501 = arith.mulf %490, %500 : vector<1x128xf32>
    %502 = arith.addf %499, %501 : vector<1x128xf32>
    %503 = math.tanh %502 : vector<1x128xf32>
    %cst_98 = arith.constant 1.000000e+00 : f32
    %504 = vector.broadcast %cst_98 : f32 to vector<1x128xf32>
    %505 = arith.subf %504, %498 : vector<1x128xf32>
    %506 = arith.mulf %505, %503 : vector<1x128xf32>
    %507 = arith.mulf %498, %479 : vector<1x128xf32>
    %508 = arith.addf %506, %507 : vector<1x128xf32>
    %509 = vector.extract_strided_slice %41 {offsets = [16, 0], sizes = [1, 384], strides = [1, 1]} : vector<22x384xf32> to vector<1x384xf32>
    %cst_99 = arith.constant dense<0.000000e+00> : vector<1x384xf32>
    %510 = tpu.matmul %508, %42, %cst_99 {dimension_numbers = #tpu.dot_dimension_numbers<[1], [0], [0], [1], [0, 0, 1, 1], [], []>} : vector<1x128xf32>, vector<128x384xf32>, vector<1x384xf32> -> vector<1x384xf32>
    %511 = arith.addf %510, %43 : vector<1x384xf32>
    %512 = vector.extract_strided_slice %509 {offsets = [0, 0], sizes = [1, 128], strides = [1, 1]} : vector<1x384xf32> to vector<1x128xf32>
    %513 = vector.extract_strided_slice %511 {offsets = [0, 0], sizes = [1, 128], strides = [1, 1]} : vector<1x384xf32> to vector<1x128xf32>
    %514 = arith.addf %512, %513 : vector<1x128xf32>
    %515 = arith.negf %514 : vector<1x128xf32>
    %516 = math.exp %515 : vector<1x128xf32>
    %cst_100 = arith.constant 1.000000e+00 : f32
    %517 = vector.broadcast %cst_100 : f32 to vector<1x128xf32>
    %518 = arith.addf %517, %516 : vector<1x128xf32>
    %519 = arith.divf %517, %518 : vector<1x128xf32>
    %520 = vector.extract_strided_slice %509 {offsets = [0, 128], sizes = [1, 128], strides = [1, 1]} : vector<1x384xf32> to vector<1x128xf32>
    %521 = vector.extract_strided_slice %511 {offsets = [0, 128], sizes = [1, 128], strides = [1, 1]} : vector<1x384xf32> to vector<1x128xf32>
    %522 = arith.addf %520, %521 : vector<1x128xf32>
    %523 = arith.negf %522 : vector<1x128xf32>
    %524 = math.exp %523 : vector<1x128xf32>
    %cst_101 = arith.constant 1.000000e+00 : f32
    %525 = vector.broadcast %cst_101 : f32 to vector<1x128xf32>
    %526 = arith.addf %525, %524 : vector<1x128xf32>
    %527 = arith.divf %525, %526 : vector<1x128xf32>
    %528 = vector.extract_strided_slice %509 {offsets = [0, 256], sizes = [1, 128], strides = [1, 1]} : vector<1x384xf32> to vector<1x128xf32>
    %529 = vector.extract_strided_slice %511 {offsets = [0, 256], sizes = [1, 128], strides = [1, 1]} : vector<1x384xf32> to vector<1x128xf32>
    %530 = arith.mulf %519, %529 : vector<1x128xf32>
    %531 = arith.addf %528, %530 : vector<1x128xf32>
    %532 = math.tanh %531 : vector<1x128xf32>
    %cst_102 = arith.constant 1.000000e+00 : f32
    %533 = vector.broadcast %cst_102 : f32 to vector<1x128xf32>
    %534 = arith.subf %533, %527 : vector<1x128xf32>
    %535 = arith.mulf %534, %532 : vector<1x128xf32>
    %536 = arith.mulf %527, %508 : vector<1x128xf32>
    %537 = arith.addf %535, %536 : vector<1x128xf32>
    %538 = vector.extract_strided_slice %41 {offsets = [17, 0], sizes = [1, 384], strides = [1, 1]} : vector<22x384xf32> to vector<1x384xf32>
    %cst_103 = arith.constant dense<0.000000e+00> : vector<1x384xf32>
    %539 = tpu.matmul %537, %42, %cst_103 {dimension_numbers = #tpu.dot_dimension_numbers<[1], [0], [0], [1], [0, 0, 1, 1], [], []>} : vector<1x128xf32>, vector<128x384xf32>, vector<1x384xf32> -> vector<1x384xf32>
    %540 = arith.addf %539, %43 : vector<1x384xf32>
    %541 = vector.extract_strided_slice %538 {offsets = [0, 0], sizes = [1, 128], strides = [1, 1]} : vector<1x384xf32> to vector<1x128xf32>
    %542 = vector.extract_strided_slice %540 {offsets = [0, 0], sizes = [1, 128], strides = [1, 1]} : vector<1x384xf32> to vector<1x128xf32>
    %543 = arith.addf %541, %542 : vector<1x128xf32>
    %544 = arith.negf %543 : vector<1x128xf32>
    %545 = math.exp %544 : vector<1x128xf32>
    %cst_104 = arith.constant 1.000000e+00 : f32
    %546 = vector.broadcast %cst_104 : f32 to vector<1x128xf32>
    %547 = arith.addf %546, %545 : vector<1x128xf32>
    %548 = arith.divf %546, %547 : vector<1x128xf32>
    %549 = vector.extract_strided_slice %538 {offsets = [0, 128], sizes = [1, 128], strides = [1, 1]} : vector<1x384xf32> to vector<1x128xf32>
    %550 = vector.extract_strided_slice %540 {offsets = [0, 128], sizes = [1, 128], strides = [1, 1]} : vector<1x384xf32> to vector<1x128xf32>
    %551 = arith.addf %549, %550 : vector<1x128xf32>
    %552 = arith.negf %551 : vector<1x128xf32>
    %553 = math.exp %552 : vector<1x128xf32>
    %cst_105 = arith.constant 1.000000e+00 : f32
    %554 = vector.broadcast %cst_105 : f32 to vector<1x128xf32>
    %555 = arith.addf %554, %553 : vector<1x128xf32>
    %556 = arith.divf %554, %555 : vector<1x128xf32>
    %557 = vector.extract_strided_slice %538 {offsets = [0, 256], sizes = [1, 128], strides = [1, 1]} : vector<1x384xf32> to vector<1x128xf32>
    %558 = vector.extract_strided_slice %540 {offsets = [0, 256], sizes = [1, 128], strides = [1, 1]} : vector<1x384xf32> to vector<1x128xf32>
    %559 = arith.mulf %548, %558 : vector<1x128xf32>
    %560 = arith.addf %557, %559 : vector<1x128xf32>
    %561 = math.tanh %560 : vector<1x128xf32>
    %cst_106 = arith.constant 1.000000e+00 : f32
    %562 = vector.broadcast %cst_106 : f32 to vector<1x128xf32>
    %563 = arith.subf %562, %556 : vector<1x128xf32>
    %564 = arith.mulf %563, %561 : vector<1x128xf32>
    %565 = arith.mulf %556, %537 : vector<1x128xf32>
    %566 = arith.addf %564, %565 : vector<1x128xf32>
    %567 = vector.extract_strided_slice %41 {offsets = [18, 0], sizes = [1, 384], strides = [1, 1]} : vector<22x384xf32> to vector<1x384xf32>
    %cst_107 = arith.constant dense<0.000000e+00> : vector<1x384xf32>
    %568 = tpu.matmul %566, %42, %cst_107 {dimension_numbers = #tpu.dot_dimension_numbers<[1], [0], [0], [1], [0, 0, 1, 1], [], []>} : vector<1x128xf32>, vector<128x384xf32>, vector<1x384xf32> -> vector<1x384xf32>
    %569 = arith.addf %568, %43 : vector<1x384xf32>
    %570 = vector.extract_strided_slice %567 {offsets = [0, 0], sizes = [1, 128], strides = [1, 1]} : vector<1x384xf32> to vector<1x128xf32>
    %571 = vector.extract_strided_slice %569 {offsets = [0, 0], sizes = [1, 128], strides = [1, 1]} : vector<1x384xf32> to vector<1x128xf32>
    %572 = arith.addf %570, %571 : vector<1x128xf32>
    %573 = arith.negf %572 : vector<1x128xf32>
    %574 = math.exp %573 : vector<1x128xf32>
    %cst_108 = arith.constant 1.000000e+00 : f32
    %575 = vector.broadcast %cst_108 : f32 to vector<1x128xf32>
    %576 = arith.addf %575, %574 : vector<1x128xf32>
    %577 = arith.divf %575, %576 : vector<1x128xf32>
    %578 = vector.extract_strided_slice %567 {offsets = [0, 128], sizes = [1, 128], strides = [1, 1]} : vector<1x384xf32> to vector<1x128xf32>
    %579 = vector.extract_strided_slice %569 {offsets = [0, 128], sizes = [1, 128], strides = [1, 1]} : vector<1x384xf32> to vector<1x128xf32>
    %580 = arith.addf %578, %579 : vector<1x128xf32>
    %581 = arith.negf %580 : vector<1x128xf32>
    %582 = math.exp %581 : vector<1x128xf32>
    %cst_109 = arith.constant 1.000000e+00 : f32
    %583 = vector.broadcast %cst_109 : f32 to vector<1x128xf32>
    %584 = arith.addf %583, %582 : vector<1x128xf32>
    %585 = arith.divf %583, %584 : vector<1x128xf32>
    %586 = vector.extract_strided_slice %567 {offsets = [0, 256], sizes = [1, 128], strides = [1, 1]} : vector<1x384xf32> to vector<1x128xf32>
    %587 = vector.extract_strided_slice %569 {offsets = [0, 256], sizes = [1, 128], strides = [1, 1]} : vector<1x384xf32> to vector<1x128xf32>
    %588 = arith.mulf %577, %587 : vector<1x128xf32>
    %589 = arith.addf %586, %588 : vector<1x128xf32>
    %590 = math.tanh %589 : vector<1x128xf32>
    %cst_110 = arith.constant 1.000000e+00 : f32
    %591 = vector.broadcast %cst_110 : f32 to vector<1x128xf32>
    %592 = arith.subf %591, %585 : vector<1x128xf32>
    %593 = arith.mulf %592, %590 : vector<1x128xf32>
    %594 = arith.mulf %585, %566 : vector<1x128xf32>
    %595 = arith.addf %593, %594 : vector<1x128xf32>
    %596 = vector.extract_strided_slice %41 {offsets = [19, 0], sizes = [1, 384], strides = [1, 1]} : vector<22x384xf32> to vector<1x384xf32>
    %cst_111 = arith.constant dense<0.000000e+00> : vector<1x384xf32>
    %597 = tpu.matmul %595, %42, %cst_111 {dimension_numbers = #tpu.dot_dimension_numbers<[1], [0], [0], [1], [0, 0, 1, 1], [], []>} : vector<1x128xf32>, vector<128x384xf32>, vector<1x384xf32> -> vector<1x384xf32>
    %598 = arith.addf %597, %43 : vector<1x384xf32>
    %599 = vector.extract_strided_slice %596 {offsets = [0, 0], sizes = [1, 128], strides = [1, 1]} : vector<1x384xf32> to vector<1x128xf32>
    %600 = vector.extract_strided_slice %598 {offsets = [0, 0], sizes = [1, 128], strides = [1, 1]} : vector<1x384xf32> to vector<1x128xf32>
    %601 = arith.addf %599, %600 : vector<1x128xf32>
    %602 = arith.negf %601 : vector<1x128xf32>
    %603 = math.exp %602 : vector<1x128xf32>
    %cst_112 = arith.constant 1.000000e+00 : f32
    %604 = vector.broadcast %cst_112 : f32 to vector<1x128xf32>
    %605 = arith.addf %604, %603 : vector<1x128xf32>
    %606 = arith.divf %604, %605 : vector<1x128xf32>
    %607 = vector.extract_strided_slice %596 {offsets = [0, 128], sizes = [1, 128], strides = [1, 1]} : vector<1x384xf32> to vector<1x128xf32>
    %608 = vector.extract_strided_slice %598 {offsets = [0, 128], sizes = [1, 128], strides = [1, 1]} : vector<1x384xf32> to vector<1x128xf32>
    %609 = arith.addf %607, %608 : vector<1x128xf32>
    %610 = arith.negf %609 : vector<1x128xf32>
    %611 = math.exp %610 : vector<1x128xf32>
    %cst_113 = arith.constant 1.000000e+00 : f32
    %612 = vector.broadcast %cst_113 : f32 to vector<1x128xf32>
    %613 = arith.addf %612, %611 : vector<1x128xf32>
    %614 = arith.divf %612, %613 : vector<1x128xf32>
    %615 = vector.extract_strided_slice %596 {offsets = [0, 256], sizes = [1, 128], strides = [1, 1]} : vector<1x384xf32> to vector<1x128xf32>
    %616 = vector.extract_strided_slice %598 {offsets = [0, 256], sizes = [1, 128], strides = [1, 1]} : vector<1x384xf32> to vector<1x128xf32>
    %617 = arith.mulf %606, %616 : vector<1x128xf32>
    %618 = arith.addf %615, %617 : vector<1x128xf32>
    %619 = math.tanh %618 : vector<1x128xf32>
    %cst_114 = arith.constant 1.000000e+00 : f32
    %620 = vector.broadcast %cst_114 : f32 to vector<1x128xf32>
    %621 = arith.subf %620, %614 : vector<1x128xf32>
    %622 = arith.mulf %621, %619 : vector<1x128xf32>
    %623 = arith.mulf %614, %595 : vector<1x128xf32>
    %624 = arith.addf %622, %623 : vector<1x128xf32>
    %625 = vector.extract_strided_slice %41 {offsets = [20, 0], sizes = [1, 384], strides = [1, 1]} : vector<22x384xf32> to vector<1x384xf32>
    %cst_115 = arith.constant dense<0.000000e+00> : vector<1x384xf32>
    %626 = tpu.matmul %624, %42, %cst_115 {dimension_numbers = #tpu.dot_dimension_numbers<[1], [0], [0], [1], [0, 0, 1, 1], [], []>} : vector<1x128xf32>, vector<128x384xf32>, vector<1x384xf32> -> vector<1x384xf32>
    %627 = arith.addf %626, %43 : vector<1x384xf32>
    %628 = vector.extract_strided_slice %625 {offsets = [0, 0], sizes = [1, 128], strides = [1, 1]} : vector<1x384xf32> to vector<1x128xf32>
    %629 = vector.extract_strided_slice %627 {offsets = [0, 0], sizes = [1, 128], strides = [1, 1]} : vector<1x384xf32> to vector<1x128xf32>
    %630 = arith.addf %628, %629 : vector<1x128xf32>
    %631 = arith.negf %630 : vector<1x128xf32>
    %632 = math.exp %631 : vector<1x128xf32>
    %cst_116 = arith.constant 1.000000e+00 : f32
    %633 = vector.broadcast %cst_116 : f32 to vector<1x128xf32>
    %634 = arith.addf %633, %632 : vector<1x128xf32>
    %635 = arith.divf %633, %634 : vector<1x128xf32>
    %636 = vector.extract_strided_slice %625 {offsets = [0, 128], sizes = [1, 128], strides = [1, 1]} : vector<1x384xf32> to vector<1x128xf32>
    %637 = vector.extract_strided_slice %627 {offsets = [0, 128], sizes = [1, 128], strides = [1, 1]} : vector<1x384xf32> to vector<1x128xf32>
    %638 = arith.addf %636, %637 : vector<1x128xf32>
    %639 = arith.negf %638 : vector<1x128xf32>
    %640 = math.exp %639 : vector<1x128xf32>
    %cst_117 = arith.constant 1.000000e+00 : f32
    %641 = vector.broadcast %cst_117 : f32 to vector<1x128xf32>
    %642 = arith.addf %641, %640 : vector<1x128xf32>
    %643 = arith.divf %641, %642 : vector<1x128xf32>
    %644 = vector.extract_strided_slice %625 {offsets = [0, 256], sizes = [1, 128], strides = [1, 1]} : vector<1x384xf32> to vector<1x128xf32>
    %645 = vector.extract_strided_slice %627 {offsets = [0, 256], sizes = [1, 128], strides = [1, 1]} : vector<1x384xf32> to vector<1x128xf32>
    %646 = arith.mulf %635, %645 : vector<1x128xf32>
    %647 = arith.addf %644, %646 : vector<1x128xf32>
    %648 = math.tanh %647 : vector<1x128xf32>
    %cst_118 = arith.constant 1.000000e+00 : f32
    %649 = vector.broadcast %cst_118 : f32 to vector<1x128xf32>
    %650 = arith.subf %649, %643 : vector<1x128xf32>
    %651 = arith.mulf %650, %648 : vector<1x128xf32>
    %652 = arith.mulf %643, %624 : vector<1x128xf32>
    %653 = arith.addf %651, %652 : vector<1x128xf32>
    %654 = vector.extract_strided_slice %41 {offsets = [21, 0], sizes = [1, 384], strides = [1, 1]} : vector<22x384xf32> to vector<1x384xf32>
    %cst_119 = arith.constant dense<0.000000e+00> : vector<1x384xf32>
    %655 = tpu.matmul %653, %42, %cst_119 {dimension_numbers = #tpu.dot_dimension_numbers<[1], [0], [0], [1], [0, 0, 1, 1], [], []>} : vector<1x128xf32>, vector<128x384xf32>, vector<1x384xf32> -> vector<1x384xf32>
    %656 = arith.addf %655, %43 : vector<1x384xf32>
    %657 = vector.extract_strided_slice %654 {offsets = [0, 0], sizes = [1, 128], strides = [1, 1]} : vector<1x384xf32> to vector<1x128xf32>
    %658 = vector.extract_strided_slice %656 {offsets = [0, 0], sizes = [1, 128], strides = [1, 1]} : vector<1x384xf32> to vector<1x128xf32>
    %659 = arith.addf %657, %658 : vector<1x128xf32>
    %660 = arith.negf %659 : vector<1x128xf32>
    %661 = math.exp %660 : vector<1x128xf32>
    %cst_120 = arith.constant 1.000000e+00 : f32
    %662 = vector.broadcast %cst_120 : f32 to vector<1x128xf32>
    %663 = arith.addf %662, %661 : vector<1x128xf32>
    %664 = arith.divf %662, %663 : vector<1x128xf32>
    %665 = vector.extract_strided_slice %654 {offsets = [0, 128], sizes = [1, 128], strides = [1, 1]} : vector<1x384xf32> to vector<1x128xf32>
    %666 = vector.extract_strided_slice %656 {offsets = [0, 128], sizes = [1, 128], strides = [1, 1]} : vector<1x384xf32> to vector<1x128xf32>
    %667 = arith.addf %665, %666 : vector<1x128xf32>
    %668 = arith.negf %667 : vector<1x128xf32>
    %669 = math.exp %668 : vector<1x128xf32>
    %cst_121 = arith.constant 1.000000e+00 : f32
    %670 = vector.broadcast %cst_121 : f32 to vector<1x128xf32>
    %671 = arith.addf %670, %669 : vector<1x128xf32>
    %672 = arith.divf %670, %671 : vector<1x128xf32>
    %673 = vector.extract_strided_slice %654 {offsets = [0, 256], sizes = [1, 128], strides = [1, 1]} : vector<1x384xf32> to vector<1x128xf32>
    %674 = vector.extract_strided_slice %656 {offsets = [0, 256], sizes = [1, 128], strides = [1, 1]} : vector<1x384xf32> to vector<1x128xf32>
    %675 = arith.mulf %664, %674 : vector<1x128xf32>
    %676 = arith.addf %673, %675 : vector<1x128xf32>
    %677 = math.tanh %676 : vector<1x128xf32>
    %cst_122 = arith.constant 1.000000e+00 : f32
    %678 = vector.broadcast %cst_122 : f32 to vector<1x128xf32>
    %679 = arith.subf %678, %672 : vector<1x128xf32>
    %680 = arith.mulf %679, %677 : vector<1x128xf32>
    %681 = arith.mulf %672, %653 : vector<1x128xf32>
    %682 = arith.addf %680, %681 : vector<1x128xf32>
    %c0_123 = arith.constant 0 : index
    %c0_124 = arith.constant 0 : index
    %683 = vector.load %arg14[%c0_123, %c0_124] : memref<128x6xf32, #tpu.memory_space<vmem>>, vector<128x6xf32>
    %cst_125 = arith.constant dense<0.000000e+00> : vector<1x6xf32>
    %684 = tpu.matmul %682, %683, %cst_125 {dimension_numbers = #tpu.dot_dimension_numbers<[1], [0], [0], [1], [0, 0, 1, 1], [], []>} : vector<1x128xf32>, vector<128x6xf32>, vector<1x6xf32> -> vector<1x6xf32>
    %c0_126 = arith.constant 0 : index
    %c0_127 = arith.constant 0 : index
    %685 = vector.load %arg15[%c0_126, %c0_127] : memref<1x6xf32, #tpu.memory_space<vmem>>, vector<1x6xf32>
    %686 = arith.addf %684, %685 : vector<1x6xf32>
    %cst_128 = arith.constant dense<0xFF800000> : vector<1xf32>
    %687 = vector.multi_reduction <maximumf>, %686, %cst_128 [1] : vector<1x6xf32> to vector<1xf32>
    %688 = vector.shape_cast %687 : vector<1xf32> to vector<1x1xf32>
    %689 = vector.broadcast %688 : vector<1x1xf32> to vector<1x6xf32>
    %690 = arith.subf %686, %689 : vector<1x6xf32>
    %691 = math.exp %690 : vector<1x6xf32>
    %cst_129 = arith.constant dense<0.000000e+00> : vector<1xf32>
    %692 = vector.multi_reduction <add>, %691, %cst_129 [1] : vector<1x6xf32> to vector<1xf32>
    %693 = vector.shape_cast %692 : vector<1xf32> to vector<1x1xf32>
    %694 = vector.broadcast %693 : vector<1x1xf32> to vector<1x6xf32>
    %695 = arith.divf %691, %694 : vector<1x6xf32>
    %c0_130 = arith.constant 0 : index
    %c0_131 = arith.constant 0 : index
    %c0_132 = arith.constant 0 : index
    %696 = vector.load %arg16[%c0_130, %c0_131, %c0_132] : memref<1x1x6xf32, #tpu.memory_space<vmem>>, vector<1x1x6xf32>
    %697 = vector.shape_cast %696 : vector<1x1x6xf32> to vector<1x6xf32>
    %698 = vector.shape_cast %695 : vector<1x6xf32> to vector<1x1x6xf32>
    tpu.vector_store %arg16[%c0_130, %c0_131, %c0_132], %698 {strides = array<i32>} : memref<1x1x6xf32, #tpu.memory_space<vmem>>, vector<1x1x6xf32>,
    return
  }
  func.func @transform_0(%arg0: i32) -> (i32, i32, i32) {
    %c0_i32 = arith.constant 0 : i32
    %c0_i32_0 = arith.constant 0 : i32
    %c0_i32_1 = arith.constant 0 : i32
    return %arg0, %c0_i32, %c0_i32_0 : i32, i32, i32
  }
  func.func @transform_1(%arg0: i32) -> (i32, i32) {
    %c0_i32 = arith.constant 0 : i32
    %c0_i32_0 = arith.constant 0 : i32
    %c0_i32_1 = arith.constant 0 : i32
    return %c0_i32, %c0_i32_0 : i32, i32
  }
  func.func @transform_2(%arg0: i32) -> (i32, i32) {
    %c0_i32 = arith.constant 0 : i32
    %c0_i32_0 = arith.constant 0 : i32
    %c0_i32_1 = arith.constant 0 : i32
    return %c0_i32, %c0_i32_0 : i32, i32
  }
  func.func @transform_3(%arg0: i32) -> (i32, i32) {
    %c0_i32 = arith.constant 0 : i32
    %c0_i32_0 = arith.constant 0 : i32
    %c0_i32_1 = arith.constant 0 : i32
    return %c0_i32, %c0_i32_0 : i32, i32
  }
  func.func @transform_4(%arg0: i32) -> (i32, i32) {
    %c0_i32 = arith.constant 0 : i32
    %c0_i32_0 = arith.constant 0 : i32
    %c0_i32_1 = arith.constant 0 : i32
    return %c0_i32, %c0_i32_0 : i32, i32
  }
  func.func @transform_5(%arg0: i32) -> (i32, i32) {
    %c0_i32 = arith.constant 0 : i32
    %c0_i32_0 = arith.constant 0 : i32
    %c0_i32_1 = arith.constant 0 : i32
    return %c0_i32, %c0_i32_0 : i32, i32
  }
  func.func @transform_6(%arg0: i32) -> (i32, i32) {
    %c0_i32 = arith.constant 0 : i32
    %c0_i32_0 = arith.constant 0 : i32
    %c0_i32_1 = arith.constant 0 : i32
    return %c0_i32, %c0_i32_0 : i32, i32
  }
  func.func @transform_7(%arg0: i32) -> (i32, i32) {
    %c0_i32 = arith.constant 0 : i32
    %c0_i32_0 = arith.constant 0 : i32
    %c0_i32_1 = arith.constant 0 : i32
    return %c0_i32, %c0_i32_0 : i32, i32
  }
  func.func @transform_8(%arg0: i32) -> (i32, i32) {
    %c0_i32 = arith.constant 0 : i32
    %c0_i32_0 = arith.constant 0 : i32
    %c0_i32_1 = arith.constant 0 : i32
    return %c0_i32, %c0_i32_0 : i32, i32
  }
  func.func @transform_9(%arg0: i32) -> (i32, i32) {
    %c0_i32 = arith.constant 0 : i32
    %c0_i32_0 = arith.constant 0 : i32
    %c0_i32_1 = arith.constant 0 : i32
    return %c0_i32, %c0_i32_0 : i32, i32
  }
  func.func @transform_10(%arg0: i32) -> (i32, i32) {
    %c0_i32 = arith.constant 0 : i32
    %c0_i32_0 = arith.constant 0 : i32
    %c0_i32_1 = arith.constant 0 : i32
    return %c0_i32, %c0_i32_0 : i32, i32
  }
  func.func @transform_11(%arg0: i32) -> (i32, i32) {
    %c0_i32 = arith.constant 0 : i32
    %c0_i32_0 = arith.constant 0 : i32
    %c0_i32_1 = arith.constant 0 : i32
    return %c0_i32, %c0_i32_0 : i32, i32
  }
  func.func @transform_12(%arg0: i32) -> (i32, i32) {
    %c0_i32 = arith.constant 0 : i32
    %c0_i32_0 = arith.constant 0 : i32
    %c0_i32_1 = arith.constant 0 : i32
    return %c0_i32, %c0_i32_0 : i32, i32
  }
  func.func @transform_13(%arg0: i32) -> (i32, i32) {
    %c0_i32 = arith.constant 0 : i32
    %c0_i32_0 = arith.constant 0 : i32
    %c0_i32_1 = arith.constant 0 : i32
    return %c0_i32, %c0_i32_0 : i32, i32
  }
  func.func @transform_14(%arg0: i32) -> (i32, i32) {
    %c0_i32 = arith.constant 0 : i32
    %c0_i32_0 = arith.constant 0 : i32
    %c0_i32_1 = arith.constant 0 : i32
    return %c0_i32, %c0_i32_0 : i32, i32
  }
  func.func @transform_15(%arg0: i32) -> (i32, i32, i32) {
    %c0_i32 = arith.constant 0 : i32
    %c0_i32_0 = arith.constant 0 : i32
    %c0_i32_1 = arith.constant 0 : i32
    return %arg0, %c0_i32, %c0_i32_0 : i32, i32, i32
  }
}

</mosaic_0001>

<bundles_post_ra>
// kernel: widar_cnn_gru_forward.1
= control target key start
LH: loop header
LB: loop body
LE: loop exit
PB: predicated region body
PF: predicated region fallthrough
CT: control target
= control target key end

     0   :  { %s13408_s0 = inlined_call_operand.vmem [shape: f32[2,22,400], index: 0, kind: input, shape index: {}]   ;;  %s13409_s1 = inlined_call_operand.hbm [shape: f32[400,512], index: 1, kind: input, shape index: {}]   ;;  %s13410_s2 = inlined_call_operand.hbm [shape: f32[1,512], index: 2, kind: input, shape index: {}]   ;;  %s13411_s3 = inlined_call_operand.hbm [shape: f32[512,1024], index: 3, kind: input, shape index: {}]   ;;  %s13412_s4 = inlined_call_operand.hbm [shape: f32[1,1024], index: 4, kind: input, shape index: {}]   ;;  %s13413_s5 = inlined_call_operand.vmem [shape: f32[256,64], index: 5, kind: input, shape index: {}]   ;;  %s13414_s6 = inlined_call_operand.hbm [shape: f32[1,64], index: 6, kind: input, shape index: {}]   ;;  %s13415_s7 = inlined_call_operand.hbm [shape: f32[64,64], index: 7, kind: input, shape index: {}]   ;;  %s13416_s8 = inlined_call_operand.hbm [shape: f32[1,64], index: 8, kind: input, shape index: {}]   ;;  %s13417_s9 = inlined_call_operand.hbm [shape: f32[64,384], index: 9, kind: input, shape index: {}]   ;;  %s13418_s10 = inlined_call_operand.hbm [shape: f32[1,384], index: 10, kind: input, shape index: {}]   ;;  %s13419_s11 = inlined_call_operand.hbm [shape: f32[128,384], index: 11, kind: input, shape index: {}]   ;;  %s13420_s12 = inlined_call_operand.hbm [shape: f32[1,384], index: 12, kind: input, shape index: {}]   ;;  %s13421_s13 = inlined_call_operand.vmem [shape: f32[128,6], index: 13, kind: input, shape index: {}]   ;;  %s13422_s14 = inlined_call_operand.hbm [shape: f32[1,6], index: 14, kind: input, shape index: {}]   ;;  %s13423_s15 = inlined_call_operand.hbm [shape: f32[2,1,6], index: 15, kind: output, shape index: {}]  }
   0x1   :  { %13437 = sst [smem:[#allocation39_spill]] %s13409_s1 }
   0x2   :  { %13438 = sst [smem:[#allocation40_spill]] %s13410_s2 }
   0x3   :  { %13439 = sst [smem:[#allocation41_spill]] %s13412_s4 }
   0x4   :  { %13440 = sst [smem:[#allocation42_spill]] %s13415_s7 }
   0x5   :  { %13441 = sst [smem:[#allocation43_spill]] %s13423_s15 }
   0x6   :  { %20 = vsyncpa [#allocation3], 0 }
   0x7   :  { %21 = vsyncpa [#allocation6], 0 }
   0x8   :  { %22 = vsyncpa [#allocation9], 0 }
   0x9   :  { %23 = vsyncpa [#allocation12], 0 }
   0xa   :  { %24 = vsyncpa [#allocation15], 0 }
   0xb   :  { %25 = vsyncpa [#allocation18], 0 }
   0xc   :  { %26 = vsyncpa [#allocation21], 0 }
   0xd   :  { %27 = vsyncpa [#allocation4], 0 }
   0xe   :  { %29 = vsyncpa [#allocation4 + $0x1], 0  ;;  %s11569_s18 = smov 0   ;;  %s11571_s19 = smov 0  }
   0xf   :  { %s11573_s20 = smov 0   ;;  %s11575_s21 = smov 0  }
  0x10 LB: > { %13442 = sst [smem:[#allocation31_spill]] %s11451_s18  ;;  %s11590_s22 = sadd.s32 4294967295, %s11463_s21   ;;  %s11463_s21 = sphi %s11575_s21, %s13482_s21   ;;  %s11459_s20 = sphi %s11573_s20, %s13485_s20   ;;  %s11455_s19 = sphi %s11571_s19, %s13484_s19   ;;  %s11451_s18 = sphi %s11569_s18, %s13483_s18  }
  0x11   : > { %13443 = sst [smem:[#allocation32_spill]] %s11455_s19  ;;  %s7127_s23 = sadd.s32 4294967294, %s11463_s21  }
  0x12   : > { %13444 = sst [smem:[#allocation33_spill]] %s11459_s20  ;;  %s11594_s24 = sadd.s32 1, %s11463_s21  }
  0x13   : > { %13445 = sst [smem:[#allocation34_spill]] %s11463_s21  ;;  %s362_s25 = sadd.s32 1, %s11459_s20 }
  0x14   : > { %13446 = sst [smem:[#allocation35_spill]] %s11594_s24  ;;  %s359_s26 = ssub.s32 %s11463_s21, %s11594_s24 }
  0x15   : > { %p372_p0 = scmp.ne.s32.totalorder %s11459_s20, %s11455_s19  ;;  %p360_p1 = scmp.eq.s32.totalorder %s359_s26, 0 }
  0x16   : > { %p373_p2 = scmp.eq.s32.totalorder %s11590_s22, 1  ;;  %p378_p3 = scmp.ne.s32.totalorder %s11455_s19, %s11451_s18 }
  0x17   : > { %p379_p4 = scmp.eq.s32.totalorder %s7127_s23, 1  ;;  %p7128_p7 = scmp.ge.s32.totalorder %s11463_s21, 1 }
  0x18   : > { %s11605_s27 = scalar_select %p360_p1, %s11459_s20, %s362_s25  }
  0x19   : > { %p11607_p5 = por %p373_p2, %p372_p0  ;;  %p11611_p6 = por %p379_p4, %p378_p3 }
  0x1a   : > { %13447 = sst [smem:[#allocation36_spill]] %s11605_s27  ;;  %p386_p8 = scmp.lt.s32.totalorder %s11463_s21, 3 }
  0x1b   : > { %s13448_s28 = scalar_select %p11607_p5, 1, 0 }
  0x1c   : > { %s13450_s29 = scalar_select %p11611_p6, 1, 0 }
  0x1d   : > { %13449 = sst [smem:[#allocation37_spill]] %s13448_s28  ;;  %p13431_p9 = scmp.eq.s32.totalorder %s11590_s22, 0 }
  0x1e   : > { %13451 = sst [smem:[#allocation38_spill]] %s13450_s29  ;;  %p11618_p10 = pnand %p7128_p7, %p386_p8 }
  0x1f   : > { %s11465_s16 = smov [#allocation5]   ;;  %s11466_s23 = smov [#allocation8]  }
  0x20   : > { %s13452_s30 = scalar_select %p11618_p10, 1, 0 }
  0x21   : > { %s412_s17 = sshll.u32 %s11465_s16, 4  ;;  %p10692_p11 = pneg %p11618_p10  ;;  %s413_s17 = int_to_ptr.vmem [resolvable:$true] %s412_s17 }
  0x22   : > { %s436_s25 = sshll.u32 %s11466_s23, 4  ;;  %s11467_s27 = smov [#allocation11]   ;;  %s11630_s25 = int_to_ptr.vmem [resolvable:$true] %s436_s25 }
  0x23   : > { %p11626_p12 = pnand %p13431_p9, %p10692_p11  ;;  %s460_s20 = sshll.u32 %s11467_s27, 4  ;;  %s11632_s20 = int_to_ptr.vmem [resolvable:$true] %s460_s20 }
  0x24   : > { %s13454_s2 = sld [smem:[#allocation40_spill]] }
  0x25   : > { %p11642_p0 = pneg %p11626_p12 }
  0x2a   : > { %s11037_s16 = scalar_lea.hbm %s13454_s2, 64 }
  0x2b   : > { %p11038_p13 = scmp.ne.s32.totalorder %s13454_s2, %s11037_s16  ;;  %p11044_p3 = scmp.lt.u32.totalorder %s11037_s16, %s13454_s2 }
  0x2d   : > { %p11040_p1 = pnand %p11642_p0, %p11038_p13 }
  0x2f   : > { %p11041_p2 = pneg %p11040_p1 }
  0x31   : > { %p11046_p4 = pnand %p11044_p3, %p11041_p2 }
  0x33   : > { %11049 = shalt.err (!%p11046_p4)
}
  0x34   : > { %s11050_s24 = scalar_lea.vmem %s413_s17, 64  ;;  %p11058_p9 = scmp.lt.s32.totalorder %s413_s17, %s413_s17 }
  0x35   : > { %p11051_p7 = scmp.ne.s32.totalorder %s413_s17, %s11050_s24  ;;  %p11059_p6 = scmp.lt.s32.totalorder %s11050_s24, %s11050_s24 }
  0x37   : > { %p11053_p8 = pnand %p11051_p7, %p11642_p0  ;;  %p11060_p5 = por %p11059_p6, %p11058_p9 }
  0x39   : > { %p11054_p11 = pneg %p11053_p8 }
  0x3b   : > { %p11061_p10 = pnand %p11060_p5, %p11054_p11 }
  0x3d   : > { %11064 = shalt.err (!%p11061_p10)
}
  0x3e   : > { %10698 = dma.hbm_to_vmem [thread:$0]  (!%p11626_p12), %s13454_s2, 64, %s413_s17, [#allocation6]  }
  0x3f   : > { %s13456_s4 = sld [smem:[#allocation41_spill]] }
  0x45   : > { %s11065_s16 = scalar_lea.hbm %s13456_s4, 128 }
  0x46   : > { %p11066_p13 = scmp.ne.s32.totalorder %s13456_s4, %s11065_s16  ;;  %p11072_p5 = scmp.lt.u32.totalorder %s11065_s16, %s13456_s4 }
  0x48   : > { %p11068_p1 = pnand %p11066_p13, %p11642_p0 }
  0x4a   : > { %p11069_p6 = pneg %p11068_p1 }
  0x4c   : > { %p11074_p9 = pnand %p11072_p5, %p11069_p6 }
  0x4e   : > { %11077 = shalt.err (!%p11074_p9)
}
  0x4f   : > { %s11078_s17 = scalar_lea.vmem %s11630_s25, 128  ;;  %p11086_p4 = scmp.lt.s32.totalorder %s11630_s25, %s11630_s25 }
  0x50   : > { %p11079_p10 = scmp.ne.s32.totalorder %s11630_s25, %s11078_s17  ;;  %p11087_p7 = scmp.lt.s32.totalorder %s11078_s17, %s11078_s17 }
  0x52   : > { %p11081_p2 = pnand %p11079_p10, %p11642_p0  ;;  %p11088_p8 = por %p11087_p7, %p11086_p4 }
  0x54   : > { %p11082_p3 = pneg %p11081_p2 }
  0x56   : > { %p11089_p11 = pnand %p11088_p8, %p11082_p3 }
  0x58   : > { %11092 = shalt.err (!%p11089_p11)
}
  0x59   : > { %10704 = dma.hbm_to_vmem [thread:$0]  (!%p11626_p12), %s13456_s4, 128, %s11630_s25, [#allocation9]  }
  0x5a   : > { %s13457_s7 = sld [smem:[#allocation42_spill]] }
  0x60   : > { %s11093_s15 = scalar_lea.hbm %s13457_s7, 1024 }
  0x61   : > { %p11094_p13 = scmp.ne.s32.totalorder %s13457_s7, %s11093_s15  ;;  %p11100_p5 = scmp.lt.u32.totalorder %s11093_s15, %s13457_s7 }
  0x63   : > { %p11096_p1 = pnand %p11094_p13, %p11642_p0 }
  0x65   : > { %p11097_p6 = pneg %p11096_p1 }
  0x67   : > { %p11102_p9 = pnand %p11100_p5, %p11097_p6 }
  0x69   : > { %11105 = shalt.err (!%p11102_p9)
}
  0x6a   : > { %s11106_s25 = scalar_lea.vmem %s11632_s20, 1024  ;;  %p11114_p4 = scmp.lt.s32.totalorder %s11632_s20, %s11632_s20 }
  0x6b   : > { %p11107_p10 = scmp.ne.s32.totalorder %s11632_s20, %s11106_s25  ;;  %p11115_p7 = scmp.lt.s32.totalorder %s11106_s25, %s11106_s25 }
  0x6d   : > { %p11109_p2 = pnand %p11107_p10, %p11642_p0  ;;  %p11116_p8 = por %p11115_p7, %p11114_p4 }
  0x6f   : > { %p11110_p3 = pneg %p11109_p2 }
  0x71   : > { %p11117_p11 = pnand %p11116_p8, %p11110_p3 }
  0x73   : > { %11120 = shalt.err (!%p11117_p11)
}
  0x74   : > { %s11468_s17 = smov 128   ;;  %s11469_s19 = smov 8  }
  0x75   : > { %10710 = dma.hbm_to_vmem [thread:$0]  (!%p11626_p12), %s13457_s7, 1024, %s11632_s20, [#allocation12], %s11468_s17, %s11468_s17, %s11469_s19  }
  0x76   : > { %s11470_s21 = smov [#allocation14]   ;;  %s11121_s27 = scalar_lea.hbm %s13417_s9, 3072 }
  0x77   : > { %s484_s15 = sshll.u32 %s11470_s21, 4  ;;  %p11122_p13 = scmp.ne.s32.totalorder %s13417_s9, %s11121_s27  ;;  %s485_s15 = int_to_ptr.vmem [resolvable:$true] %s484_s15 }
  0x78   : > { %p11128_p5 = scmp.lt.u32.totalorder %s11121_s27, %s13417_s9 }
  0x79   : > { %p11124_p1 = pnand %p11122_p13, %p11642_p0 }
  0x7b   : > { %p11125_p6 = pneg %p11124_p1 }
  0x7d   : > { %p11130_p9 = pnand %p11128_p5, %p11125_p6 }
  0x7f   : > { %11133 = shalt.err (!%p11130_p9)
}
  0x80   : > { %s11134_s20 = scalar_lea.vmem %s485_s15, 3072  ;;  %p11142_p4 = scmp.lt.s32.totalorder %s485_s15, %s485_s15 }
  0x81   : > { %p11135_p10 = scmp.ne.s32.totalorder %s485_s15, %s11134_s20  ;;  %p11143_p7 = scmp.lt.s32.totalorder %s11134_s20, %s11134_s20 }
  0x83   : > { %p11137_p2 = pnand %p11135_p10, %p11642_p0  ;;  %p11144_p8 = por %p11143_p7, %p11142_p4 }
  0x85   : > { %p11138_p3 = pneg %p11137_p2 }
  0x87   : > { %p11145_p11 = pnand %p11144_p8, %p11138_p3 }
  0x89   : > { %11148 = shalt.err (!%p11145_p11)
}
  0x8a   : > { %s11471_s17 = smov 384   ;;  %s11472_s19 = smov 24  }
  0x8b   : > { %10716 = dma.hbm_to_vmem [thread:$0]  (!%p11626_p12), %s13417_s9, 3072, %s485_s15, [#allocation15], %s11471_s17, %s11471_s17, %s11472_s19  }
  0x8c   : > { %s11473_s28 = smov [#allocation17]   ;;  %s11474_s21 = smov [#allocation2]  }
  0x8d   : > { %s508_s18 = sshll.u32 %s11473_s28, 4  ;;  %s398_s29 = sshll.u32 %s11474_s21, 4  ;;  %s509_s18 = int_to_ptr.vmem [resolvable:$true] %s508_s18  ;;  %s11722_s29 = int_to_ptr.vmem [resolvable:$true] %s398_s29 }
  0x8e   : > { %s11149_s24 = scalar_lea.hbm %s13419_s11, 6144 }
  0x8f   : > { %p11150_p13 = scmp.ne.s32.totalorder %s13419_s11, %s11149_s24  ;;  %p11156_p5 = scmp.lt.u32.totalorder %s11149_s24, %s13419_s11 }
  0x91   : > { %p11152_p1 = pnand %p11150_p13, %p11642_p0 }
  0x93   : > { %p11153_p6 = pneg %p11152_p1 }
  0x95   : > { %p11158_p9 = pnand %p11156_p5, %p11153_p6 }
  0x97   : > { %11161 = shalt.err (!%p11158_p9)
}
  0x98   : > { %s11162_s4 = scalar_lea.vmem %s509_s18, 6144  ;;  %p11170_p4 = scmp.lt.s32.totalorder %s509_s18, %s509_s18 }
  0x99   : > { %p11163_p10 = scmp.ne.s32.totalorder %s509_s18, %s11162_s4  ;;  %p11171_p7 = scmp.lt.s32.totalorder %s11162_s4, %s11162_s4 }
  0x9b   : > { %p11165_p2 = pnand %p11163_p10, %p11642_p0  ;;  %p11172_p8 = por %p11171_p7, %p11170_p4 }
  0x9d   : > { %p11166_p3 = pneg %p11165_p2 }
  0x9f   : > { %p11173_p11 = pnand %p11172_p8, %p11166_p3 }
  0xa1   : > { %11176 = shalt.err (!%p11173_p11)
}
  0xa2   : > { %10722 = dma.hbm_to_vmem [thread:$0]  (!%p11626_p12), %s13419_s11, 6144, %s509_s18, [#allocation18], %s11471_s17, %s11471_s17, %s11472_s19  }
  0xa3   : > { %s13458_s1 = sld [smem:[#allocation39_spill]] }
  0xa9   : > { %s11177_s24 = scalar_lea.hbm %s13458_s1, 25600 }
  0xaa   : > { %p11178_p13 = scmp.ne.s32.totalorder %s13458_s1, %s11177_s24  ;;  %p11184_p5 = scmp.lt.u32.totalorder %s11177_s24, %s13458_s1 }
  0xac   : > { %p11180_p1 = pnand %p11178_p13, %p11642_p0 }
  0xae   : > { %p11181_p6 = pneg %p11180_p1 }
  0xb0   : > { %p11186_p9 = pnand %p11184_p5, %p11181_p6 }
  0xb2   : > { %11189 = shalt.err (!%p11186_p9)
}
  0xb3   : > { %s11190_s17 = scalar_lea.vmem %s11722_s29, 25600  ;;  %p11198_p4 = scmp.lt.s32.totalorder %s11722_s29, %s11722_s29 }
  0xb4   : > { %p11191_p10 = scmp.ne.s32.totalorder %s11722_s29, %s11190_s17  ;;  %p11199_p7 = scmp.lt.s32.totalorder %s11190_s17, %s11190_s17 }
  0xb6   : > { %p11193_p2 = pnand %p11191_p10, %p11642_p0  ;;  %p11200_p8 = por %p11199_p7, %p11198_p4 }
  0xb8   : > { %p11194_p3 = pneg %p11193_p2 }
  0xba   : > { %p11201_p11 = pnand %p11200_p8, %p11194_p3 }
  0xbc   : > { %11204 = shalt.err (!%p11201_p11)
}
  0xbd   : > { %s11475_s19 = smov 512   ;;  %s11476_s18 = smov 32  }
  0xbe   : > { %10695 = dma.hbm_to_vmem [thread:$0]  (!%p11626_p12), %s13458_s1, 25600, %s11722_s29, [#allocation3], %s11475_s19, %s11475_s19, %s11476_s18  }
  0xbf   : > { %s11477_s21 = smov [#allocation7]   ;;  %s11205_s25 = scalar_lea.hbm %s13411_s3, 65536 }
  0xc0   : > { %s422_s16 = sshll.u32 %s11477_s21, 4  ;;  %p11206_p13 = scmp.ne.s32.totalorder %s13411_s3, %s11205_s25  ;;  %s423_s16 = int_to_ptr.vmem [resolvable:$true] %s422_s16 }
  0xc1   : > { %p11212_p5 = scmp.lt.u32.totalorder %s11205_s25, %s13411_s3 }
  0xc2   : > { %p11208_p1 = pnand %p11206_p13, %p11642_p0 }
  0xc4   : > { %p11209_p6 = pneg %p11208_p1 }
  0xc6   : > { %p11214_p9 = pnand %p11212_p5, %p11209_p6 }
  0xc8   : > { %11217 = shalt.err (!%p11214_p9)
}
  0xc9   : > { %s11218_s29 = scalar_lea.vmem %s423_s16, 65536  ;;  %p11226_p4 = scmp.lt.s32.totalorder %s423_s16, %s423_s16 }
  0xca   : > { %p11219_p10 = scmp.ne.s32.totalorder %s423_s16, %s11218_s29  ;;  %p11227_p7 = scmp.lt.s32.totalorder %s11218_s29, %s11218_s29 }
  0xcc   : > { %p11221_p2 = pnand %p11219_p10, %p11642_p0  ;;  %p11228_p8 = por %p11227_p7, %p11226_p4 }
  0xce   : > { %p11222_p3 = pneg %p11221_p2 }
  0xd0   : > { %p11229_p11 = pnand %p11228_p8, %p11222_p3 }
  0xd2   : > { %11232 = shalt.err (!%p11229_p11)
}
  0xd3   : > { %s11478_s19 = smov 1024   ;;  %s11479_s18 = smov 64  }
  0xd4   : > { %10701 = dma.hbm_to_vmem [thread:$0]  (!%p11626_p12), %s13411_s3, 65536, %s423_s16, [#allocation6], %s11478_s19, %s11478_s19, %s11479_s18  }
  0xd5   : > { %s11480_s21 = smov [#allocation10]   ;;  %s11481_s24 = smov [#allocation13]  }
  0xd6   : > { %s450_s27 = sshll.u32 %s11480_s21, 4  ;;  %s474_s25 = sshll.u32 %s11481_s24, 4  ;;  %s451_s27 = int_to_ptr.vmem [resolvable:$true] %s450_s27  ;;  %s475_s25 = int_to_ptr.vmem [resolvable:$true] %s474_s25 }
  0xd7   : > { %s11233_s15 = scalar_lea.hbm %s13414_s6, 16 }
  0xd8   : > { %p11234_p13 = scmp.ne.s32.totalorder %s13414_s6, %s11233_s15  ;;  %p11240_p5 = scmp.lt.u32.totalorder %s11233_s15, %s13414_s6 }
  0xda   : > { %p11236_p1 = pnand %p11234_p13, %p11642_p0 }
  0xdc   : > { %p11237_p6 = pneg %p11236_p1 }
  0xde   : > { %p11242_p9 = pnand %p11240_p5, %p11237_p6 }
  0xe0   : > { %11245 = shalt.err (!%p11242_p9)
}
  0xe1   : > { %s11246_s16 = scalar_lea.vmem %s451_s27, 16  ;;  %s11253_s19 = scalar_lea.vmem %s451_s27, 32 }
  0xe2   : > { %p11247_p10 = scmp.ne.s32.totalorder %s451_s27, %s11246_s16  ;;  %p11254_p4 = scmp.lt.s32.totalorder %s451_s27, %s451_s27 }
  0xe3   : > { %p11255_p7 = scmp.lt.s32.totalorder %s11253_s19, %s11246_s16 }
  0xe4   : > { %p11249_p2 = pnand %p11247_p10, %p11642_p0 }
  0xe5   : > { %p11256_p8 = por %p11255_p7, %p11254_p4 }
  0xe6   : > { %p11250_p3 = pneg %p11249_p2 }
  0xe8   : > { %p11257_p11 = pnand %p11256_p8, %p11250_p3 }
  0xea   : > { %11260 = shalt.err (!%p11257_p11)
}
  0xeb   : > { %10707 = dma.hbm_to_vmem [thread:$0]  (!%p11626_p12), %s13414_s6, 16, %s451_s27, [#allocation9]  }
  0xec   : > { %s11261_s28 = scalar_lea.hbm %s13416_s8, 16 }
  0xed   : > { %p11262_p13 = scmp.ne.s32.totalorder %s13416_s8, %s11261_s28  ;;  %p11268_p5 = scmp.lt.u32.totalorder %s11261_s28, %s13416_s8 }
  0xef   : > { %p11264_p1 = pnand %p11262_p13, %p11642_p0 }
  0xf1   : > { %p11265_p6 = pneg %p11264_p1 }
  0xf3   : > { %p11270_p9 = pnand %p11268_p5, %p11265_p6 }
  0xf5   : > { %11273 = shalt.err (!%p11270_p9)
}
  0xf6   : > { %s11274_s15 = scalar_lea.vmem %s475_s25, 16  ;;  %s11281_s27 = scalar_lea.vmem %s475_s25, 32 }
  0xf7   : > { %p11275_p10 = scmp.ne.s32.totalorder %s475_s25, %s11274_s15  ;;  %p11282_p4 = scmp.lt.s32.totalorder %s475_s25, %s475_s25 }
  0xf8   : > { %p11283_p7 = scmp.lt.s32.totalorder %s11281_s27, %s11274_s15 }
  0xf9   : > { %p11277_p2 = pnand %p11275_p10, %p11642_p0 }
  0xfa   : > { %p11284_p8 = por %p11283_p7, %p11282_p4 }
  0xfb   : > { %p11278_p3 = pneg %p11277_p2 }
  0xfd   : > { %p11285_p11 = pnand %p11284_p8, %p11278_p3 }
  0xff   : > { %11288 = shalt.err (!%p11285_p11)
}
 0x100   : > { %10713 = dma.hbm_to_vmem [thread:$0]  (!%p11626_p12), %s13416_s8, 16, %s475_s25, [#allocation12]  }
 0x101   : > { %s11482_s16 = smov [#allocation16]   ;;  %s11483_s18 = smov [#allocation19]  }
 0x102   : > { %s498_s19 = sshll.u32 %s11482_s16, 4  ;;  %s522_s4 = sshll.u32 %s11483_s18, 4  ;;  %s499_s19 = int_to_ptr.vmem [resolvable:$true] %s498_s19  ;;  %s523_s4 = int_to_ptr.vmem [resolvable:$true] %s522_s4 }
 0x103   : > { %s11289_s28 = scalar_lea.hbm %s13418_s10, 48 }
 0x104   : > { %p11290_p13 = scmp.ne.s32.totalorder %s13418_s10, %s11289_s28  ;;  %p11296_p5 = scmp.lt.u32.totalorder %s11289_s28, %s13418_s10 }
 0x106   : > { %p11292_p1 = pnand %p11290_p13, %p11642_p0 }
 0x108   : > { %p11293_p6 = pneg %p11292_p1 }
 0x10a   : > { %p11298_p9 = pnand %p11296_p5, %p11293_p6 }
 0x10c   : > { %11301 = shalt.err (!%p11298_p9)
}
 0x10d   : > { %s11302_s25 = scalar_lea.vmem %s499_s19, 48  ;;  %s11309_s15 = scalar_lea.vmem %s499_s19, 64 }
 0x10e   : > { %p11303_p10 = scmp.ne.s32.totalorder %s499_s19, %s11302_s25  ;;  %p11310_p4 = scmp.lt.s32.totalorder %s499_s19, %s499_s19 }
 0x10f   : > { %p11311_p7 = scmp.lt.s32.totalorder %s11309_s15, %s11302_s25 }
 0x110   : > { %p11305_p2 = pnand %p11303_p10, %p11642_p0 }
 0x111   : > { %p11312_p8 = por %p11311_p7, %p11310_p4 }
 0x112   : > { %p11306_p3 = pneg %p11305_p2 }
 0x114   : > { %p11313_p11 = pnand %p11312_p8, %p11306_p3 }
 0x116   : > { %11316 = shalt.err (!%p11313_p11)
}
 0x117   : > { %10719 = dma.hbm_to_vmem [thread:$0]  (!%p11626_p12), %s13418_s10, 48, %s499_s19, [#allocation15]  }
 0x118   : > { %s11317_s18 = scalar_lea.hbm %s13420_s12, 48 }
 0x119   : > { %p11318_p13 = scmp.ne.s32.totalorder %s13420_s12, %s11317_s18  ;;  %p11324_p5 = scmp.lt.u32.totalorder %s11317_s18, %s13420_s12 }
 0x11b   : > { %p11320_p1 = pnand %p11318_p13, %p11642_p0 }
 0x11d   : > { %p11321_p6 = pneg %p11320_p1 }
 0x11f   : > { %p11326_p9 = pnand %p11324_p5, %p11321_p6 }
 0x121   : > { %11329 = shalt.err (!%p11326_p9)
}
 0x122   : > { %s11330_s24 = scalar_lea.vmem %s523_s4, 48  ;;  %s11337_s19 = scalar_lea.vmem %s523_s4, 64 }
 0x123   : > { %p11331_p10 = scmp.ne.s32.totalorder %s523_s4, %s11330_s24  ;;  %p11338_p4 = scmp.lt.s32.totalorder %s523_s4, %s523_s4 }
 0x124   : > { %p11339_p7 = scmp.lt.s32.totalorder %s11337_s19, %s11330_s24 }
 0x125   : > { %p11333_p2 = pnand %p11331_p10, %p11642_p0 }
 0x126   : > { %p11340_p8 = por %p11339_p7, %p11338_p4 }
 0x127   : > { %p11334_p3 = pneg %p11333_p2 }
 0x129   : > { %p11341_p11 = pnand %p11340_p8, %p11334_p3 }
 0x12b   : > { %11344 = shalt.err (!%p11341_p11)
}
 0x12c   : > { %10725 = dma.hbm_to_vmem [thread:$0]  (!%p11626_p12), %s13420_s12, 48, %s523_s4, [#allocation18]  }
 0x12d   : > { %s11484_s25 = smov [#allocation20]   ;;  %s11345_s29 = scalar_lea.hbm %s13422_s14, 16 }
 0x12e   : > { %s536_s15 = sshll.u32 %s11484_s25, 4  ;;  %p11346_p13 = scmp.ne.s32.totalorder %s13422_s14, %s11345_s29  ;;  %s537_s15 = int_to_ptr.vmem [resolvable:$true] %s536_s15 }
 0x12f   : > { %p11352_p5 = scmp.lt.u32.totalorder %s11345_s29, %s13422_s14 }
 0x130   : > { %p11348_p1 = pnand %p11346_p13, %p11642_p0 }
 0x132   : > { %p11349_p6 = pneg %p11348_p1 }
 0x134   : > { %p11354_p9 = pnand %p11352_p5, %p11349_p6 }
 0x136   : > { %11357 = shalt.err (!%p11354_p9)
}
 0x137   : > { %s11358_s4 = scalar_lea.vmem %s537_s15, 16  ;;  %s11365_s28 = scalar_lea.vmem %s537_s15, 32 }
 0x138   : > { %p11359_p10 = scmp.ne.s32.totalorder %s537_s15, %s11358_s4  ;;  %p11366_p4 = scmp.lt.s32.totalorder %s537_s15, %s537_s15 }
 0x139   : > { %p11367_p7 = scmp.lt.s32.totalorder %s11365_s28, %s11358_s4 }
 0x13a   : > { %p11361_p2 = pnand %p11359_p10, %p11642_p0 }
 0x13b   : > { %p11368_p8 = por %p11367_p7, %p11366_p4 }
 0x13c   : > { %p11362_p3 = pneg %p11361_p2 }
 0x13e   : > { %p11369_p11 = pnand %p11368_p8, %p11362_p3 }
 0x140   : > { %11372 = shalt.err (!%p11369_p11)
}
 0x141   : > { %10728 = dma.hbm_to_vmem [thread:$0]  (!%p11626_p12), %s13422_s14, 16, %s537_s15, [#allocation21]  }
 0x142   : > { %p13459_p13 = scmp.ne.s32.totalorder %s13452_s30, 0 }
 0x143   : > { %p13460_p1 = scmp.eq.s32.totalorder (!%p13459_p13), %s11590_s22, 0 }
 0x144   : > { %557 = sbr.rel (%p13459_p13) target bundleno = 7916 (0x1eec), region = 80 }
 0x14b   : > { %11418 = dma.done.wait (%p13460_p1), [#allocation3], 25600   ;;  %p13461_p0 = pmov %p13460_p1 }
 0x14d   : > { %11420 = vsyncadd (%p13461_p0), [#allocation3], 4294941696  ;;  %p13462_p6 = pmov %p13461_p0 }
 0x14e   : > { %p13463_p5 = pmov %p13461_p0 }
 0x14f   : > { %11422 = dma.done.wait (%p13462_p6), [#allocation6], 65600  }
 0x150   : > { %11424 = vsyncadd (%p13463_p5), [#allocation6], 4294901696  ;;  %p13464_p9 = pmov %p13461_p0 }
 0x151   : > { %p13465_p12 = pmov %p13461_p0 }
 0x152   : > { %11426 = dma.done.wait (%p13464_p9), [#allocation9], 144  }
 0x153   : > { %11428 = vsyncadd (%p13465_p12), [#allocation9], 4294967152  ;;  %p13466_p10 = pmov %p13461_p0 }
 0x154   : > { %p13467_p2 = pmov %p13461_p0 }
 0x155   : > { %11430 = dma.done.wait (%p13466_p10), [#allocation12], 1040  }
 0x156   : > { %11432 = vsyncadd (%p13467_p2), [#allocation12], 4294966256  ;;  %p13468_p3 = pmov %p13461_p0 }
 0x157   : > { %p13469_p4 = pmov %p13461_p0 }
 0x158   : > { %11434 = dma.done.wait (%p13468_p3), [#allocation15], 3120  }
 0x159   : > { %11436 = vsyncadd (%p13469_p4), [#allocation15], 4294964176  ;;  %p13470_p7 = pmov %p13461_p0 }
 0x15a   : > { %p13471_p8 = pmov %p13461_p0 }
 0x15b   : > { %11438 = dma.done.wait (%p13470_p7), [#allocation18], 6192  }
 0x15c   : > { %11440 = vsyncadd (%p13471_p8), [#allocation18], 4294961104  ;;  %p13472_p11 = pmov %p13461_p0 }
 0x15d   : > { %p13473_p13 = pmov %p13461_p0 }
 0x15e   : > { %11442 = dma.done.wait (%p13472_p11), [#allocation21], 16  }
 0x15f   : > { %11444 = vsyncadd (%p13473_p13), [#allocation21], 4294967280  ;;  %v666_v0 = vld [vmem:[#allocation2 + $0x8] sm:$0xff]  ;;  %v665_v2 = vld [vmem:[#allocation2] sm:$0xff]  ;;  %p648_p1 = scmp.lt.s32.totalorder %s11590_s22, 1  ;;  %vm887_vm0 = vcmask 130048  }
 0x160   : > { %v670_v1 = vld [vmem:[#allocation2 + $0x28] sm:$0xff]  ;;  %v669_v4 = vld [vmem:[#allocation2 + $0x20] sm:$0xff]  ;;  %v668_v25 = vld [vmem:[#allocation2 + $0x18] sm:$0xff]  ;;  %vm11486_vm1 = vmmov 0   ;;  %vm2638_vm2 = vcmask 523264   ;;  %s13474_s25 = sld [smem:[#allocation32_spill]] }
 0x161   : > { %v8529_v3 = vpack.c.bf16 %v670_v1, %v666_v0  ;;  %v674_v5 = vld [vmem:[#allocation2 + $0x48] sm:$0xff]  ;;  %v8531_v7 = vpack.c.bf16 %v669_v4, %v665_v2  ;;  %v673_v9 = vld [vmem:[#allocation2 + $0x40] sm:$0xff]  ;;  %v672_v26 = vld [vmem:[#allocation2 + $0x38] sm:$0xff]  ;;  %s11907_s30 = scalar_select %p648_p1, %s11590_s22, 1  ;;  %vm6929_vm3 = vcmask 40960  }
 0x162   : > { %v678_v6 = vld [vmem:[#allocation2 + $0x68] sm:$0xff]  ;;  %v677_v10 = vld [vmem:[#allocation2 + $0x60] sm:$0xff]  ;;  %v8629_v27 = vpack.c.bf16 %v672_v26, %v668_v25  ;;  %v667_v28 = vld [vmem:[#allocation2 + $0x10] sm:$0xff]  ;;  %s13475_s15 = sld [smem:[#allocation37_spill]]  ;;  %s7217_s17 = sshll.u32 %s11590_s22, 4 }
 0x163   : > { %v8533_v8 = vpack.c.bf16 %v678_v6, %v674_v5  ;;  %v682_v11 = vld [vmem:[#allocation2 + $0x88] sm:$0xff]  ;;  %8530 = vmatprep.subr.bf16.mxu0 %v8529_v3  ;;  %v8535_v13 = vpack.c.bf16 %v677_v10, %v673_v9  ;;  %v681_v15 = vld [vmem:[#allocation2 + $0x80] sm:$0xff]  ;;  %v671_v29 = vld [vmem:[#allocation2 + $0x30] sm:$0xff]  ;;  %s10641_s26 = smul.u32 96, %s11907_s30  ;;  %s13476_s7 = sld [smem:[#allocation43_spill]] }
 0x164   : > { %v686_v12 = vld [vmem:[#allocation2 + $0xa8] sm:$0xff]  ;;  %8532 = vmatpush1.bf16.msra.mxu0 %v8531_v7  ;;  %v685_v16 = vld [vmem:[#allocation2 + $0xa0] sm:$0xff]  ;;  %v8631_v32 = vpack.c.bf16 %v671_v29, %v667_v28  ;;  %v676_v33 = vld [vmem:[#allocation2 + $0x58] sm:$0xff]  ;;  %8630 = vmatprep.subr.bf16.mxu1 %v8629_v27  ;;  %s11488_s22 = smov [#allocation22]  }
 0x165   : > { %8534 = vmatprep.subr.bf16.mxu0 %v8533_v8  ;;  %v8537_v14 = vpack.c.bf16 %v686_v12, %v682_v11  ;;  %v690_v17 = vld [vmem:[#allocation2 + $0xc8] sm:$0xff]  ;;  %v8539_v19 = vpack.c.bf16 %v685_v16, %v681_v15  ;;  %v689_v21 = vld [vmem:[#allocation2 + $0xc0] sm:$0xff]  ;;  %v680_v37 = vld [vmem:[#allocation2 + $0x78] sm:$0xff]  ;;  %s11913_s20 = scalar_lea.vmem %s13408_s0, %s10641_s26  ;;  %s11377_s24 = sshll.u32 %s11488_s22, 4  ;;  %s11378_s24 = int_to_ptr.vmem [resolvable:$false] %s11377_s24 }
 0x166   : > { %v694_v18 = vld [vmem:[#allocation2 + $0xe8] sm:$0xff]  ;;  %v693_v22 = vld [vmem:[#allocation2 + $0xe0] sm:$0xff]  ;;  %8632 = vmatpush1.bf16.msra.mxu1 %v8631_v32  ;;  %v8633_v39 = vpack.c.bf16 %v680_v37, %v676_v33  ;;  %v675_v40 = vld [vmem:[#allocation2 + $0x50] sm:$0xff]  ;;  %s646_s27 = sand.u32 1, %s13474_s25   ;;  %s11379_s30 = scalar_lea.vmem %s11378_s24, 32 }
 0x167   : > { %v8541_v20 = vpack.c.bf16 %v694_v18, %v690_v17  ;;  %v698_v23 = vld [vmem:[#allocation2 + $0x108] sm:$0xff]  ;;  %v8543_v30 = vpack.c.bf16 %v693_v22, %v689_v21  ;;  %v697_v31 = vld [vmem:[#allocation2 + $0x100] sm:$0xff]  ;;  %v679_v41 = vld [vmem:[#allocation2 + $0x70] sm:$0xff]  ;;  %s647_s29 = scalar_lea.vmem [#allocation22], %s646_s27  ;;  %s6943_s28 = scalar_lea.sflag [#allocation4], %s646_s27 }
 0x168   : > { %8536 = vmatpush1.bf16.msra.mxu0 %v8535_v13  ;;  %v702_v24 = vld [vmem:[#allocation2 + $0x128] sm:$0xff]  ;;  %v701_v35 = vld [vmem:[#allocation2 + $0x120] sm:$0xff]  ;;  %v8635_v42 = vpack.c.bf16 %v679_v41, %v675_v40  ;;  %v684_v43 = vld [vmem:[#allocation2 + $0x98] sm:$0xff]  ;;  %8634 = vmatprep.subr.bf16.mxu1 %v8633_v39  ;;  %s6955_s16 = sshll.u32 %s647_s29, 4  ;;  %p13477_p6 = scmp.ne.s32.totalorder %s13475_s15, 0  ;;  %s13367_s16 = int_to_ptr.vmem [resolvable:$true] %s6955_s16 }
 0x169   : > { %8538 = vmatprep.subr.bf16.mxu0 %v8537_v14  ;;  %v8545_v34 = vpack.c.bf16 %v702_v24, %v698_v23  ;;  %v706_v36 = vld [vmem:[#allocation2 + $0x148] sm:$0xff]  ;;  %v688_v44 = vld [vmem:[#allocation2 + $0xb8] sm:$0xff]  ;;  %v8547_v45 = vpack.c.bf16 %v701_v35, %v697_v31  ;;  %v705_v46 = vld [vmem:[#allocation2 + $0x140] sm:$0xff]  ;;  %s13365_s4 = scalar_lea.hbm %s13476_s7, %s7217_s17  ;;  %s11373_s21 = scalar_lea.vmem %s13367_s16, 16 }
 0x16a   : > { %v710_v38 = vld [vmem:[#allocation2 + $0x168] sm:$0xff]  ;;  %v8637_v47 = vpack.c.bf16 %v688_v44, %v684_v43  ;;  %v683_v48 = vld [vmem:[#allocation2 + $0x90] sm:$0xff]  ;;  %v709_v50 = vld [vmem:[#allocation2 + $0x160] sm:$0xff]  ;;  %8636 = vmatpush1.bf16.msra.mxu1 %v8635_v42  ;;  %p11374_p0 = scmp.ne.s32.totalorder %s13367_s16, %s11373_s21  ;;  %p11380_p12 = scmp.lt.s32.totalorder %s13367_s16, %s11378_s24 }
 0x16b   : > { %v8549_v49 = vpack.c.bf16 %v710_v38, %v706_v36  ;;  %v714_v51 = vld [vmem:[#allocation2 + $0x188] sm:$0xff]  ;;  %v687_v52 = vld [vmem:[#allocation2 + $0xb0] sm:$0xff]  ;;  %v692_v55 = vld [vmem:[#allocation2 + $0xd8] sm:$0xff]  ;;  %v8551_v60 = vpack.c.bf16 %v709_v50, %v705_v46  ;;  %p11381_p10 = scmp.lt.s32.totalorder %s11379_s30, %s11373_s21 }
 0x16c   : > { %8540 = vmatpush1.bf16.msra.mxu0 %v8539_v19  ;;  %v718_v53 = vld [vmem:[#allocation2 + $0x1a8] sm:$0xff]  ;;  %v8639_v54 = vpack.c.bf16 %v687_v52, %v683_v48  ;;  %v696_v56 = vld [vmem:[#allocation2 + $0xf8] sm:$0xff]  ;;  %8638 = vmatprep.subr.bf16.mxu1 %v8637_v47  ;;  %v691_v58 = vld [vmem:[#allocation2 + $0xd0] sm:$0xff]  ;;  %p11375_p5 = pnand %p11374_p0, %p13477_p6 }
 0x16d   : > { %8542 = vmatprep.subr.bf16.mxu0 %v8541_v20  ;;  %v8641_v57 = vpack.c.bf16 %v696_v56, %v692_v55  ;;  %v695_v59 = vld [vmem:[#allocation2 + $0xf0] sm:$0xff]  ;;  %v700_v61 = vld [vmem:[#allocation2 + $0x118] sm:$0xff]  ;;  %v8553_v62 = vpack.c.bf16 %v718_v53, %v714_v51  ;;  %v713_v63 = vld [vmem:[#allocation2 + $0x180] sm:$0xff]  ;;  %p11382_p2 = por %p11381_p10, %p11380_p12 }
 0x16e   : > { %v717_v0 = vld [vmem:[#allocation2 + $0x1a0] sm:$0xff]  ;;  %v704_v1 = vld [vmem:[#allocation2 + $0x138] sm:$0xff]  ;;  %v722_v2 = vld [vmem:[#allocation2 + $0x1c8] sm:$0xff]  ;;  %8640 = vmatpush1.bf16.msra.mxu1 %v8639_v54  ;;  %v8643_v4 = vpack.c.bf16 %v695_v59, %v691_v58  ;;  %p11376_p9 = pneg %p11375_p5 }
 0x16f   : > { %v726_v3 = vld [vmem:[#allocation2 + $0x1e8] sm:$0xff]  ;;  %8642 = vmatprep.subr.bf16.mxu1 %v8641_v57  ;;  %v8645_v5 = vpack.c.bf16 %v704_v1, %v700_v61  ;;  %v699_v6 = vld [vmem:[#allocation2 + $0x110] sm:$0xff]  ;;  %v8555_v8 = vpack.c.bf16 %v717_v0, %v713_v63  ;;  %v708_v9 = vld [vmem:[#allocation2 + $0x158] sm:$0xff] }
 0x170   : > { %8544 = vmatpush1.bf16.msra.mxu0 %v8543_v30  ;;  %v703_v7 = vld [vmem:[#allocation2 + $0x130] sm:$0xff]  ;;  %v712_v10 = vld [vmem:[#allocation2 + $0x178] sm:$0xff]  ;;  %v8557_v11 = vpack.c.bf16 %v726_v3, %v722_v2  ;;  %v721_v12 = vld [vmem:[#allocation2 + $0x1c0] sm:$0xff]  ;;  %p11383_p3 = pnand %p11382_p2, %p11376_p9 }
 0x171   : > { %8546 = vmatprep.subr.bf16.mxu0 %v8545_v34  ;;  %v725_v13 = vld [vmem:[#allocation2 + $0x1e0] sm:$0xff]  ;;  %v730_v14 = vld [vmem:[#allocation2 + $0x208] sm:$0xff]  ;;  %v8647_v16 = vpack.c.bf16 %v703_v7, %v699_v6  ;;  %v8649_v17 = vpack.c.bf16 %v712_v10, %v708_v9  ;;  %v707_v18 = vld [vmem:[#allocation2 + $0x150] sm:$0xff] }
 0x172   : > { %v734_v15 = vld [vmem:[#allocation2 + $0x228] sm:$0xff]  ;;  %8644 = vmatpush1.bf16.msra.mxu1 %v8643_v4  ;;  %v711_v19 = vld [vmem:[#allocation2 + $0x170] sm:$0xff]  ;;  %v8559_v20 = vpack.c.bf16 %v725_v13, %v721_v12  ;;  %v716_v21 = vld [vmem:[#allocation2 + $0x198] sm:$0xff] }
 0x173   : > { %8646 = vmatprep.subr.bf16.mxu1 %v8645_v5  ;;  %v720_v22 = vld [vmem:[#allocation2 + $0x1b8] sm:$0xff]  ;;  %v8561_v23 = vpack.c.bf16 %v734_v15, %v730_v14  ;;  %v729_v24 = vld [vmem:[#allocation2 + $0x200] sm:$0xff]  ;;  %v738_v26 = vld [vmem:[#allocation2 + $0x248] sm:$0xff]  ;;  %v8651_v28 = vpack.c.bf16 %v711_v19, %v707_v18 }
 0x174   : > { %8548 = vmatpush1.bf16.msra.mxu0 %v8547_v45  ;;  %v733_v25 = vld [vmem:[#allocation2 + $0x220] sm:$0xff]  ;;  %v742_v27 = vld [vmem:[#allocation2 + $0x268] sm:$0xff]  ;;  %v8653_v29 = vpack.c.bf16 %v720_v22, %v716_v21  ;;  %v715_v30 = vld [vmem:[#allocation2 + $0x190] sm:$0xff] }
 0x175   : > { %8550 = vmatprep.subr.bf16.mxu0 %v8549_v49  ;;  %v719_v31 = vld [vmem:[#allocation2 + $0x1b0] sm:$0xff]  ;;  %v8563_v32 = vpack.c.bf16 %v733_v25, %v729_v24  ;;  %v724_v33 = vld [vmem:[#allocation2 + $0x1d8] sm:$0xff]  ;;  %v8565_v35 = vpack.c.bf16 %v742_v27, %v738_v26  ;;  %v737_v36 = vld [vmem:[#allocation2 + $0x240] sm:$0xff] }
 0x176   : > { %8648 = vmatpush1.bf16.msra.mxu1 %v8647_v16  ;;  %v728_v34 = vld [vmem:[#allocation2 + $0x1f8] sm:$0xff]  ;;  %v741_v37 = vld [vmem:[#allocation2 + $0x260] sm:$0xff]  ;;  %v654_v38 = vld [vmem:[%s11913_s20 + $0x8] sm:$0xff]  ;;  %v8655_v41 = vpack.c.bf16 %v719_v31, %v715_v30 }
 0x177   : > { %8650 = vmatprep.subr.bf16.mxu1 %v8649_v17  ;;  %v746_v39 = vld [vmem:[#allocation2 + $0x288] sm:$0xff]  ;;  %961 = vmatprep.mubr.f32.mxu0 %v654_v38  ;;  %v8657_v42 = vpack.c.bf16 %v728_v34, %v724_v33  ;;  %v723_v43 = vld [vmem:[#allocation2 + $0x1d0] sm:$0xff]  ;;  %v8567_v45 = vpack.c.bf16 %v741_v37, %v737_v36  ;;  %v732_v46 = vld [vmem:[#allocation2 + $0x218] sm:$0xff] }
 0x178   : > { %8552 = vmatpush1.bf16.msra.mxu0 %v8551_v60  ;;  %v750_v40 = vld [vmem:[#allocation2 + $0x2a8] sm:$0xff]  ;;  %v727_v44 = vld [vmem:[#allocation2 + $0x1f0] sm:$0xff]  ;;  %1127 = vmatprep.mubr.f32.mxu1 %v654_v38  ;;  %v736_v47 = vld [vmem:[#allocation2 + $0x238] sm:$0xff] }
 0x179   : > { %8554 = vmatprep.subr.bf16.mxu0 %v8553_v62  ;;  %v8569_v48 = vpack.c.bf16 %v750_v40, %v746_v39  ;;  %v745_v49 = vld [vmem:[#allocation2 + $0x280] sm:$0xff]  ;;  %v754_v51 = vld [vmem:[#allocation2 + $0x2c8] sm:$0xff]  ;;  %v8659_v53 = vpack.c.bf16 %v727_v44, %v723_v43  ;;  %v8661_v54 = vpack.c.bf16 %v736_v47, %v732_v46  ;;  %v731_v55 = vld [vmem:[#allocation2 + $0x210] sm:$0xff] }
 0x17a   : > { %8652 = vmatpush1.bf16.msra.mxu1 %v8651_v28  ;;  %v749_v50 = vld [vmem:[#allocation2 + $0x2a0] sm:$0xff]  ;;  %v758_v52 = vld [vmem:[#allocation2 + $0x2e8] sm:$0xff]  ;;  %v735_v56 = vld [vmem:[#allocation2 + $0x230] sm:$0xff] }
 0x17b   : > { %8654 = vmatprep.subr.bf16.mxu1 %v8653_v29  ;;  %v8571_v57 = vpack.c.bf16 %v749_v50, %v745_v49  ;;  %v740_v58 = vld [vmem:[#allocation2 + $0x258] sm:$0xff]  ;;  %v8573_v60 = vpack.c.bf16 %v758_v52, %v754_v51  ;;  %v753_v61 = vld [vmem:[#allocation2 + $0x2c0] sm:$0xff]  ;;  %v762_v63 = vld [vmem:[#allocation2 + $0x308] sm:$0xff]  ;;  %v8663_v1 = vpack.c.bf16 %v735_v56, %v731_v55 }
 0x17c   : > { %8556 = vmatpush1.bf16.msra.mxu0 %v8555_v8  ;;  %v744_v59 = vld [vmem:[#allocation2 + $0x278] sm:$0xff]  ;;  %v757_v62 = vld [vmem:[#allocation2 + $0x2e0] sm:$0xff]  ;;  %v766_v0 = vld [vmem:[#allocation2 + $0x328] sm:$0xff] }
 0x17d   : > { %8558 = vmatprep.subr.bf16.mxu0 %v8557_v11  ;;  %v8665_v2 = vpack.c.bf16 %v744_v59, %v740_v58  ;;  %v739_v3 = vld [vmem:[#allocation2 + $0x250] sm:$0xff]  ;;  %v8575_v5 = vpack.c.bf16 %v757_v62, %v753_v61  ;;  %v748_v6 = vld [vmem:[#allocation2 + $0x298] sm:$0xff]  ;;  %v8577_v8 = vpack.c.bf16 %v766_v0, %v762_v63  ;;  %v761_v9 = vld [vmem:[#allocation2 + $0x300] sm:$0xff] }
 0x17e   : > { %8656 = vmatpush1.bf16.msra.mxu1 %v8655_v41  ;;  %v743_v4 = vld [vmem:[#allocation2 + $0x270] sm:$0xff]  ;;  %v752_v7 = vld [vmem:[#allocation2 + $0x2b8] sm:$0xff]  ;;  %v765_v10 = vld [vmem:[#allocation2 + $0x320] sm:$0xff] }
 0x17f   : > { %8658 = vmatprep.subr.bf16.mxu1 %v8657_v42  ;;  %v770_v11 = vld [vmem:[#allocation2 + $0x348] sm:$0xff]  ;;  %v8667_v13 = vpack.c.bf16 %v743_v4, %v739_v3  ;;  %v8669_v14 = vpack.c.bf16 %v752_v7, %v748_v6  ;;  %v747_v15 = vld [vmem:[#allocation2 + $0x290] sm:$0xff]  ;;  %v8579_v17 = vpack.c.bf16 %v765_v10, %v761_v9  ;;  %v756_v18 = vld [vmem:[#allocation2 + $0x2d8] sm:$0xff] }
 0x180   : > { %8560 = vmatpush1.bf16.msra.mxu0 %v8559_v20  ;;  %v774_v12 = vld [vmem:[#allocation2 + $0x368] sm:$0xff]  ;;  %v751_v16 = vld [vmem:[#allocation2 + $0x2b0] sm:$0xff]  ;;  %v760_v19 = vld [vmem:[#allocation2 + $0x2f8] sm:$0xff] }
 0x181   : > { %8562 = vmatprep.subr.bf16.mxu0 %v8561_v23  ;;  %v8581_v20 = vpack.c.bf16 %v774_v12, %v770_v11  ;;  %v769_v21 = vld [vmem:[#allocation2 + $0x340] sm:$0xff]  ;;  %v778_v23 = vld [vmem:[#allocation2 + $0x388] sm:$0xff]  ;;  %v8671_v25 = vpack.c.bf16 %v751_v16, %v747_v15  ;;  %v8673_v26 = vpack.c.bf16 %v760_v19, %v756_v18  ;;  %v755_v27 = vld [vmem:[#allocation2 + $0x2d0] sm:$0xff] }
 0x182   : > { %8660 = vmatpush1.bf16.msra.mxu1 %v8659_v53  ;;  %v773_v22 = vld [vmem:[#allocation2 + $0x360] sm:$0xff]  ;;  %v782_v24 = vld [vmem:[#allocation2 + $0x3a8] sm:$0xff]  ;;  %v759_v28 = vld [vmem:[#allocation2 + $0x2f0] sm:$0xff] }
 0x183   : > { %8662 = vmatprep.subr.bf16.mxu1 %v8661_v54  ;;  %v8583_v29 = vpack.c.bf16 %v773_v22, %v769_v21  ;;  %v764_v30 = vld [vmem:[#allocation2 + $0x318] sm:$0xff]  ;;  %v777_v33 = vld [vmem:[#allocation2 + $0x380] sm:$0xff]  ;;  %v790_v36 = vld [vmem:[#allocation2 + $0x3e8] sm:$0xff]  ;;  %v8675_v37 = vpack.c.bf16 %v759_v28, %v755_v27 }
 0x184   : > { %8564 = vmatpush1.bf16.msra.mxu0 %v8563_v32  ;;  %v768_v31 = vld [vmem:[#allocation2 + $0x338] sm:$0xff]  ;;  %v8585_v32 = vpack.c.bf16 %v782_v24, %v778_v23  ;;  %v781_v34 = vld [vmem:[#allocation2 + $0x3a0] sm:$0xff]  ;;  %v763_v39 = vld [vmem:[#allocation2 + $0x310] sm:$0xff] }
 0x185   : > { %8566 = vmatprep.subr.bf16.mxu0 %v8565_v35  ;;  %v786_v35 = vld [vmem:[#allocation2 + $0x3c8] sm:$0xff]  ;;  %v8677_v38 = vpack.c.bf16 %v768_v31, %v764_v30  ;;  %v767_v40 = vld [vmem:[#allocation2 + $0x330] sm:$0xff]  ;;  %v8587_v41 = vpack.c.bf16 %v781_v34, %v777_v33  ;;  %v772_v42 = vld [vmem:[#allocation2 + $0x358] sm:$0xff] }
 0x186   : > { %8664 = vmatpush1.bf16.msra.mxu1 %v8663_v1  ;;  %v776_v43 = vld [vmem:[#allocation2 + $0x378] sm:$0xff]  ;;  %v8589_v44 = vpack.c.bf16 %v790_v36, %v786_v35  ;;  %v789_v46 = vld [vmem:[#allocation2 + $0x3e0] sm:$0xff]  ;;  %v794_v47 = vld [vmem:[#allocation2 + $0x408] sm:$0xff]  ;;  %v8679_v49 = vpack.c.bf16 %v767_v40, %v763_v39 }
 0x187   : > { %8666 = vmatprep.subr.bf16.mxu1 %v8665_v2  ;;  %v8681_v50 = vpack.c.bf16 %v776_v43, %v772_v42  ;;  %v771_v51 = vld [vmem:[#allocation2 + $0x350] sm:$0xff]  ;;  %v780_v54 = vld [vmem:[#allocation2 + $0x398] sm:$0xff]  ;;  %v797_v58 = vld [vmem:[#allocation2 + $0x420] sm:$0xff] }
 0x188   : > { %8568 = vmatpush1.bf16.msra.mxu0 %v8567_v45  ;;  %v785_v45 = vld [vmem:[#allocation2 + $0x3c0] sm:$0xff]  ;;  %v775_v52 = vld [vmem:[#allocation2 + $0x370] sm:$0xff]  ;;  %v784_v55 = vld [vmem:[#allocation2 + $0x3b8] sm:$0xff] }
 0x189   : > { %8570 = vmatprep.subr.bf16.mxu0 %v8569_v48  ;;  %v798_v48 = vld [vmem:[#allocation2 + $0x428] sm:$0xff]  ;;  %v8591_v53 = vpack.c.bf16 %v789_v46, %v785_v45  ;;  %v8683_v61 = vpack.c.bf16 %v775_v52, %v771_v51  ;;  %v8685_v62 = vpack.c.bf16 %v784_v55, %v780_v54  ;;  %v779_v63 = vld [vmem:[#allocation2 + $0x390] sm:$0xff]  ;;  %v11917_v1 = vld [vmem:[%s11913_s20] sm:$0xff] }
 0x18a   : > { %8668 = vmatpush1.bf16.msra.mxu1 %v8667_v13  ;;  %v8593_v56 = vpack.c.bf16 %v798_v48, %v794_v47  ;;  %v802_v59 = vld [vmem:[#allocation2 + $0x448] sm:$0xff]  ;;  %v783_v0 = vld [vmem:[#allocation2 + $0x3b0] sm:$0xff]  ;;  %v788_v3 = vld [vmem:[#allocation2 + $0x3d8] sm:$0xff] }
 0x18b   : > { %8670 = vmatprep.subr.bf16.mxu1 %v8669_v14  ;;  %v792_v4 = vld [vmem:[#allocation2 + $0x3f8] sm:$0xff]  ;;  %v801_v6 = vld [vmem:[#allocation2 + $0x440] sm:$0xff]  ;;  %v810_v9 = vld [vmem:[#allocation2 + $0x488] sm:$0xff]  ;;  %v8687_v11 = vpack.c.bf16 %v783_v0, %v779_v63 }
 0x18c   : > { %8572 = vmatpush1.bf16.msra.mxu0 %v8571_v57  ;;  %v793_v57 = vld [vmem:[#allocation2 + $0x400] sm:$0xff]  ;;  %v814_v10 = vld [vmem:[#allocation2 + $0x4a8] sm:$0xff]  ;;  %v8689_v12 = vpack.c.bf16 %v792_v4, %v788_v3  ;;  %v787_v13 = vld [vmem:[#allocation2 + $0x3d0] sm:$0xff] }
 0x18d   : > { %8574 = vmatprep.subr.bf16.mxu0 %v8573_v60  ;;  %v806_v60 = vld [vmem:[#allocation2 + $0x468] sm:$0xff]  ;;  %v8595_v2 = vpack.c.bf16 %v797_v58, %v793_v57  ;;  %v805_v7 = vld [vmem:[#allocation2 + $0x460] sm:$0xff]  ;;  %v791_v14 = vld [vmem:[#allocation2 + $0x3f0] sm:$0xff]  ;;  %v8601_v19 = vpack.c.bf16 %v814_v10, %v810_v9 }
 0x18e   : > { %8672 = vmatpush1.bf16.msra.mxu1 %v8671_v25  ;;  %v8599_v15 = vpack.c.bf16 %v805_v7, %v801_v6  ;;  %v11925_v16 = vld [vmem:[%s11913_s20 + $0x20] sm:$0xff]  ;;  %v800_v18 = vld [vmem:[#allocation2 + $0x438] sm:$0xff]  ;;  %v11928_v22 = vld [vmem:[%s11913_s20 + $0x48] sm:$0x3f]  ;;  %v8691_v25 = vpack.c.bf16 %v791_v14, %v787_v13 }
 0x18f   : > { %8674 = vmatprep.subr.bf16.mxu1 %v8673_v26  ;;  %v813_v21 = vld [vmem:[#allocation2 + $0x4a0] sm:$0xff]  ;;  %v818_v23 = vld [vmem:[#allocation2 + $0x4c8] sm:$0xff]  ;;  %v795_v27 = vld [vmem:[#allocation2 + $0x410] sm:$0xff] }
 0x190   : > { %8576 = vmatpush1.bf16.msra.mxu0 %v8575_v5  ;;  %v8597_v5 = vpack.c.bf16 %v806_v60, %v802_v59  ;;  %v822_v24 = vld [vmem:[#allocation2 + $0x4e8] sm:$0xff]  ;;  %v799_v28 = vld [vmem:[#allocation2 + $0x430] sm:$0xff]  ;;  %v661_v30 = vld [vmem:[%s11913_s20 + $0x40] sm:$0x3f] }
 0x191   : > { %8578 = vmatprep.subr.bf16.mxu0 %v8577_v8  ;;  %v11920_v8 = vld [vmem:[%s11913_s20 + $0x28] sm:$0xff]  ;;  %v804_v31 = vld [vmem:[#allocation2 + $0x458] sm:$0xff]  ;;  %v8605_v33 = vpack.c.bf16 %v822_v24, %v818_v23  ;;  %v817_v34 = vld [vmem:[#allocation2 + $0x4c0] sm:$0xff]  ;;  %v8695_v39 = vpack.c.bf16 %v799_v28, %v795_v27 }
 0x192   : > { %8676 = vmatpush1.bf16.msra.mxu1 %v8675_v37  ;;  %v821_v35 = vld [vmem:[#allocation2 + $0x4e0] sm:$0xff]  ;;  %v656_v36 = vld [vmem:[%s11913_s20 + $0x18] sm:$0xff]  ;;  %v826_v37 = vld [vmem:[#allocation2 + $0x508] sm:$0xff] }
 0x193   : > { %8678 = vmatprep.subr.bf16.mxu1 %v8677_v38  ;;  %v830_v38 = vld [vmem:[#allocation2 + $0x528] sm:$0xff]  ;;  %v807_v42 = vld [vmem:[#allocation2 + $0x470] sm:$0xff]  ;;  %v8607_v43 = vpack.c.bf16 %v821_v35, %v817_v34  ;;  %v816_v45 = vld [vmem:[#allocation2 + $0x4b8] sm:$0xff] }
 0x194   : > { %8580 = vmatpush1.bf16.msra.mxu0 %v8579_v17  ;;  %v796_v17 = vld [vmem:[#allocation2 + $0x418] sm:$0xff]  ;;  %v8609_v46 = vpack.c.bf16 %v830_v38, %v826_v37  ;;  %v825_v47 = vld [vmem:[#allocation2 + $0x500] sm:$0xff]  ;;  %v815_v54 = vld [vmem:[#allocation2 + $0x4b0] sm:$0xff] }
 0x195   : > { %8582 = vmatprep.subr.bf16.mxu0 %v8581_v20  ;;  %v809_v20 = vld [vmem:[#allocation2 + $0x480] sm:$0xff]  ;;  %v8693_v26 = vpack.c.bf16 %v800_v18, %v796_v17  ;;  %v824_v57 = vld [vmem:[#allocation2 + $0x4f8] sm:$0xff]  ;;  %v850_v9 = vld [vmem:[#allocation2 + $0x5c8] sm:$0xff] }
 0x196   : > { %8680 = vmatpush1.bf16.msra.mxu1 %v8679_v49  ;;  %v829_v48 = vld [vmem:[#allocation2 + $0x520] sm:$0xff]  ;;  %v834_v49 = vld [vmem:[#allocation2 + $0x548] sm:$0xff]  ;;  %v828_v4 = vld [vmem:[#allocation2 + $0x518] sm:$0xff] }
 0x197   : > { %8682 = vmatprep.subr.bf16.mxu1 %v8681_v50  ;;  %v838_v50 = vld [vmem:[#allocation2 + $0x568] sm:$0xff]  ;;  %v8611_v55 = vpack.c.bf16 %v829_v48, %v825_v47  ;;  %v833_v59 = vld [vmem:[#allocation2 + $0x540] sm:$0xff]  ;;  %v827_v13 = vld [vmem:[#allocation2 + $0x510] sm:$0xff] }
 0x198   : > { %8584 = vmatpush1.bf16.msra.mxu0 %v8583_v29  ;;  %v8603_v29 = vpack.c.bf16 %v813_v21, %v809_v20  ;;  %v8613_v58 = vpack.c.bf16 %v838_v50, %v834_v49  ;;  %v837_v60 = vld [vmem:[#allocation2 + $0x560] sm:$0xff]  ;;  %v854_v10 = vld [vmem:[#allocation2 + $0x5e8] sm:$0xff]  ;;  %v831_v14 = vld [vmem:[#allocation2 + $0x530] sm:$0xff] }
 0x199   : > { %8586 = vmatprep.subr.bf16.mxu0 %v8585_v32  ;;  %v808_v32 = vld [vmem:[#allocation2 + $0x478] sm:$0xff]  ;;  %v8615_v3 = vpack.c.bf16 %v837_v60, %v833_v59  ;;  %v841_v7 = vld [vmem:[#allocation2 + $0x580] sm:$0xff]  ;;  %v8621_v18 = vpack.c.bf16 %v854_v10, %v850_v9  ;;  %v858_v21 = vld [vmem:[#allocation2 + $0x608] sm:$0xff]  ;;  %v8711_v23 = vpack.c.bf16 %v831_v14, %v827_v13 }
 0x19a   : > { %8684 = vmatpush1.bf16.msra.mxu1 %v8683_v61  ;;  %v8697_v40 = vpack.c.bf16 %v808_v32, %v804_v31  ;;  %v842_v61 = vld [vmem:[#allocation2 + $0x588] sm:$0xff]  ;;  %v840_v17 = vld [vmem:[#allocation2 + $0x578] sm:$0xff]  ;;  %v853_v20 = vld [vmem:[#allocation2 + $0x5e0] sm:$0xff] }
 0x19b   : > { %8686 = vmatprep.subr.bf16.mxu1 %v8685_v62  ;;  %v846_v62 = vld [vmem:[#allocation2 + $0x5a8] sm:$0xff]  ;;  %v844_v28 = vld [vmem:[#allocation2 + $0x598] sm:$0xff]  ;;  %v857_v31 = vld [vmem:[#allocation2 + $0x600] sm:$0xff] }
 0x19c   : > { %8588 = vmatpush1.bf16.msra.mxu0 %v8587_v41  ;;  %v803_v41 = vld [vmem:[#allocation2 + $0x450] sm:$0xff]  ;;  %v8617_v6 = vpack.c.bf16 %v846_v62, %v842_v61  ;;  %v861_v32 = vld [vmem:[#allocation2 + $0x620] sm:$0xff] }
 0x19d   : > { %8590 = vmatprep.subr.bf16.mxu0 %v8589_v44  ;;  %v812_v44 = vld [vmem:[#allocation2 + $0x498] sm:$0xff]  ;;  %v8699_v51 = vpack.c.bf16 %v807_v42, %v803_v41  ;;  %v1242_v34 = vld [vmem:[#allocation7 + $0x8] sm:$0xff] }
 0x19e   : > { %8688 = vmatpush1.bf16.msra.mxu1 %v8687_v11  ;;  %v8701_v52 = vpack.c.bf16 %v816_v45, %v812_v44  ;;  %v1250_v35 = vld [vmem:[#allocation7 + $0x48] sm:$0xff]  ;;  %v856_v41 = vld [vmem:[#allocation2 + $0x5f8] sm:$0xff]  ;;  %v1249_v44 = vld [vmem:[#allocation7 + $0x40] sm:$0xff] }
 0x19f   : > { %8690 = vmatprep.subr.bf16.mxu1 %v8689_v12  ;;  %v843_v37 = vld [vmem:[#allocation2 + $0x590] sm:$0xff]  ;;  %v8729_v42 = vpack.c.bf16 %v1250_v35, %v1242_v34 }
 0x1a0   : > { %8592 = vmatpush1.bf16.msra.mxu0 %v8591_v53  ;;  %v811_v53 = vld [vmem:[#allocation2 + $0x490] sm:$0xff] }
 0x1a1   : > { %8594 = vmatprep.subr.bf16.mxu0 %v8593_v56  ;;  %v820_v56 = vld [vmem:[#allocation2 + $0x4d8] sm:$0xff]  ;;  %v8703_v63 = vpack.c.bf16 %v815_v54, %v811_v53  ;;  %v847_v38 = vld [vmem:[#allocation2 + $0x5b0] sm:$0xff] }
 0x1a2   : > { %8692 = vmatpush1.bf16.msra.mxu1 %v8691_v25  ;;  %v8705_v0 = vpack.c.bf16 %v824_v57, %v820_v56  ;;  %v835_v25 = vld [vmem:[#allocation2 + $0x550] sm:$0xff]  ;;  %v8719_v45 = vpack.c.bf16 %v847_v38, %v843_v37  ;;  %v864_v53 = vld [vmem:[#allocation2 + $0x638] sm:$0xff]  ;;  %v1257_v57 = vld [vmem:[#allocation7 + $0x80] sm:$0xff] }
 0x1a3   : > { %962 = vmatmul.mubr.f32.vlgmr.msra.gmra.mrb[0].mxu0 %v11917_v1  ;;  %8694 = vmatprep.subr.bf16.mxu1 %v8693_v26  ;;  %v839_v26 = vld [vmem:[#allocation2 + $0x570] sm:$0xff] }
 0x1a4   : > { %8596 = vmatpush1.bf16.msra.mxu0 %v8595_v2  ;;  %967 = vmatprep.mubr.f32.mxu0 %v11920_v8  ;;  %v823_v2 = vld [vmem:[#allocation2 + $0x4f0] sm:$0xff] }
 0x1a5   : > { %8598 = vmatprep.subr.bf16.mxu0 %v8597_v5  ;;  %1128 = vmatmul.mubr.f32.vlgmr.msra.gmra.mrb[0].mxu1 %v11917_v1  ;;  %v819_v1 = vld [vmem:[#allocation2 + $0x4d0] sm:$0xff]  ;;  %v832_v5 = vld [vmem:[#allocation2 + $0x538] sm:$0xff] }
 0x1a6   : > { %8696 = vmatpush1.bf16.msra.mxu1 %v8695_v39  ;;  %1133 = vmatprep.mubr.f32.mxu1 %v11920_v8  ;;  %v845_v8 = vld [vmem:[#allocation2 + $0x5a0] sm:$0xff]  ;;  %v8707_v11 = vpack.c.bf16 %v823_v2, %v819_v1  ;;  %v8709_v12 = vpack.c.bf16 %v832_v5, %v828_v4  ;;  %v8627_v39 = vpack.c.bf16 %v861_v32, %v857_v31  ;;  %v1266_v47 = vld [vmem:[#allocation7 + $0xc8] sm:$0xff]  ;;  %v664_v5 = vld [vmem:[%s11913_s20 + $0x58] sm:$0x3f] }
 0x1a7   : > { %968 = vmatmul.mubr.f32.gmra.mrb[2].mxu0 %v11925_v16  ;;  %8698 = vmatprep.subr.bf16.mxu1 %v8697_v40  ;;  %v852_v40 = vld [vmem:[#allocation2 + $0x5d8] sm:$0xff]  ;;  %v851_v49 = vld [vmem:[#allocation2 + $0x5d0] sm:$0xff]  ;;  %v1305_v32 = vld [vmem:[#allocation7 + $0x200] sm:$0xff] }
 0x1a8   : > { %8600 = vmatpush1.bf16.msra.mxu0 %v8599_v15  ;;  %973 = vmatprep.mubr.f32.mxu0 %v11928_v22  ;;  %v8619_v15 = vpack.c.bf16 %v845_v8, %v841_v7  ;;  %v8721_v48 = vpack.c.bf16 %v856_v41, %v852_v40  ;;  %v855_v50 = vld [vmem:[#allocation2 + $0x5f0] sm:$0xff]  ;;  %v1244_v2 = vld [vmem:[#allocation7 + $0x18] sm:$0xff]  ;;  %v1273_v7 = vld [vmem:[#allocation7 + $0x100] sm:$0xff] }
 0x1a9   : > { %8602 = vmatprep.subr.bf16.mxu0 %v8601_v19  ;;  %1134 = vmatmul.mubr.f32.gmra.mrb[2].mxu1 %v11925_v16  ;;  %v836_v16 = vld [vmem:[#allocation2 + $0x558] sm:$0xff]  ;;  %v849_v19 = vld [vmem:[#allocation2 + $0x5c0] sm:$0xff]  ;;  %v8723_v59 = vpack.c.bf16 %v855_v50, %v851_v49  ;;  %v1274_v60 = vld [vmem:[#allocation7 + $0x108] sm:$0xff] }
 0x1aa   : > { %8700 = vmatpush1.bf16.msra.mxu1 %v8699_v51  ;;  %1139 = vmatprep.mubr.f32.mxu1 %v11928_v22  ;;  %v862_v22 = vld [vmem:[#allocation2 + $0x628] sm:$0xff]  ;;  %v8713_v24 = vpack.c.bf16 %v840_v17, %v836_v16  ;;  %v8623_v27 = vpack.c.bf16 %v853_v20, %v849_v19  ;;  %v655_v51 = vld [vmem:[%s11913_s20 + $0x10] sm:$0xff]  ;;  %v1260_v16 = vld [vmem:[#allocation7 + $0x98] sm:$0xff] }
 0x1ab   : > { %974 = vmatmul.mubr.f32.gmra.mrb[4].mxu0 %v661_v30  ;;  %8702 = vmatprep.subr.bf16.mxu1 %v8701_v52  ;;  %v860_v52 = vld [vmem:[#allocation2 + $0x618] sm:$0xff]  ;;  %v1282_v61 = vld [vmem:[#allocation7 + $0x148] sm:$0xff]  ;;  %v1281_v8 = vld [vmem:[#allocation7 + $0x140] sm:$0xff] }
 0x1ac   : > { %8604 = vmatpush1.bf16.msra.mxu0 %v8603_v29  ;;  %7156 = vmatprep.mubr.msk.f32.mxu0 %vm887_vm0, %v656_v36  ;;  %v848_v29 = vld [vmem:[#allocation2 + $0x5b8] sm:$0xff]  ;;  %v8725_v62 = vpack.c.bf16 %v864_v53, %v860_v52  ;;  %v659_v1 = vld [vmem:[%s11913_s20 + $0x30] sm:$0xff]  ;;  %v1289_v20 = vld [vmem:[#allocation7 + $0x180] sm:$0xff] }
 0x1ad   : > { %8606 = vmatprep.subr.bf16.mxu0 %v8605_v33  ;;  %1140 = vmatmul.mubr.f32.gmra.mrb[4].mxu1 %v661_v30  ;;  %v8625_v30 = vpack.c.bf16 %v862_v22, %v858_v21  ;;  %v8715_v33 = vpack.c.bf16 %v839_v26, %v835_v25  ;;  %v1290_v10 = vld [vmem:[#allocation7 + $0x188] sm:$0xff]  ;;  %v1243_v13 = vld [vmem:[#allocation7 + $0x10] sm:$0xff]  ;;  %v1268_v17 = vld [vmem:[#allocation7 + $0xd8] sm:$0xff] }
 0x1ae   : > { %8704 = vmatpush1.bf16.msra.mxu1 %v8703_v63  ;;  %7159 = vmatprep.mubr.msk.f32.mxu1 %vm887_vm0, %v656_v36  ;;  %v8717_v36 = vpack.c.bf16 %v848_v29, %v844_v28  ;;  %v859_v63 = vld [vmem:[#allocation2 + $0x610] sm:$0xff]  ;;  %v1297_v21 = vld [vmem:[#allocation7 + $0x1c0] sm:$0xff]  ;;  %v8861_v25 = vpack.c.bf16 %v1268_v17, %v1260_v16  ;;  %v1276_v28 = vld [vmem:[#allocation7 + $0x118] sm:$0xff] }
 0x1af   : > { %8706 = vmatprep.subr.bf16.mxu1 %v8705_v0  ;;  %v863_v0 = vld [vmem:[#allocation2 + $0x630] sm:$0xff]  ;;  %v1284_v29 = vld [vmem:[#allocation7 + $0x158] sm:$0xff]  ;;  %v1369_v16 = vld [vmem:[#allocation7 + $0x400] sm:$0xff] }
 0x1b0   : > { %8608 = vmatpush1.bf16.msra.mxu0 %v8607_v43  ;;  %v1241_v43 = vld [vmem:[#allocation7] sm:$0xff]  ;;  %v8727_v9 = vpack.c.bf16 %v863_v0, %v859_v63  ;;  %v1251_v14 = vld [vmem:[#allocation7 + $0x50] sm:$0xff]  ;;  %v1322_v35 = vld [vmem:[#allocation7 + $0x288] sm:$0xff]  ;;  %v8865_v37 = vpack.c.bf16 %v1284_v29, %v1276_v28 }
 0x1b1   : > { %8610 = vmatprep.subr.bf16.mxu0 %v8609_v46  ;;  %v1258_v46 = vld [vmem:[#allocation7 + $0x88] sm:$0xff]  ;;  %v8731_v54 = vpack.c.bf16 %v1249_v44, %v1241_v43  ;;  %v8859_v22 = vpack.c.bf16 %v1251_v14, %v1243_v13  ;;  %v1259_v26 = vld [vmem:[#allocation7 + $0x90] sm:$0xff]  ;;  %v1292_v40 = vld [vmem:[#allocation7 + $0x198] sm:$0xff] }
 0x1b2   : > { %8708 = vmatpush1.bf16.msra.mxu1 %v8707_v11  ;;  %v8733_v56 = vpack.c.bf16 %v1266_v47, %v1258_v46  ;;  %v1298_v11 = vld [vmem:[#allocation7 + $0x1c8] sm:$0xff]  ;;  %v1275_v38 = vld [vmem:[#allocation7 + $0x110] sm:$0xff]  ;;  %v1300_v41 = vld [vmem:[#allocation7 + $0x1d8] sm:$0xff] }
 0x1b3   : > { %8710 = vmatprep.subr.bf16.mxu1 %v8709_v12  ;;  %v8741_v19 = vpack.c.bf16 %v1298_v11, %v1290_v10  ;;  %v1321_v44 = vld [vmem:[#allocation7 + $0x280] sm:$0xff]  ;;  %v1338_v47 = vld [vmem:[#allocation7 + $0x308] sm:$0xff]  ;;  %v8869_v49 = vpack.c.bf16 %v1300_v41, %v1292_v40  ;;  %v1291_v50 = vld [vmem:[#allocation7 + $0x190] sm:$0xff] }
 0x1b4   : > { %8612 = vmatpush1.bf16.msra.mxu0 %v8611_v55  ;;  %v660_v55 = vld [vmem:[%s11913_s20 + $0x38] sm:$0xff]  ;;  %v1377_v17 = vld [vmem:[#allocation7 + $0x440] sm:$0xff] }
 0x1b5   : > { %8614 = vmatprep.subr.bf16.mxu0 %v8613_v58  ;;  %v1265_v58 = vld [vmem:[#allocation7 + $0xc0] sm:$0xff]  ;;  %v1308_v52 = vld [vmem:[#allocation7 + $0x218] sm:$0xff]  ;;  %v1315_v63 = vld [vmem:[#allocation7 + $0x250] sm:$0xff] }
 0x1b6   : > { %8712 = vmatpush1.bf16.msra.mxu1 %v8711_v23  ;;  %v8735_v4 = vpack.c.bf16 %v1265_v58, %v1257_v57  ;;  %v1306_v23 = vld [vmem:[#allocation7 + $0x208] sm:$0xff]  ;;  %v1316_v53 = vld [vmem:[#allocation7 + $0x258] sm:$0xff]  ;;  %v1345_v57 = vld [vmem:[#allocation7 + $0x340] sm:$0xff] }
 0x1b7   : > { %8714 = vmatprep.subr.bf16.mxu1 %v8713_v24  ;;  %v1314_v24 = vld [vmem:[#allocation7 + $0x248] sm:$0xff]  ;;  %v1324_v0 = vld [vmem:[#allocation7 + $0x298] sm:$0xff]  ;;  %v1323_v10 = vld [vmem:[#allocation7 + $0x290] sm:$0xff] }
 0x1b8   : > { %8616 = vmatpush1.bf16.msra.mxu0 %v8615_v3  ;;  %v1252_v3 = vld [vmem:[#allocation7 + $0x58] sm:$0xff]  ;;  %v8745_v31 = vpack.c.bf16 %v1314_v24, %v1306_v23  ;;  %v1331_v11 = vld [vmem:[#allocation7 + $0x2d0] sm:$0xff]  ;;  %v1385_v28 = vld [vmem:[#allocation7 + $0x480] sm:$0xff] }
 0x1b9   : > { %8618 = vmatprep.subr.bf16.mxu0 %v8617_v6  ;;  %v8737_v6 = vpack.c.bf16 %v1282_v61, %v1274_v60  ;;  %v8857_v12 = vpack.c.bf16 %v1252_v3, %v1244_v2  ;;  %v1362_v60 = vld [vmem:[#allocation7 + $0x3c8] sm:$0xff]  ;;  %v8873_v61 = vpack.c.bf16 %v1316_v53, %v1308_v52  ;;  %v1348_v13 = vld [vmem:[#allocation7 + $0x358] sm:$0xff]  ;;  %v1347_v23 = vld [vmem:[#allocation7 + $0x350] sm:$0xff] }
 0x1ba   : > { %8716 = vmatpush1.bf16.msra.mxu1 %v8715_v33  ;;  %v1313_v33 = vld [vmem:[#allocation7 + $0x240] sm:$0xff]  ;;  %v1356_v24 = vld [vmem:[#allocation7 + $0x398] sm:$0xff] }
 0x1bb   : > { %8718 = vmatprep.subr.bf16.mxu1 %v8717_v36  ;;  %v1330_v36 = vld [vmem:[#allocation7 + $0x2c8] sm:$0xff]  ;;  %v1393_v29 = vld [vmem:[#allocation7 + $0x4c0] sm:$0xff] }
 0x1bc   : > { %8620 = vmatpush1.bf16.msra.mxu0 %v8619_v15  ;;  %v663_v15 = vld [vmem:[%s11913_s20 + $0x50] sm:$0x3f]  ;;  %v8749_v43 = vpack.c.bf16 %v1330_v36, %v1322_v35  ;;  %v1372_v36 = vld [vmem:[#allocation7 + $0x418] sm:$0xff]  ;;  %v1401_v40 = vld [vmem:[#allocation7 + $0x500] sm:$0xff] }
 0x1bd   : > { %8622 = vmatprep.subr.bf16.mxu0 %v8621_v18  ;;  %v8739_v18 = vpack.c.bf16 %v1281_v8, %v1273_v7  ;;  %v1370_v7 = vld [vmem:[#allocation7 + $0x408] sm:$0xff]  ;;  %v1363_v35 = vld [vmem:[#allocation7 + $0x3d0] sm:$0xff]  ;;  %v1409_v41 = vld [vmem:[#allocation7 + $0x540] sm:$0xff] }
 0x1be   : > { %8720 = vmatpush1.bf16.msra.mxu1 %v8719_v45  ;;  %v1329_v45 = vld [vmem:[#allocation7 + $0x2c0] sm:$0xff]  ;;  %v1378_v8 = vld [vmem:[#allocation7 + $0x448] sm:$0xff] }
 0x1bf   : > { %8722 = vmatprep.subr.bf16.mxu1 %v8721_v48  ;;  %v1346_v48 = vld [vmem:[#allocation7 + $0x348] sm:$0xff]  ;;  %v1417_v52 = vld [vmem:[#allocation7 + $0x580] sm:$0xff] }
 0x1c0   : > { %8624 = vmatpush1.bf16.msra.mxu0 %v8623_v27  ;;  %v1267_v27 = vld [vmem:[#allocation7 + $0xd0] sm:$0xff]  ;;  %v1425_v53 = vld [vmem:[#allocation7 + $0x5c0] sm:$0xff] }
 0x1c1   : > { %8626 = vmatprep.subr.bf16.mxu0 %v8625_v30  ;;  %v8743_v30 = vpack.c.bf16 %v1297_v21, %v1289_v20  ;;  %v8863_v34 = vpack.c.bf16 %v1267_v27, %v1259_v26  ;;  %v1394_v20 = vld [vmem:[#allocation7 + $0x4c8] sm:$0xff]  ;;  %v8763_v26 = vpack.c.bf16 %v1377_v17, %v1369_v16 }
 0x1c2   : > { %8724 = vmatpush1.bf16.msra.mxu1 %v8723_v59  ;;  %v1354_v59 = vld [vmem:[#allocation7 + $0x388] sm:$0xff] }
 0x1c3   : > { %8726 = vmatprep.subr.bf16.mxu1 %v8725_v62  ;;  %v1307_v62 = vld [vmem:[#allocation7 + $0x210] sm:$0xff]  ;;  %v8757_v3 = vpack.c.bf16 %v1362_v60, %v1354_v59  ;;  %v1404_v60 = vld [vmem:[#allocation7 + $0x518] sm:$0xff]  ;;  %v1474_v16 = vld [vmem:[#allocation7 + $0x748] sm:$0xff] }
 0x1c4   : > { %8628 = vmatpush1.bf16.msra.mxu0 %v8627_v39  ;;  %v1283_v39 = vld [vmem:[#allocation7 + $0x150] sm:$0xff] }
 0x1c5   : > { %8730 = vmatprep.subr.bf16.mxu0 %v8729_v42  ;;  %v8747_v42 = vpack.c.bf16 %v1313_v33, %v1305_v32  ;;  %v8867_v46 = vpack.c.bf16 %v1283_v39, %v1275_v38  ;;  %v1410_v32 = vld [vmem:[#allocation7 + $0x548] sm:$0xff]  ;;  %v8767_v38 = vpack.c.bf16 %v1393_v29, %v1385_v28  ;;  %v1395_v59 = vld [vmem:[#allocation7 + $0x4d0] sm:$0xff] }
 0x1c6   : > { %8728 = vmatpush1.bf16.msra.mxu1 %v8727_v9  ;;  %v1435_v28 = vld [vmem:[#allocation7 + $0x610] sm:$0xff] }
 0x1c7   : > { %1045 = vmatmul.mubr.f32.vlgmr.msra.gmra.mrb[0].mxu0 %v655_v51  ;;  %8858 = vmatprep.subr.bf16.mxu1 %v8857_v12  ;;  %v1340_v12 = vld [vmem:[#allocation7 + $0x318] sm:$0xff]  ;;  %v1443_v29 = vld [vmem:[#allocation7 + $0x650] sm:$0xff] }
 0x1c8   : > { %7157 = vmatprep.mubr.msk.f32.mxu0 %vm887_vm0, %v660_v55  ;;  %8732 = vmatpush1.bf16.msra.mxu0 %v8731_v54  ;;  %v8751_v54 = vpack.c.bf16 %v1329_v45, %v1321_v44  ;;  %v8881_v21 = vpack.c.bf16 %v1348_v13, %v1340_v12  ;;  %v1426_v44 = vld [vmem:[#allocation7 + $0x5c8] sm:$0xff]  ;;  %v1449_v12 = vld [vmem:[#allocation7 + $0x680] sm:$0xff] }
 0x1c9   : > { %8734 = vmatprep.subr.bf16.mxu0 %v8733_v56  ;;  %1211 = vmatmul.mubr.f32.vlgmr.msra.gmra.mrb[0].mxu1 %v655_v51  ;;  %v1299_v51 = vld [vmem:[#allocation7 + $0x1d0] sm:$0xff]  ;;  %v1337_v56 = vld [vmem:[#allocation7 + $0x300] sm:$0xff] }
 0x1ca   : > { %7160 = vmatprep.mubr.msk.f32.mxu1 %vm887_vm0, %v660_v55  ;;  %8860 = vmatpush1.bf16.msra.mxu1 %v8859_v22  ;;  %v8753_v55 = vpack.c.bf16 %v1346_v48, %v1338_v47  ;;  %v8871_v58 = vpack.c.bf16 %v1299_v51, %v1291_v50  ;;  %v8755_v2 = vpack.c.bf16 %v1345_v57, %v1337_v56  ;;  %v1339_v22 = vld [vmem:[#allocation7 + $0x310] sm:$0xff]  ;;  %v1388_v48 = vld [vmem:[#allocation7 + $0x498] sm:$0xff]  ;;  %v1442_v56 = vld [vmem:[#allocation7 + $0x648] sm:$0xff] }
 0x1cb   : > { %1051 = vmatmul.mubr.f32.gmra.mrb[2].mxu0 %v659_v1  ;;  %8862 = vmatprep.subr.bf16.mxu1 %v8861_v25  ;;  %v1364_v25 = vld [vmem:[#allocation7 + $0x3d8] sm:$0xff]  ;;  %v1379_v47 = vld [vmem:[#allocation7 + $0x450] sm:$0xff]  ;;  %v8771_v50 = vpack.c.bf16 %v1409_v41, %v1401_v40  ;;  %v1457_v13 = vld [vmem:[#allocation7 + $0x6c0] sm:$0xff] }
 0x1cc   : > { %7158 = vmatprep.mubr.msk.f32.mxu0 %vm887_vm0, %v664_v5  ;;  %8736 = vmatpush1.bf16.msra.mxu0 %v8735_v4  ;;  %v1353_v4 = vld [vmem:[#allocation7 + $0x380] sm:$0xff]  ;;  %v8885_v33 = vpack.c.bf16 %v1364_v25, %v1356_v24  ;;  %v1467_v41 = vld [vmem:[#allocation7 + $0x710] sm:$0xff] }
 0x1cd   : > { %8738 = vmatprep.subr.bf16.mxu0 %v8737_v6  ;;  %1217 = vmatmul.mubr.f32.gmra.mrb[2].mxu1 %v659_v1  ;;  %v1332_v1 = vld [vmem:[#allocation7 + $0x2d8] sm:$0xff]  ;;  %v8875_v6 = vpack.c.bf16 %v1315_v63, %v1307_v62  ;;  %v8775_v62 = vpack.c.bf16 %v1425_v53, %v1417_v52  ;;  %v1465_v24 = vld [vmem:[#allocation7 + $0x700] sm:$0xff]  ;;  %v1483_v53 = vld [vmem:[#allocation7 + $0x790] sm:$0xff] }
 0x1ce   : > { %7161 = vmatprep.mubr.msk.f32.mxu1 %vm887_vm0, %v664_v5  ;;  %8864 = vmatpush1.bf16.msra.mxu1 %v8863_v34  ;;  %v1361_v5 = vld [vmem:[#allocation7 + $0x3c0] sm:$0xff]  ;;  %v8877_v9 = vpack.c.bf16 %v1332_v1, %v1324_v0  ;;  %v1355_v34 = vld [vmem:[#allocation7 + $0x390] sm:$0xff] }
 0x1cf   : > { %1057 = vmatmul.mubr.f32.gmra.mrb[4].mxu0 %v663_v15  ;;  %8866 = vmatprep.subr.bf16.mxu1 %v8865_v37  ;;  %v8759_v14 = vpack.c.bf16 %v1361_v5, %v1353_v4  ;;  %v1380_v37 = vld [vmem:[#allocation7 + $0x458] sm:$0xff]  ;;  %v1433_v0 = vld [vmem:[#allocation7 + $0x600] sm:$0xff]  ;;  %v1458_v4 = vld [vmem:[#allocation7 + $0x6c8] sm:$0xff] }
 0x1d0   : > { %8740 = vmatpush1.bf16.msra.mxu0 %v8739_v18  ;;  %v8879_v18 = vpack.c.bf16 %v1331_v11, %v1323_v10  ;;  %v8889_v45 = vpack.c.bf16 %v1380_v37, %v1372_v36  ;;  %v1441_v1 = vld [vmem:[#allocation7 + $0x640] sm:$0xff]  ;;  %v1459_v36 = vld [vmem:[#allocation7 + $0x6d0] sm:$0xff]  ;;  %v1468_v37 = vld [vmem:[#allocation7 + $0x718] sm:$0xff] }
 0x1d1   : > { %8742 = vmatprep.subr.bf16.mxu0 %v8741_v19  ;;  %1223 = vmatmul.mubr.f32.gmra.mrb[4].mxu1 %v663_v15  ;;  %v8761_v15 = vpack.c.bf16 %v1378_v8, %v1370_v7  ;;  %v1386_v19 = vld [vmem:[#allocation7 + $0x488] sm:$0xff]  ;;  %v1411_v7 = vld [vmem:[#allocation7 + $0x550] sm:$0xff]  ;;  %v1420_v8 = vld [vmem:[#allocation7 + $0x598] sm:$0xff]  ;;  %v8779_v10 = vpack.c.bf16 %v1441_v1, %v1433_v0 }
 0x1d2   : > { %8868 = vmatpush1.bf16.msra.mxu1 %v8867_v46  ;;  %v8765_v27 = vpack.c.bf16 %v1394_v20, %v1386_v19  ;;  %v1371_v46 = vld [vmem:[#allocation7 + $0x410] sm:$0xff]  ;;  %v1436_v20 = vld [vmem:[#allocation7 + $0x618] sm:$0xff]  ;;  %v1473_v25 = vld [vmem:[#allocation7 + $0x740] sm:$0xff] }
 0x1d3   : > { %8870 = vmatprep.subr.bf16.mxu1 %v8869_v49  ;;  %v1396_v49 = vld [vmem:[#allocation7 + $0x4d8] sm:$0xff]  ;;  %v1427_v19 = vld [vmem:[#allocation7 + $0x5d0] sm:$0xff] }
 0x1d4   : > { %8744 = vmatpush1.bf16.msra.mxu0 %v8743_v30  ;;  %v8883_v30 = vpack.c.bf16 %v1347_v23, %v1339_v22  ;;  %v8893_v57 = vpack.c.bf16 %v1396_v49, %v1388_v48  ;;  %v8783_v22 = vpack.c.bf16 %v1457_v13, %v1449_v12  ;;  %v1492_v48 = vld [vmem:[#allocation7 + $0x7d8] sm:$0xff]  ;;  %v1481_v49 = vld [vmem:[#allocation7 + $0x780] sm:$0xff]  ;;  %v1514_v12 = vld [vmem:[#allocation7 + $0x888] sm:$0xff] }
 0x1d5   : > { %8746 = vmatprep.subr.bf16.mxu0 %v8745_v31  ;;  %v1402_v31 = vld [vmem:[#allocation7 + $0x508] sm:$0xff]  ;;  %v11954_v1 = vld [vmem:[#allocation5] sm:$0xf] }
 0x1d6   : > { %8872 = vmatpush1.bf16.msra.mxu1 %v8871_v58  ;;  %v8769_v39 = vpack.c.bf16 %v1410_v32, %v1402_v31  ;;  %v1387_v58 = vld [vmem:[#allocation7 + $0x490] sm:$0xff]  ;;  %v1460_v31 = vld [vmem:[#allocation7 + $0x6d8] sm:$0xff]  ;;  %v8787_v32 = vpack.c.bf16 %v1473_v25, %v1465_v24 }
 0x1d7   : > { %8874 = vmatprep.subr.bf16.mxu1 %v8873_v61  ;;  %v1412_v61 = vld [vmem:[#allocation7 + $0x558] sm:$0xff] }
 0x1d8   : > { %8748 = vmatpush1.bf16.msra.mxu0 %v8747_v42  ;;  %v8887_v42 = vpack.c.bf16 %v1363_v35, %v1355_v34  ;;  %v8897_v5 = vpack.c.bf16 %v1412_v61, %v1404_v60  ;;  %v1451_v35 = vld [vmem:[#allocation7 + $0x690] sm:$0xff]  ;;  %v1508_v60 = vld [vmem:[#allocation7 + $0x858] sm:$0xff] }
 0x1d9   : > { %8750 = vmatprep.subr.bf16.mxu0 %v8749_v43  ;;  %v1418_v43 = vld [vmem:[#allocation7 + $0x588] sm:$0xff] }
 0x1da   : > { %8876 = vmatpush1.bf16.msra.mxu1 %v8875_v6  ;;  %v8773_v51 = vpack.c.bf16 %v1426_v44, %v1418_v43  ;;  %v1403_v6 = vld [vmem:[#allocation7 + $0x510] sm:$0xff]  ;;  %v1482_v44 = vld [vmem:[#allocation7 + $0x788] sm:$0xff] }
 0x1db   : > { %8878 = vmatprep.subr.bf16.mxu1 %v8877_v9  ;;  %v1428_v9 = vld [vmem:[#allocation7 + $0x5d8] sm:$0xff] }
 0x1dc   : > { %8752 = vmatpush1.bf16.msra.mxu0 %v8751_v54  ;;  %v8891_v54 = vpack.c.bf16 %v1379_v47, %v1371_v46  ;;  %v8901_v17 = vpack.c.bf16 %v1428_v9, %v1420_v8  ;;  %v1484_v46 = vld [vmem:[#allocation7 + $0x798] sm:$0xff] }
 0x1dd   : > { %8754 = vmatprep.subr.bf16.mxu0 %v8753_v55  ;;  %v1434_v55 = vld [vmem:[#allocation7 + $0x608] sm:$0xff] }
 0x1de   : > { %8880 = vmatpush1.bf16.msra.mxu1 %v8879_v18  ;;  %v8777_v63 = vpack.c.bf16 %v1442_v56, %v1434_v55  ;;  %v1419_v18 = vld [vmem:[#allocation7 + $0x590] sm:$0xff]  ;;  %v1498_v56 = vld [vmem:[#allocation7 + $0x808] sm:$0xff] }
 0x1df   : > { %8882 = vmatprep.subr.bf16.mxu1 %v8881_v21  ;;  %v1444_v21 = vld [vmem:[#allocation7 + $0x658] sm:$0xff] }
 0x1e0   : > { %8756 = vmatpush1.bf16.msra.mxu0 %v8755_v2  ;;  %v8895_v2 = vpack.c.bf16 %v1395_v59, %v1387_v58  ;;  %v1500_v59 = vld [vmem:[#allocation7 + $0x818] sm:$0xff] }
 0x1e1   : > { %8758 = vmatprep.subr.bf16.mxu0 %v8757_v3  ;;  %v1450_v3 = vld [vmem:[#allocation7 + $0x688] sm:$0xff]  ;;  %v8921_v61 = vpack.c.bf16 %v1508_v60, %v1500_v59  ;;  %v1545_v60 = vld [vmem:[#allocation7 + $0x980] sm:$0xff] }
 0x1e2   : > { %8884 = vmatpush1.bf16.msra.mxu1 %v8883_v30  ;;  %v8781_v11 = vpack.c.bf16 %v1458_v4, %v1450_v3  ;;  %v1452_v30 = vld [vmem:[#allocation7 + $0x698] sm:$0xff] }
 0x1e3   : > { %8886 = vmatprep.subr.bf16.mxu1 %v8885_v33  ;;  %v8907_v33 = vpack.c.bf16 %v1443_v29, %v1435_v28  ;;  %v8909_v34 = vpack.c.bf16 %v1460_v31, %v1452_v30  ;;  %v1515_v29 = vld [vmem:[#allocation7 + $0x890] sm:$0xff]  ;;  %v1530_v31 = vld [vmem:[#allocation7 + $0x908] sm:$0xff] }
 0x1e4   : > { %8760 = vmatpush1.bf16.msra.mxu0 %v8759_v14  ;;  %v8899_v14 = vpack.c.bf16 %v1411_v7, %v1403_v6  ;;  %v1497_v6 = vld [vmem:[#allocation7 + $0x800] sm:$0xff]  ;;  %v1523_v30 = vld [vmem:[#allocation7 + $0x8d0] sm:$0xff] }
 0x1e5   : > { %8762 = vmatprep.subr.bf16.mxu0 %v8761_v15  ;;  %v1466_v15 = vld [vmem:[#allocation7 + $0x708] sm:$0xff]  ;;  %v1505_v7 = vld [vmem:[#allocation7 + $0x840] sm:$0xff] }
 0x1e6   : > { %8888 = vmatpush1.bf16.msra.mxu1 %v8887_v42  ;;  %v8785_v23 = vpack.c.bf16 %v1474_v16, %v1466_v15  ;;  %v1475_v42 = vld [vmem:[#allocation7 + $0x750] sm:$0xff]  ;;  %v1516_v15 = vld [vmem:[#allocation7 + $0x898] sm:$0xff] }
 0x1e7   : > { %8890 = vmatprep.subr.bf16.mxu1 %v8889_v45  ;;  %v8915_v43 = vpack.c.bf16 %v1475_v42, %v1467_v41  ;;  %v1490_v45 = vld [vmem:[#allocation7 + $0x7c8] sm:$0xff]  ;;  %v1524_v16 = vld [vmem:[#allocation7 + $0x8d8] sm:$0xff]  ;;  %v1537_v41 = vld [vmem:[#allocation7 + $0x940] sm:$0xff] }
 0x1e8   : > { %8764 = vmatpush1.bf16.msra.mxu0 %v8763_v26  ;;  %v8903_v26 = vpack.c.bf16 %v1427_v19, %v1419_v18  ;;  %v8789_v47 = vpack.c.bf16 %v1490_v45, %v1482_v44  ;;  %v8795_v19 = vpack.c.bf16 %v1505_v7, %v1497_v6  ;;  %v8925_v28 = vpack.c.bf16 %v1524_v16, %v1516_v15  ;;  %v1547_v6 = vld [vmem:[#allocation7 + $0x990] sm:$0xff] }
 0x1e9   : > { %8766 = vmatprep.subr.bf16.mxu0 %v8765_v27  ;;  %v8905_v27 = vpack.c.bf16 %v1444_v21, %v1436_v20  ;;  %v1513_v21 = vld [vmem:[#allocation7 + $0x880] sm:$0xff]  ;;  %v1555_v7 = vld [vmem:[#allocation7 + $0x9d0] sm:$0xff] }
 0x1ea   : > { %8892 = vmatpush1.bf16.msra.mxu1 %v8891_v54  ;;  %v1491_v54 = vld [vmem:[#allocation7 + $0x7d0] sm:$0xff]  ;;  %v8935_v16 = vpack.c.bf16 %v1555_v7, %v1547_v6 }
 0x1eb   : > { %8894 = vmatprep.subr.bf16.mxu1 %v8893_v57  ;;  %v8919_v55 = vpack.c.bf16 %v1491_v54, %v1483_v53  ;;  %v1506_v57 = vld [vmem:[#allocation7 + $0x848] sm:$0xff]  ;;  %v1548_v53 = vld [vmem:[#allocation7 + $0x998] sm:$0xff] }
 0x1ec   : > { %8768 = vmatpush1.bf16.msra.mxu0 %v8767_v38  ;;  %v1476_v38 = vld [vmem:[#allocation7 + $0x758] sm:$0xff]  ;;  %v8793_v58 = vpack.c.bf16 %v1506_v57, %v1498_v56 }
 0x1ed   : > { %8770 = vmatprep.subr.bf16.mxu0 %v8769_v39  ;;  %v8911_v39 = vpack.c.bf16 %v1459_v36, %v1451_v35  ;;  %v8913_v40 = vpack.c.bf16 %v1476_v38, %v1468_v37  ;;  %v1540_v35 = vld [vmem:[#allocation7 + $0x958] sm:$0xff] }
 0x1ee   : > { %8896 = vmatpush1.bf16.msra.mxu1 %v8895_v2  ;;  %v1556_v54 = vld [vmem:[#allocation7 + $0x9d8] sm:$0xff] }
 0x1ef   : > { %8898 = vmatprep.subr.bf16.mxu1 %v8897_v5 }
 0x1f0   : > { %8772 = vmatpush1.bf16.msra.mxu0 %v8771_v50  ;;  %v1489_v50 = vld [vmem:[#allocation7 + $0x7c0] sm:$0xff] }
 0x1f1   : > { %8774 = vmatprep.subr.bf16.mxu0 %v8773_v51  ;;  %v8917_v51 = vpack.c.bf16 %v1492_v48, %v1484_v46  ;;  %v8791_v52 = vpack.c.bf16 %v1489_v50, %v1481_v49  ;;  %v1531_v48 = vld [vmem:[#allocation7 + $0x910] sm:$0xff]  ;;  %v1546_v50 = vld [vmem:[#allocation7 + $0x988] sm:$0xff] }
 0x1f2   : > { %8900 = vmatpush1.bf16.msra.mxu1 %v8899_v14  ;;  %v1522_v14 = vld [vmem:[#allocation7 + $0x8c8] sm:$0xff]  ;;  %v1539_v49 = vld [vmem:[#allocation7 + $0x950] sm:$0xff] }
 0x1f3   : > { %8902 = vmatprep.subr.bf16.mxu1 %v8901_v17  ;;  %v8931_v59 = vpack.c.bf16 %v1539_v49, %v1531_v48  ;;  %v1593_v49 = vld [vmem:[#allocation7 + $0xb00] sm:$0xff] }
 0x1f4   : > { %8776 = vmatpush1.bf16.msra.mxu0 %v8775_v62  ;;  %v867_v62 = vlaneseq }
 0x1f5   : > { %8778 = vmatprep.subr.bf16.mxu0 %v8777_v63 }
 0x1f6   : > { %8904 = vmatpush1.bf16.msra.mxu1 %v8903_v26  ;;  %v11949_v63 = vshrl.u32 %v867_v62, 7 }
 0x1f7   : > { %8906 = vmatprep.subr.bf16.mxu1 %v8905_v27  ;;  %v8797_v27 = vpack.c.bf16 %v1522_v14, %v1514_v12 }
 0x1f8   : > { %8780 = vmatpush1.bf16.msra.mxu0 %v8779_v10  ;;  %v11952_v0 = vsub.s32 0, %v11949_v63  ;;  %v11957_v2 = vsub.s32 1, %v11949_v63  ;;  %v1499_v10 = vld [vmem:[#allocation7 + $0x810] sm:$0xff] }
 0x1f9   : > { %8782 = vmatprep.subr.bf16.mxu0 %v8781_v11  ;;  %v1507_v11 = vld [vmem:[#allocation7 + $0x850] sm:$0xff] }
 0x1fa   : > { %8908 = vmatpush1.bf16.msra.mxu1 %v8907_v33  ;;  %v870_v3 = vrot.slane %v11954_v1, %v11952_v0  ;;  %v874_v4 = vrot.slane %v11954_v1, %v11957_v2  ;;  %v8923_v20 = vpack.c.bf16 %v1507_v11, %v1499_v10  ;;  %v1538_v33 = vld [vmem:[#allocation7 + $0x948] sm:$0xff]  ;;  %v1564_v10 = vld [vmem:[#allocation7 + $0xa18] sm:$0xff] }
 0x1fb   : > { %8910 = vmatprep.subr.bf16.mxu1 %v8909_v34  ;;  %v1532_v34 = vld [vmem:[#allocation7 + $0x918] sm:$0xff]  ;;  %v8801_v46 = vpack.c.bf16 %v1538_v33, %v1530_v31 }
 0x1fc   : > { %8784 = vmatpush1.bf16.msra.mxu0 %v8783_v22  ;;  %v1521_v22 = vld [vmem:[#allocation7 + $0x8c0] sm:$0xff]  ;;  %v1572_v11 = vld [vmem:[#allocation7 + $0xa58] sm:$0xff] }
 0x1fd   : > { %8786 = vmatprep.subr.bf16.mxu0 %v8785_v23  ;;  %v881_v23 = vsub.s32 3, %v11949_v63  ;;  %v8799_v38 = vpack.c.bf16 %v1521_v22, %v1513_v21  ;;  %v8937_v21 = vpack.c.bf16 %v1572_v11, %v1564_v10  ;;  %v1563_v22 = vld [vmem:[#allocation7 + $0xa10] sm:$0xff]  ;;  %v1626_v10 = vld [vmem:[#allocation7 + $0xc08] sm:$0xff] }
 0x1fe   : > { %8912 = vmatpush1.bf16.msra.mxu1 %v8911_v39  ;;  %v8927_v39 = vpack.c.bf16 %v1523_v30, %v1515_v29  ;;  %v1588_v29 = vld [vmem:[#allocation7 + $0xad8] sm:$0xff]  ;;  %v1634_v11 = vld [vmem:[#allocation7 + $0xc48] sm:$0xff] }
 0x1ff   : > { %8914 = vmatprep.subr.bf16.mxu1 %v8913_v40  ;;  %v1529_v40 = vld [vmem:[#allocation7 + $0x900] sm:$0xff]  ;;  %v11977_v42 = vrot.slane %v11954_v1, %v881_v23 }
 0x200   : > { %8788 = vmatpush1.bf16.msra.mxu0 %v8787_v32 }
 0x201   : > { %8790 = vmatprep.subr.bf16.mxu0 %v8789_v47  ;;  %v8929_v47 = vpack.c.bf16 %v1540_v35, %v1532_v34  ;;  %v1577_v34 = vld [vmem:[#allocation7 + $0xa80] sm:$0xff] }
 0x202   : > { %8916 = vmatpush1.bf16.msra.mxu1 %v8915_v43  ;;  %v1585_v35 = vld [vmem:[#allocation7 + $0xac0] sm:$0xff] }
 0x203   : > { %8918 = vmatprep.subr.bf16.mxu1 %v8917_v51 }
 0x204   : > { %8792 = vmatpush1.bf16.msra.mxu0 %v8791_v52  ;;  %v1554_v52 = vld [vmem:[#allocation7 + $0x9c8] sm:$0xff] }
 0x205   : > { %8794 = vmatprep.subr.bf16.mxu0 %v8793_v58  ;;  %v8803_v58 = vpack.c.bf16 %v1537_v41, %v1529_v40  ;;  %v1587_v40 = vld [vmem:[#allocation7 + $0xad0] sm:$0xff]  ;;  %v1594_v41 = vld [vmem:[#allocation7 + $0xb08] sm:$0xff] }
 0x206   : > { %8920 = vmatpush1.bf16.msra.mxu1 %v8919_v55 }
 0x207   : > { %8922 = vmatprep.subr.bf16.mxu1 %v8921_v61  ;;  %v1553_v61 = vld [vmem:[#allocation7 + $0x9c0] sm:$0xff] }
 0x208   : > { %v8807_v15 = vpack.c.bf16 %v1553_v61, %v1545_v60  ;;  %v1620_v60 = vld [vmem:[#allocation7 + $0xbd8] sm:$0xff] }
 0x29a   : > { %v1046_v5 = vpop.f32.mrb[0].mxu0 }
 0x29b   : > { %v10569_v8 = vadd.f32 %v1046_v5, %v870_v3  ;;  %v1048_v9 = vpop.f32.mrb[1].mxu0  ;;  %v8933_v5 = vpack.c.bf16 %v1556_v54, %v1548_v53  ;;  %v1595_v53 = vld [vmem:[#allocation7 + $0xb10] sm:$0xff] }
 0x29c   : > { %v10570_v13 = vadd.f32 %v1048_v9, %v874_v4  ;;  %v11983_v55 = vpop.f32.mrb[0].mxu1  ;;  %v1570_v9 = vld [vmem:[#allocation7 + $0xa48] sm:$0xff]  ;;  %v1603_v54 = vld [vmem:[#allocation7 + $0xb50] sm:$0xff] }
 0x29d   : > { %v11966_v24 = vmax.f32 %v10569_v8, 0.0  ;;  %v1214_v56 = vpop.f32.mrb[1].mxu1  ;;  %v1562_v8 = vld [vmem:[#allocation7 + $0xa08] sm:$0xff] }
 0x29e   : > { %v11963_v17 = vmax.f32 %v10570_v13, 0.0  ;;  %v1052_v18 = vpop.f32.mrb[2].mxu0  ;;  %v10576_v62 = vadd.f32 %v1214_v56, %v11977_v42  ;;  %v1610_v56 = vld [vmem:[#allocation7 + $0xb88] sm:$0xff] }
 0x29f   : > { %v10571_v25 = vadd.f32 %v1052_v18, %v870_v3  ;;  %v1054_v26 = vpop.f32.mrb[3].mxu0  ;;  %v1561_v18 = vld [vmem:[#allocation7 + $0xa00] sm:$0xff] }
 0x2a0   : > { %v10572_v32 = vadd.f32 %v1054_v26, %v874_v4  ;;  %1859 = vmatprep.mubr.f32.mxu0 %v11963_v17  ;;  %2025 = vmatprep.mubr.f32.mxu1 %v11963_v17  ;;  %v11994_v12 = vmax.f32 %v10576_v62, 0.0  ;;  %v11996_v13 = vpop.f32.mrb[2].mxu1  ;;  %v1578_v26 = vld [vmem:[#allocation7 + $0xa88] sm:$0xff]  ;;  %v8947_v62 = vpack.c.bf16 %v1603_v54, %v1595_v53 }
 0x2a1   : > { %1860 = vmatmul.mubr.f32.vlgmr.msra.gmra.mrb[6].mxu0 %v11966_v24  ;;  %2026 = vmatmul.mubr.f32.vlgmr.msra.gmra.mrb[6].mxu1 %v11966_v24  ;;  %v11979_v43 = vmax.f32 %v10571_v25, 0.0  ;;  %v12000_v14 = vpop.f32.mrb[3].mxu1  ;;  %v1571_v25 = vld [vmem:[#allocation7 + $0xa50] sm:$0xff] }
 0x2a2   : > { %v11972_v36 = vmax.f32 %v10572_v32, 0.0  ;;  %8796 = vmatpush1.bf16.msra.mxu0 %v8795_v19  ;;  %8924 = vmatpush1.bf16.msra.mxu1 %v8923_v20  ;;  %v1058_v37 = vpop.f32.mrb[4].mxu0  ;;  %v1569_v19 = vld [vmem:[#allocation7 + $0xa40] sm:$0xff]  ;;  %v8809_v20 = vpack.c.bf16 %v1570_v9, %v1562_v8  ;;  %v8939_v33 = vpack.c.bf16 %v1571_v25, %v1563_v22  ;;  %v1611_v8 = vld [vmem:[#allocation7 + $0xb90] sm:$0xff]  ;;  %v8825_v22 = vpack.c.bf16 %v1634_v11, %v1626_v10 }
 0x2a3   : > { %v10573_v44 = vadd.f32 %v1058_v37, %v870_v3  ;;  %v1060_v45 = vpop.f32.mrb[5].mxu0  ;;  %8798 = vmatprep.subr.bf16.mxu0 %v8797_v27  ;;  %8926 = vmatprep.subr.bf16.mxu1 %v8925_v28  ;;  %v1586_v27 = vld [vmem:[#allocation7 + $0xac8] sm:$0xff]  ;;  %v1580_v28 = vld [vmem:[#allocation7 + $0xa98] sm:$0xff]  ;;  %v8811_v32 = vpack.c.bf16 %v1569_v19, %v1561_v18  ;;  %v1619_v9 = vld [vmem:[#allocation7 + $0xbd0] sm:$0xff] }
 0x2a4   : > { %v10574_v51 = vadd.f32 %v1060_v45, %v874_v4  ;;  %1865 = vmatprep.mubr.f32.mxu0 %v11972_v36  ;;  %2031 = vmatprep.mubr.f32.mxu1 %v11972_v36  ;;  %v8805_v4 = vpack.c.bf16 %v1554_v52, %v1546_v50  ;;  %v12004_v30 = vpop.f32.mrb[4].mxu1  ;;  %v8813_v37 = vpack.c.bf16 %v1586_v27, %v1578_v26  ;;  %v1596_v45 = vld [vmem:[#allocation7 + $0xb18] sm:$0xff]  ;;  %v1601_v50 = vld [vmem:[#allocation7 + $0xb40] sm:$0xff]  ;;  %v1627_v26 = vld [vmem:[#allocation7 + $0xc10] sm:$0xff] }
 0x2a5   : > { %1866 = vmatmul.mubr.f32.gmra.mrb[8].mxu0 %v11979_v43  ;;  %2032 = vmatmul.mubr.f32.gmra.mrb[8].mxu1 %v11979_v43  ;;  %v11990_v3 = vmax.f32 %v10573_v44, 0.0  ;;  %v12006_v31 = vpop.f32.mrb[5].mxu1  ;;  %v1602_v44 = vld [vmem:[#allocation7 + $0xb48] sm:$0xff]  ;;  %v8819_v61 = vpack.c.bf16 %v1601_v50, %v1593_v49  ;;  %v8951_v19 = vpack.c.bf16 %v1619_v9, %v1611_v8  ;;  %v1635_v27 = vld [vmem:[#allocation7 + $0xc50] sm:$0xff] }
 0x2a6   : > { %v11987_v57 = vmax.f32 %v10574_v51, 0.0  ;;  %8800 = vmatpush1.bf16.msra.mxu0 %v8799_v38  ;;  %8928 = vmatpush1.bf16.msra.mxu1 %v8927_v39  ;;  %v8941_v38 = vpack.c.bf16 %v1588_v29, %v1580_v28  ;;  %v1579_v39 = vld [vmem:[#allocation7 + $0xa90] sm:$0xff]  ;;  %v8817_v51 = vpack.c.bf16 %v1602_v44, %v1594_v41  ;;  %v1642_v28 = vld [vmem:[#allocation7 + $0xc88] sm:$0xff] }
 0x2a7   : > { %8802 = vmatprep.subr.bf16.mxu0 %v8801_v46  ;;  %8930 = vmatprep.subr.bf16.mxu1 %v8929_v47  ;;  %v1604_v46 = vld [vmem:[#allocation7 + $0xb58] sm:$0xff]  ;;  %v8815_v47 = vpack.c.bf16 %v1585_v35, %v1577_v34  ;;  %v8943_v48 = vpack.c.bf16 %v1587_v40, %v1579_v39  ;;  %v1650_v29 = vld [vmem:[#allocation7 + $0xcc8] sm:$0xff]  ;;  %v8955_v35 = vpack.c.bf16 %v1635_v27, %v1627_v26  ;;  %v1643_v41 = vld [vmem:[#allocation7 + $0xc90] sm:$0xff] }
 0x2a8   : > { %1871 = vmatprep.mubr.f32.mxu0 %v11987_v57  ;;  %2037 = vmatprep.mubr.f32.mxu1 %v11987_v57  ;;  %v8945_v52 = vpack.c.bf16 %v1604_v46, %v1596_v45  ;;  %v8829_v39 = vpack.c.bf16 %v1650_v29, %v1642_v28  ;;  %v1651_v44 = vld [vmem:[#allocation7 + $0xcd0] sm:$0xff]  ;;  %v1658_v45 = vld [vmem:[#allocation7 + $0xd08] sm:$0xff] }
 0x2a9   : > { %1872 = vmatmul.mubr.f32.gmra.mrb[10].mxu0 %v11990_v3  ;;  %2038 = vmatmul.mubr.f32.gmra.mrb[10].mxu1 %v11990_v3  ;;  %v1666_v46 = vld [vmem:[#allocation7 + $0xd48] sm:$0xff]  ;;  %v8959_v50 = vpack.c.bf16 %v1651_v44, %v1643_v41  ;;  %v1675_v10 = vld [vmem:[#allocation7 + $0xd90] sm:$0xff] }
 0x2aa   : > { %8804 = vmatpush1.bf16.msra.mxu0 %v8803_v58  ;;  %8932 = vmatpush1.bf16.msra.mxu1 %v8931_v59  ;;  %v1618_v58 = vld [vmem:[#allocation7 + $0xbc8] sm:$0xff]  ;;  %v1612_v59 = vld [vmem:[#allocation7 + $0xb98] sm:$0xff]  ;;  %v8833_v53 = vpack.c.bf16 %v1666_v46, %v1658_v45  ;;  %v1683_v11 = vld [vmem:[#allocation7 + $0xdd0] sm:$0xff] }
 0x2ab   : > { %8806 = vmatprep.subr.bf16.mxu0 %v8805_v4  ;;  %8934 = vmatprep.subr.bf16.mxu1 %v8933_v5  ;;  %v1609_v4 = vld [vmem:[#allocation7 + $0xb80] sm:$0xff]  ;;  %v8821_v6 = vpack.c.bf16 %v1618_v58, %v1610_v56  ;;  %v8949_v7 = vpack.c.bf16 %v1620_v60, %v1612_v59  ;;  %v1659_v56 = vld [vmem:[#allocation7 + $0xd10] sm:$0xff]  ;;  %v1674_v59 = vld [vmem:[#allocation7 + $0xd88] sm:$0xff] }
 0x2ac   : > { %1942 = vmatprep.mubr.f32.mxu0 %v11994_v12  ;;  %2108 = vmatprep.mubr.f32.mxu1 %v11994_v12  ;;  %v1617_v5 = vld [vmem:[#allocation7 + $0xbc0] sm:$0xff]  ;;  %v1667_v58 = vld [vmem:[#allocation7 + $0xd50] sm:$0xff]  ;;  %v1682_v60 = vld [vmem:[#allocation7 + $0xdc8] sm:$0xff] }
 0x2ad   : > { %v8823_v18 = vpack.c.bf16 %v1617_v5, %v1609_v4  ;;  %v8963_v5 = vpack.c.bf16 %v1667_v58, %v1659_v56  ;;  %v8837_v8 = vpack.c.bf16 %v1682_v60, %v1674_v59  ;;  %v1691_v28 = vld [vmem:[#allocation7 + $0xe10] sm:$0xff]  ;;  %v12009_v56 = vsub.s32 2, %v11949_v63 }
 0x2ae   : > { %8808 = vmatpush1.bf16.msra.mxu0 %v8807_v15  ;;  %8936 = vmatpush1.bf16.msra.mxu1 %v8935_v16  ;;  %v1628_v15 = vld [vmem:[#allocation7 + $0xc18] sm:$0xff]  ;;  %v1699_v29 = vld [vmem:[#allocation7 + $0xe50] sm:$0xff] }
 0x2af   : > { %8810 = vmatprep.subr.bf16.mxu0 %v8809_v20  ;;  %8938 = vmatprep.subr.bf16.mxu1 %v8937_v21  ;;  %v1636_v16 = vld [vmem:[#allocation7 + $0xc58] sm:$0xff]  ;;  %v1625_v20 = vld [vmem:[#allocation7 + $0xc00] sm:$0xff]  ;;  %v1707_v45 = vld [vmem:[#allocation7 + $0xe90] sm:$0xff] }
 0x2b0   : > { %v1633_v21 = vld [vmem:[#allocation7 + $0xc40] sm:$0xff]  ;;  %v8953_v25 = vpack.c.bf16 %v1636_v16, %v1628_v15  ;;  %v1690_v15 = vld [vmem:[#allocation7 + $0xe08] sm:$0xff]  ;;  %v1715_v46 = vld [vmem:[#allocation7 + $0xed0] sm:$0xff] }
 0x2b1   : > { %v8827_v34 = vpack.c.bf16 %v1633_v21, %v1625_v20  ;;  %v1698_v16 = vld [vmem:[#allocation7 + $0xe48] sm:$0xff]  ;;  %v8967_v21 = vpack.c.bf16 %v1683_v11, %v1675_v10  ;;  %v1723_v60 = vld [vmem:[#allocation7 + $0xf10] sm:$0xff]  ;;  %v1745_v10 = vld [vmem:[#allocation7 + $0xfc0] sm:$0xff]  ;;  %v878_v11 = vrot.slane %v11954_v1, %v12009_v56 }
 0x2b2   : > { %8812 = vmatpush1.bf16.msra.mxu0 %v8811_v32  ;;  %8940 = vmatpush1.bf16.msra.mxu1 %v8939_v33  ;;  %v1644_v32 = vld [vmem:[#allocation7 + $0xc98] sm:$0xff]  ;;  %v8841_v26 = vpack.c.bf16 %v1698_v16, %v1690_v15 }
 0x2b3   : > { %8814 = vmatprep.subr.bf16.mxu0 %v8813_v37  ;;  %8942 = vmatprep.subr.bf16.mxu1 %v8941_v38  ;;  %v1652_v33 = vld [vmem:[#allocation7 + $0xcd8] sm:$0xff]  ;;  %v1641_v37 = vld [vmem:[#allocation7 + $0xc80] sm:$0xff] }
 0x2b4   : > { %v1649_v38 = vld [vmem:[#allocation7 + $0xcc0] sm:$0xff]  ;;  %v8957_v40 = vpack.c.bf16 %v1652_v33, %v1644_v32  ;;  %v1706_v32 = vld [vmem:[#allocation7 + $0xe88] sm:$0xff] }
 0x2b5   : > { %v8831_v49 = vpack.c.bf16 %v1649_v38, %v1641_v37  ;;  %v1714_v33 = vld [vmem:[#allocation7 + $0xec8] sm:$0xff]  ;;  %v8971_v38 = vpack.c.bf16 %v1699_v29, %v1691_v28  ;;  %v10575_v28 = vadd.f32 %v11983_v55, %v878_v11  ;;  %v10577_v55 = vadd.f32 %v11996_v13, %v878_v11 }
 0x2b6   : > { %8816 = vmatpush1.bf16.msra.mxu0 %v8815_v47  ;;  %8944 = vmatpush1.bf16.msra.mxu1 %v8943_v48  ;;  %v1660_v47 = vld [vmem:[#allocation7 + $0xd18] sm:$0xff]  ;;  %v8845_v41 = vpack.c.bf16 %v1714_v33, %v1706_v32  ;;  %v1245_v32 = vld [vmem:[#allocation7 + $0x20] sm:$0xff]  ;;  %v1286_v13 = vld [vmem:[#allocation7 + $0x168] sm:$0xff] }
 0x2b7   : > { %8818 = vmatprep.subr.bf16.mxu0 %v8817_v51  ;;  %8946 = vmatprep.subr.bf16.mxu1 %v8945_v52  ;;  %v1668_v48 = vld [vmem:[#allocation7 + $0xd58] sm:$0xff]  ;;  %v1657_v51 = vld [vmem:[#allocation7 + $0xd00] sm:$0xff] }
 0x2b8   : > { %v1665_v52 = vld [vmem:[#allocation7 + $0xd40] sm:$0xff]  ;;  %v8961_v54 = vpack.c.bf16 %v1668_v48, %v1660_v47  ;;  %v1722_v47 = vld [vmem:[#allocation7 + $0xf08] sm:$0xff] }
 0x2b9   : > { %v8835_v4 = vpack.c.bf16 %v1665_v52, %v1657_v51  ;;  %v1730_v48 = vld [vmem:[#allocation7 + $0xf48] sm:$0xff]  ;;  %v8975_v52 = vpack.c.bf16 %v1715_v46, %v1707_v45  ;;  %v1253_v33 = vld [vmem:[#allocation7 + $0x60] sm:$0xff] }
 0x2ba   : > { %8820 = vmatpush1.bf16.msra.mxu0 %v8819_v61  ;;  %8948 = vmatpush1.bf16.msra.mxu1 %v8947_v62  ;;  %v1676_v61 = vld [vmem:[#allocation7 + $0xd98] sm:$0xff]  ;;  %v8849_v58 = vpack.c.bf16 %v1730_v48, %v1722_v47  ;;  %v8987_v45 = vpack.c.bf16 %v1253_v33, %v1245_v32  ;;  %v1261_v47 = vld [vmem:[#allocation7 + $0xa0] sm:$0xff] }
 0x2bb   : > { %8822 = vmatprep.subr.bf16.mxu0 %v8821_v6  ;;  %8950 = vmatprep.subr.bf16.mxu1 %v8949_v7  ;;  %v1684_v62 = vld [vmem:[#allocation7 + $0xdd8] sm:$0xff]  ;;  %v1673_v6 = vld [vmem:[#allocation7 + $0xd80] sm:$0xff] }
 0x2bc   : > { %v1681_v7 = vld [vmem:[#allocation7 + $0xdc0] sm:$0xff]  ;;  %v8965_v9 = vpack.c.bf16 %v1684_v62, %v1676_v61  ;;  %v1731_v61 = vld [vmem:[#allocation7 + $0xf50] sm:$0xff]  ;;  %v1738_v62 = vld [vmem:[#allocation7 + $0xf88] sm:$0xff] }
 0x2bd   : > { %v8839_v20 = vpack.c.bf16 %v1681_v7, %v1673_v6  ;;  %v1748_v6 = vld [vmem:[#allocation7 + $0xfd8] sm:$0xff]  ;;  %v1269_v48 = vld [vmem:[#allocation7 + $0xe0] sm:$0xff] }
 0x2be   : > { %8824 = vmatpush1.bf16.msra.mxu0 %v8823_v18  ;;  %8952 = vmatpush1.bf16.msra.mxu1 %v8951_v19  ;;  %v1692_v18 = vld [vmem:[#allocation7 + $0xe18] sm:$0xff] }
 0x2bf   : > { %8826 = vmatprep.subr.bf16.mxu0 %v8825_v22  ;;  %8954 = vmatprep.subr.bf16.mxu1 %v8953_v25  ;;  %v1700_v19 = vld [vmem:[#allocation7 + $0xe58] sm:$0xff]  ;;  %v1689_v22 = vld [vmem:[#allocation7 + $0xe00] sm:$0xff] }
 0x2c0   : > { %v1697_v25 = vld [vmem:[#allocation7 + $0xe40] sm:$0xff]  ;;  %v8969_v27 = vpack.c.bf16 %v1700_v19, %v1692_v18  ;;  %v1739_v18 = vld [vmem:[#allocation7 + $0xf90] sm:$0xff]  ;;  %v1320_v32 = vld [vmem:[#allocation7 + $0x278] sm:$0xff] }
 0x2c1   : > { %v8843_v37 = vpack.c.bf16 %v1697_v25, %v1689_v22  ;;  %v1747_v19 = vld [vmem:[#allocation7 + $0xfd0] sm:$0xff]  ;;  %v1248_v22 = vld [vmem:[#allocation7 + $0x38] sm:$0xff] }
 0x2c2   : > { %8828 = vmatpush1.bf16.msra.mxu0 %v8827_v34  ;;  %8956 = vmatpush1.bf16.msra.mxu1 %v8955_v35  ;;  %v1708_v34 = vld [vmem:[#allocation7 + $0xe98] sm:$0xff] }
 0x2c3   : > { %8830 = vmatprep.subr.bf16.mxu0 %v8829_v39  ;;  %8958 = vmatprep.subr.bf16.mxu1 %v8957_v40  ;;  %v1716_v35 = vld [vmem:[#allocation7 + $0xed8] sm:$0xff]  ;;  %v1705_v39 = vld [vmem:[#allocation7 + $0xe80] sm:$0xff] }
 0x2c4   : > { %v1713_v40 = vld [vmem:[#allocation7 + $0xec0] sm:$0xff]  ;;  %v8973_v44 = vpack.c.bf16 %v1716_v35, %v1708_v34  ;;  %v1256_v25 = vld [vmem:[#allocation7 + $0x78] sm:$0xff]  ;;  %v10578_v34 = vadd.f32 %v12000_v14, %v11977_v42  ;;  %v1247_v35 = vld [vmem:[#allocation7 + $0x30] sm:$0xff]  ;;  %v10580_v14 = vadd.f32 %v12006_v31, %v11977_v42  ;;  %v10579_v42 = vadd.f32 %v12004_v30, %v878_v11 }
 0x2c5   : > { %v8847_v51 = vpack.c.bf16 %v1713_v40, %v1705_v39  ;;  %v9113_v1 = vpack.c.bf16 %v1256_v25, %v1248_v22  ;;  %v1270_v39 = vld [vmem:[#allocation7 + $0xe8] sm:$0xff]  ;;  %v1264_v40 = vld [vmem:[#allocation7 + $0xb8] sm:$0xff]  ;;  %v8991_v31 = vpack.c.bf16 %v1269_v48, %v1261_v47 }
 0x2c6   : > { %8832 = vmatpush1.bf16.msra.mxu0 %v8831_v49  ;;  %8960 = vmatpush1.bf16.msra.mxu1 %v8959_v50  ;;  %v1724_v49 = vld [vmem:[#allocation7 + $0xf18] sm:$0xff]  ;;  %v1302_v30 = vld [vmem:[#allocation7 + $0x1e8] sm:$0xff] }
 0x2c7   : > { %8834 = vmatprep.subr.bf16.mxu0 %v8833_v53  ;;  %8962 = vmatprep.subr.bf16.mxu1 %v8961_v54  ;;  %v1732_v50 = vld [vmem:[#allocation7 + $0xf58] sm:$0xff]  ;;  %v1721_v53 = vld [vmem:[#allocation7 + $0xf00] sm:$0xff] }
 0x2c8   : > { %v1729_v54 = vld [vmem:[#allocation7 + $0xf40] sm:$0xff]  ;;  %v8977_v59 = vpack.c.bf16 %v1732_v50, %v1724_v49  ;;  %v12019_v49 = vmax.f32 %v10578_v34, 0.0  ;;  %v1296_v11 = vld [vmem:[#allocation7 + $0x1b8] sm:$0xff] }
 0x2c9   : > { %v8851_v7 = vpack.c.bf16 %v1729_v54, %v1721_v53  ;;  %v1271_v53 = vld [vmem:[#allocation7 + $0xf0] sm:$0xff]  ;;  %v1278_v54 = vld [vmem:[#allocation7 + $0x128] sm:$0xff]  ;;  %v1336_v47 = vld [vmem:[#allocation7 + $0x2f8] sm:$0xff] }
 0x2ca   : > { %8836 = vmatpush1.bf16.msra.mxu0 %v8835_v4  ;;  %8964 = vmatpush1.bf16.msra.mxu1 %v8963_v5  ;;  %v1746_v4 = vld [vmem:[#allocation7 + $0xfc8] sm:$0xff]  ;;  %v1740_v5 = vld [vmem:[#allocation7 + $0xf98] sm:$0xff] }
 0x2cb   : > { %8838 = vmatprep.subr.bf16.mxu0 %v8837_v8  ;;  %8966 = vmatprep.subr.bf16.mxu1 %v8965_v9  ;;  %v8979_v8 = vpack.c.bf16 %v1731_v61, %v1723_v60  ;;  %v1737_v9 = vld [vmem:[#allocation7 + $0xf80] sm:$0xff]  ;;  %v8853_v15 = vpack.c.bf16 %v1746_v4, %v1738_v62  ;;  %v8981_v16 = vpack.c.bf16 %v1748_v6, %v1740_v5  ;;  %v12027_v60 = vmax.f32 %v10577_v55, 0.0  ;;  %v1326_v55 = vld [vmem:[#allocation7 + $0x2a8] sm:$0xff] }
 0x2cc   : > { %v1277_v62 = vld [vmem:[#allocation7 + $0x120] sm:$0xff]  ;;  %v12030_v5 = vmax.f32 %v10580_v14, 0.0  ;;  %v8993_v6 = vpack.c.bf16 %v1286_v13, %v1278_v54  ;;  %v1335_v54 = vld [vmem:[#allocation7 + $0x2f0] sm:$0xff]  ;;  %v1342_v13 = vld [vmem:[#allocation7 + $0x328] sm:$0xff] }
 0x2cd   : > { %v1285_v4 = vld [vmem:[#allocation7 + $0x160] sm:$0xff] }
 0x2ce   : > { %8840 = vmatpush1.bf16.msra.mxu0 %v8839_v20  ;;  %8968 = vmatpush1.bf16.msra.mxu1 %v8967_v21  ;;  %v1246_v20 = vld [vmem:[#allocation7 + $0x28] sm:$0xff]  ;;  %v1325_v14 = vld [vmem:[#allocation7 + $0x2a0] sm:$0xff] }
 0x2cf   : > { %8842 = vmatprep.subr.bf16.mxu0 %v8841_v26  ;;  %8970 = vmatprep.subr.bf16.mxu1 %v8969_v27  ;;  %v1254_v21 = vld [vmem:[#allocation7 + $0x68] sm:$0xff]  ;;  %v8855_v26 = vpack.c.bf16 %v1745_v10, %v1737_v9  ;;  %v8983_v27 = vpack.c.bf16 %v1747_v19, %v1739_v18  ;;  %v1287_v9 = vld [vmem:[#allocation7 + $0x170] sm:$0xff]  ;;  %v8995_v18 = vpack.c.bf16 %v1285_v4, %v1277_v62  ;;  %v1341_v62 = vld [vmem:[#allocation7 + $0x320] sm:$0xff] }
 0x2d0   : > { %v8985_v29 = vpack.c.bf16 %v1254_v21, %v1246_v20  ;;  %v1294_v10 = vld [vmem:[#allocation7 + $0x1a8] sm:$0xff]  ;;  %v1293_v20 = vld [vmem:[#allocation7 + $0x1a0] sm:$0xff] }
 0x2d1   : > { %v1301_v21 = vld [vmem:[#allocation7 + $0x1e0] sm:$0xff]  ;;  %v8997_v22 = vpack.c.bf16 %v1302_v30, %v1294_v10  ;;  %v1358_v10 = vld [vmem:[#allocation7 + $0x3a8] sm:$0xff] }
 0x2d2   : > { %8844 = vmatpush1.bf16.msra.mxu0 %v8843_v37  ;;  %8972 = vmatpush1.bf16.msra.mxu1 %v8971_v38  ;;  %v1255_v37 = vld [vmem:[#allocation7 + $0x70] sm:$0xff]  ;;  %v1262_v38 = vld [vmem:[#allocation7 + $0xa8] sm:$0xff]  ;;  %v8999_v33 = vpack.c.bf16 %v1301_v21, %v1293_v20  ;;  %v1349_v4 = vld [vmem:[#allocation7 + $0x360] sm:$0xff] }
 0x2d3   : > { %8846 = vmatprep.subr.bf16.mxu0 %v8845_v41  ;;  %8974 = vmatprep.subr.bf16.mxu1 %v8973_v44  ;;  %v1272_v41 = vld [vmem:[#allocation7 + $0xf8] sm:$0xff]  ;;  %v12016_v44 = vmax.f32 %v10575_v28, 0.0  ;;  %v9115_v46 = vpack.c.bf16 %v1255_v37, %v1247_v35  ;;  %v8989_v50 = vpack.c.bf16 %v1270_v39, %v1262_v38  ;;  %v1310_v28 = vld [vmem:[#allocation7 + $0x228] sm:$0xff]  ;;  %v1309_v35 = vld [vmem:[#allocation7 + $0x220] sm:$0xff] }
 0x2d4   : > { %v1317_v37 = vld [vmem:[#allocation7 + $0x260] sm:$0xff]  ;;  %v1366_v30 = vld [vmem:[#allocation7 + $0x3e8] sm:$0xff] }
 0x2d5   : > { %v9003_v48 = vpack.c.bf16 %v1317_v37, %v1309_v35  ;;  %v1357_v20 = vld [vmem:[#allocation7 + $0x3a0] sm:$0xff] }
 0x2d6   : > { %8848 = vmatpush1.bf16.msra.mxu0 %v8847_v51  ;;  %8976 = vmatpush1.bf16.msra.mxu1 %v8975_v52  ;;  %v9117_v51 = vpack.c.bf16 %v1272_v41, %v1264_v40  ;;  %v1263_v52 = vld [vmem:[#allocation7 + $0xb0] sm:$0xff]  ;;  %v1365_v21 = vld [vmem:[#allocation7 + $0x3e0] sm:$0xff] }
 0x2d7   : > { %8850 = vmatprep.subr.bf16.mxu0 %v8849_v58  ;;  %8978 = vmatprep.subr.bf16.mxu1 %v8977_v59  ;;  %v1280_v58 = vld [vmem:[#allocation7 + $0x138] sm:$0xff]  ;;  %v9119_v61 = vpack.c.bf16 %v1271_v53, %v1263_v52  ;;  %v1311_v40 = vld [vmem:[#allocation7 + $0x230] sm:$0xff]  ;;  %v1373_v35 = vld [vmem:[#allocation7 + $0x420] sm:$0xff] }
 0x2d8   : > { %v1288_v59 = vld [vmem:[#allocation7 + $0x178] sm:$0xff]  ;;  %v1319_v41 = vld [vmem:[#allocation7 + $0x270] sm:$0xff]  ;;  %v1381_v37 = vld [vmem:[#allocation7 + $0x460] sm:$0xff] }
 0x2d9   : > { %v1327_v53 = vld [vmem:[#allocation7 + $0x2b0] sm:$0xff] }
 0x2da   : > { %8852 = vmatpush1.bf16.msra.mxu0 %v8851_v7  ;;  %8980 = vmatpush1.bf16.msra.mxu1 %v8979_v8  ;;  %v9121_v7 = vpack.c.bf16 %v1288_v59, %v1280_v58  ;;  %v1279_v8 = vld [vmem:[#allocation7 + $0x130] sm:$0xff]  ;;  %v1350_v58 = vld [vmem:[#allocation7 + $0x368] sm:$0xff]  ;;  %v1344_v59 = vld [vmem:[#allocation7 + $0x338] sm:$0xff] }
 0x2db   : > { %8854 = vmatprep.subr.bf16.mxu0 %v8853_v15  ;;  %8982 = vmatprep.subr.bf16.mxu1 %v8981_v16  ;;  %v1304_v15 = vld [vmem:[#allocation7 + $0x1f8] sm:$0xff]  ;;  %v12036_v16 = vmax.f32 %v10579_v42, 0.0  ;;  %v9123_v19 = vpack.c.bf16 %v1287_v9, %v1279_v8  ;;  %v1343_v8 = vld [vmem:[#allocation7 + $0x330] sm:$0xff] }
 0x2dc   : > { %v9125_v25 = vpack.c.bf16 %v1304_v15, %v1296_v11  ;;  %v1352_v42 = vld [vmem:[#allocation7 + $0x378] sm:$0xff]  ;;  %v1351_v9 = vld [vmem:[#allocation7 + $0x370] sm:$0xff] }
 0x2dd   : > { %v1360_v11 = vld [vmem:[#allocation7 + $0x3b8] sm:$0xff] }
 0x2de   : > { %8856 = vmatpush1.bf16.msra.mxu0 %v8855_v26  ;;  %8984 = vmatpush1.bf16.msra.mxu1 %v8983_v27  ;;  %v1295_v26 = vld [vmem:[#allocation7 + $0x1b0] sm:$0xff]  ;;  %v1368_v15 = vld [vmem:[#allocation7 + $0x3f8] sm:$0xff] }
 0x2df   : > { %8986 = vmatprep.subr.bf16.mxu0 %v8985_v29  ;;  %9114 = vmatprep.subr.bf16.mxu1 %v9113_v1  ;;  %v1303_v27 = vld [vmem:[#allocation7 + $0x1f0] sm:$0xff]  ;;  %v1318_v29 = vld [vmem:[#allocation7 + $0x268] sm:$0xff]  ;;  %v1312_v1 = vld [vmem:[#allocation7 + $0x238] sm:$0xff] }
 0x2e0   : > { %v9127_v34 = vpack.c.bf16 %v1303_v27, %v1295_v26  ;;  %v9001_v38 = vpack.c.bf16 %v1318_v29, %v1310_v28  ;;  %v9129_v39 = vpack.c.bf16 %v1320_v32, %v1312_v1  ;;  %v1359_v26 = vld [vmem:[#allocation7 + $0x3b0] sm:$0xff]  ;;  %v1374_v28 = vld [vmem:[#allocation7 + $0x428] sm:$0xff]  ;;  %v1376_v1 = vld [vmem:[#allocation7 + $0x438] sm:$0xff] }
 0x2e1   : > { %1943 = vmatmul.mubr.f32.vlgmr.msra.gmra.mrb[6].mxu0 %v12016_v44  ;;  %2109 = vmatmul.mubr.f32.vlgmr.msra.gmra.mrb[6].mxu1 %v12016_v44  ;;  %v1367_v27 = vld [vmem:[#allocation7 + $0x3f0] sm:$0xff]  ;;  %v1382_v29 = vld [vmem:[#allocation7 + $0x468] sm:$0xff]  ;;  %v1384_v32 = vld [vmem:[#allocation7 + $0x478] sm:$0xff] }
 0x2e2   : > { %1948 = vmatprep.mubr.f32.mxu0 %v12019_v49  ;;  %2114 = vmatprep.mubr.f32.mxu1 %v12019_v49 }
 0x2e3   : > { %8988 = vmatpush1.bf16.msra.mxu0 %v8987_v45  ;;  %9116 = vmatpush1.bf16.msra.mxu1 %v9115_v46  ;;  %v1334_v45 = vld [vmem:[#allocation7 + $0x2e8] sm:$0xff]  ;;  %v1328_v46 = vld [vmem:[#allocation7 + $0x2b8] sm:$0xff] }
 0x2e4   : > { %8990 = vmatprep.subr.bf16.mxu0 %v8989_v50  ;;  %9118 = vmatprep.subr.bf16.mxu1 %v9117_v51  ;;  %v1333_v50 = vld [vmem:[#allocation7 + $0x2e0] sm:$0xff]  ;;  %v9005_v51 = vpack.c.bf16 %v1334_v45, %v1326_v55  ;;  %v9133_v52 = vpack.c.bf16 %v1336_v47, %v1328_v46  ;;  %v1390_v55 = vld [vmem:[#allocation7 + $0x4a8] sm:$0xff]  ;;  %v1392_v46 = vld [vmem:[#allocation7 + $0x4b8] sm:$0xff] }
 0x2e5   : > { %1949 = vmatmul.mubr.f32.gmra.mrb[8].mxu0 %v12027_v60  ;;  %2115 = vmatmul.mubr.f32.gmra.mrb[8].mxu1 %v12027_v60  ;;  %v1398_v45 = vld [vmem:[#allocation7 + $0x4e8] sm:$0xff]  ;;  %v1400_v47 = vld [vmem:[#allocation7 + $0x4f8] sm:$0xff] }
 0x2e6   : > { %1954 = vmatprep.mubr.f32.mxu0 %v12030_v5  ;;  %2120 = vmatprep.mubr.f32.mxu1 %v12030_v5 }
 0x2e7   : > { %8992 = vmatpush1.bf16.msra.mxu0 %v8991_v31  ;;  %9120 = vmatpush1.bf16.msra.mxu1 %v9119_v61  ;;  %v9007_v31 = vpack.c.bf16 %v1333_v50, %v1325_v14  ;;  %v9135_v61 = vpack.c.bf16 %v1335_v54, %v1327_v53  ;;  %v1389_v14 = vld [vmem:[#allocation7 + $0x4a0] sm:$0xff]  ;;  %v1391_v53 = vld [vmem:[#allocation7 + $0x4b0] sm:$0xff] }
 0x2e8   : > { %8994 = vmatprep.subr.bf16.mxu0 %v8993_v6  ;;  %9122 = vmatprep.subr.bf16.mxu1 %v9121_v7  ;;  %v9009_v6 = vpack.c.bf16 %v1350_v58, %v1342_v13  ;;  %v9137_v7 = vpack.c.bf16 %v1352_v42, %v1344_v59  ;;  %v1397_v50 = vld [vmem:[#allocation7 + $0x4e0] sm:$0xff]  ;;  %v1399_v54 = vld [vmem:[#allocation7 + $0x4f0] sm:$0xff]  ;;  %v1406_v13 = vld [vmem:[#allocation7 + $0x528] sm:$0xff] }
 0x2e9   : > { %1955 = vmatmul.mubr.f32.gmra.mrb[10].mxu0 %v12036_v16  ;;  %2121 = vmatmul.mubr.f32.gmra.mrb[10].mxu1 %v12036_v16  ;;  %v1414_v58 = vld [vmem:[#allocation7 + $0x568] sm:$0xff]  ;;  %v1408_v59 = vld [vmem:[#allocation7 + $0x538] sm:$0xff] }
 0x2ea   : > { %2191 = vmatprep.mubr.f32.mxu0 %v11963_v17  ;;  %2357 = vmatprep.mubr.f32.mxu1 %v11963_v17  ;;  %v9131_v17 = vpack.c.bf16 %v1319_v41, %v1311_v40  ;;  %v1375_v40 = vld [vmem:[#allocation7 + $0x430] sm:$0xff]  ;;  %v1416_v42 = vld [vmem:[#allocation7 + $0x578] sm:$0xff] }
 0x2eb   : > { %8996 = vmatpush1.bf16.msra.mxu0 %v8995_v18  ;;  %9124 = vmatpush1.bf16.msra.mxu1 %v9123_v19  ;;  %v9011_v18 = vpack.c.bf16 %v1349_v4, %v1341_v62  ;;  %v9139_v19 = vpack.c.bf16 %v1351_v9, %v1343_v8  ;;  %v1383_v41 = vld [vmem:[#allocation7 + $0x470] sm:$0xff]  ;;  %v1405_v62 = vld [vmem:[#allocation7 + $0x520] sm:$0xff] }
 0x2ec   : > { %8998 = vmatprep.subr.bf16.mxu0 %v8997_v22  ;;  %9126 = vmatprep.subr.bf16.mxu1 %v9125_v25  ;;  %v9013_v22 = vpack.c.bf16 %v1366_v30, %v1358_v10  ;;  %v9141_v25 = vpack.c.bf16 %v1368_v15, %v1360_v11  ;;  %v1413_v4 = vld [vmem:[#allocation7 + $0x560] sm:$0xff]  ;;  %v1407_v8 = vld [vmem:[#allocation7 + $0x530] sm:$0xff]  ;;  %v1422_v10 = vld [vmem:[#allocation7 + $0x5a8] sm:$0xff] }
 0x2ed   : > { %v1415_v9 = vld [vmem:[#allocation7 + $0x570] sm:$0xff]  ;;  %v1430_v30 = vld [vmem:[#allocation7 + $0x5e8] sm:$0xff]  ;;  %v1424_v11 = vld [vmem:[#allocation7 + $0x5b8] sm:$0xff] }
 0x2ee   : > { %v1432_v15 = vld [vmem:[#allocation7 + $0x5f8] sm:$0xff] }
 0x2ef   : > { %9000 = vmatpush1.bf16.msra.mxu0 %v8999_v33  ;;  %9128 = vmatpush1.bf16.msra.mxu1 %v9127_v34  ;;  %v9015_v33 = vpack.c.bf16 %v1365_v21, %v1357_v20  ;;  %v9143_v34 = vpack.c.bf16 %v1367_v27, %v1359_v26  ;;  %v1421_v20 = vld [vmem:[#allocation7 + $0x5a0] sm:$0xff]  ;;  %v1423_v26 = vld [vmem:[#allocation7 + $0x5b0] sm:$0xff] }
 0x2f0   : > { %9002 = vmatprep.subr.bf16.mxu0 %v9001_v38  ;;  %9130 = vmatprep.subr.bf16.mxu1 %v9129_v39  ;;  %v9017_v38 = vpack.c.bf16 %v1382_v29, %v1374_v28  ;;  %v9145_v39 = vpack.c.bf16 %v1384_v32, %v1376_v1  ;;  %v1429_v21 = vld [vmem:[#allocation7 + $0x5e0] sm:$0xff]  ;;  %v1431_v27 = vld [vmem:[#allocation7 + $0x5f0] sm:$0xff]  ;;  %v1438_v28 = vld [vmem:[#allocation7 + $0x628] sm:$0xff] }
 0x2f1   : > { %v1446_v29 = vld [vmem:[#allocation7 + $0x668] sm:$0xff]  ;;  %v1440_v1 = vld [vmem:[#allocation7 + $0x638] sm:$0xff] }
 0x2f2   : > { %v1448_v32 = vld [vmem:[#allocation7 + $0x678] sm:$0xff] }
 0x2f3   : > { %9004 = vmatpush1.bf16.msra.mxu0 %v9003_v48  ;;  %9132 = vmatpush1.bf16.msra.mxu1 %v9131_v17  ;;  %v9019_v48 = vpack.c.bf16 %v1381_v37, %v1373_v35  ;;  %v9147_v17 = vpack.c.bf16 %v1383_v41, %v1375_v40  ;;  %v1437_v35 = vld [vmem:[#allocation7 + $0x620] sm:$0xff]  ;;  %v1439_v40 = vld [vmem:[#allocation7 + $0x630] sm:$0xff] }
 0x2f4   : > { %9006 = vmatprep.subr.bf16.mxu0 %v9005_v51  ;;  %9134 = vmatprep.subr.bf16.mxu1 %v9133_v52  ;;  %v9021_v51 = vpack.c.bf16 %v1398_v45, %v1390_v55  ;;  %v9149_v52 = vpack.c.bf16 %v1400_v47, %v1392_v46  ;;  %v1445_v37 = vld [vmem:[#allocation7 + $0x660] sm:$0xff]  ;;  %v1447_v41 = vld [vmem:[#allocation7 + $0x670] sm:$0xff]  ;;  %v1454_v55 = vld [vmem:[#allocation7 + $0x6a8] sm:$0xff] }
 0x2f5   : > { %v1462_v45 = vld [vmem:[#allocation7 + $0x6e8] sm:$0xff]  ;;  %v1456_v46 = vld [vmem:[#allocation7 + $0x6b8] sm:$0xff] }
 0x2f6   : > { %v1464_v47 = vld [vmem:[#allocation7 + $0x6f8] sm:$0xff] }
 0x2f7   : > { %9008 = vmatpush1.bf16.msra.mxu0 %v9007_v31  ;;  %9136 = vmatpush1.bf16.msra.mxu1 %v9135_v61  ;;  %v9023_v31 = vpack.c.bf16 %v1397_v50, %v1389_v14  ;;  %v9151_v61 = vpack.c.bf16 %v1399_v54, %v1391_v53  ;;  %v1453_v14 = vld [vmem:[#allocation7 + $0x6a0] sm:$0xff]  ;;  %v1455_v53 = vld [vmem:[#allocation7 + $0x6b0] sm:$0xff] }
 0x2f8   : > { %9010 = vmatprep.subr.bf16.mxu0 %v9009_v6  ;;  %9138 = vmatprep.subr.bf16.mxu1 %v9137_v7  ;;  %v9025_v6 = vpack.c.bf16 %v1414_v58, %v1406_v13  ;;  %v9153_v7 = vpack.c.bf16 %v1416_v42, %v1408_v59  ;;  %v1461_v50 = vld [vmem:[#allocation7 + $0x6e0] sm:$0xff]  ;;  %v1463_v54 = vld [vmem:[#allocation7 + $0x6f0] sm:$0xff]  ;;  %v1470_v13 = vld [vmem:[#allocation7 + $0x728] sm:$0xff] }
 0x2f9   : > { %v1478_v58 = vld [vmem:[#allocation7 + $0x768] sm:$0xff]  ;;  %v1472_v59 = vld [vmem:[#allocation7 + $0x738] sm:$0xff] }
 0x2fa   : > { %v1480_v42 = vld [vmem:[#allocation7 + $0x778] sm:$0xff] }
 0x2fb   : > { %9012 = vmatpush1.bf16.msra.mxu0 %v9011_v18  ;;  %9140 = vmatpush1.bf16.msra.mxu1 %v9139_v19  ;;  %v9027_v18 = vpack.c.bf16 %v1413_v4, %v1405_v62  ;;  %v9155_v19 = vpack.c.bf16 %v1415_v9, %v1407_v8  ;;  %v1469_v62 = vld [vmem:[#allocation7 + $0x720] sm:$0xff]  ;;  %v1471_v8 = vld [vmem:[#allocation7 + $0x730] sm:$0xff] }
 0x2fc   : > { %9014 = vmatprep.subr.bf16.mxu0 %v9013_v22  ;;  %9142 = vmatprep.subr.bf16.mxu1 %v9141_v25  ;;  %v9029_v22 = vpack.c.bf16 %v1430_v30, %v1422_v10  ;;  %v9157_v25 = vpack.c.bf16 %v1432_v15, %v1424_v11  ;;  %v1477_v4 = vld [vmem:[#allocation7 + $0x760] sm:$0xff]  ;;  %v1479_v9 = vld [vmem:[#allocation7 + $0x770] sm:$0xff]  ;;  %v1486_v10 = vld [vmem:[#allocation7 + $0x7a8] sm:$0xff] }
 0x2fd   : > { %v1494_v30 = vld [vmem:[#allocation7 + $0x7e8] sm:$0xff]  ;;  %v1488_v11 = vld [vmem:[#allocation7 + $0x7b8] sm:$0xff] }
 0x2fe   : > { %v1496_v15 = vld [vmem:[#allocation7 + $0x7f8] sm:$0xff] }
 0x2ff   : > { %9016 = vmatpush1.bf16.msra.mxu0 %v9015_v33  ;;  %9144 = vmatpush1.bf16.msra.mxu1 %v9143_v34  ;;  %v9031_v33 = vpack.c.bf16 %v1429_v21, %v1421_v20  ;;  %v9159_v34 = vpack.c.bf16 %v1431_v27, %v1423_v26  ;;  %v1485_v20 = vld [vmem:[#allocation7 + $0x7a0] sm:$0xff]  ;;  %v1487_v26 = vld [vmem:[#allocation7 + $0x7b0] sm:$0xff] }
 0x300   : > { %9018 = vmatprep.subr.bf16.mxu0 %v9017_v38  ;;  %9146 = vmatprep.subr.bf16.mxu1 %v9145_v39  ;;  %v9033_v38 = vpack.c.bf16 %v1446_v29, %v1438_v28  ;;  %v9161_v39 = vpack.c.bf16 %v1448_v32, %v1440_v1  ;;  %v1493_v21 = vld [vmem:[#allocation7 + $0x7e0] sm:$0xff]  ;;  %v1495_v27 = vld [vmem:[#allocation7 + $0x7f0] sm:$0xff]  ;;  %v1502_v28 = vld [vmem:[#allocation7 + $0x828] sm:$0xff] }
 0x301   : > { %v1510_v29 = vld [vmem:[#allocation7 + $0x868] sm:$0xff]  ;;  %v1504_v1 = vld [vmem:[#allocation7 + $0x838] sm:$0xff] }
 0x302   : > { %v1512_v32 = vld [vmem:[#allocation7 + $0x878] sm:$0xff] }
 0x303   : > { %9020 = vmatpush1.bf16.msra.mxu0 %v9019_v48  ;;  %9148 = vmatpush1.bf16.msra.mxu1 %v9147_v17  ;;  %v9035_v48 = vpack.c.bf16 %v1445_v37, %v1437_v35  ;;  %v9163_v17 = vpack.c.bf16 %v1447_v41, %v1439_v40  ;;  %v9049_v35 = vpack.c.bf16 %v1510_v29, %v1502_v28  ;;  %v1503_v40 = vld [vmem:[#allocation7 + $0x830] sm:$0xff]  ;;  %v1576_v28 = vld [vmem:[#allocation7 + $0xa78] sm:$0xff] }
 0x304   : > { %9022 = vmatprep.subr.bf16.mxu0 %v9021_v51  ;;  %9150 = vmatprep.subr.bf16.mxu1 %v9149_v52  ;;  %v9037_v51 = vpack.c.bf16 %v1462_v45, %v1454_v55  ;;  %v9165_v52 = vpack.c.bf16 %v1464_v47, %v1456_v46  ;;  %v9177_v37 = vpack.c.bf16 %v1512_v32, %v1504_v1  ;;  %v1511_v41 = vld [vmem:[#allocation7 + $0x870] sm:$0xff]  ;;  %v1518_v55 = vld [vmem:[#allocation7 + $0x8a8] sm:$0xff]  ;;  %v1520_v46 = vld [vmem:[#allocation7 + $0x8b8] sm:$0xff] }
 0x305   : > { %v1526_v45 = vld [vmem:[#allocation7 + $0x8e8] sm:$0xff]  ;;  %v1528_v47 = vld [vmem:[#allocation7 + $0x8f8] sm:$0xff]  ;;  %v1565_v32 = vld [vmem:[#allocation7 + $0xa20] sm:$0xff] }
 0x307   : > { %9024 = vmatpush1.bf16.msra.mxu0 %v9023_v31  ;;  %9152 = vmatpush1.bf16.msra.mxu1 %v9151_v61  ;;  %v9039_v31 = vpack.c.bf16 %v1461_v50, %v1453_v14  ;;  %v9167_v61 = vpack.c.bf16 %v1463_v54, %v1455_v53  ;;  %v1517_v14 = vld [vmem:[#allocation7 + $0x8a0] sm:$0xff]  ;;  %v1519_v53 = vld [vmem:[#allocation7 + $0x8b0] sm:$0xff] }
 0x308   : > { %9026 = vmatprep.subr.bf16.mxu0 %v9025_v6  ;;  %9154 = vmatprep.subr.bf16.mxu1 %v9153_v7  ;;  %v9041_v6 = vpack.c.bf16 %v1478_v58, %v1470_v13  ;;  %v9169_v7 = vpack.c.bf16 %v1480_v42, %v1472_v59  ;;  %v1525_v50 = vld [vmem:[#allocation7 + $0x8e0] sm:$0xff]  ;;  %v1527_v54 = vld [vmem:[#allocation7 + $0x8f0] sm:$0xff]  ;;  %v1534_v13 = vld [vmem:[#allocation7 + $0x928] sm:$0xff] }
 0x309   : > { %v1542_v58 = vld [vmem:[#allocation7 + $0x968] sm:$0xff]  ;;  %v1536_v59 = vld [vmem:[#allocation7 + $0x938] sm:$0xff] }
 0x30a   : > { %v1544_v42 = vld [vmem:[#allocation7 + $0x978] sm:$0xff] }
 0x30b   : > { %9028 = vmatpush1.bf16.msra.mxu0 %v9027_v18  ;;  %9156 = vmatpush1.bf16.msra.mxu1 %v9155_v19  ;;  %v9043_v18 = vpack.c.bf16 %v1477_v4, %v1469_v62  ;;  %v9171_v19 = vpack.c.bf16 %v1479_v9, %v1471_v8  ;;  %v1533_v62 = vld [vmem:[#allocation7 + $0x920] sm:$0xff]  ;;  %v1535_v8 = vld [vmem:[#allocation7 + $0x930] sm:$0xff] }
 0x30c   : > { %9030 = vmatprep.subr.bf16.mxu0 %v9029_v22  ;;  %9158 = vmatprep.subr.bf16.mxu1 %v9157_v25  ;;  %v9045_v22 = vpack.c.bf16 %v1494_v30, %v1486_v10  ;;  %v9173_v25 = vpack.c.bf16 %v1496_v15, %v1488_v11  ;;  %v1541_v4 = vld [vmem:[#allocation7 + $0x960] sm:$0xff]  ;;  %v1543_v9 = vld [vmem:[#allocation7 + $0x970] sm:$0xff]  ;;  %v1558_v10 = vld [vmem:[#allocation7 + $0x9e8] sm:$0xff] }
 0x30d   : > { %v1552_v30 = vld [vmem:[#allocation7 + $0x9b8] sm:$0xff]  ;;  %v9187_v15 = vpack.c.bf16 %v1543_v9, %v1535_v8 }
 0x30e   : > { %v1560_v11 = vld [vmem:[#allocation7 + $0x9f8] sm:$0xff] }
 0x30f   : > { %9032 = vmatpush1.bf16.msra.mxu0 %v9031_v33  ;;  %9160 = vmatpush1.bf16.msra.mxu1 %v9159_v34  ;;  %v9047_v33 = vpack.c.bf16 %v1493_v21, %v1485_v20  ;;  %v9175_v34 = vpack.c.bf16 %v1495_v27, %v1487_v26  ;;  %v1551_v20 = vld [vmem:[#allocation7 + $0x9b0] sm:$0xff]  ;;  %v1574_v26 = vld [vmem:[#allocation7 + $0xa68] sm:$0xff]  ;;  %v1568_v27 = vld [vmem:[#allocation7 + $0xa38] sm:$0xff] }
 0x310   : > { %9034 = vmatprep.subr.bf16.mxu0 %v9033_v38  ;;  %9162 = vmatprep.subr.bf16.mxu1 %v9161_v39  ;;  %v1501_v38 = vld [vmem:[#allocation7 + $0x820] sm:$0xff] }
 0x311   : > { %v1509_v39 = vld [vmem:[#allocation7 + $0x860] sm:$0xff] }
 0x313   : > { %9036 = vmatpush1.bf16.msra.mxu0 %v9035_v48  ;;  %9164 = vmatpush1.bf16.msra.mxu1 %v9163_v17  ;;  %v9051_v48 = vpack.c.bf16 %v1509_v39, %v1501_v38  ;;  %v9179_v17 = vpack.c.bf16 %v1511_v41, %v1503_v40  ;;  %v1582_v38 = vld [vmem:[#allocation7 + $0xaa8] sm:$0xff]  ;;  %v1584_v39 = vld [vmem:[#allocation7 + $0xab8] sm:$0xff] }
 0x314   : > { %9038 = vmatprep.subr.bf16.mxu0 %v9037_v51  ;;  %9166 = vmatprep.subr.bf16.mxu1 %v9165_v52  ;;  %v9053_v51 = vpack.c.bf16 %v1526_v45, %v1518_v55  ;;  %v9181_v52 = vpack.c.bf16 %v1528_v47, %v1520_v46  ;;  %v1592_v40 = vld [vmem:[#allocation7 + $0xaf8] sm:$0xff]  ;;  %v1589_v46 = vld [vmem:[#allocation7 + $0xae0] sm:$0xff]  ;;  %v1583_v47 = vld [vmem:[#allocation7 + $0xab0] sm:$0xff] }
 0x317   : > { %9040 = vmatpush1.bf16.msra.mxu0 %v9039_v31  ;;  %9168 = vmatpush1.bf16.msra.mxu1 %v9167_v61  ;;  %v9055_v31 = vpack.c.bf16 %v1525_v50, %v1517_v14  ;;  %v9183_v61 = vpack.c.bf16 %v1527_v54, %v1519_v53  ;;  %v1598_v14 = vld [vmem:[#allocation7 + $0xb28] sm:$0xff] }
 0x318   : > { %9042 = vmatprep.subr.bf16.mxu0 %v9041_v6  ;;  %9170 = vmatprep.subr.bf16.mxu1 %v9169_v7  ;;  %v9057_v6 = vpack.c.bf16 %v1542_v58, %v1534_v13  ;;  %v9185_v7 = vpack.c.bf16 %v1544_v42, %v1536_v59  ;;  %v1606_v50 = vld [vmem:[#allocation7 + $0xb68] sm:$0xff]  ;;  %v1597_v58 = vld [vmem:[#allocation7 + $0xb20] sm:$0xff]  ;;  %v1599_v42 = vld [vmem:[#allocation7 + $0xb30] sm:$0xff] }
 0x319   : > { %v9073_v13 = vpack.c.bf16 %v1606_v50, %v1598_v14  ;;  %v1605_v59 = vld [vmem:[#allocation7 + $0xb60] sm:$0xff] }
 0x31a   : > { %v9075_v8 = vpack.c.bf16 %v1605_v59, %v1597_v58  ;;  %v1661_v50 = vld [vmem:[#allocation7 + $0xd20] sm:$0xff]  ;;  %v1686_v58 = vld [vmem:[#allocation7 + $0xde8] sm:$0xff]  ;;  %v1680_v59 = vld [vmem:[#allocation7 + $0xdb8] sm:$0xff] }
 0x31b   : > { %9044 = vmatpush1.bf16.msra.mxu0 %v9043_v18  ;;  %9172 = vmatpush1.bf16.msra.mxu1 %v9171_v19  ;;  %v1549_v18 = vld [vmem:[#allocation7 + $0x9a0] sm:$0xff] }
 0x31c   : > { %9046 = vmatprep.subr.bf16.mxu0 %v9045_v22  ;;  %9174 = vmatprep.subr.bf16.mxu1 %v9173_v25  ;;  %v1557_v19 = vld [vmem:[#allocation7 + $0x9e0] sm:$0xff]  ;;  %v9189_v22 = vpack.c.bf16 %v1560_v11, %v1552_v30  ;;  %v1559_v25 = vld [vmem:[#allocation7 + $0x9f0] sm:$0xff] }
 0x31d   : > { %v9191_v29 = vpack.c.bf16 %v1559_v25, %v1551_v20  ;;  %v1621_v30 = vld [vmem:[#allocation7 + $0xbe0] sm:$0xff]  ;;  %v1615_v11 = vld [vmem:[#allocation7 + $0xbb0] sm:$0xff]  ;;  %v1632_v20 = vld [vmem:[#allocation7 + $0xc38] sm:$0xff] }
 0x31f   : > { %9048 = vmatpush1.bf16.msra.mxu0 %v9047_v33  ;;  %9176 = vmatpush1.bf16.msra.mxu1 %v9175_v34  ;;  %v1573_v33 = vld [vmem:[#allocation7 + $0xa60] sm:$0xff]  ;;  %v1567_v34 = vld [vmem:[#allocation7 + $0xa30] sm:$0xff] }
 0x320   : > { %9050 = vmatprep.subr.bf16.mxu0 %v9049_v35  ;;  %9178 = vmatprep.subr.bf16.mxu1 %v9177_v37  ;;  %v9193_v35 = vpack.c.bf16 %v1576_v28, %v1568_v27  ;;  %v1575_v37 = vld [vmem:[#allocation7 + $0xa70] sm:$0xff]  ;;  %v9067_v41 = vpack.c.bf16 %v1573_v33, %v1565_v32  ;;  %v1637_v27 = vld [vmem:[#allocation7 + $0xc60] sm:$0xff]  ;;  %v1654_v32 = vld [vmem:[#allocation7 + $0xce8] sm:$0xff] }
 0x321   : > { %v9195_v55 = vpack.c.bf16 %v1575_v37, %v1567_v34  ;;  %v1631_v28 = vld [vmem:[#allocation7 + $0xc30] sm:$0xff]  ;;  %v1648_v33 = vld [vmem:[#allocation7 + $0xcb8] sm:$0xff] }
 0x322   : > { %2192 = vmatmul.mubr.f32.vlgmr.msra.gmra.mrb[12].mxu0 %v11966_v24  ;;  %2358 = vmatmul.mubr.f32.vlgmr.msra.gmra.mrb[12].mxu1 %v11966_v24  ;;  %v1550_v24 = vld [vmem:[#allocation7 + $0x9a8] sm:$0xff]  ;;  %v1656_v34 = vld [vmem:[#allocation7 + $0xcf8] sm:$0xff] }
 0x323   : > { %2197 = vmatprep.mubr.f32.mxu0 %v11972_v36  ;;  %9052 = vmatpush1.bf16.msra.mxu0 %v9051_v48  ;;  %v9061_v21 = vpack.c.bf16 %v1558_v10, %v1550_v24  ;;  %v9197_v48 = vpack.c.bf16 %v1592_v40, %v1584_v39  ;;  %v1613_v10 = vld [vmem:[#allocation7 + $0xba0] sm:$0xff]  ;;  %v1647_v40 = vld [vmem:[#allocation7 + $0xcb0] sm:$0xff] }
 0x324   : > { %2363 = vmatprep.mubr.f32.mxu1 %v11972_v36  ;;  %9180 = vmatpush1.bf16.msra.mxu1 %v9179_v17  ;;  %v9059_v36 = vpack.c.bf16 %v1541_v4, %v1533_v62  ;;  %v1591_v17 = vld [vmem:[#allocation7 + $0xaf0] sm:$0xff]  ;;  %v1614_v62 = vld [vmem:[#allocation7 + $0xba8] sm:$0xff]  ;;  %v1653_v39 = vld [vmem:[#allocation7 + $0xce0] sm:$0xff] }
 0x325   : > { %9054 = vmatprep.subr.bf16.mxu0 %v9053_v51  ;;  %9182 = vmatprep.subr.bf16.mxu1 %v9181_v52  ;;  %v1600_v51 = vld [vmem:[#allocation7 + $0xb38] sm:$0xff]  ;;  %v9199_v54 = vpack.c.bf16 %v1591_v17, %v1583_v47  ;;  %v1622_v4 = vld [vmem:[#allocation7 + $0xbe8] sm:$0xff] }
 0x326   : > { %2198 = vmatmul.mubr.f32.gmra.mrb[14].mxu0 %v11979_v43  ;;  %2364 = vmatmul.mubr.f32.gmra.mrb[14].mxu1 %v11979_v43  ;;  %v1566_v43 = vld [vmem:[#allocation7 + $0xa28] sm:$0xff]  ;;  %v1608_v52 = vld [vmem:[#allocation7 + $0xb78] sm:$0xff]  ;;  %v9077_v24 = vpack.c.bf16 %v1622_v4, %v1614_v62  ;;  %v1677_v4 = vld [vmem:[#allocation7 + $0xda0] sm:$0xff] }
 0x327   : > { %2203 = vmatprep.mubr.f32.mxu0 %v11987_v57  ;;  %9056 = vmatpush1.bf16.msra.mxu0 %v9055_v31  ;;  %v9065_v1 = vpack.c.bf16 %v1574_v26, %v1566_v43  ;;  %v9201_v31 = vpack.c.bf16 %v1608_v52, %v1600_v51  ;;  %v1629_v26 = vld [vmem:[#allocation7 + $0xc20] sm:$0xff]  ;;  %v1672_v47 = vld [vmem:[#allocation7 + $0xd78] sm:$0xff]  ;;  %v1663_v52 = vld [vmem:[#allocation7 + $0xd30] sm:$0xff] }
 0x328   : > { %2369 = vmatprep.mubr.f32.mxu1 %v11987_v57  ;;  %9184 = vmatpush1.bf16.msra.mxu1 %v9183_v61  ;;  %v9063_v57 = vpack.c.bf16 %v1557_v19, %v1549_v18  ;;  %v1607_v61 = vld [vmem:[#allocation7 + $0xb70] sm:$0xff]  ;;  %v1630_v18 = vld [vmem:[#allocation7 + $0xc28] sm:$0xff]  ;;  %v1669_v51 = vld [vmem:[#allocation7 + $0xd60] sm:$0xff] }
 0x329   : > { %9058 = vmatprep.subr.bf16.mxu0 %v9057_v6  ;;  %9186 = vmatprep.subr.bf16.mxu1 %v9185_v7  ;;  %v1616_v6 = vld [vmem:[#allocation7 + $0xbb8] sm:$0xff]  ;;  %v9203_v9 = vpack.c.bf16 %v1607_v61, %v1599_v42  ;;  %v1638_v19 = vld [vmem:[#allocation7 + $0xc68] sm:$0xff] }
 0x32a   : > { %2204 = vmatmul.mubr.f32.gmra.mrb[16].mxu0 %v11990_v3  ;;  %2370 = vmatmul.mubr.f32.gmra.mrb[16].mxu1 %v11990_v3  ;;  %v1590_v3 = vld [vmem:[#allocation7 + $0xae8] sm:$0xff]  ;;  %v1624_v7 = vld [vmem:[#allocation7 + $0xbf8] sm:$0xff]  ;;  %v9081_v43 = vpack.c.bf16 %v1638_v19, %v1630_v18  ;;  %v1693_v19 = vld [vmem:[#allocation7 + $0xe20] sm:$0xff] }
 0x32b   : > { %9060 = vmatpush1.bf16.msra.mxu0 %v9059_v36  ;;  %2274 = vmatprep.mubr.f32.mxu0 %v11994_v12  ;;  %v9069_v45 = vpack.c.bf16 %v1590_v3, %v1582_v38  ;;  %v9205_v36 = vpack.c.bf16 %v1624_v7, %v1616_v6  ;;  %v1645_v3 = vld [vmem:[#allocation7 + $0xca0] sm:$0xff]  ;;  %v1688_v42 = vld [vmem:[#allocation7 + $0xdf8] sm:$0xff]  ;;  %v1679_v7 = vld [vmem:[#allocation7 + $0xdb0] sm:$0xff] }
 0x32c   : > { %9188 = vmatpush1.bf16.msra.mxu1 %v9187_v15  ;;  %2440 = vmatprep.mubr.f32.mxu1 %v11994_v12  ;;  %v1581_v12 = vld [vmem:[#allocation7 + $0xaa0] sm:$0xff]  ;;  %v1623_v15 = vld [vmem:[#allocation7 + $0xbf0] sm:$0xff] }
 0x32d   : > { %9062 = vmatprep.subr.bf16.mxu0 %v9061_v21  ;;  %9190 = vmatprep.subr.bf16.mxu1 %v9189_v22  ;;  %v9071_v53 = vpack.c.bf16 %v1589_v46, %v1581_v12  ;;  %v1640_v21 = vld [vmem:[#allocation7 + $0xc78] sm:$0xff]  ;;  %v9079_v22 = vpack.c.bf16 %v1621_v30, %v1613_v10  ;;  %v9207_v25 = vpack.c.bf16 %v1623_v15, %v1615_v11  ;;  %v1670_v12 = vld [vmem:[#allocation7 + $0xd68] sm:$0xff]  ;;  %v1685_v6 = vld [vmem:[#allocation7 + $0xde0] sm:$0xff] }
 0x32e   : > { %v1664_v46 = vld [vmem:[#allocation7 + $0xd38] sm:$0xff]  ;;  %v1702_v10 = vld [vmem:[#allocation7 + $0xe68] sm:$0xff] }
 0x32f   : > { %9064 = vmatpush1.bf16.msra.mxu0 %v9063_v57  ;;  %v9209_v57 = vpack.c.bf16 %v1640_v21, %v1632_v20  ;;  %v1696_v30 = vld [vmem:[#allocation7 + $0xe38] sm:$0xff]  ;;  %v1701_v20 = vld [vmem:[#allocation7 + $0xe60] sm:$0xff]  ;;  %v1695_v21 = vld [vmem:[#allocation7 + $0xe30] sm:$0xff] }
 0x330   : > { %9192 = vmatpush1.bf16.msra.mxu1 %v9191_v29  ;;  %9066 = vmatprep.subr.bf16.mxu0 %v9065_v1  ;;  %v1639_v29 = vld [vmem:[#allocation7 + $0xc70] sm:$0xff]  ;;  %v1646_v1 = vld [vmem:[#allocation7 + $0xca8] sm:$0xff]  ;;  %v1704_v11 = vld [vmem:[#allocation7 + $0xe78] sm:$0xff] }
 0x331   : > { %9194 = vmatprep.subr.bf16.mxu1 %v9193_v35  ;;  %v9083_v35 = vpack.c.bf16 %v1637_v27, %v1629_v26  ;;  %v9211_v37 = vpack.c.bf16 %v1639_v29, %v1631_v28  ;;  %v9085_v38 = vpack.c.bf16 %v1654_v32, %v1646_v1  ;;  %v1718_v26 = vld [vmem:[#allocation7 + $0xee8] sm:$0xff]  ;;  %v1712_v27 = vld [vmem:[#allocation7 + $0xeb8] sm:$0xff]  ;;  %v1709_v32 = vld [vmem:[#allocation7 + $0xea0] sm:$0xff] }
 0x332   : > { %v1720_v28 = vld [vmem:[#allocation7 + $0xef8] sm:$0xff] }
 0x333   : > { %9068 = vmatpush1.bf16.msra.mxu0 %v9067_v41  ;;  %v9213_v41 = vpack.c.bf16 %v1656_v34, %v1648_v33  ;;  %v1717_v33 = vld [vmem:[#allocation7 + $0xee0] sm:$0xff]  ;;  %v1711_v34 = vld [vmem:[#allocation7 + $0xeb0] sm:$0xff] }
 0x334   : > { %9196 = vmatpush1.bf16.msra.mxu1 %v9195_v55  ;;  %9070 = vmatprep.subr.bf16.mxu0 %v9069_v45  ;;  %v1655_v55 = vld [vmem:[#allocation7 + $0xcf0] sm:$0xff]  ;;  %v1662_v45 = vld [vmem:[#allocation7 + $0xd28] sm:$0xff] }
 0x335   : > { %9198 = vmatprep.subr.bf16.mxu1 %v9197_v48  ;;  %v9087_v48 = vpack.c.bf16 %v1653_v39, %v1645_v3  ;;  %v9215_v17 = vpack.c.bf16 %v1655_v55, %v1647_v40  ;;  %v9089_v14 = vpack.c.bf16 %v1670_v12, %v1662_v45  ;;  %v1734_v3 = vld [vmem:[#allocation7 + $0xf68] sm:$0xff]  ;;  %v1728_v39 = vld [vmem:[#allocation7 + $0xf38] sm:$0xff]  ;;  %v1725_v12 = vld [vmem:[#allocation7 + $0xf20] sm:$0xff] }
 0x336   : > { %v1736_v40 = vld [vmem:[#allocation7 + $0xf78] sm:$0xff] }
 0x337   : > { %9072 = vmatpush1.bf16.msra.mxu0 %v9071_v53  ;;  %v9217_v53 = vpack.c.bf16 %v1672_v47, %v1664_v46  ;;  %v1733_v46 = vld [vmem:[#allocation7 + $0xf60] sm:$0xff]  ;;  %v1727_v47 = vld [vmem:[#allocation7 + $0xf30] sm:$0xff] }
 0x338   : > { %9200 = vmatpush1.bf16.msra.mxu1 %v9199_v54  ;;  %9074 = vmatprep.subr.bf16.mxu0 %v9073_v13  ;;  %v1671_v54 = vld [vmem:[#allocation7 + $0xd70] sm:$0xff]  ;;  %v1678_v13 = vld [vmem:[#allocation7 + $0xda8] sm:$0xff] }
 0x339   : > { %9202 = vmatprep.subr.bf16.mxu1 %v9201_v31  ;;  %v9091_v31 = vpack.c.bf16 %v1669_v51, %v1661_v50  ;;  %v9219_v61 = vpack.c.bf16 %v1671_v54, %v1663_v52  ;;  %v9093_v62 = vpack.c.bf16 %v1686_v58, %v1678_v13  ;;  %v1750_v50 = vld [vmem:[#allocation7 + $0xfe8] sm:$0xff]  ;;  %v1744_v51 = vld [vmem:[#allocation7 + $0xfb8] sm:$0xff]  ;;  %v1741_v58 = vld [vmem:[#allocation7 + $0xfa0] sm:$0xff] }
 0x33a   : > { %v1752_v52 = vld [vmem:[#allocation7 + $0xff8] sm:$0xff] }
 0x33b   : > { %9076 = vmatpush1.bf16.msra.mxu0 %v9075_v8  ;;  %v9221_v8 = vpack.c.bf16 %v1688_v42, %v1680_v59  ;;  %v1749_v59 = vld [vmem:[#allocation7 + $0xfe0] sm:$0xff]  ;;  %v1743_v42 = vld [vmem:[#allocation7 + $0xfb0] sm:$0xff] }
 0x33c   : > { %9204 = vmatpush1.bf16.msra.mxu1 %v9203_v9  ;;  %9078 = vmatprep.subr.bf16.mxu0 %v9077_v24  ;;  %v1687_v9 = vld [vmem:[#allocation7 + $0xdf0] sm:$0xff]  ;;  %v1694_v24 = vld [vmem:[#allocation7 + $0xe28] sm:$0xff] }
 0x33d   : > { %9206 = vmatprep.subr.bf16.mxu1 %v9205_v36  ;;  %v9095_v36 = vpack.c.bf16 %v1685_v6, %v1677_v4  ;;  %v9223_v15 = vpack.c.bf16 %v1687_v9, %v1679_v7  ;;  %v9097_v18 = vpack.c.bf16 %v1702_v10, %v1694_v24  ;;  %v2518_v4 = vld [vmem:[%s13413_s5 + $0x88] sm:$0xff]  ;;  %v9111_v6 = vpack.c.bf16 %v1749_v59, %v1741_v58  ;;  %v2501_v9 = vld [vmem:[%s13413_s5] sm:$0xff]  ;;  %v2519_v10 = vld [vmem:[%s13413_s5 + $0x90] sm:$0xff] }
 0x33e   : > { %v2502_v24 = vld [vmem:[%s13413_s5 + $0x8] sm:$0xff]  ;;  %v2513_v59 = vld [vmem:[%s13413_s5 + $0x60] sm:$0xff] }
 0x33f   : > { %9080 = vmatpush1.bf16.msra.mxu0 %v9079_v22  ;;  %v9225_v22 = vpack.c.bf16 %v1704_v11, %v1696_v30  ;;  %v2520_v30 = vld [vmem:[%s13413_s5 + $0x98] sm:$0xff]  ;;  %v9243_v11 = vpack.c.bf16 %v2502_v24, %v2501_v9 }
 0x340   : > { %9208 = vmatpush1.bf16.msra.mxu1 %v9207_v25  ;;  %9082 = vmatprep.subr.bf16.mxu0 %v9081_v43  ;;  %v1703_v25 = vld [vmem:[#allocation7 + $0xe70] sm:$0xff]  ;;  %v1710_v43 = vld [vmem:[#allocation7 + $0xea8] sm:$0xff] }
 0x341   : > { %9210 = vmatprep.subr.bf16.mxu1 %v9209_v57  ;;  %v9099_v57 = vpack.c.bf16 %v1701_v20, %v1693_v19  ;;  %v9227_v29 = vpack.c.bf16 %v1703_v25, %v1695_v21  ;;  %v9101_v1 = vpack.c.bf16 %v1718_v26, %v1710_v43  ;;  %v2521_v19 = vld [vmem:[%s13413_s5 + $0xa0] sm:$0xff]  ;;  %v2522_v20 = vld [vmem:[%s13413_s5 + $0xa8] sm:$0xff] }
 0x342   : > { %v2505_v25 = vld [vmem:[%s13413_s5 + $0x20] sm:$0xff]  ;;  %v2506_v43 = vld [vmem:[%s13413_s5 + $0x28] sm:$0xff] }
 0x343   : > { %9084 = vmatpush1.bf16.msra.mxu0 %v9083_v35  ;;  %v9229_v35 = vpack.c.bf16 %v1720_v28, %v1712_v27  ;;  %v9251_v26 = vpack.c.bf16 %v2506_v43, %v2505_v25  ;;  %v2507_v28 = vld [vmem:[%s13413_s5 + $0x30] sm:$0xff]  ;;  %v2516_v25 = vld [vmem:[%s13413_s5 + $0x78] sm:$0xff] }
 0x344   : > { %9212 = vmatpush1.bf16.msra.mxu1 %v9211_v37  ;;  %9086 = vmatprep.subr.bf16.mxu0 %v9085_v38  ;;  %v1719_v37 = vld [vmem:[#allocation7 + $0xef0] sm:$0xff]  ;;  %v1726_v38 = vld [vmem:[#allocation7 + $0xf28] sm:$0xff] }
 0x345   : > { %9214 = vmatprep.subr.bf16.mxu1 %v9213_v41  ;;  %v9103_v41 = vpack.c.bf16 %v1717_v33, %v1709_v32  ;;  %v9231_v55 = vpack.c.bf16 %v1719_v37, %v1711_v34  ;;  %v9105_v45 = vpack.c.bf16 %v1734_v3, %v1726_v38  ;;  %v2509_v32 = vld [vmem:[%s13413_s5 + $0x40] sm:$0xff]  ;;  %v2510_v33 = vld [vmem:[%s13413_s5 + $0x48] sm:$0xff]  ;;  %v2527_v34 = vld [vmem:[%s13413_s5 + $0xd0] sm:$0xff] }
 0x346   : > { %v12130_v38 = vld [vmem:[#allocation8] sm:$0xff] }
 0x347   : > { %9088 = vmatpush1.bf16.msra.mxu0 %v9087_v48  ;;  %v9233_v48 = vpack.c.bf16 %v1736_v40, %v1728_v39  ;;  %v1758_v3 = vrot.slane %v12130_v38, %v11952_v0  ;;  %v1766_v39 = vrot.slane %v12130_v38, %v12009_v56  ;;  %v1762_v40 = vrot.slane %v12130_v38, %v11957_v2 }
 0x348   : > { %9216 = vmatpush1.bf16.msra.mxu1 %v9215_v17  ;;  %9090 = vmatprep.subr.bf16.mxu0 %v9089_v14  ;;  %v1735_v17 = vld [vmem:[#allocation7 + $0xf70] sm:$0xff]  ;;  %v1742_v14 = vld [vmem:[#allocation7 + $0xfa8] sm:$0xff] }
 0x349   : > { %9218 = vmatprep.subr.bf16.mxu1 %v9217_v53  ;;  %v9107_v53 = vpack.c.bf16 %v1733_v46, %v1725_v12  ;;  %v9235_v54 = vpack.c.bf16 %v1735_v17, %v1727_v47  ;;  %v9109_v13 = vpack.c.bf16 %v1750_v50, %v1742_v14 }
 0x34b   : > { %9092 = vmatpush1.bf16.msra.mxu0 %v9091_v31  ;;  %v9237_v31 = vpack.c.bf16 %v1752_v52, %v1744_v51 }
 0x34c   : > { %9220 = vmatpush1.bf16.msra.mxu1 %v9219_v61  ;;  %9094 = vmatprep.subr.bf16.mxu0 %v9093_v62  ;;  %v1751_v61 = vld [vmem:[#allocation7 + $0xff0] sm:$0xff]  ;;  %v2517_v62 = vld [vmem:[%s13413_s5 + $0x80] sm:$0xff] }
 0x34d   : > { %9222 = vmatprep.subr.bf16.mxu1 %v9221_v8  ;;  %v9239_v7 = vpack.c.bf16 %v1751_v61, %v1743_v42  ;;  %v9241_v8 = vpack.c.bf16 %v2518_v4, %v2517_v62  ;;  %v2514_v42 = vld [vmem:[%s13413_s5 + $0x68] sm:$0xff] }
 0x34f   : > { %9096 = vmatpush1.bf16.msra.mxu0 %v9095_v36  ;;  %v9245_v36 = vpack.c.bf16 %v2520_v30, %v2519_v10 }
 0x350   : > { %9224 = vmatpush1.bf16.msra.mxu1 %v9223_v15  ;;  %9098 = vmatprep.subr.bf16.mxu0 %v9097_v18  ;;  %v2503_v15 = vld [vmem:[%s13413_s5 + $0x10] sm:$0xff]  ;;  %v2504_v18 = vld [vmem:[%s13413_s5 + $0x18] sm:$0xff] }
 0x351   : > { %9226 = vmatprep.subr.bf16.mxu1 %v9225_v22  ;;  %v9247_v21 = vpack.c.bf16 %v2504_v18, %v2503_v15  ;;  %v9249_v22 = vpack.c.bf16 %v2522_v20, %v2521_v19  ;;  %v2531_v15 = vld [vmem:[%s13413_s5 + $0xf0] sm:$0xff]  ;;  %v2532_v18 = vld [vmem:[%s13413_s5 + $0xf8] sm:$0xff] }
 0x353   : > { %9100 = vmatpush1.bf16.msra.mxu0 %v9099_v57  ;;  %v2508_v57 = vld [vmem:[%s13413_s5 + $0x38] sm:$0xff] }
 0x354   : > { %9228 = vmatpush1.bf16.msra.mxu1 %v9227_v29  ;;  %9102 = vmatprep.subr.bf16.mxu0 %v9101_v1  ;;  %v9255_v29 = vpack.c.bf16 %v2508_v57, %v2507_v28 }
 0x355   : > { %9230 = vmatprep.subr.bf16.mxu1 %v9229_v35  ;;  %v9259_v35 = vpack.c.bf16 %v2510_v33, %v2509_v32 }
 0x357   : > { %9104 = vmatpush1.bf16.msra.mxu0 %v9103_v41  ;;  %v1770_v41 = vrot.slane %v12130_v38, %v881_v23  ;;  %v2529_v23 = vld [vmem:[%s13413_s5 + $0xe0] sm:$0xff] }
 0x358   : > { %9232 = vmatpush1.bf16.msra.mxu1 %v9231_v55  ;;  %9106 = vmatprep.subr.bf16.mxu0 %v9105_v45  ;;  %v2511_v55 = vld [vmem:[%s13413_s5 + $0x50] sm:$0xff]  ;;  %v2512_v45 = vld [vmem:[%s13413_s5 + $0x58] sm:$0xff] }
 0x359   : > { %9234 = vmatprep.subr.bf16.mxu1 %v9233_v48  ;;  %v9263_v47 = vpack.c.bf16 %v2512_v45, %v2511_v55 }
 0x35b   : > { %9108 = vmatpush1.bf16.msra.mxu0 %v9107_v53  ;;  %v2530_v53 = vld [vmem:[%s13413_s5 + $0xe8] sm:$0xff] }
 0x35c   : > { %9236 = vmatpush1.bf16.msra.mxu1 %v9235_v54  ;;  %9110 = vmatprep.subr.bf16.mxu0 %v9109_v13  ;;  %v9265_v58 = vpack.c.bf16 %v2530_v53, %v2529_v23 }
 0x35d   : > { %9238 = vmatprep.subr.bf16.mxu1 %v9237_v31 }
 0x35f   : > { %9112 = vmatpush1.bf16.msra.mxu0 %v9111_v6  ;;  %v9267_v6 = vpack.c.bf16 %v2514_v42, %v2513_v59 }
 0x360   : > { %9240 = vmatpush1.bf16.msra.mxu1 %v9239_v7  ;;  %9242 = vmatprep.subr.bf16.mxu0 %v9241_v8 }
 0x362   : > { %2275 = vmatmul.mubr.f32.vlgmr.msra.gmra.mrb[12].mxu0 %v12016_v44 }
 0x363   : > { %2441 = vmatmul.mubr.f32.vlgmr.msra.gmra.mrb[12].mxu1 %v12016_v44  ;;  %2280 = vmatprep.mubr.f32.mxu0 %v12019_v49  ;;  %v2523_v44 = vld [vmem:[%s13413_s5 + $0xb0] sm:$0xff] }
 0x364   : > { %2446 = vmatprep.mubr.f32.mxu1 %v12019_v49  ;;  %9244 = vmatpush3.bf16.msra.mxu0 %v9243_v11  ;;  %v2524_v49 = vld [vmem:[%s13413_s5 + $0xb8] sm:$0xff] }
 0x365   : > { %9246 = vmatprep.subr.bf16.mxu0 %v9245_v36  ;;  %v9253_v27 = vpack.c.bf16 %v2524_v49, %v2523_v44 }
 0x366   : > { %2281 = vmatmul.mubr.f32.gmra.mrb[14].mxu0 %v12027_v60 }
 0x367   : > { %2447 = vmatmul.mubr.f32.gmra.mrb[14].mxu1 %v12027_v60  ;;  %2286 = vmatprep.mubr.f32.mxu0 %v12030_v5  ;;  %v2525_v60 = vld [vmem:[%s13413_s5 + $0xc0] sm:$0xff] }
 0x368   : > { %2452 = vmatprep.mubr.f32.mxu1 %v12030_v5  ;;  %9248 = vmatpush3.bf16.msra.mxu0 %v9247_v21  ;;  %v2526_v5 = vld [vmem:[%s13413_s5 + $0xc8] sm:$0xff]  ;;  %v9269_v21 = vpack.c.bf16 %v2532_v18, %v2531_v15 }
 0x369   : > { %9250 = vmatprep.subr.bf16.mxu0 %v9249_v22  ;;  %v9257_v1 = vpack.c.bf16 %v2526_v5, %v2525_v60  ;;  %v2515_v22 = vld [vmem:[%s13413_s5 + $0x70] sm:$0xff] }
 0x36a   : > { %2287 = vmatmul.mubr.f32.gmra.mrb[16].mxu0 %v12036_v16 }
 0x36b   : > { %2453 = vmatmul.mubr.f32.gmra.mrb[16].mxu1 %v12036_v16  ;;  %v2528_v16 = vld [vmem:[%s13413_s5 + $0xd8] sm:$0xff] }
 0x36c   : > { %9252 = vmatpush3.bf16.msra.mxu0 %v9251_v26  ;;  %v9261_v37 = vpack.c.bf16 %v2528_v16, %v2527_v34 }
 0x36d   : > { %9254 = vmatprep.subr.bf16.mxu0 %v9253_v27  ;;  %v9271_v27 = vpack.c.bf16 %v2516_v25, %v2515_v22 }
 0x370   : > { %9256 = vmatpush3.bf16.msra.mxu0 %v9255_v29 }
 0x371   : > { %9258 = vmatprep.subr.bf16.mxu0 %v9257_v1 }
 0x374   : > { %9260 = vmatpush3.bf16.msra.mxu0 %v9259_v35 }
 0x375   : > { %9262 = vmatprep.subr.bf16.mxu0 %v9261_v37 }
 0x378   : > { %9264 = vmatpush3.bf16.msra.mxu0 %v9263_v47 }
 0x379   : > { %9266 = vmatprep.subr.bf16.mxu0 %v9265_v58 }
 0x37c   : > { %9268 = vmatpush3.bf16.msra.mxu0 %v9267_v6 }
 0x37d   : > { %9270 = vmatprep.subr.bf16.mxu0 %v9269_v21 }
 0x380   : > { %9272 = vmatpush3.bf16.msra.mxu0 %v9271_v27 }
 0x3b4   : > { %v1944_v12 = vpop.f32.mrb[6].mxu0  ;;  %v2110_v46 = vpop.f32.mrb[6].mxu1 }
 0x3b5   : > { %v10581_v48 = vadd.f32 %v1944_v12, %v1758_v3  ;;  %v10587_v17 = vadd.f32 %v2110_v46, %v1766_v39  ;;  %v1946_v14 = vpop.f32.mrb[7].mxu0  ;;  %v2112_v50 = vpop.f32.mrb[7].mxu1  ;;  %v2623_v12 = vld [vmem:[#allocation11] sm:$0xff]  ;;  %v2624_v46 = vld [vmem:[#allocation11 + $0x8] sm:$0xff] }
 0x3b6   : > { %v10582_v51 = vadd.f32 %v1946_v14, %v1762_v40  ;;  %v10588_v52 = vadd.f32 %v2112_v50, %v1770_v41  ;;  %v9274_v47 = vpack.c.bf16 %v2624_v46, %v2623_v12  ;;  %v1777_v14 = vsub.s32 5, %v11949_v63 }
 0x3b7   : > { %v2459_v54 = vmax.f32 %v10581_v48, 0.0  ;;  %v2461_v13 = vmax.f32 %v10587_v17, 0.0  ;;  %v2626_v48 = vld [vmem:[#allocation11 + $0x18] sm:$0xff]  ;;  %v1781_v17 = vsub.s32 6, %v11949_v63  ;;  %v1785_v50 = vsub.s32 7, %v11949_v63 }
 0x3b8   : > { %v2460_v31 = vmax.f32 %v10582_v51, 0.0  ;;  %v2462_v61 = vmax.f32 %v10588_v52, 0.0  ;;  %v1950_v62 = vpop.f32.mrb[8].mxu0  ;;  %v2116_v4 = vpop.f32.mrb[8].mxu1  ;;  %v1778_v23 = vrot.slane %v12130_v38, %v1777_v14 }
 0x3b9   : > { %v12159_v7 = vmax.f32 %v2459_v54, %v2461_v13  ;;  %v10583_v8 = vadd.f32 %v1950_v62, %v1758_v3  ;;  %v10589_v9 = vadd.f32 %v2116_v4, %v1766_v39  ;;  %v1952_v24 = vpop.f32.mrb[9].mxu0  ;;  %v2118_v10 = vpop.f32.mrb[9].mxu1  ;;  %v1782_v52 = vrot.slane %v12130_v38, %v1781_v17  ;;  %v2628_v17 = vld [vmem:[#allocation11 + $0x28] sm:$0xff] }
 0x3ba   : > { %v12161_v30 = vmax.f32 %v2460_v31, %v2462_v61  ;;  %v10584_v11 = vadd.f32 %v1952_v24, %v1762_v40  ;;  %v10590_v36 = vadd.f32 %v2118_v10, %v1770_v41  ;;  %v1786_v53 = vrot.slane %v12130_v38, %v1785_v50  ;;  %v2630_v50 = vld [vmem:[#allocation11 + $0x38] sm:$0xff] }
 0x3bb   : > { %v2467_v19 = vmax.f32 %v10583_v8, 0.0  ;;  %v2469_v20 = vmax.f32 %v10589_v9, 0.0 }
 0x3bc   : > { %v2468_v43 = vmax.f32 %v10584_v11, 0.0  ;;  %v2470_v44 = vmax.f32 %v10590_v36, 0.0  ;;  %v1956_v49 = vpop.f32.mrb[10].mxu0  ;;  %v2122_v26 = vpop.f32.mrb[10].mxu1 }
 0x3bd   : > { %v12175_v28 = vmax.f32 %v2467_v19, %v2469_v20  ;;  %v10585_v57 = vadd.f32 %v1956_v49, %v1758_v3  ;;  %v10591_v60 = vadd.f32 %v2122_v26, %v1766_v39  ;;  %v1958_v5 = vpop.f32.mrb[11].mxu0  ;;  %v2124_v29 = vpop.f32.mrb[11].mxu1  ;;  %v2625_v3 = vld [vmem:[#allocation11 + $0x10] sm:$0xff]  ;;  %v11485_v39 = vmov 0.0|0.0  }
 0x3be   : > { %v12177_v1 = vmax.f32 %v2468_v43, %v2470_v44  ;;  %v10586_v32 = vadd.f32 %v1958_v5, %v1762_v40  ;;  %v10592_v33 = vadd.f32 %v2124_v29, %v1770_v41  ;;  %9273 = vmatprep.subr.bf16.mxu1 %v11485_v39  ;;  %9301 = vmatprep.subr.bf16.mxu0 %v11485_v39  ;;  %v1773_v41 = vsub.s32 4, %v11949_v63 }
 0x3bf   : > { %v2475_v34 = vmax.f32 %v10585_v57, 0.0  ;;  %v2477_v16 = vmax.f32 %v10591_v60, 0.0  ;;  %9275 = vmatpush3.bf16.msra.mxu1 %v9274_v47  ;;  %v9277_v40 = vpack.c.bf16 %v2626_v48, %v2625_v3 }
 0x3c0   : > { %v2476_v35 = vmax.f32 %v10586_v32, 0.0  ;;  %v2478_v37 = vmax.f32 %v10592_v33, 0.0  ;;  %9276 = vmatprep.subr.bf16.mxu1 %v11485_v39  ;;  %v1774_v51 = vrot.slane %v12130_v38, %v1773_v41  ;;  %v2627_v41 = vld [vmem:[#allocation11 + $0x20] sm:$0xff] }
 0x3c1   : > { %v12179_v55 = vmax.f32 %v2475_v34, %v2477_v16  ;;  %v9280_v14 = vpack.c.bf16 %v2628_v17, %v2627_v41  ;;  %v2948_v41 = vld [vmem:[#allocation17 + $0x20] sm:$0xff] }
 0x3c2   : > { %v12181_v45 = vmax.f32 %v2476_v35, %v2478_v37 }
 0x3c3   : > { %9278 = vmatpush3.bf16.msra.mxu1 %v9277_v40 }
 0x3c4   : > { %9279 = vmatprep.subr.bf16.mxu1 %v11485_v39 }
 0x3c7   : > { %9281 = vmatpush3.bf16.msra.mxu1 %v9280_v14  ;;  %v7163_v14 = vld [vmem:[#allocation13] ss:$0 sm:$0xff] }
 0x3c8   : > { %9282 = vmatprep.subr.bf16.mxu1 %v11485_v39 }
 0x435   : > { %v2276_v54 = vpop.f32.mrb[12].mxu0 }
 0x436   : > { %v10593_v13 = vadd.f32 %v2276_v54, %v1774_v51  ;;  %v2442_v58 = vpop.f32.mrb[12].mxu1  ;;  %v2278_v59 = vpop.f32.mrb[13].mxu0 }
 0x437   : > { %v10599_v42 = vadd.f32 %v2442_v58, %v1782_v52  ;;  %v10594_v31 = vadd.f32 %v2278_v59, %v1778_v23  ;;  %v2444_v61 = vpop.f32.mrb[13].mxu1  ;;  %v2742_v58 = vld [vmem:[#allocation14 + $0x58] sm:$0xff] }
 0x438   : > { %v2463_v62 = vmax.f32 %v10593_v13, 0.0  ;;  %v10600_v4 = vadd.f32 %v2444_v61, %v1786_v53  ;;  %v2739_v13 = vld [vmem:[#allocation14 + $0x40] sm:$0xff] }
 0x439   : > { %v2465_v6 = vmax.f32 %v10599_v42, 0.0  ;;  %v2464_v8 = vmax.f32 %v10594_v31, 0.0  ;;  %v2282_v63 = vpop.f32.mrb[14].mxu0  ;;  %v9305_v59 = vpack.c.bf16 %v2742_v58, %v2739_v13  ;;  %v2745_v42 = vld [vmem:[#allocation14 + $0x70] sm:$0xff]  ;;  %v2748_v31 = vld [vmem:[#allocation14 + $0x88] sm:$0xff] }
 0x43a   : > { %v2466_v9 = vmax.f32 %v10600_v4, 0.0  ;;  %v10595_v24 = vadd.f32 %v2282_v63, %v1774_v51  ;;  %v2448_v10 = vpop.f32.mrb[14].mxu1  ;;  %v2284_v11 = vpop.f32.mrb[15].mxu0  ;;  %v9308_v61 = vpack.c.bf16 %v2748_v31, %v2745_v42  ;;  %v7162_v4 = vld [vmem:[#allocation10] ss:$0 sm:$0xff]  ;;  %v2731_v63 = vld [vmem:[#allocation14] sm:$0xff] }
 0x43b   : > { %v2489_v36 = vmax.f32 %v2463_v62, %v2465_v6  ;;  %v10601_v15 = vadd.f32 %v2448_v10, %v1782_v52  ;;  %v10596_v18 = vadd.f32 %v2284_v11, %v1778_v23  ;;  %v2450_v38 = vpop.f32.mrb[15].mxu1  ;;  %v2741_v10 = vld [vmem:[#allocation14 + $0x50] sm:$0xff] }
 0x43c   : > { %v2490_v19 = vmax.f32 %v2464_v8, %v2466_v9  ;;  %v2471_v20 = vmax.f32 %v10595_v24, 0.0  ;;  %v10602_v21 = vadd.f32 %v2450_v38, %v1786_v53  ;;  %v2734_v9 = vld [vmem:[#allocation14 + $0x18] sm:$0xff]  ;;  %v2953_v31 = vld [vmem:[#allocation17 + $0x48] sm:$0xff] }
 0x43d   : > { %v2495_v22 = vmax.f32 %v12159_v7, %v2489_v36  ;;  %v2473_v25 = vmax.f32 %v10601_v15, 0.0  ;;  %v2472_v43 = vmax.f32 %v10596_v18, 0.0  ;;  %v2288_v44 = vpop.f32.mrb[16].mxu0  ;;  %v2738_v24 = vld [vmem:[#allocation14 + $0x38] sm:$0xff]  ;;  %v9287_v18 = vpack.c.bf16 %v2734_v9, %v2731_v63 }
 0x43e   : > { %v2474_v49 = vmax.f32 %v10602_v21, 0.0  ;;  %v10597_v26 = vadd.f32 %v2288_v44, %v1774_v51  ;;  %v2454_v27 = vpop.f32.mrb[16].mxu1  ;;  %v2290_v57 = vpop.f32.mrb[17].mxu0  ;;  %v2496_v60 = vmax.f32 %v12161_v30, %v2490_v19  ;;  %v2737_v21 = vld [vmem:[#allocation14 + $0x30] sm:$0xff] }
 0x43f   : > { %v2491_v5 = vmax.f32 %v2471_v20, %v2473_v25  ;;  %v10603_v29 = vadd.f32 %v2454_v27, %v1782_v52  ;;  %v10598_v32 = vadd.f32 %v2290_v57, %v1778_v23  ;;  %v2456_v33 = vpop.f32.mrb[17].mxu1  ;;  %v2733_v23 = vld [vmem:[#allocation14 + $0x10] sm:$0xff]  ;;  %v9289_v20 = vpack.c.bf16 %v2741_v10, %v2738_v24  ;;  %v2744_v25 = vld [vmem:[#allocation14 + $0x68] sm:$0xff] }
 0x440   : > { %v2492_v34 = vmax.f32 %v2472_v43, %v2474_v49  ;;  %v2479_v16 = vmax.f32 %v10597_v26, 0.0  ;;  %v10604_v35 = vadd.f32 %v2456_v33, %v1786_v53  ;;  %2604 = vmatprep.mubr.f32.mxu0 %v2496_v60  ;;  %v2736_v53 = vld [vmem:[#allocation14 + $0x28] sm:$0xff]  ;;  %v2747_v43 = vld [vmem:[#allocation14 + $0x80] sm:$0xff]  ;;  %v2950_v42 = vld [vmem:[#allocation17 + $0x30] sm:$0xff] }
 0x441   : > { %v2481_v37 = vmax.f32 %v10603_v29, 0.0  ;;  %v2480_v12 = vmax.f32 %v10598_v32, 0.0  ;;  %2605 = vmatmul.mubr.f32.vlgmr.msra.gmra.mrb[18].mxu0 %v2495_v22  ;;  %v2497_v7 = vmax.f32 %v12175_v28, %v2491_v5  ;;  %v2629_v28 = vld [vmem:[#allocation11 + $0x30] sm:$0xff]  ;;  %v9302_v54 = vpack.c.bf16 %v2736_v53, %v2733_v23  ;;  %v2743_v29 = vld [vmem:[#allocation14 + $0x60] sm:$0xff]  ;;  %v2746_v32 = vld [vmem:[#allocation14 + $0x78] sm:$0xff] }
 0x442   : > { %v2482_v46 = vmax.f32 %v10604_v35, 0.0  ;;  %v2498_v3 = vmax.f32 %v12177_v1, %v2492_v34  ;;  %v9283_v51 = vpack.c.bf16 %v2630_v50, %v2629_v28  ;;  %v11487_v1 = vmov 0.0   ;;  %v2740_v22 = vld [vmem:[#allocation14 + $0x48] sm:$0xff]  ;;  %v2750_v35 = vld [vmem:[#allocation14 + $0x98] sm:$0xff] }
 0x443   : > { %v2493_v47 = vmax.f32 %v2479_v16, %v2481_v37  ;;  %7690 = vmatprep.mubr.msk.f32.mxu1 %vm11486_vm1, %v11487_v1  ;;  %9303 = vmatpush3.bf16.msra.mxu0 %v9302_v54  ;;  %v9291_v27 = vpack.c.bf16 %v2740_v22, %v2737_v21  ;;  %v9293_v5 = vpack.c.bf16 %v2747_v43, %v2744_v25  ;;  %v2753_v37 = vld [vmem:[#allocation14 + $0xb0] sm:$0xff]  ;;  %v2944_v28 = vld [vmem:[#allocation17] sm:$0xff]  ;;  %v2947_v50 = vld [vmem:[#allocation17 + $0x18] sm:$0xff] }
 0x444   : > { %v2494_v48 = vmax.f32 %v2480_v12, %v2482_v46  ;;  %2609 = vmatprep.mubr.f32.mxu0 %v2498_v3  ;;  %9284 = vmatpush3.bf16.msra.mxu1 %v9283_v51  ;;  %v9295_v34 = vpack.c.bf16 %v2746_v32, %v2743_v29  ;;  %v9297_v12 = vpack.c.bf16 %v2753_v37, %v2750_v35  ;;  %v2752_v46 = vld [vmem:[#allocation14 + $0xa8] sm:$0xff]  ;;  %v2946_v53 = vld [vmem:[#allocation17 + $0x10] sm:$0xff]  ;;  %v2975_v35 = vld [vmem:[#allocation17 + $0xf8] sm:$0xff] }
 0x445   : > { %2610 = vmatmul.mubr.f32.gmra.mrb[20].mxu0 %v2497_v7  ;;  %v2499_v30 = vmax.f32 %v12179_v55, %v2493_v47  ;;  %v2732_v55 = vld [vmem:[#allocation14 + $0x8] sm:$0xff]  ;;  %9304 = vmatprep.subr.bf16.mxu0 %v11485_v39  ;;  %v2749_v7 = vld [vmem:[#allocation14 + $0x90] sm:$0xff]  ;;  %v2751_v47 = vld [vmem:[#allocation14 + $0xa0] sm:$0xff]  ;;  %v12221_v13 = vpack.c.bf16 %v2947_v50, %v2944_v28  ;;  %v12231_v9 = vpack.c.bf16 %v2953_v31, %v2950_v42 }
 0x446   : > { %v2500_v40 = vmax.f32 %v12181_v45, %v2494_v48  ;;  %v2735_v45 = vld [vmem:[#allocation14 + $0x20] sm:$0xff]  ;;  %v9299_v3 = vpack.c.bf16 %v2752_v46, %v2749_v7  ;;  %v2754_v48 = vld [vmem:[#allocation14 + $0xb8] sm:$0xff]  ;;  %v2949_v54 = vld [vmem:[#allocation17 + $0x28] sm:$0xff] }
 0x447   : > { %v9285_v52 = vpack.c.bf16 %v2735_v45, %v2732_v55  ;;  %9306 = vmatpush3.bf16.msra.mxu0 %v9305_v59  ;;  %v2951_v55 = vld [vmem:[#allocation17 + $0x38] sm:$0xff]  ;;  %v2954_v45 = vld [vmem:[#allocation17 + $0x50] sm:$0xff]  ;;  %v2961_v29 = vld [vmem:[#allocation17 + $0x88] sm:$0xff] }
 0x448   : > { %2614 = vmatprep.mubr.f32.mxu0 %v2500_v40  ;;  %9307 = vmatprep.subr.bf16.mxu0 %v11485_v39  ;;  %v2945_v40 = vld [vmem:[#allocation17 + $0x8] sm:$0xff]  ;;  %v12223_v59 = vpack.c.bf16 %v2954_v45, %v2951_v55  ;;  %v2964_v7 = vld [vmem:[#allocation17 + $0xa0] sm:$0xff]  ;;  %v2967_v46 = vld [vmem:[#allocation17 + $0xb8] sm:$0xff] }
 0x449   : > { %2615 = vmatmul.mubr.f32.gmra.mrb[22].mxu0 %v2499_v30  ;;  %9286 = vmatprep.subr.bf16.mxu1 %v9285_v52  ;;  %v9311_v30 = vpack.c.bf16 %v2754_v48, %v2751_v47  ;;  %v12217_v17 = vpack.c.bf16 %v2948_v41, %v2945_v40  ;;  %v2974_v48 = vld [vmem:[#allocation17 + $0xf0] sm:$0xff]  ;;  %v2981_v40 = vld [vmem:[#allocation17 + $0x128] sm:$0xff]  ;;  %v12275_v41 = vpack.c.bf16 %v2967_v46, %v2964_v7  ;;  %v2980_v45 = vld [vmem:[#allocation17 + $0x120] sm:$0xff] }
 0x44a   : > { %7715 = vmatprep.mubr.msk.f32.mxu0 %vm11486_vm1, %v11487_v1  ;;  %v2970_v28 = vld [vmem:[#allocation17 + $0xd0] sm:$0xff]  ;;  %v2973_v50 = vld [vmem:[#allocation17 + $0xe8] sm:$0xff]  ;;  %v2979_v42 = vld [vmem:[#allocation17 + $0x118] sm:$0xff] }
 0x44b   : > { %9309 = vmatpush3.bf16.msra.mxu0 %v9308_v61 }
 0x44c   : > { %9310 = vmatprep.subr.bf16.mxu0 %v11485_v39 }
 0x44f   : > { %9312 = vmatpush3.bf16.msra.mxu0 %v9311_v30  ;;  %v2977_v30 = vld [vmem:[#allocation17 + $0x108] sm:$0xff] }
 0x450   : > { %9345 = vmatprep.subr.bf16.mxu0 %v11485_v39 }
 0x514   : > { %v7252_v62 = vpop.f32.mrb[18].mxu0 }
 0x515   : > { %v7253_v6 = vpop.f32.mrb[19].mxu0 }
 0x516   : > { %v7254_v8 = vadd.f32 %v7253_v6, %v7252_v62  ;;  %v2957_v62 = vld [vmem:[#allocation17 + $0x68] sm:$0xff]  ;;  %v12225_v6 = vpack.c.bf16 %v2949_v54, %v2946_v53  ;;  %v12285_v53 = vpack.c.bf16 %v2973_v50, %v2970_v28  ;;  %v2990_v54 = vld [vmem:[#allocation17 + $0x170] sm:$0xff]  ;;  %v2992_v50 = vld [vmem:[#allocation19] sm:$0x7] }
 0x518   : > { %v2607_v11 = vadd.f32 %v7254_v8, %v7162_v4  ;;  %v7255_v36 = vpop.f32.mrb[20].mxu0 }
 0x519   : > { %v7256_v15 = vpop.f32.mrb[21].mxu0 }
 0x51a   : > { %v2620_v38 = vmax.f32 %v2607_v11, 0.0  ;;  %v7257_v19 = vadd.f32 %v7256_v15, %v7255_v36  ;;  %v2956_v11 = vld [vmem:[#allocation17 + $0x60] sm:$0xff]  ;;  %v2959_v36 = vld [vmem:[#allocation17 + $0x78] sm:$0xff] }
 0x51b   : > { %v2963_v15 = vld [vmem:[#allocation17 + $0x98] sm:$0xff]  ;;  %v12243_v25 = vpack.c.bf16 %v2959_v36, %v2956_v11 }
 0x51c   : > { %v2612_v44 = vadd.f32 %v7257_v19, %v7162_v4  ;;  %v7258_v49 = vpop.f32.mrb[22].mxu0  ;;  %7691 = vmatmul.mubr.msk.f32.vlgmr.msra.gmra.mrb[18].mxu1 %vm2638_vm2, %v2620_v38  ;;  %v2966_v38 = vld [vmem:[#allocation17 + $0xb0] sm:$0xff]  ;;  %v2952_v19 = vld [vmem:[#allocation17 + $0x40] sm:$0xff] }
 0x51d   : > { %v7259_v26 = vpop.f32.mrb[23].mxu0  ;;  %7693 = vmatprep.mubr.msk.f32.mxu1 %vm11486_vm1, %v11487_v1  ;;  %9288 = vmatpush1.bf16.msra.mxu1 %v9287_v18 }
 0x51e   : > { %v2621_v57 = vmax.f32 %v2612_v44, 0.0  ;;  %v7260_v60 = vadd.f32 %v7259_v26, %v7258_v49  ;;  %9290 = vmatprep.subr.bf16.mxu1 %v9289_v20  ;;  %v2955_v20 = vld [vmem:[#allocation17 + $0x58] sm:$0xff]  ;;  %v12248_v44 = vpack.c.bf16 %v2966_v38, %v2963_v15  ;;  %v2962_v49 = vld [vmem:[#allocation17 + $0x90] sm:$0xff]  ;;  %v2965_v26 = vld [vmem:[#allocation17 + $0xa8] sm:$0xff] }
 0x51f   : > { %v12256_v32 = vpack.c.bf16 %v2965_v26, %v2962_v49  ;;  %v2988_v15 = vld [vmem:[#allocation17 + $0x160] sm:$0xff] }
 0x520   : > { %v2617_v33 = vadd.f32 %v7260_v60, %v7162_v4  ;;  %7694 = vmatmul.mubr.msk.f32.gmra.mrb[20].mxu1 %vm2638_vm2, %v2621_v57  ;;  %v2960_v4 = vld [vmem:[#allocation17 + $0x80] sm:$0xff]  ;;  %v12250_v57 = vpack.c.bf16 %v2955_v20, %v2952_v19  ;;  %v2755_v19 = vld [vmem:[#allocation16] sm:$0x7] }
 0x521   : > { %7696 = vmatprep.mubr.msk.f32.mxu1 %vm11486_vm1, %v11487_v1  ;;  %9292 = vmatpush1.bf16.msra.mxu1 %v9291_v27  ;;  %v12236_v10 = vpack.c.bf16 %v2960_v4, %v2957_v62  ;;  %v2969_v27 = vld [vmem:[#allocation17 + $0xc8] sm:$0xff]  ;;  %v2972_v60 = vld [vmem:[#allocation17 + $0xe0] sm:$0xff]  ;;  %v2986_v62 = vld [vmem:[#allocation17 + $0x150] sm:$0xff]  ;;  %v2760_v49 = vrot.slane %v2755_v19, %v11952_v0  ;;  %v2768_v26 = vrot.slane %v2755_v19, %v12009_v56 }
 0x522   : > { %v2622_v16 = vmax.f32 %v2617_v33, 0.0  ;;  %9294 = vmatprep.subr.bf16.mxu1 %v9293_v5  ;;  %v2958_v5 = vld [vmem:[#allocation17 + $0x70] sm:$0xff]  ;;  %v12260_v33 = vpack.c.bf16 %v2972_v60, %v2969_v27  ;;  %v2989_v4 = vld [vmem:[#allocation17 + $0x168] sm:$0xff]  ;;  %v2764_v27 = vrot.slane %v2755_v19, %v11957_v2 }
 0x523   : > { %v12263_v37 = vpack.c.bf16 %v2961_v29, %v2958_v5  ;;  %v12299_v11 = vpack.c.bf16 %v2989_v4, %v2986_v62 }
 0x524   : > { %7697 = vmatmul.mubr.msk.f32.gmra.mrb[22].mxu1 %vm2638_vm2, %v2622_v16  ;;  %v2971_v16 = vld [vmem:[#allocation17 + $0xd8] sm:$0xff] }
 0x525   : > { %9296 = vmatpush1.bf16.msra.mxu1 %v9295_v34  ;;  %2845 = vmatprep.mubr.f32.mxu1 %v11487_v1  ;;  %v2968_v34 = vld [vmem:[#allocation17 + $0xc0] sm:$0xff] }
 0x526   : > { %9298 = vmatprep.subr.bf16.mxu1 %v9297_v12  ;;  %v2978_v12 = vld [vmem:[#allocation17 + $0x110] sm:$0xff] }
 0x527   : > { %v12272_v47 = vpack.c.bf16 %v2978_v12, %v2975_v35 }
 0x529   : > { %9300 = vmatpush1.bf16.msra.mxu1 %v9299_v3  ;;  %v12269_v3 = vpack.c.bf16 %v2971_v16, %v2968_v34 }
 0x52a   : > { %9314 = vmatprep.subr.bf16.mxu1 %v12217_v17 }
 0x5ef   : > { %v2714_v51 = vpop.f32.mrb[18].mxu1 }
 0x5f0   : > { %v2715_v52 = vadd.f32 %v7163_v14, %v2714_v51  ;;  %v7692_v23 = vpop.f32.mrb[19].mxu1  ;;  %v12279_v51 = vpack.c.bf16 %v2977_v30, %v2974_v48 }
 0x5f1   : > { %v2987_v23 = vld [vmem:[#allocation17 + $0x158] sm:$0xff] }
 0x5f2   : > { %v2728_v58 = vmax.f32 %v2715_v52, 0.0  ;;  %v2983_v52 = vld [vmem:[#allocation17 + $0x138] sm:$0xff] }
 0x5f3   : > { %v2719_v61 = vpop.f32.mrb[20].mxu1  ;;  %v12289_v31 = vpack.c.bf16 %v2983_v52, %v2980_v45  ;;  %v12367_v45 = vrot.slane %v2992_v50, %v11952_v0  ;;  %v12370_v52 = vrot.slane %v2992_v50, %v11957_v2 }
 0x5f4   : > { %v2720_v8 = vadd.f32 %v7163_v14, %v2719_v61  ;;  %v7695_v63 = vpop.f32.mrb[21].mxu1  ;;  %7167 = vmatmul.mubr.msk.f32.vlgmr.msra.gmra.mrb[24].mxu1 %vm2638_vm2, %v2728_v58  ;;  %7716 = vmatmul.mubr.msk.f32.vlgmr.msra.gmra.mrb[24].mxu0 %vm2638_vm2, %v2728_v58  ;;  %v2976_v58 = vld [vmem:[#allocation17 + $0x100] sm:$0xff]  ;;  %v12292_v61 = vpack.c.bf16 %v2990_v54, %v2987_v23 }
 0x5f5   : > { %9316 = vmatpush1.bf16.msra.mxu1 %v12221_v13  ;;  %2851 = vmatprep.mubr.f32.mxu1 %v11487_v1  ;;  %v2982_v63 = vld [vmem:[#allocation17 + $0x130] sm:$0xff] }
 0x5f6   : > { %v2729_v24 = vmax.f32 %v2720_v8, 0.0  ;;  %7718 = vmatprep.mubr.msk.f32.mxu0 %vm11486_vm1, %v11487_v1  ;;  %9318 = vmatprep.subr.bf16.mxu1 %v12223_v59  ;;  %v12295_v8 = vpack.c.bf16 %v2979_v42, %v2976_v58 }
 0x5f7   : > { %v2724_v18 = vpop.f32.mrb[22].mxu1  ;;  %9347 = vmatpush3.bf16.msra.mxu0 %v12225_v6 }
 0x5f8   : > { %v2725_v21 = vadd.f32 %v7163_v14, %v2724_v18  ;;  %v7698_v22 = vpop.f32.mrb[23].mxu1  ;;  %7168 = vmatmul.mubr.msk.f32.gmra.mrb[26].mxu1 %vm2638_vm2, %v2729_v24  ;;  %7719 = vmatmul.mubr.msk.f32.gmra.mrb[26].mxu0 %vm2638_vm2, %v2729_v24  ;;  %v2984_v14 = vld [vmem:[#allocation17 + $0x140] sm:$0xff]  ;;  %v2985_v24 = vld [vmem:[#allocation17 + $0x148] sm:$0xff]  ;;  %v2991_v18 = vld [vmem:[#allocation17 + $0x178] sm:$0xff] }
 0x5f9   : > { %9320 = vmatpush1.bf16.msra.mxu1 %v12231_v9  ;;  %2857 = vmatprep.mubr.f32.mxu1 %v11487_v1  ;;  %v12282_v55 = vpack.c.bf16 %v2984_v14, %v2981_v40  ;;  %v12303_v36 = vpack.c.bf16 %v2985_v24, %v2982_v63  ;;  %v12308_v38 = vpack.c.bf16 %v2991_v18, %v2988_v15 }
 0x5fa   : > { %v2730_v43 = vmax.f32 %v2725_v21, 0.0  ;;  %7721 = vmatprep.mubr.msk.f32.mxu0 %vm11486_vm1, %v11487_v1  ;;  %9322 = vmatprep.subr.bf16.mxu1 %v12236_v10 }
 0x5fb   : > { %9348 = vmatprep.subr.bf16.mxu0 %v11485_v39 }
 0x5fc   : > { %7169 = vmatmul.mubr.msk.f32.gmra.mrb[28].mxu1 %vm2638_vm2, %v2730_v43  ;;  %7722 = vmatmul.mubr.msk.f32.gmra.mrb[28].mxu0 %vm2638_vm2, %v2730_v43 }
 0x5fd   : > { %9324 = vmatpush1.bf16.msra.mxu1 %v12243_v25  ;;  %3073 = vmatprep.mubr.f32.mxu1 %v11487_v1 }
 0x5fe   : > { %9326 = vmatprep.subr.bf16.mxu1 %v12248_v44  ;;  %9350 = vmatpush3.bf16.msra.mxu0 %v12250_v57 }
 0x5ff   : > { %9351 = vmatprep.subr.bf16.mxu0 %v11485_v39  ;;  %7756 = vmatprep.mubr.msk.f32.mxu0 %vm11486_vm1, %v11487_v1 }
 0x601   : > { %9328 = vmatpush1.bf16.msra.mxu1 %v12256_v32 }
 0x602   : > { %9330 = vmatprep.subr.bf16.mxu1 %v12260_v33  ;;  %9353 = vmatpush3.bf16.msra.mxu0 %v12263_v37 }
 0x603   : > { %9354 = vmatprep.subr.bf16.mxu0 %v11485_v39 }
 0x605   : > { %9332 = vmatpush1.bf16.msra.mxu1 %v12269_v3 }
 0x606   : > { %9334 = vmatprep.subr.bf16.mxu1 %v12272_v47  ;;  %9356 = vmatpush3.bf16.msra.mxu0 %v12275_v41 }
 0x607   : > { %9357 = vmatprep.subr.bf16.mxu0 %v11485_v39 }
 0x609   : > { %9336 = vmatpush1.bf16.msra.mxu1 %v12279_v51 }
 0x60a   : > { %9338 = vmatprep.subr.bf16.mxu1 %v12282_v55  ;;  %9359 = vmatpush3.bf16.msra.mxu0 %v12285_v53 }
 0x60b   : > { %9360 = vmatprep.subr.bf16.mxu0 %v11485_v39 }
 0x60d   : > { %9340 = vmatpush1.bf16.msra.mxu1 %v12289_v31 }
 0x60e   : > { %9342 = vmatprep.subr.bf16.mxu1 %v12292_v61  ;;  %9362 = vmatpush3.bf16.msra.mxu0 %v12295_v8 }
 0x60f   : > { %9363 = vmatprep.subr.bf16.mxu0 %v11485_v39 }
 0x611   : > { %9344 = vmatpush1.bf16.msra.mxu1 %v12299_v11 }
 0x612   : > { %9365 = vmatpush3.bf16.msra.mxu0 %v12303_v36  ;;  %9370 = vmatprep.subr.bf16.mxu1 %v12217_v17 }
 0x613   : > { %9366 = vmatprep.subr.bf16.mxu0 %v11485_v39 }
 0x614   : > { %3074 = vmatmul.mubr.f32.vlgmr.msra.gmra.mrb[30].mxu1 %v11487_v1 }
 0x615   : > { %9372 = vmatpush1.bf16.msra.mxu1 %v12221_v13  ;;  %3235 = vmatprep.mubr.f32.mxu1 %v11487_v1 }
 0x616   : > { %9368 = vmatpush3.bf16.msra.mxu0 %v12308_v38  ;;  %9374 = vmatprep.subr.bf16.mxu1 %v12223_v59 }
 0x617   : > { %9401 = vmatprep.subr.bf16.mxu0 %v11485_v39 }
 0x619   : > { %7757 = vmatmul.mubr.f32.vlgmr.msra.gmra.mrb[30].mxu0 %v11487_v1  ;;  %9376 = vmatpush1.bf16.msra.mxu1 %v12231_v9 }
 0x61a   : > { %9403 = vmatpush3.bf16.msra.mxu0 %v12225_v6  ;;  %9378 = vmatprep.subr.bf16.mxu1 %v12236_v10 }
 0x61b   : > { %9404 = vmatprep.subr.bf16.mxu0 %v11485_v39  ;;  %7791 = vmatprep.mubr.msk.f32.mxu0 %vm11486_vm1, %v11487_v1 }
 0x61d   : > { %9380 = vmatpush1.bf16.msra.mxu1 %v12243_v25 }
 0x61e   : > { %9406 = vmatpush3.bf16.msra.mxu0 %v12250_v57  ;;  %9382 = vmatprep.subr.bf16.mxu1 %v12248_v44 }
 0x61f   : > { %9407 = vmatprep.subr.bf16.mxu0 %v11485_v39 }
 0x621   : > { %9384 = vmatpush1.bf16.msra.mxu1 %v12256_v32 }
 0x622   : > { %9409 = vmatpush3.bf16.msra.mxu0 %v12263_v37  ;;  %9386 = vmatprep.subr.bf16.mxu1 %v12260_v33 }
 0x623   : > { %9410 = vmatprep.subr.bf16.mxu0 %v11485_v39 }
 0x625   : > { %9388 = vmatpush1.bf16.msra.mxu1 %v12269_v3 }
 0x626   : > { %9412 = vmatpush3.bf16.msra.mxu0 %v12275_v41  ;;  %9390 = vmatprep.subr.bf16.mxu1 %v12272_v47 }
 0x627   : > { %9413 = vmatprep.subr.bf16.mxu0 %v11485_v39 }
 0x629   : > { %9392 = vmatpush1.bf16.msra.mxu1 %v12279_v51 }
 0x62a   : > { %9415 = vmatpush3.bf16.msra.mxu0 %v12285_v53  ;;  %9394 = vmatprep.subr.bf16.mxu1 %v12282_v55 }
 0x62b   : > { %9416 = vmatprep.subr.bf16.mxu0 %v11485_v39 }
 0x62d   : > { %9396 = vmatpush1.bf16.msra.mxu1 %v12289_v31 }
 0x62e   : > { %9418 = vmatpush3.bf16.msra.mxu0 %v12295_v8  ;;  %9398 = vmatprep.subr.bf16.mxu1 %v12292_v61 }
 0x62f   : > { %9419 = vmatprep.subr.bf16.mxu0 %v11485_v39 }
 0x631   : > { %9400 = vmatpush1.bf16.msra.mxu1 %v12299_v11 }
 0x632   : > { %9421 = vmatpush3.bf16.msra.mxu0 %v12303_v36  ;;  %9426 = vmatprep.subr.bf16.mxu1 %v12217_v17 }
 0x633   : > { %9422 = vmatprep.subr.bf16.mxu0 %v11485_v39 }
 0x636   : > { %9424 = vmatpush3.bf16.msra.mxu0 %v12308_v38 }
 0x637   : > { %9457 = vmatprep.subr.bf16.mxu0 %v11485_v39 }
 0x6c7   : > { %v2847_v20 = vpop.f32.mrb[24].mxu1  ;;  %v2930_v21 = vpop.f32.mrb[24].mxu0 }
 0x6c8   : > { %v2849_v22 = vpop.f32.mrb[25].mxu1  ;;  %v7717_v43 = vpop.f32.mrb[25].mxu0  ;;  %v12372_v54 = vadd.f32 %v2847_v20, %v2760_v49 }
 0x6c9   : > { %v12377_v63 = vadd.f32 %v2849_v22, %v2764_v27  ;;  %v12381_v43 = vrot.slane %v2992_v50, %v12009_v56 }
 0x6cb   : > { %v2853_v60 = vpop.f32.mrb[26].mxu1  ;;  %v2935_v5 = vpop.f32.mrb[26].mxu0 }
 0x6cc   : > { %v12354_v29 = vadd.f32 %v2853_v60, %v2760_v49  ;;  %v12356_v34 = vadd.f32 %v2935_v5, %v2768_v26  ;;  %v2855_v16 = vpop.f32.mrb[27].mxu1  ;;  %v7720_v35 = vpop.f32.mrb[27].mxu0 }
 0x6cd   : > { %v12358_v12 = vadd.f32 %v2855_v16, %v2764_v27 }
 0x6cf   : > { %v2859_v7 = vpop.f32.mrb[28].mxu1  ;;  %v2940_v46 = vpop.f32.mrb[28].mxu0 }
 0x6d0   : > { %v12360_v48 = vadd.f32 %v2859_v7, %v2760_v49  ;;  %v12362_v30 = vadd.f32 %v2940_v46, %v2768_v26  ;;  %v2861_v40 = vpop.f32.mrb[29].mxu1  ;;  %v7723_v14 = vpop.f32.mrb[29].mxu0 }
 0x6d1   : > { %v12364_v28 = vadd.f32 %v2861_v40, %v2764_v27  ;;  %v12384_v27 = vadd.f32 %v2930_v21, %v2768_v26 }
 0x6e7   : > { %v3075_v23 = vpop.f32.mrb[30].mxu1 }
 0x6e8   : > { %v3076_v58 = vadd.f32 %v3075_v23, %v12367_v45  ;;  %v3077_v42 = vpop.f32.mrb[31].mxu1 }
 0x6e9   : > { %v3078_v62 = vadd.f32 %v3077_v42, %v12370_v52 }
 0x6ea   : > { %v3150_v4 = vadd.f32 %v3076_v58, %v12372_v54 }
 0x6eb   : > { %v3157_v0 = vadd.f32 %v3078_v62, %v12377_v63 }
 0x6ec   : > { %v7173_v24 = vmul.f32 -1.442695, %v3150_v4  ;;  %v3146_v15 = vpop.f32.mrb[30].mxu0 }
 0x6ed   : > { %v7758_v18 = vpop.f32.mrb[31].mxu0  ;;  %v7174_v2 = vmul.f32 -1.442695, %v3157_v0  ;;  %v3147_v5 = vadd.f32 %v3146_v15, %v12381_v43 }
 0x6ee   : > { %10813 = vpow2.f32 %v7173_v24 }
 0x6ef   : > { %10815 = vpow2.f32 %v7174_v2 }
 0x6f8   : > { %v10814_v19 = vpop.eup %10813 }
 0x6f9   : > { %v3154_v20 = vadd.f32 1.0, %v10814_v19  ;;  %v10816_v49 = vpop.eup %10815 }
 0x6fa   : > { %v3161_v60 = vadd.f32 1.0, %v10816_v49 }
 0x6fb   : > { %10817 = vrcp.f32 %v3154_v20 }
 0x6fc   : > { %10819 = vrcp.f32 %v3161_v60 }
 0x705   : > { %v10818_v22 = vpop.eup %10817 }
 0x706   : > { %v3164_v16 = vmul.f32 %v10818_v22, %v3147_v5  ;;  %v10820_v7 = vpop.eup %10819 }
 0x707   : > { %v3167_v46 = vsub.f32 1.0, %v10820_v7  ;;  %v3169_v23 = vmul.f32 0.0, %v10820_v7 }
 0x708   : > { %v3165_v35 = vadd.f32 %v3164_v16, %v12384_v27 }
 0x70a   : > { %10821 = vtanh.f32 %v3165_v35 }
 0x714   : > { %v10822_v40 = vpop.eup %10821 }
 0x715   : > { %v3168_v14 = vmul.f32 %v10822_v40, %v3167_v46 }
 0x717   : > { %v12387_v58 = vadd.f32 %v3169_v23, %v3168_v14 }
 0x719   : > { %3236 = vmatmul.mubr.f32.vlgmr.msra.gmra.mrb[32].mxu1 %v12387_v58  ;;  %7792 = vmatmul.mubr.f32.vlgmr.msra.gmra.mrb[32].mxu0 %v12387_v58  ;;  %v3341_v35 = vrot.slane %v12387_v58, 7 }
 0x71a   : > { %9428 = vmatpush1.bf16.msra.mxu1 %v12221_v13  ;;  %9459 = vmatpush3.bf16.msra.mxu0 %v12225_v6 }
 0x71b   : > { %9430 = vmatprep.subr.bf16.mxu1 %v12223_v59  ;;  %9460 = vmatprep.subr.bf16.mxu0 %v11485_v39 }
 0x71c   : > { %3412 = vmatprep.mubr.f32.mxu1 %v11487_v1  ;;  %7826 = vmatprep.mubr.msk.f32.mxu0 %vm11486_vm1, %v11487_v1 }
 0x71e   : > { %9432 = vmatpush1.bf16.msra.mxu1 %v12231_v9  ;;  %9462 = vmatpush3.bf16.msra.mxu0 %v12250_v57 }
 0x71f   : > { %9434 = vmatprep.subr.bf16.mxu1 %v12236_v10  ;;  %9463 = vmatprep.subr.bf16.mxu0 %v11485_v39 }
 0x722   : > { %9436 = vmatpush1.bf16.msra.mxu1 %v12243_v25  ;;  %9465 = vmatpush3.bf16.msra.mxu0 %v12263_v37 }
 0x723   : > { %9438 = vmatprep.subr.bf16.mxu1 %v12248_v44  ;;  %9466 = vmatprep.subr.bf16.mxu0 %v11485_v39 }
 0x726   : > { %9440 = vmatpush1.bf16.msra.mxu1 %v12256_v32  ;;  %9468 = vmatpush3.bf16.msra.mxu0 %v12275_v41 }
 0x727   : > { %9442 = vmatprep.subr.bf16.mxu1 %v12260_v33  ;;  %9469 = vmatprep.subr.bf16.mxu0 %v11485_v39 }
 0x72a   : > { %9444 = vmatpush1.bf16.msra.mxu1 %v12269_v3  ;;  %9471 = vmatpush3.bf16.msra.mxu0 %v12285_v53 }
 0x72b   : > { %9446 = vmatprep.subr.bf16.mxu1 %v12272_v47  ;;  %9472 = vmatprep.subr.bf16.mxu0 %v11485_v39 }
 0x72e   : > { %9448 = vmatpush1.bf16.msra.mxu1 %v12279_v51  ;;  %9474 = vmatpush3.bf16.msra.mxu0 %v12295_v8 }
 0x72f   : > { %9450 = vmatprep.subr.bf16.mxu1 %v12282_v55  ;;  %9475 = vmatprep.subr.bf16.mxu0 %v11485_v39 }
 0x732   : > { %9452 = vmatpush1.bf16.msra.mxu1 %v12289_v31  ;;  %9477 = vmatpush3.bf16.msra.mxu0 %v12303_v36 }
 0x733   : > { %9454 = vmatprep.subr.bf16.mxu1 %v12292_v61  ;;  %9478 = vmatprep.subr.bf16.mxu0 %v11485_v39 }
 0x736   : > { %9456 = vmatpush1.bf16.msra.mxu1 %v12299_v11  ;;  %9480 = vmatpush3.bf16.msra.mxu0 %v12308_v38 }
 0x737   : > { %9482 = vmatprep.subr.bf16.mxu1 %v12217_v17  ;;  %9513 = vmatprep.subr.bf16.mxu0 %v11485_v39 }
 0x7ec   : > { %v3237_v56 = vpop.f32.mrb[32].mxu1  ;;  %v3308_v21 = vpop.f32.mrb[32].mxu0 }
 0x7ed   : > { %v3238_v26 = vadd.f32 %v3237_v56, %v12367_v45  ;;  %v3239_v50 = vpop.f32.mrb[33].mxu1  ;;  %v7793_v42 = vpop.f32.mrb[33].mxu0  ;;  %v3309_v5 = vadd.f32 %v3308_v21, %v12381_v43 }
 0x7ee   : > { %v3240_v62 = vadd.f32 %v3239_v50, %v12370_v52 }
 0x7ef   : > { %v3313_v4 = vrot.slane %v3238_v26, 7  ;;  %v3333_v22 = vrot.slane %v3309_v5, 7 }
 0x7f0   : > { %v3323_v24 = vrot.slane %v3240_v62, 7 }
 0x7f1   : > { %v3315_v15 = vadd.f32 %v3313_v4, %v12372_v54 }
 0x7f2   : > { %v3325_v0 = vadd.f32 %v3323_v24, %v12377_v63 }
 0x7f3   : > { %v7175_v18 = vmul.f32 -1.442695, %v3315_v15 }
 0x7f4   : > { %v7176_v2 = vmul.f32 -1.442695, %v3325_v0 }
 0x7f5   : > { %10823 = vpow2.f32 %v7175_v18 }
 0x7f6   : > { %10825 = vpow2.f32 %v7176_v2 }
 0x7ff   : > { %v10824_v19 = vpop.eup %10823 }
 0x800   : > { %v10826_v20 = vpop.eup %10825  ;;  %v3319_v49 = vadd.f32 1.0, %v10824_v19 }
 0x801   : > { %v3329_v60 = vadd.f32 1.0, %v10826_v20 }
 0x802   : > { %10827 = vrcp.f32 %v3319_v49 }
 0x803   : > { %10829 = vrcp.f32 %v3329_v60 }
 0x80c   : > { %v10828_v16 = vpop.eup %10827 }
 0x80d   : > { %v10830_v7 = vpop.eup %10829  ;;  %v3335_v46 = vmul.f32 %v10828_v16, %v3333_v22 }
 0x80e   : > { %v3343_v40 = vmul.f32 %v10830_v7, %v3341_v35  ;;  %v3338_v23 = vsub.f32 1.0, %v10830_v7 }
 0x80f   : > { %v3336_v14 = vadd.f32 %v3335_v46, %v12384_v27 }
 0x811   : > { %10831 = vtanh.f32 %v3336_v14 }
 0x81b   : > { %v10832_v56 = vpop.eup %10831 }
 0x81c   : > { %v3339_v26 = vmul.f32 %v10832_v56, %v3338_v23 }
 0x81e   : > { %v12433_v50 = vadd.f32 %v3343_v40, %v3339_v26 }
 0x820   : > { %v3346_v42 = vrot.slane %v12433_v50, 1  ;;  %v3517_v40 = vrot.slane %v12433_v50, 7 }
 0x822   : > { %3413 = vmatmul.mubr.f32.vlgmr.msra.gmra.mrb[34].mxu1 %v3346_v42  ;;  %7827 = vmatmul.mubr.f32.vlgmr.msra.gmra.mrb[34].mxu0 %v3346_v42 }
 0x823   : > { %9484 = vmatpush1.bf16.msra.mxu1 %v12221_v13  ;;  %9515 = vmatpush3.bf16.msra.mxu0 %v12225_v6 }
 0x824   : > { %9486 = vmatprep.subr.bf16.mxu1 %v12223_v59  ;;  %9516 = vmatprep.subr.bf16.mxu0 %v11485_v39 }
 0x825   : > { %3588 = vmatprep.mubr.f32.mxu1 %v11487_v1  ;;  %7861 = vmatprep.mubr.msk.f32.mxu0 %vm11486_vm1, %v11487_v1 }
 0x827   : > { %9488 = vmatpush1.bf16.msra.mxu1 %v12231_v9  ;;  %9518 = vmatpush3.bf16.msra.mxu0 %v12250_v57 }
 0x828   : > { %9490 = vmatprep.subr.bf16.mxu1 %v12236_v10  ;;  %9519 = vmatprep.subr.bf16.mxu0 %v11485_v39 }
 0x82b   : > { %9492 = vmatpush1.bf16.msra.mxu1 %v12243_v25  ;;  %9521 = vmatpush3.bf16.msra.mxu0 %v12263_v37 }
 0x82c   : > { %9494 = vmatprep.subr.bf16.mxu1 %v12248_v44  ;;  %9522 = vmatprep.subr.bf16.mxu0 %v11485_v39 }
 0x82f   : > { %9496 = vmatpush1.bf16.msra.mxu1 %v12256_v32  ;;  %9524 = vmatpush3.bf16.msra.mxu0 %v12275_v41 }
 0x830   : > { %9498 = vmatprep.subr.bf16.mxu1 %v12260_v33  ;;  %9525 = vmatprep.subr.bf16.mxu0 %v11485_v39 }
 0x833   : > { %9500 = vmatpush1.bf16.msra.mxu1 %v12269_v3  ;;  %9527 = vmatpush3.bf16.msra.mxu0 %v12285_v53 }
 0x834   : > { %9502 = vmatprep.subr.bf16.mxu1 %v12272_v47  ;;  %9528 = vmatprep.subr.bf16.mxu0 %v11485_v39 }
 0x837   : > { %9504 = vmatpush1.bf16.msra.mxu1 %v12279_v51  ;;  %9530 = vmatpush3.bf16.msra.mxu0 %v12295_v8 }
 0x838   : > { %9506 = vmatprep.subr.bf16.mxu1 %v12282_v55  ;;  %9531 = vmatprep.subr.bf16.mxu0 %v11485_v39 }
 0x83b   : > { %9508 = vmatpush1.bf16.msra.mxu1 %v12289_v31  ;;  %9533 = vmatpush3.bf16.msra.mxu0 %v12303_v36 }
 0x83c   : > { %9510 = vmatprep.subr.bf16.mxu1 %v12292_v61  ;;  %9534 = vmatprep.subr.bf16.mxu0 %v11485_v39 }
 0x83f   : > { %9512 = vmatpush1.bf16.msra.mxu1 %v12299_v11  ;;  %9536 = vmatpush3.bf16.msra.mxu0 %v12308_v38 }
 0x840   : > { %9538 = vmatprep.subr.bf16.mxu1 %v12217_v17  ;;  %9569 = vmatprep.subr.bf16.mxu0 %v11485_v39 }
 0x8f5   : > { %v3414_v58 = vpop.f32.mrb[34].mxu1  ;;  %v3485_v21 = vpop.f32.mrb[34].mxu0 }
 0x8f6   : > { %v3415_v62 = vadd.f32 %v3414_v58, %v12367_v45  ;;  %v3416_v4 = vpop.f32.mrb[35].mxu1  ;;  %v7828_v24 = vpop.f32.mrb[35].mxu0  ;;  %v3486_v35 = vadd.f32 %v3485_v21, %v12381_v43 }
 0x8f7   : > { %v3417_v15 = vadd.f32 %v3416_v4, %v12370_v52 }
 0x8f8   : > { %v3490_v0 = vrot.slane %v3415_v62, 6  ;;  %v3510_v7 = vrot.slane %v3486_v35, 6 }
 0x8f9   : > { %v3500_v18 = vrot.slane %v3417_v15, 6 }
 0x8fa   : > { %v3492_v2 = vadd.f32 %v3490_v0, %v12372_v54 }
 0x8fb   : > { %v3502_v19 = vadd.f32 %v3500_v18, %v12377_v63 }
 0x8fc   : > { %v7177_v20 = vmul.f32 -1.442695, %v3492_v2 }
 0x8fd   : > { %v7178_v49 = vmul.f32 -1.442695, %v3502_v19 }
 0x8fe   : > { %10833 = vpow2.f32 %v7177_v20 }
 0x8ff   : > { %10835 = vpow2.f32 %v7178_v49 }
 0x908   : > { %v10834_v60 = vpop.eup %10833 }
 0x909   : > { %v10836_v5 = vpop.eup %10835  ;;  %v3496_v22 = vadd.f32 1.0, %v10834_v60 }
 0x90a   : > { %v3506_v16 = vadd.f32 1.0, %v10836_v5 }
 0x90b   : > { %10837 = vrcp.f32 %v3496_v22 }
 0x90c   : > { %10839 = vrcp.f32 %v3506_v16 }
 0x915   : > { %v10838_v46 = vpop.eup %10837 }
 0x916   : > { %v10840_v14 = vpop.eup %10839  ;;  %v3512_v23 = vmul.f32 %v10838_v46, %v3510_v7 }
 0x917   : > { %v3519_v56 = vmul.f32 %v10840_v14, %v3517_v40  ;;  %v3515_v42 = vsub.f32 1.0, %v10840_v14 }
 0x918   : > { %v3513_v26 = vadd.f32 %v3512_v23, %v12384_v27 }
 0x91a   : > { %10841 = vtanh.f32 %v3513_v26 }
 0x924   : > { %v10842_v58 = vpop.eup %10841 }
 0x925   : > { %v3516_v62 = vmul.f32 %v10842_v58, %v3515_v42 }
 0x927   : > { %v12478_v4 = vadd.f32 %v3519_v56, %v3516_v62 }
 0x929   : > { %v3522_v24 = vrot.slane %v12478_v4, 2  ;;  %v3693_v56 = vrot.slane %v12478_v4, 7 }
 0x92b   : > { %3589 = vmatmul.mubr.f32.vlgmr.msra.gmra.mrb[36].mxu1 %v3522_v24  ;;  %7862 = vmatmul.mubr.f32.vlgmr.msra.gmra.mrb[36].mxu0 %v3522_v24 }
 0x92c   : > { %9540 = vmatpush1.bf16.msra.mxu1 %v12221_v13  ;;  %9571 = vmatpush3.bf16.msra.mxu0 %v12225_v6 }
 0x92d   : > { %9542 = vmatprep.subr.bf16.mxu1 %v12223_v59  ;;  %9572 = vmatprep.subr.bf16.mxu0 %v11485_v39 }
 0x92e   : > { %3764 = vmatprep.mubr.f32.mxu1 %v11487_v1  ;;  %7896 = vmatprep.mubr.msk.f32.mxu0 %vm11486_vm1, %v11487_v1 }
 0x930   : > { %9544 = vmatpush1.bf16.msra.mxu1 %v12231_v9  ;;  %9574 = vmatpush3.bf16.msra.mxu0 %v12250_v57 }
 0x931   : > { %9546 = vmatprep.subr.bf16.mxu1 %v12236_v10  ;;  %9575 = vmatprep.subr.bf16.mxu0 %v11485_v39 }
 0x934   : > { %9548 = vmatpush1.bf16.msra.mxu1 %v12243_v25  ;;  %9577 = vmatpush3.bf16.msra.mxu0 %v12263_v37 }
 0x935   : > { %9550 = vmatprep.subr.bf16.mxu1 %v12248_v44  ;;  %9578 = vmatprep.subr.bf16.mxu0 %v11485_v39 }
 0x938   : > { %9552 = vmatpush1.bf16.msra.mxu1 %v12256_v32  ;;  %9580 = vmatpush3.bf16.msra.mxu0 %v12275_v41 }
 0x939   : > { %9554 = vmatprep.subr.bf16.mxu1 %v12260_v33  ;;  %9581 = vmatprep.subr.bf16.mxu0 %v11485_v39 }
 0x93c   : > { %9556 = vmatpush1.bf16.msra.mxu1 %v12269_v3  ;;  %9583 = vmatpush3.bf16.msra.mxu0 %v12285_v53 }
 0x93d   : > { %9558 = vmatprep.subr.bf16.mxu1 %v12272_v47  ;;  %9584 = vmatprep.subr.bf16.mxu0 %v11485_v39 }
 0x940   : > { %9560 = vmatpush1.bf16.msra.mxu1 %v12279_v51  ;;  %9586 = vmatpush3.bf16.msra.mxu0 %v12295_v8 }
 0x941   : > { %9562 = vmatprep.subr.bf16.mxu1 %v12282_v55  ;;  %9587 = vmatprep.subr.bf16.mxu0 %v11485_v39 }
 0x944   : > { %9564 = vmatpush1.bf16.msra.mxu1 %v12289_v31  ;;  %9589 = vmatpush3.bf16.msra.mxu0 %v12303_v36 }
 0x945   : > { %9566 = vmatprep.subr.bf16.mxu1 %v12292_v61  ;;  %9590 = vmatprep.subr.bf16.mxu0 %v11485_v39 }
 0x948   : > { %9568 = vmatpush1.bf16.msra.mxu1 %v12299_v11  ;;  %9592 = vmatpush3.bf16.msra.mxu0 %v12308_v38 }
 0x949   : > { %9594 = vmatprep.subr.bf16.mxu1 %v12217_v17  ;;  %9625 = vmatprep.subr.bf16.mxu0 %v11485_v39 }
 0x9fe   : > { %v3590_v50 = vpop.f32.mrb[36].mxu1  ;;  %v3661_v21 = vpop.f32.mrb[36].mxu0 }
 0x9ff   : > { %v3591_v15 = vadd.f32 %v3590_v50, %v12367_v45  ;;  %v3592_v0 = vpop.f32.mrb[37].mxu1  ;;  %v7863_v18 = vpop.f32.mrb[37].mxu0  ;;  %v3662_v40 = vadd.f32 %v3661_v21, %v12381_v43 }
 0xa00   : > { %v3593_v2 = vadd.f32 %v3592_v0, %v12370_v52 }
 0xa01   : > { %v3666_v19 = vrot.slane %v3591_v15, 5  ;;  %v3686_v14 = vrot.slane %v3662_v40, 5 }
 0xa02   : > { %v3676_v20 = vrot.slane %v3593_v2, 5 }
 0xa03   : > { %v3668_v49 = vadd.f32 %v3666_v19, %v12372_v54 }
 0xa04   : > { %v3678_v60 = vadd.f32 %v3676_v20, %v12377_v63 }
 0xa05   : > { %v7179_v5 = vmul.f32 -1.442695, %v3668_v49 }
 0xa06   : > { %v7180_v22 = vmul.f32 -1.442695, %v3678_v60 }
 0xa07   : > { %10843 = vpow2.f32 %v7179_v5 }
 0xa08   : > { %10845 = vpow2.f32 %v7180_v22 }
 0xa11   : > { %v10844_v16 = vpop.eup %10843 }
 0xa12   : > { %v10846_v35 = vpop.eup %10845  ;;  %v3672_v7 = vadd.f32 1.0, %v10844_v16 }
 0xa13   : > { %v3682_v46 = vadd.f32 1.0, %v10846_v35 }
 0xa14   : > { %10847 = vrcp.f32 %v3672_v7 }
 0xa15   : > { %10849 = vrcp.f32 %v3682_v46 }
 0xa1e   : > { %v10848_v23 = vpop.eup %10847 }
 0xa1f   : > { %v10850_v26 = vpop.eup %10849  ;;  %v3688_v42 = vmul.f32 %v10848_v23, %v3686_v14 }
 0xa20   : > { %v3695_v58 = vmul.f32 %v10850_v26, %v3693_v56  ;;  %v3691_v24 = vsub.f32 1.0, %v10850_v26 }
 0xa21   : > { %v3689_v62 = vadd.f32 %v3688_v42, %v12384_v27 }
 0xa23   : > { %10851 = vtanh.f32 %v3689_v62 }
 0xa2d   : > { %v10852_v50 = vpop.eup %10851 }
 0xa2e   : > { %v3692_v15 = vmul.f32 %v10852_v50, %v3691_v24 }
 0xa30   : > { %v12523_v0 = vadd.f32 %v3695_v58, %v3692_v15 }
 0xa32   : > { %v3698_v18 = vrot.slane %v12523_v0, 3  ;;  %v3869_v58 = vrot.slane %v12523_v0, 7 }
 0xa34   : > { %3765 = vmatmul.mubr.f32.vlgmr.msra.gmra.mrb[38].mxu1 %v3698_v18  ;;  %7897 = vmatmul.mubr.f32.vlgmr.msra.gmra.mrb[38].mxu0 %v3698_v18 }
 0xa35   : > { %9596 = vmatpush1.bf16.msra.mxu1 %v12221_v13  ;;  %9627 = vmatpush3.bf16.msra.mxu0 %v12225_v6 }
 0xa36   : > { %9598 = vmatprep.subr.bf16.mxu1 %v12223_v59  ;;  %9628 = vmatprep.subr.bf16.mxu0 %v11485_v39 }
 0xa37   : > { %3940 = vmatprep.mubr.f32.mxu1 %v11487_v1  ;;  %7931 = vmatprep.mubr.msk.f32.mxu0 %vm11486_vm1, %v11487_v1 }
 0xa39   : > { %9600 = vmatpush1.bf16.msra.mxu1 %v12231_v9  ;;  %9630 = vmatpush3.bf16.msra.mxu0 %v12250_v57 }
 0xa3a   : > { %9602 = vmatprep.subr.bf16.mxu1 %v12236_v10  ;;  %9631 = vmatprep.subr.bf16.mxu0 %v11485_v39 }
 0xa3d   : > { %9604 = vmatpush1.bf16.msra.mxu1 %v12243_v25  ;;  %9633 = vmatpush3.bf16.msra.mxu0 %v12263_v37 }
 0xa3e   : > { %9606 = vmatprep.subr.bf16.mxu1 %v12248_v44  ;;  %9634 = vmatprep.subr.bf16.mxu0 %v11485_v39 }
 0xa41   : > { %9608 = vmatpush1.bf16.msra.mxu1 %v12256_v32  ;;  %9636 = vmatpush3.bf16.msra.mxu0 %v12275_v41 }
 0xa42   : > { %9610 = vmatprep.subr.bf16.mxu1 %v12260_v33  ;;  %9637 = vmatprep.subr.bf16.mxu0 %v11485_v39 }
 0xa45   : > { %9612 = vmatpush1.bf16.msra.mxu1 %v12269_v3  ;;  %9639 = vmatpush3.bf16.msra.mxu0 %v12285_v53 }
 0xa46   : > { %9614 = vmatprep.subr.bf16.mxu1 %v12272_v47  ;;  %9640 = vmatprep.subr.bf16.mxu0 %v11485_v39 }
 0xa49   : > { %9616 = vmatpush1.bf16.msra.mxu1 %v12279_v51  ;;  %9642 = vmatpush3.bf16.msra.mxu0 %v12295_v8 }
 0xa4a   : > { %9618 = vmatprep.subr.bf16.mxu1 %v12282_v55  ;;  %9643 = vmatprep.subr.bf16.mxu0 %v11485_v39 }
 0xa4d   : > { %9620 = vmatpush1.bf16.msra.mxu1 %v12289_v31  ;;  %9645 = vmatpush3.bf16.msra.mxu0 %v12303_v36 }
 0xa4e   : > { %9622 = vmatprep.subr.bf16.mxu1 %v12292_v61  ;;  %9646 = vmatprep.subr.bf16.mxu0 %v11485_v39 }
 0xa51   : > { %9624 = vmatpush1.bf16.msra.mxu1 %v12299_v11  ;;  %9648 = vmatpush3.bf16.msra.mxu0 %v12308_v38 }
 0xa52   : > { %9650 = vmatprep.subr.bf16.mxu1 %v12217_v17  ;;  %9681 = vmatprep.subr.bf16.mxu0 %v11485_v39 }
 0xb07   : > { %v3766_v4 = vpop.f32.mrb[38].mxu1  ;;  %v3837_v21 = vpop.f32.mrb[38].mxu0 }
 0xb08   : > { %v3767_v2 = vadd.f32 %v3766_v4, %v12367_v45  ;;  %v3768_v19 = vpop.f32.mrb[39].mxu1  ;;  %v7898_v20 = vpop.f32.mrb[39].mxu0  ;;  %v3838_v56 = vadd.f32 %v3837_v21, %v12381_v43 }
 0xb09   : > { %v3769_v49 = vadd.f32 %v3768_v19, %v12370_v52 }
 0xb0a   : > { %v3842_v60 = vrot.slane %v3767_v2, 4  ;;  %v3862_v26 = vrot.slane %v3838_v56, 4 }
 0xb0b   : > { %v3852_v5 = vrot.slane %v3769_v49, 4 }
 0xb0c   : > { %v3844_v22 = vadd.f32 %v3842_v60, %v12372_v54 }
 0xb0d   : > { %v3854_v16 = vadd.f32 %v3852_v5, %v12377_v63 }
 0xb0e   : > { %v7181_v35 = vmul.f32 -1.442695, %v3844_v22 }
 0xb0f   : > { %v7182_v7 = vmul.f32 -1.442695, %v3854_v16 }
 0xb10   : > { %10853 = vpow2.f32 %v7181_v35 }
 0xb11   : > { %10855 = vpow2.f32 %v7182_v7 }
 0xb1a   : > { %v10854_v46 = vpop.eup %10853 }
 0xb1b   : > { %v10856_v40 = vpop.eup %10855  ;;  %v3848_v14 = vadd.f32 1.0, %v10854_v46 }
 0xb1c   : > { %v3858_v23 = vadd.f32 1.0, %v10856_v40 }
 0xb1d   : > { %10857 = vrcp.f32 %v3848_v14 }
 0xb1e   : > { %10859 = vrcp.f32 %v3858_v23 }
 0xb27   : > { %v10858_v42 = vpop.eup %10857 }
 0xb28   : > { %v10860_v62 = vpop.eup %10859  ;;  %v3864_v24 = vmul.f32 %v10858_v42, %v3862_v26 }
 0xb29   : > { %v3871_v50 = vmul.f32 %v10860_v62, %v3869_v58  ;;  %v3867_v18 = vsub.f32 1.0, %v10860_v62 }
 0xb2a   : > { %v3865_v15 = vadd.f32 %v3864_v24, %v12384_v27 }
 0xb2c   : > { %10861 = vtanh.f32 %v3865_v15 }
 0xb36   : > { %v10862_v4 = vpop.eup %10861 }
 0xb37   : > { %v3868_v2 = vmul.f32 %v10862_v4, %v3867_v18 }
 0xb39   : > { %v12568_v19 = vadd.f32 %v3871_v50, %v3868_v2 }
 0xb3b   : > { %v3874_v20 = vrot.slane %v12568_v19, 4  ;;  %v4045_v50 = vrot.slane %v12568_v19, 7 }
 0xb3d   : > { %3941 = vmatmul.mubr.f32.vlgmr.msra.gmra.mrb[40].mxu1 %v3874_v20  ;;  %7932 = vmatmul.mubr.f32.vlgmr.msra.gmra.mrb[40].mxu0 %v3874_v20 }
 0xb3e   : > { %9652 = vmatpush1.bf16.msra.mxu1 %v12221_v13  ;;  %9683 = vmatpush3.bf16.msra.mxu0 %v12225_v6 }
 0xb3f   : > { %9654 = vmatprep.subr.bf16.mxu1 %v12223_v59  ;;  %9684 = vmatprep.subr.bf16.mxu0 %v11485_v39 }
 0xb40   : > { %4116 = vmatprep.mubr.f32.mxu1 %v11487_v1  ;;  %7966 = vmatprep.mubr.msk.f32.mxu0 %vm11486_vm1, %v11487_v1 }
 0xb42   : > { %9656 = vmatpush1.bf16.msra.mxu1 %v12231_v9  ;;  %9686 = vmatpush3.bf16.msra.mxu0 %v12250_v57 }
 0xb43   : > { %9658 = vmatprep.subr.bf16.mxu1 %v12236_v10  ;;  %9687 = vmatprep.subr.bf16.mxu0 %v11485_v39 }
 0xb46   : > { %9660 = vmatpush1.bf16.msra.mxu1 %v12243_v25  ;;  %9689 = vmatpush3.bf16.msra.mxu0 %v12263_v37 }
 0xb47   : > { %9662 = vmatprep.subr.bf16.mxu1 %v12248_v44  ;;  %9690 = vmatprep.subr.bf16.mxu0 %v11485_v39 }
 0xb4a   : > { %9664 = vmatpush1.bf16.msra.mxu1 %v12256_v32  ;;  %9692 = vmatpush3.bf16.msra.mxu0 %v12275_v41 }
 0xb4b   : > { %9666 = vmatprep.subr.bf16.mxu1 %v12260_v33  ;;  %9693 = vmatprep.subr.bf16.mxu0 %v11485_v39 }
 0xb4e   : > { %9668 = vmatpush1.bf16.msra.mxu1 %v12269_v3  ;;  %9695 = vmatpush3.bf16.msra.mxu0 %v12285_v53 }
 0xb4f   : > { %9670 = vmatprep.subr.bf16.mxu1 %v12272_v47  ;;  %9696 = vmatprep.subr.bf16.mxu0 %v11485_v39 }
 0xb52   : > { %9672 = vmatpush1.bf16.msra.mxu1 %v12279_v51  ;;  %9698 = vmatpush3.bf16.msra.mxu0 %v12295_v8 }
 0xb53   : > { %9674 = vmatprep.subr.bf16.mxu1 %v12282_v55  ;;  %9699 = vmatprep.subr.bf16.mxu0 %v11485_v39 }
 0xb56   : > { %9676 = vmatpush1.bf16.msra.mxu1 %v12289_v31  ;;  %9701 = vmatpush3.bf16.msra.mxu0 %v12303_v36 }
 0xb57   : > { %9678 = vmatprep.subr.bf16.mxu1 %v12292_v61  ;;  %9702 = vmatprep.subr.bf16.mxu0 %v11485_v39 }
 0xb5a   : > { %9680 = vmatpush1.bf16.msra.mxu1 %v12299_v11  ;;  %9704 = vmatpush3.bf16.msra.mxu0 %v12308_v38 }
 0xb5b   : > { %9706 = vmatprep.subr.bf16.mxu1 %v12217_v17  ;;  %9737 = vmatprep.subr.bf16.mxu0 %v11485_v39 }
 0xc10   : > { %v3942_v0 = vpop.f32.mrb[40].mxu1  ;;  %v4013_v21 = vpop.f32.mrb[40].mxu0 }
 0xc11   : > { %v3943_v49 = vadd.f32 %v3942_v0, %v12367_v45  ;;  %v3944_v60 = vpop.f32.mrb[41].mxu1  ;;  %v7933_v5 = vpop.f32.mrb[41].mxu0  ;;  %v4014_v58 = vadd.f32 %v4013_v21, %v12381_v43 }
 0xc12   : > { %v3945_v22 = vadd.f32 %v3944_v60, %v12370_v52 }
 0xc13   : > { %v4018_v16 = vrot.slane %v3943_v49, 3  ;;  %v4038_v62 = vrot.slane %v4014_v58, 3 }
 0xc14   : > { %v4028_v35 = vrot.slane %v3945_v22, 3 }
 0xc15   : > { %v4020_v7 = vadd.f32 %v4018_v16, %v12372_v54 }
 0xc16   : > { %v4030_v46 = vadd.f32 %v4028_v35, %v12377_v63 }
 0xc17   : > { %v7183_v40 = vmul.f32 -1.442695, %v4020_v7 }
 0xc18   : > { %v7184_v14 = vmul.f32 -1.442695, %v4030_v46 }
 0xc19   : > { %10863 = vpow2.f32 %v7183_v40 }
 0xc1a   : > { %10865 = vpow2.f32 %v7184_v14 }
 0xc23   : > { %v10864_v23 = vpop.eup %10863 }
 0xc24   : > { %v10866_v56 = vpop.eup %10865  ;;  %v4024_v26 = vadd.f32 1.0, %v10864_v23 }
 0xc25   : > { %v4034_v42 = vadd.f32 1.0, %v10866_v56 }
 0xc26   : > { %10867 = vrcp.f32 %v4024_v26 }
 0xc27   : > { %10869 = vrcp.f32 %v4034_v42 }
 0xc30   : > { %v10868_v24 = vpop.eup %10867 }
 0xc31   : > { %v10870_v15 = vpop.eup %10869  ;;  %v4040_v18 = vmul.f32 %v10868_v24, %v4038_v62 }
 0xc32   : > { %v4047_v4 = vmul.f32 %v10870_v15, %v4045_v50  ;;  %v4043_v20 = vsub.f32 1.0, %v10870_v15 }
 0xc33   : > { %v4041_v2 = vadd.f32 %v4040_v18, %v12384_v27 }
 0xc35   : > { %10871 = vtanh.f32 %v4041_v2 }
 0xc3f   : > { %v10872_v0 = vpop.eup %10871 }
 0xc40   : > { %v4044_v49 = vmul.f32 %v10872_v0, %v4043_v20 }
 0xc42   : > { %v12613_v60 = vadd.f32 %v4047_v4, %v4044_v49 }
 0xc44   : > { %v4050_v5 = vrot.slane %v12613_v60, 5  ;;  %v4221_v4 = vrot.slane %v12613_v60, 7 }
 0xc46   : > { %4117 = vmatmul.mubr.f32.vlgmr.msra.gmra.mrb[42].mxu1 %v4050_v5  ;;  %7967 = vmatmul.mubr.f32.vlgmr.msra.gmra.mrb[42].mxu0 %v4050_v5 }
 0xc47   : > { %9708 = vmatpush1.bf16.msra.mxu1 %v12221_v13  ;;  %9739 = vmatpush3.bf16.msra.mxu0 %v12225_v6 }
 0xc48   : > { %9710 = vmatprep.subr.bf16.mxu1 %v12223_v59  ;;  %9740 = vmatprep.subr.bf16.mxu0 %v11485_v39 }
 0xc49   : > { %4292 = vmatprep.mubr.f32.mxu1 %v11487_v1  ;;  %8001 = vmatprep.mubr.msk.f32.mxu0 %vm11486_vm1, %v11487_v1 }
 0xc4b   : > { %9712 = vmatpush1.bf16.msra.mxu1 %v12231_v9  ;;  %9742 = vmatpush3.bf16.msra.mxu0 %v12250_v57 }
 0xc4c   : > { %9714 = vmatprep.subr.bf16.mxu1 %v12236_v10  ;;  %9743 = vmatprep.subr.bf16.mxu0 %v11485_v39 }
 0xc4f   : > { %9716 = vmatpush1.bf16.msra.mxu1 %v12243_v25  ;;  %9745 = vmatpush3.bf16.msra.mxu0 %v12263_v37 }
 0xc50   : > { %9718 = vmatprep.subr.bf16.mxu1 %v12248_v44  ;;  %9746 = vmatprep.subr.bf16.mxu0 %v11485_v39 }
 0xc53   : > { %9720 = vmatpush1.bf16.msra.mxu1 %v12256_v32  ;;  %9748 = vmatpush3.bf16.msra.mxu0 %v12275_v41 }
 0xc54   : > { %9722 = vmatprep.subr.bf16.mxu1 %v12260_v33  ;;  %9749 = vmatprep.subr.bf16.mxu0 %v11485_v39 }
 0xc57   : > { %9724 = vmatpush1.bf16.msra.mxu1 %v12269_v3  ;;  %9751 = vmatpush3.bf16.msra.mxu0 %v12285_v53 }
 0xc58   : > { %9726 = vmatprep.subr.bf16.mxu1 %v12272_v47  ;;  %9752 = vmatprep.subr.bf16.mxu0 %v11485_v39 }
 0xc5b   : > { %9728 = vmatpush1.bf16.msra.mxu1 %v12279_v51  ;;  %9754 = vmatpush3.bf16.msra.mxu0 %v12295_v8 }
 0xc5c   : > { %9730 = vmatprep.subr.bf16.mxu1 %v12282_v55  ;;  %9755 = vmatprep.subr.bf16.mxu0 %v11485_v39 }
 0xc5f   : > { %9732 = vmatpush1.bf16.msra.mxu1 %v12289_v31  ;;  %9757 = vmatpush3.bf16.msra.mxu0 %v12303_v36 }
 0xc60   : > { %9734 = vmatprep.subr.bf16.mxu1 %v12292_v61  ;;  %9758 = vmatprep.subr.bf16.mxu0 %v11485_v39 }
 0xc63   : > { %9736 = vmatpush1.bf16.msra.mxu1 %v12299_v11  ;;  %9760 = vmatpush3.bf16.msra.mxu0 %v12308_v38 }
 0xc64   : > { %9762 = vmatprep.subr.bf16.mxu1 %v12217_v17  ;;  %9793 = vmatprep.subr.bf16.mxu0 %v11485_v39 }
 0xd19   : > { %v4118_v19 = vpop.f32.mrb[42].mxu1  ;;  %v4189_v21 = vpop.f32.mrb[42].mxu0 }
 0xd1a   : > { %v4119_v22 = vadd.f32 %v4118_v19, %v12367_v45  ;;  %v4120_v16 = vpop.f32.mrb[43].mxu1  ;;  %v7968_v35 = vpop.f32.mrb[43].mxu0  ;;  %v4190_v50 = vadd.f32 %v4189_v21, %v12381_v43 }
 0xd1b   : > { %v4121_v7 = vadd.f32 %v4120_v16, %v12370_v52 }
 0xd1c   : > { %v4194_v46 = vrot.slane %v4119_v22, 2  ;;  %v4214_v15 = vrot.slane %v4190_v50, 2 }
 0xd1d   : > { %v4204_v40 = vrot.slane %v4121_v7, 2 }
 0xd1e   : > { %v4196_v14 = vadd.f32 %v4194_v46, %v12372_v54 }
 0xd1f   : > { %v4206_v23 = vadd.f32 %v4204_v40, %v12377_v63 }
 0xd20   : > { %v7185_v56 = vmul.f32 -1.442695, %v4196_v14 }
 0xd21   : > { %v7186_v26 = vmul.f32 -1.442695, %v4206_v23 }
 0xd22   : > { %10873 = vpow2.f32 %v7185_v56 }
 0xd23   : > { %10875 = vpow2.f32 %v7186_v26 }
 0xd2c   : > { %v10874_v42 = vpop.eup %10873 }
 0xd2d   : > { %v10876_v58 = vpop.eup %10875  ;;  %v4200_v62 = vadd.f32 1.0, %v10874_v42 }
 0xd2e   : > { %v4210_v24 = vadd.f32 1.0, %v10876_v58 }
 0xd2f   : > { %10877 = vrcp.f32 %v4200_v62 }
 0xd30   : > { %10879 = vrcp.f32 %v4210_v24 }
 0xd39   : > { %v10878_v18 = vpop.eup %10877 }
 0xd3a   : > { %v10880_v2 = vpop.eup %10879  ;;  %v4216_v20 = vmul.f32 %v10878_v18, %v4214_v15 }
 0xd3b   : > { %v4223_v0 = vmul.f32 %v10880_v2, %v4221_v4  ;;  %v4219_v5 = vsub.f32 1.0, %v10880_v2 }
 0xd3c   : > { %v4217_v49 = vadd.f32 %v4216_v20, %v12384_v27 }
 0xd3e   : > { %10881 = vtanh.f32 %v4217_v49 }
 0xd48   : > { %v10882_v19 = vpop.eup %10881 }
 0xd49   : > { %v4220_v22 = vmul.f32 %v10882_v19, %v4219_v5 }
 0xd4b   : > { %v12658_v16 = vadd.f32 %v4223_v0, %v4220_v22 }
 0xd4d   : > { %v4226_v35 = vrot.slane %v12658_v16, 6  ;;  %v4397_v0 = vrot.slane %v12658_v16, 7 }
 0xd4f   : > { %4293 = vmatmul.mubr.f32.vlgmr.msra.gmra.mrb[44].mxu1 %v4226_v35  ;;  %8002 = vmatmul.mubr.f32.vlgmr.msra.gmra.mrb[44].mxu0 %v4226_v35 }
 0xd50   : > { %9764 = vmatpush1.bf16.msra.mxu1 %v12221_v13  ;;  %9795 = vmatpush3.bf16.msra.mxu0 %v12225_v6 }
 0xd51   : > { %9766 = vmatprep.subr.bf16.mxu1 %v12223_v59  ;;  %9796 = vmatprep.subr.bf16.mxu0 %v11485_v39 }
 0xd52   : > { %4468 = vmatprep.mubr.f32.mxu1 %v11487_v1  ;;  %8036 = vmatprep.mubr.msk.f32.mxu0 %vm11486_vm1, %v11487_v1 }
 0xd54   : > { %9768 = vmatpush1.bf16.msra.mxu1 %v12231_v9  ;;  %9798 = vmatpush3.bf16.msra.mxu0 %v12250_v57 }
 0xd55   : > { %9770 = vmatprep.subr.bf16.mxu1 %v12236_v10  ;;  %9799 = vmatprep.subr.bf16.mxu0 %v11485_v39 }
 0xd58   : > { %9772 = vmatpush1.bf16.msra.mxu1 %v12243_v25  ;;  %9801 = vmatpush3.bf16.msra.mxu0 %v12263_v37 }
 0xd59   : > { %9774 = vmatprep.subr.bf16.mxu1 %v12248_v44  ;;  %9802 = vmatprep.subr.bf16.mxu0 %v11485_v39 }
 0xd5c   : > { %9776 = vmatpush1.bf16.msra.mxu1 %v12256_v32  ;;  %9804 = vmatpush3.bf16.msra.mxu0 %v12275_v41 }
 0xd5d   : > { %9778 = vmatprep.subr.bf16.mxu1 %v12260_v33  ;;  %9805 = vmatprep.subr.bf16.mxu0 %v11485_v39 }
 0xd60   : > { %9780 = vmatpush1.bf16.msra.mxu1 %v12269_v3  ;;  %9807 = vmatpush3.bf16.msra.mxu0 %v12285_v53 }
 0xd61   : > { %9782 = vmatprep.subr.bf16.mxu1 %v12272_v47  ;;  %9808 = vmatprep.subr.bf16.mxu0 %v11485_v39 }
 0xd64   : > { %9784 = vmatpush1.bf16.msra.mxu1 %v12279_v51  ;;  %9810 = vmatpush3.bf16.msra.mxu0 %v12295_v8 }
 0xd65   : > { %9786 = vmatprep.subr.bf16.mxu1 %v12282_v55  ;;  %9811 = vmatprep.subr.bf16.mxu0 %v11485_v39 }
 0xd68   : > { %9788 = vmatpush1.bf16.msra.mxu1 %v12289_v31  ;;  %9813 = vmatpush3.bf16.msra.mxu0 %v12303_v36 }
 0xd69   : > { %9790 = vmatprep.subr.bf16.mxu1 %v12292_v61  ;;  %9814 = vmatprep.subr.bf16.mxu0 %v11485_v39 }
 0xd6c   : > { %9792 = vmatpush1.bf16.msra.mxu1 %v12299_v11  ;;  %9816 = vmatpush3.bf16.msra.mxu0 %v12308_v38 }
 0xd6d   : > { %9818 = vmatprep.subr.bf16.mxu1 %v12217_v17  ;;  %9849 = vmatprep.subr.bf16.mxu0 %v11485_v39 }
 0xe22   : > { %v4294_v60 = vpop.f32.mrb[44].mxu1  ;;  %v4365_v21 = vpop.f32.mrb[44].mxu0 }
 0xe23   : > { %v4295_v7 = vadd.f32 %v4294_v60, %v12367_v45  ;;  %v4296_v46 = vpop.f32.mrb[45].mxu1  ;;  %v8003_v40 = vpop.f32.mrb[45].mxu0  ;;  %v4366_v4 = vadd.f32 %v4365_v21, %v12381_v43 }
 0xe24   : > { %v4297_v14 = vadd.f32 %v4296_v46, %v12370_v52 }
 0xe25   : > { %v4370_v23 = vrot.slane %v4295_v7, 1  ;;  %v4390_v2 = vrot.slane %v4366_v4, 1 }
 0xe26   : > { %v4380_v56 = vrot.slane %v4297_v14, 1 }
 0xe27   : > { %v4372_v26 = vadd.f32 %v4370_v23, %v12372_v54 }
 0xe28   : > { %v4382_v42 = vadd.f32 %v4380_v56, %v12377_v63 }
 0xe29   : > { %v7187_v58 = vmul.f32 -1.442695, %v4372_v26 }
 0xe2a   : > { %v7188_v62 = vmul.f32 -1.442695, %v4382_v42 }
 0xe2b   : > { %10883 = vpow2.f32 %v7187_v58 }
 0xe2c   : > { %10885 = vpow2.f32 %v7188_v62 }
 0xe35   : > { %v10884_v24 = vpop.eup %10883 }
 0xe36   : > { %v10886_v50 = vpop.eup %10885  ;;  %v4376_v15 = vadd.f32 1.0, %v10884_v24 }
 0xe37   : > { %v4386_v18 = vadd.f32 1.0, %v10886_v50 }
 0xe38   : > { %10887 = vrcp.f32 %v4376_v15 }
 0xe39   : > { %10889 = vrcp.f32 %v4386_v18 }
 0xe42   : > { %v10888_v20 = vpop.eup %10887 }
 0xe43   : > { %v10890_v49 = vpop.eup %10889  ;;  %v4392_v54 = vmul.f32 %v10888_v20, %v4390_v2 }
 0xe44   : > { %v4399_v5 = vmul.f32 %v10890_v49, %v4397_v0  ;;  %v4395_v19 = vsub.f32 1.0, %v10890_v49 }
 0xe45   : > { %v4393_v63 = vadd.f32 %v4392_v54, %v12384_v27 }
 0xe47   : > { %10891 = vtanh.f32 %v4393_v63 }
 0xe51   : > { %v10892_v22 = vpop.eup %10891 }
 0xe52   : > { %v4396_v35 = vmul.f32 %v10892_v22, %v4395_v19 }
 0xe54   : > { %v4400_v60 = vadd.f32 %v4399_v5, %v4396_v35 }
 0xe56   : > { %v12703_v7 = vrot.slane %v4400_v60, 7 }
 0xe58   : > { %4469 = vmatmul.mubr.f32.vlgmr.msra.gmra.mrb[46].mxu1 %v12703_v7  ;;  %8037 = vmatmul.mubr.f32.vlgmr.msra.gmra.mrb[46].mxu0 %v12703_v7 }
 0xe59   : > { %9820 = vmatpush1.bf16.msra.mxu1 %v12221_v13  ;;  %9851 = vmatpush3.bf16.msra.mxu0 %v12225_v6 }
 0xe5a   : > { %9822 = vmatprep.subr.bf16.mxu1 %v12223_v59  ;;  %9852 = vmatprep.subr.bf16.mxu0 %v11485_v39 }
 0xe5b   : > { %4630 = vmatprep.mubr.f32.mxu1 %v11487_v1  ;;  %8071 = vmatprep.mubr.msk.f32.mxu0 %vm11486_vm1, %v11487_v1 }
 0xe5d   : > { %9824 = vmatpush1.bf16.msra.mxu1 %v12231_v9  ;;  %9854 = vmatpush3.bf16.msra.mxu0 %v12250_v57 }
 0xe5e   : > { %9826 = vmatprep.subr.bf16.mxu1 %v12236_v10  ;;  %9855 = vmatprep.subr.bf16.mxu0 %v11485_v39 }
 0xe61   : > { %9828 = vmatpush1.bf16.msra.mxu1 %v12243_v25  ;;  %9857 = vmatpush3.bf16.msra.mxu0 %v12263_v37 }
 0xe62   : > { %9830 = vmatprep.subr.bf16.mxu1 %v12248_v44  ;;  %9858 = vmatprep.subr.bf16.mxu0 %v11485_v39 }
 0xe65   : > { %9832 = vmatpush1.bf16.msra.mxu1 %v12256_v32  ;;  %9860 = vmatpush3.bf16.msra.mxu0 %v12275_v41 }
 0xe66   : > { %9834 = vmatprep.subr.bf16.mxu1 %v12260_v33  ;;  %9861 = vmatprep.subr.bf16.mxu0 %v11485_v39 }
 0xe69   : > { %9836 = vmatpush1.bf16.msra.mxu1 %v12269_v3  ;;  %9863 = vmatpush3.bf16.msra.mxu0 %v12285_v53 }
 0xe6a   : > { %9838 = vmatprep.subr.bf16.mxu1 %v12272_v47  ;;  %9864 = vmatprep.subr.bf16.mxu0 %v11485_v39 }
 0xe6d   : > { %9840 = vmatpush1.bf16.msra.mxu1 %v12279_v51  ;;  %9866 = vmatpush3.bf16.msra.mxu0 %v12295_v8 }
 0xe6e   : > { %9842 = vmatprep.subr.bf16.mxu1 %v12282_v55  ;;  %9867 = vmatprep.subr.bf16.mxu0 %v11485_v39 }
 0xe71   : > { %9844 = vmatpush1.bf16.msra.mxu1 %v12289_v31  ;;  %9869 = vmatpush3.bf16.msra.mxu0 %v12303_v36 }
 0xe72   : > { %9846 = vmatprep.subr.bf16.mxu1 %v12292_v61  ;;  %9870 = vmatprep.subr.bf16.mxu0 %v11485_v39 }
 0xe75   : > { %9848 = vmatpush1.bf16.msra.mxu1 %v12299_v11  ;;  %9872 = vmatpush3.bf16.msra.mxu0 %v12308_v38 }
 0xe76   : > { %9874 = vmatprep.subr.bf16.mxu1 %v12217_v17  ;;  %9905 = vmatprep.subr.bf16.mxu0 %v11485_v39 }
 0xf2b   : > { %v4470_v27 = vpop.f32.mrb[46].mxu1  ;;  %v4541_v16 = vpop.f32.mrb[46].mxu0 }
 0xf2c   : > { %v4471_v21 = vadd.f32 %v4470_v27, %v12367_v45  ;;  %v4472_v46 = vpop.f32.mrb[47].mxu1  ;;  %v8038_v40 = vpop.f32.mrb[47].mxu0  ;;  %v4542_v15 = vadd.f32 %v4541_v16, %v12381_v43 }
 0xf2d   : > { %v4473_v14 = vadd.f32 %v4472_v46, %v12370_v52 }
 0xf2e   : > { %v4545_v23 = vadd.f32 %v4471_v21, %v12354_v29 }
 0xf2f   : > { %v4552_v26 = vadd.f32 %v4473_v14, %v12358_v12 }
 0xf30   : > { %v7189_v56 = vmul.f32 -1.442695, %v4545_v23 }
 0xf31   : > { %v7190_v42 = vmul.f32 -1.442695, %v4552_v26 }
 0xf32   : > { %10893 = vpow2.f32 %v7189_v56 }
 0xf33   : > { %10895 = vpow2.f32 %v7190_v42 }
 0xf3c   : > { %v10894_v58 = vpop.eup %10893 }
 0xf3d   : > { %v4549_v62 = vadd.f32 1.0, %v10894_v58  ;;  %v10896_v24 = vpop.eup %10895 }
 0xf3e   : > { %v4556_v50 = vadd.f32 1.0, %v10896_v24 }
 0xf3f   : > { %10897 = vrcp.f32 %v4549_v62 }
 0xf40   : > { %10899 = vrcp.f32 %v4556_v50 }
 0xf49   : > { %v10898_v18 = vpop.eup %10897 }
 0xf4a   : > { %v4559_v4 = vmul.f32 %v10898_v18, %v4542_v15  ;;  %v10900_v20 = vpop.eup %10899 }
 0xf4b   : > { %v4562_v0 = vsub.f32 1.0, %v10900_v20  ;;  %v4564_v5 = vmul.f32 %v10900_v20, %v12703_v7 }
 0xf4c   : > { %v4560_v2 = vadd.f32 %v4559_v4, %v12356_v34 }
 0xf4e   : > { %10901 = vtanh.f32 %v4560_v2 }
 0xf58   : > { %v10902_v49 = vpop.eup %10901 }
 0xf59   : > { %v4563_v54 = vmul.f32 %v10902_v49, %v4562_v0 }
 0xf5b   : > { %v12749_v63 = vadd.f32 %v4564_v5, %v4563_v54 }
 0xf5d   : > { %4631 = vmatmul.mubr.f32.vlgmr.msra.gmra.mrb[48].mxu1 %v12749_v63  ;;  %8072 = vmatmul.mubr.f32.vlgmr.msra.gmra.mrb[48].mxu0 %v12749_v63  ;;  %v4736_v15 = vrot.slane %v12749_v63, 7 }
 0xf5e   : > { %9876 = vmatpush1.bf16.msra.mxu1 %v12221_v13  ;;  %9907 = vmatpush3.bf16.msra.mxu0 %v12225_v6 }
 0xf5f   : > { %9878 = vmatprep.subr.bf16.mxu1 %v12223_v59  ;;  %9908 = vmatprep.subr.bf16.mxu0 %v11485_v39 }
 0xf60   : > { %4807 = vmatprep.mubr.f32.mxu1 %v11487_v1  ;;  %8106 = vmatprep.mubr.msk.f32.mxu0 %vm11486_vm1, %v11487_v1 }
 0xf62   : > { %9880 = vmatpush1.bf16.msra.mxu1 %v12231_v9  ;;  %9910 = vmatpush3.bf16.msra.mxu0 %v12250_v57 }
 0xf63   : > { %9882 = vmatprep.subr.bf16.mxu1 %v12236_v10  ;;  %9911 = vmatprep.subr.bf16.mxu0 %v11485_v39 }
 0xf66   : > { %9884 = vmatpush1.bf16.msra.mxu1 %v12243_v25  ;;  %9913 = vmatpush3.bf16.msra.mxu0 %v12263_v37 }
 0xf67   : > { %9886 = vmatprep.subr.bf16.mxu1 %v12248_v44  ;;  %9914 = vmatprep.subr.bf16.mxu0 %v11485_v39 }
 0xf6a   : > { %9888 = vmatpush1.bf16.msra.mxu1 %v12256_v32  ;;  %9916 = vmatpush3.bf16.msra.mxu0 %v12275_v41 }
 0xf6b   : > { %9890 = vmatprep.subr.bf16.mxu1 %v12260_v33  ;;  %9917 = vmatprep.subr.bf16.mxu0 %v11485_v39 }
 0xf6e   : > { %9892 = vmatpush1.bf16.msra.mxu1 %v12269_v3  ;;  %9919 = vmatpush3.bf16.msra.mxu0 %v12285_v53 }
 0xf6f   : > { %9894 = vmatprep.subr.bf16.mxu1 %v12272_v47  ;;  %9920 = vmatprep.subr.bf16.mxu0 %v11485_v39 }
 0xf72   : > { %9896 = vmatpush1.bf16.msra.mxu1 %v12279_v51  ;;  %9922 = vmatpush3.bf16.msra.mxu0 %v12295_v8 }
 0xf73   : > { %9898 = vmatprep.subr.bf16.mxu1 %v12282_v55  ;;  %9923 = vmatprep.subr.bf16.mxu0 %v11485_v39 }
 0xf76   : > { %9900 = vmatpush1.bf16.msra.mxu1 %v12289_v31  ;;  %9925 = vmatpush3.bf16.msra.mxu0 %v12303_v36 }
 0xf77   : > { %9902 = vmatprep.subr.bf16.mxu1 %v12292_v61  ;;  %9926 = vmatprep.subr.bf16.mxu0 %v11485_v39 }
 0xf7a   : > { %9904 = vmatpush1.bf16.msra.mxu1 %v12299_v11  ;;  %9928 = vmatpush3.bf16.msra.mxu0 %v12308_v38 }
 0xf7b   : > { %9930 = vmatprep.subr.bf16.mxu1 %v12217_v17  ;;  %9961 = vmatprep.subr.bf16.mxu0 %v11485_v39 }
0x1030   : > { %v4632_v19 = vpop.f32.mrb[48].mxu1  ;;  %v4703_v22 = vpop.f32.mrb[48].mxu0 }
0x1031   : > { %v4633_v35 = vadd.f32 %v4632_v19, %v12367_v45  ;;  %v4634_v60 = vpop.f32.mrb[49].mxu1  ;;  %v8073_v7 = vpop.f32.mrb[49].mxu0  ;;  %v4704_v62 = vadd.f32 %v4703_v22, %v12381_v43 }
0x1032   : > { %v4635_v27 = vadd.f32 %v4634_v60, %v12370_v52 }
0x1033   : > { %v4708_v16 = vrot.slane %v4633_v35, 7  ;;  %v4728_v24 = vrot.slane %v4704_v62, 7 }
0x1034   : > { %v4718_v21 = vrot.slane %v4635_v27, 7 }
0x1035   : > { %v4710_v46 = vadd.f32 %v4708_v16, %v12354_v29 }
0x1036   : > { %v4720_v40 = vadd.f32 %v4718_v21, %v12358_v12 }
0x1037   : > { %v7191_v14 = vmul.f32 -1.442695, %v4710_v46 }
0x1038   : > { %v7192_v23 = vmul.f32 -1.442695, %v4720_v40 }
0x1039   : > { %10903 = vpow2.f32 %v7191_v14 }
0x103a   : > { %10905 = vpow2.f32 %v7192_v23 }
0x1043   : > { %v10904_v56 = vpop.eup %10903 }
0x1044   : > { %v10906_v26 = vpop.eup %10905  ;;  %v4714_v42 = vadd.f32 1.0, %v10904_v56 }
0x1045   : > { %v4724_v58 = vadd.f32 1.0, %v10906_v26 }
0x1046   : > { %10907 = vrcp.f32 %v4714_v42 }
0x1047   : > { %10909 = vrcp.f32 %v4724_v58 }
0x1050   : > { %v10908_v50 = vpop.eup %10907 }
0x1051   : > { %v10910_v18 = vpop.eup %10909  ;;  %v4730_v4 = vmul.f32 %v10908_v50, %v4728_v24 }
0x1052   : > { %v4738_v2 = vmul.f32 %v10910_v18, %v4736_v15  ;;  %v4733_v0 = vsub.f32 1.0, %v10910_v18 }
0x1053   : > { %v4731_v20 = vadd.f32 %v4730_v4, %v12356_v34 }
0x1055   : > { %10911 = vtanh.f32 %v4731_v20 }
0x105f   : > { %v10912_v49 = vpop.eup %10911 }
0x1060   : > { %v4734_v54 = vmul.f32 %v10912_v49, %v4733_v0 }
0x1062   : > { %v12795_v5 = vadd.f32 %v4738_v2, %v4734_v54 }
0x1064   : > { %v4741_v19 = vrot.slane %v12795_v5, 1  ;;  %v4912_v15 = vrot.slane %v12795_v5, 7 }
0x1066   : > { %4808 = vmatmul.mubr.f32.vlgmr.msra.gmra.mrb[50].mxu1 %v4741_v19  ;;  %8107 = vmatmul.mubr.f32.vlgmr.msra.gmra.mrb[50].mxu0 %v4741_v19 }
0x1067   : > { %9932 = vmatpush1.bf16.msra.mxu1 %v12221_v13  ;;  %9963 = vmatpush3.bf16.msra.mxu0 %v12225_v6 }
0x1068   : > { %9934 = vmatprep.subr.bf16.mxu1 %v12223_v59  ;;  %9964 = vmatprep.subr.bf16.mxu0 %v11485_v39 }
0x1069   : > { %4983 = vmatprep.mubr.f32.mxu1 %v11487_v1  ;;  %8141 = vmatprep.mubr.msk.f32.mxu0 %vm11486_vm1, %v11487_v1 }
0x106b   : > { %9936 = vmatpush1.bf16.msra.mxu1 %v12231_v9  ;;  %9966 = vmatpush3.bf16.msra.mxu0 %v12250_v57 }
0x106c   : > { %9938 = vmatprep.subr.bf16.mxu1 %v12236_v10  ;;  %9967 = vmatprep.subr.bf16.mxu0 %v11485_v39 }
0x106f   : > { %9940 = vmatpush1.bf16.msra.mxu1 %v12243_v25  ;;  %9969 = vmatpush3.bf16.msra.mxu0 %v12263_v37 }
0x1070   : > { %9942 = vmatprep.subr.bf16.mxu1 %v12248_v44  ;;  %9970 = vmatprep.subr.bf16.mxu0 %v11485_v39 }
0x1073   : > { %9944 = vmatpush1.bf16.msra.mxu1 %v12256_v32  ;;  %9972 = vmatpush3.bf16.msra.mxu0 %v12275_v41 }
0x1074   : > { %9946 = vmatprep.subr.bf16.mxu1 %v12260_v33  ;;  %9973 = vmatprep.subr.bf16.mxu0 %v11485_v39 }
0x1077   : > { %9948 = vmatpush1.bf16.msra.mxu1 %v12269_v3  ;;  %9975 = vmatpush3.bf16.msra.mxu0 %v12285_v53 }
0x1078   : > { %9950 = vmatprep.subr.bf16.mxu1 %v12272_v47  ;;  %9976 = vmatprep.subr.bf16.mxu0 %v11485_v39 }
0x107b   : > { %9952 = vmatpush1.bf16.msra.mxu1 %v12279_v51  ;;  %9978 = vmatpush3.bf16.msra.mxu0 %v12295_v8 }
0x107c   : > { %9954 = vmatprep.subr.bf16.mxu1 %v12282_v55  ;;  %9979 = vmatprep.subr.bf16.mxu0 %v11485_v39 }
0x107f   : > { %9956 = vmatpush1.bf16.msra.mxu1 %v12289_v31  ;;  %9981 = vmatpush3.bf16.msra.mxu0 %v12303_v36 }
0x1080   : > { %9958 = vmatprep.subr.bf16.mxu1 %v12292_v61  ;;  %9982 = vmatprep.subr.bf16.mxu0 %v11485_v39 }
0x1083   : > { %9960 = vmatpush1.bf16.msra.mxu1 %v12299_v11  ;;  %9984 = vmatpush3.bf16.msra.mxu0 %v12308_v38 }
0x1084   : > { %9986 = vmatprep.subr.bf16.mxu1 %v12217_v17  ;;  %10017 = vmatprep.subr.bf16.mxu0 %v11485_v39 }
0x1139   : > { %v4809_v63 = vpop.f32.mrb[50].mxu1  ;;  %v4880_v22 = vpop.f32.mrb[50].mxu0 }
0x113a   : > { %v4810_v35 = vadd.f32 %v4809_v63, %v12367_v45  ;;  %v4811_v60 = vpop.f32.mrb[51].mxu1  ;;  %v8108_v7 = vpop.f32.mrb[51].mxu0  ;;  %v4881_v62 = vadd.f32 %v4880_v22, %v12381_v43 }
0x113b   : > { %v4812_v27 = vadd.f32 %v4811_v60, %v12370_v52 }
0x113c   : > { %v4885_v16 = vrot.slane %v4810_v35, 6  ;;  %v4905_v24 = vrot.slane %v4881_v62, 6 }
0x113d   : > { %v4895_v21 = vrot.slane %v4812_v27, 6 }
0x113e   : > { %v4887_v46 = vadd.f32 %v4885_v16, %v12354_v29 }
0x113f   : > { %v4897_v40 = vadd.f32 %v4895_v21, %v12358_v12 }
0x1140   : > { %v7193_v14 = vmul.f32 -1.442695, %v4887_v46 }
0x1141   : > { %v7194_v23 = vmul.f32 -1.442695, %v4897_v40 }
0x1142   : > { %10913 = vpow2.f32 %v7193_v14 }
0x1143   : > { %10915 = vpow2.f32 %v7194_v23 }
0x114c   : > { %v10914_v56 = vpop.eup %10913 }
0x114d   : > { %v10916_v26 = vpop.eup %10915  ;;  %v4891_v42 = vadd.f32 1.0, %v10914_v56 }
0x114e   : > { %v4901_v58 = vadd.f32 1.0, %v10916_v26 }
0x114f   : > { %10917 = vrcp.f32 %v4891_v42 }
0x1150   : > { %10919 = vrcp.f32 %v4901_v58 }
0x1159   : > { %v10918_v50 = vpop.eup %10917 }
0x115a   : > { %v10920_v18 = vpop.eup %10919  ;;  %v4907_v4 = vmul.f32 %v10918_v50, %v4905_v24 }
0x115b   : > { %v4914_v2 = vmul.f32 %v10920_v18, %v4912_v15  ;;  %v4910_v0 = vsub.f32 1.0, %v10920_v18 }
0x115c   : > { %v4908_v20 = vadd.f32 %v4907_v4, %v12356_v34 }
0x115e   : > { %10921 = vtanh.f32 %v4908_v20 }
0x1168   : > { %v10922_v49 = vpop.eup %10921 }
0x1169   : > { %v4911_v54 = vmul.f32 %v10922_v49, %v4910_v0 }
0x116b   : > { %v12840_v19 = vadd.f32 %v4914_v2, %v4911_v54 }
0x116d   : > { %v4917_v63 = vrot.slane %v12840_v19, 2  ;;  %v5088_v15 = vrot.slane %v12840_v19, 7 }
0x116f   : > { %4984 = vmatmul.mubr.f32.vlgmr.msra.gmra.mrb[52].mxu1 %v4917_v63  ;;  %8142 = vmatmul.mubr.f32.vlgmr.msra.gmra.mrb[52].mxu0 %v4917_v63 }
0x1170   : > { %9988 = vmatpush1.bf16.msra.mxu1 %v12221_v13  ;;  %10019 = vmatpush3.bf16.msra.mxu0 %v12225_v6 }
0x1171   : > { %9990 = vmatprep.subr.bf16.mxu1 %v12223_v59  ;;  %10020 = vmatprep.subr.bf16.mxu0 %v11485_v39 }
0x1172   : > { %5159 = vmatprep.mubr.f32.mxu1 %v11487_v1  ;;  %8176 = vmatprep.mubr.msk.f32.mxu0 %vm11486_vm1, %v11487_v1 }
0x1174   : > { %9992 = vmatpush1.bf16.msra.mxu1 %v12231_v9  ;;  %10022 = vmatpush3.bf16.msra.mxu0 %v12250_v57 }
0x1175   : > { %9994 = vmatprep.subr.bf16.mxu1 %v12236_v10  ;;  %10023 = vmatprep.subr.bf16.mxu0 %v11485_v39 }
0x1178   : > { %9996 = vmatpush1.bf16.msra.mxu1 %v12243_v25  ;;  %10025 = vmatpush3.bf16.msra.mxu0 %v12263_v37 }
0x1179   : > { %9998 = vmatprep.subr.bf16.mxu1 %v12248_v44  ;;  %10026 = vmatprep.subr.bf16.mxu0 %v11485_v39 }
0x117c   : > { %10000 = vmatpush1.bf16.msra.mxu1 %v12256_v32  ;;  %10028 = vmatpush3.bf16.msra.mxu0 %v12275_v41 }
0x117d   : > { %10002 = vmatprep.subr.bf16.mxu1 %v12260_v33  ;;  %10029 = vmatprep.subr.bf16.mxu0 %v11485_v39 }
0x1180   : > { %10004 = vmatpush1.bf16.msra.mxu1 %v12269_v3  ;;  %10031 = vmatpush3.bf16.msra.mxu0 %v12285_v53 }
0x1181   : > { %10006 = vmatprep.subr.bf16.mxu1 %v12272_v47  ;;  %10032 = vmatprep.subr.bf16.mxu0 %v11485_v39 }
0x1184   : > { %10008 = vmatpush1.bf16.msra.mxu1 %v12279_v51  ;;  %10034 = vmatpush3.bf16.msra.mxu0 %v12295_v8 }
0x1185   : > { %10010 = vmatprep.subr.bf16.mxu1 %v12282_v55  ;;  %10035 = vmatprep.subr.bf16.mxu0 %v11485_v39 }
0x1188   : > { %10012 = vmatpush1.bf16.msra.mxu1 %v12289_v31  ;;  %10037 = vmatpush3.bf16.msra.mxu0 %v12303_v36 }
0x1189   : > { %10014 = vmatprep.subr.bf16.mxu1 %v12292_v61  ;;  %10038 = vmatprep.subr.bf16.mxu0 %v11485_v39 }
0x118c   : > { %10016 = vmatpush1.bf16.msra.mxu1 %v12299_v11  ;;  %10040 = vmatpush3.bf16.msra.mxu0 %v12308_v38 }
0x118d   : > { %10042 = vmatprep.subr.bf16.mxu1 %v12217_v17  ;;  %10073 = vmatprep.subr.bf16.mxu0 %v11485_v39 }
0x1242   : > { %v4985_v5 = vpop.f32.mrb[52].mxu1  ;;  %v5056_v22 = vpop.f32.mrb[52].mxu0 }
0x1243   : > { %v4986_v35 = vadd.f32 %v4985_v5, %v12367_v45  ;;  %v4987_v60 = vpop.f32.mrb[53].mxu1  ;;  %v8143_v7 = vpop.f32.mrb[53].mxu0  ;;  %v5057_v62 = vadd.f32 %v5056_v22, %v12381_v43 }
0x1244   : > { %v4988_v27 = vadd.f32 %v4987_v60, %v12370_v52 }
0x1245   : > { %v5061_v16 = vrot.slane %v4986_v35, 5  ;;  %v5081_v24 = vrot.slane %v5057_v62, 5 }
0x1246   : > { %v5071_v21 = vrot.slane %v4988_v27, 5 }
0x1247   : > { %v5063_v46 = vadd.f32 %v5061_v16, %v12354_v29 }
0x1248   : > { %v5073_v40 = vadd.f32 %v5071_v21, %v12358_v12 }
0x1249   : > { %v7195_v14 = vmul.f32 -1.442695, %v5063_v46 }
0x124a   : > { %v7196_v23 = vmul.f32 -1.442695, %v5073_v40 }
0x124b   : > { %10923 = vpow2.f32 %v7195_v14 }
0x124c   : > { %10925 = vpow2.f32 %v7196_v23 }
0x1255   : > { %v10924_v56 = vpop.eup %10923 }
0x1256   : > { %v10926_v26 = vpop.eup %10925  ;;  %v5067_v42 = vadd.f32 1.0, %v10924_v56 }
0x1257   : > { %v5077_v58 = vadd.f32 1.0, %v10926_v26 }
0x1258   : > { %10927 = vrcp.f32 %v5067_v42 }
0x1259   : > { %10929 = vrcp.f32 %v5077_v58 }
0x1262   : > { %v10928_v50 = vpop.eup %10927 }
0x1263   : > { %v10930_v18 = vpop.eup %10929  ;;  %v5083_v4 = vmul.f32 %v10928_v50, %v5081_v24 }
0x1264   : > { %v5090_v2 = vmul.f32 %v10930_v18, %v5088_v15  ;;  %v5086_v0 = vsub.f32 1.0, %v10930_v18 }
0x1265   : > { %v5084_v20 = vadd.f32 %v5083_v4, %v12356_v34 }
0x1267   : > { %10931 = vtanh.f32 %v5084_v20 }
0x1271   : > { %v10932_v49 = vpop.eup %10931 }
0x1272   : > { %v5087_v54 = vmul.f32 %v10932_v49, %v5086_v0 }
0x1274   : > { %v12885_v63 = vadd.f32 %v5090_v2, %v5087_v54 }
0x1276   : > { %v5093_v5 = vrot.slane %v12885_v63, 3  ;;  %v5264_v15 = vrot.slane %v12885_v63, 7 }
0x1278   : > { %5160 = vmatmul.mubr.f32.vlgmr.msra.gmra.mrb[54].mxu1 %v5093_v5  ;;  %8177 = vmatmul.mubr.f32.vlgmr.msra.gmra.mrb[54].mxu0 %v5093_v5 }
0x1279   : > { %10044 = vmatpush1.bf16.msra.mxu1 %v12221_v13  ;;  %10075 = vmatpush3.bf16.msra.mxu0 %v12225_v6 }
0x127a   : > { %10046 = vmatprep.subr.bf16.mxu1 %v12223_v59  ;;  %10076 = vmatprep.subr.bf16.mxu0 %v11485_v39 }
0x127b   : > { %5335 = vmatprep.mubr.f32.mxu1 %v11487_v1  ;;  %8211 = vmatprep.mubr.msk.f32.mxu0 %vm11486_vm1, %v11487_v1 }
0x127d   : > { %10048 = vmatpush1.bf16.msra.mxu1 %v12231_v9  ;;  %10078 = vmatpush3.bf16.msra.mxu0 %v12250_v57 }
0x127e   : > { %10050 = vmatprep.subr.bf16.mxu1 %v12236_v10  ;;  %10079 = vmatprep.subr.bf16.mxu0 %v11485_v39 }
0x1281   : > { %10052 = vmatpush1.bf16.msra.mxu1 %v12243_v25  ;;  %10081 = vmatpush3.bf16.msra.mxu0 %v12263_v37 }
0x1282   : > { %10054 = vmatprep.subr.bf16.mxu1 %v12248_v44  ;;  %10082 = vmatprep.subr.bf16.mxu0 %v11485_v39 }
0x1285   : > { %10056 = vmatpush1.bf16.msra.mxu1 %v12256_v32  ;;  %10084 = vmatpush3.bf16.msra.mxu0 %v12275_v41 }
0x1286   : > { %10058 = vmatprep.subr.bf16.mxu1 %v12260_v33  ;;  %10085 = vmatprep.subr.bf16.mxu0 %v11485_v39 }
0x1289   : > { %10060 = vmatpush1.bf16.msra.mxu1 %v12269_v3  ;;  %10087 = vmatpush3.bf16.msra.mxu0 %v12285_v53 }
0x128a   : > { %10062 = vmatprep.subr.bf16.mxu1 %v12272_v47  ;;  %10088 = vmatprep.subr.bf16.mxu0 %v11485_v39 }
0x128d   : > { %10064 = vmatpush1.bf16.msra.mxu1 %v12279_v51  ;;  %10090 = vmatpush3.bf16.msra.mxu0 %v12295_v8 }
0x128e   : > { %10066 = vmatprep.subr.bf16.mxu1 %v12282_v55  ;;  %10091 = vmatprep.subr.bf16.mxu0 %v11485_v39 }
0x1291   : > { %10068 = vmatpush1.bf16.msra.mxu1 %v12289_v31  ;;  %10093 = vmatpush3.bf16.msra.mxu0 %v12303_v36 }
0x1292   : > { %10070 = vmatprep.subr.bf16.mxu1 %v12292_v61  ;;  %10094 = vmatprep.subr.bf16.mxu0 %v11485_v39 }
0x1295   : > { %10072 = vmatpush1.bf16.msra.mxu1 %v12299_v11  ;;  %10096 = vmatpush3.bf16.msra.mxu0 %v12308_v38 }
0x1296   : > { %10098 = vmatprep.subr.bf16.mxu1 %v12217_v17  ;;  %10129 = vmatprep.subr.bf16.mxu0 %v11485_v39 }
0x134b   : > { %v5161_v19 = vpop.f32.mrb[54].mxu1  ;;  %v5232_v22 = vpop.f32.mrb[54].mxu0 }
0x134c   : > { %v5162_v35 = vadd.f32 %v5161_v19, %v12367_v45  ;;  %v5163_v60 = vpop.f32.mrb[55].mxu1  ;;  %v8178_v7 = vpop.f32.mrb[55].mxu0  ;;  %v5233_v62 = vadd.f32 %v5232_v22, %v12381_v43 }
0x134d   : > { %v5164_v27 = vadd.f32 %v5163_v60, %v12370_v52 }
0x134e   : > { %v5237_v16 = vrot.slane %v5162_v35, 4  ;;  %v5257_v24 = vrot.slane %v5233_v62, 4 }
0x134f   : > { %v5247_v21 = vrot.slane %v5164_v27, 4 }
0x1350   : > { %v5239_v46 = vadd.f32 %v5237_v16, %v12354_v29 }
0x1351   : > { %v5249_v40 = vadd.f32 %v5247_v21, %v12358_v12 }
0x1352   : > { %v7197_v14 = vmul.f32 -1.442695, %v5239_v46 }
0x1353   : > { %v7198_v23 = vmul.f32 -1.442695, %v5249_v40 }
0x1354   : > { %10933 = vpow2.f32 %v7197_v14 }
0x1355   : > { %10935 = vpow2.f32 %v7198_v23 }
0x135e   : > { %v10934_v56 = vpop.eup %10933 }
0x135f   : > { %v10936_v26 = vpop.eup %10935  ;;  %v5243_v42 = vadd.f32 1.0, %v10934_v56 }
0x1360   : > { %v5253_v58 = vadd.f32 1.0, %v10936_v26 }
0x1361   : > { %10937 = vrcp.f32 %v5243_v42 }
0x1362   : > { %10939 = vrcp.f32 %v5253_v58 }
0x136b   : > { %v10938_v50 = vpop.eup %10937 }
0x136c   : > { %v10940_v18 = vpop.eup %10939  ;;  %v5259_v4 = vmul.f32 %v10938_v50, %v5257_v24 }
0x136d   : > { %v5266_v2 = vmul.f32 %v10940_v18, %v5264_v15  ;;  %v5262_v0 = vsub.f32 1.0, %v10940_v18 }
0x136e   : > { %v5260_v20 = vadd.f32 %v5259_v4, %v12356_v34 }
0x1370   : > { %10941 = vtanh.f32 %v5260_v20 }
0x137a   : > { %v10942_v49 = vpop.eup %10941 }
0x137b   : > { %v5263_v54 = vmul.f32 %v10942_v49, %v5262_v0 }
0x137d   : > { %v12930_v5 = vadd.f32 %v5266_v2, %v5263_v54 }
0x137f   : > { %v5269_v19 = vrot.slane %v12930_v5, 4  ;;  %v5440_v15 = vrot.slane %v12930_v5, 7 }
0x1381   : > { %5336 = vmatmul.mubr.f32.vlgmr.msra.gmra.mrb[56].mxu1 %v5269_v19  ;;  %8212 = vmatmul.mubr.f32.vlgmr.msra.gmra.mrb[56].mxu0 %v5269_v19 }
0x1382   : > { %10100 = vmatpush1.bf16.msra.mxu1 %v12221_v13  ;;  %10131 = vmatpush3.bf16.msra.mxu0 %v12225_v6 }
0x1383   : > { %10102 = vmatprep.subr.bf16.mxu1 %v12223_v59  ;;  %10132 = vmatprep.subr.bf16.mxu0 %v11485_v39 }
0x1384   : > { %5511 = vmatprep.mubr.f32.mxu1 %v11487_v1  ;;  %8246 = vmatprep.mubr.msk.f32.mxu0 %vm11486_vm1, %v11487_v1 }
0x1386   : > { %10104 = vmatpush1.bf16.msra.mxu1 %v12231_v9  ;;  %10134 = vmatpush3.bf16.msra.mxu0 %v12250_v57 }
0x1387   : > { %10106 = vmatprep.subr.bf16.mxu1 %v12236_v10  ;;  %10135 = vmatprep.subr.bf16.mxu0 %v11485_v39 }
0x138a   : > { %10108 = vmatpush1.bf16.msra.mxu1 %v12243_v25  ;;  %10137 = vmatpush3.bf16.msra.mxu0 %v12263_v37 }
0x138b   : > { %10110 = vmatprep.subr.bf16.mxu1 %v12248_v44  ;;  %10138 = vmatprep.subr.bf16.mxu0 %v11485_v39 }
0x138e   : > { %10112 = vmatpush1.bf16.msra.mxu1 %v12256_v32  ;;  %10140 = vmatpush3.bf16.msra.mxu0 %v12275_v41 }
0x138f   : > { %10114 = vmatprep.subr.bf16.mxu1 %v12260_v33  ;;  %10141 = vmatprep.subr.bf16.mxu0 %v11485_v39 }
0x1392   : > { %10116 = vmatpush1.bf16.msra.mxu1 %v12269_v3  ;;  %10143 = vmatpush3.bf16.msra.mxu0 %v12285_v53 }
0x1393   : > { %10118 = vmatprep.subr.bf16.mxu1 %v12272_v47  ;;  %10144 = vmatprep.subr.bf16.mxu0 %v11485_v39 }
0x1396   : > { %10120 = vmatpush1.bf16.msra.mxu1 %v12279_v51  ;;  %10146 = vmatpush3.bf16.msra.mxu0 %v12295_v8 }
0x1397   : > { %10122 = vmatprep.subr.bf16.mxu1 %v12282_v55  ;;  %10147 = vmatprep.subr.bf16.mxu0 %v11485_v39 }
0x139a   : > { %10124 = vmatpush1.bf16.msra.mxu1 %v12289_v31  ;;  %10149 = vmatpush3.bf16.msra.mxu0 %v12303_v36 }
0x139b   : > { %10126 = vmatprep.subr.bf16.mxu1 %v12292_v61  ;;  %10150 = vmatprep.subr.bf16.mxu0 %v11485_v39 }
0x139e   : > { %10128 = vmatpush1.bf16.msra.mxu1 %v12299_v11  ;;  %10152 = vmatpush3.bf16.msra.mxu0 %v12308_v38 }
0x139f   : > { %10154 = vmatprep.subr.bf16.mxu1 %v12217_v17  ;;  %10185 = vmatprep.subr.bf16.mxu0 %v11485_v39 }
0x1454   : > { %v5337_v63 = vpop.f32.mrb[56].mxu1  ;;  %v5408_v22 = vpop.f32.mrb[56].mxu0 }
0x1455   : > { %v5338_v35 = vadd.f32 %v5337_v63, %v12367_v45  ;;  %v5339_v60 = vpop.f32.mrb[57].mxu1  ;;  %v8213_v7 = vpop.f32.mrb[57].mxu0  ;;  %v5409_v62 = vadd.f32 %v5408_v22, %v12381_v43 }
0x1456   : > { %v5340_v27 = vadd.f32 %v5339_v60, %v12370_v52 }
0x1457   : > { %v5413_v16 = vrot.slane %v5338_v35, 3  ;;  %v5433_v24 = vrot.slane %v5409_v62, 3 }
0x1458   : > { %v5423_v21 = vrot.slane %v5340_v27, 3 }
0x1459   : > { %v5415_v46 = vadd.f32 %v5413_v16, %v12354_v29 }
0x145a   : > { %v5425_v40 = vadd.f32 %v5423_v21, %v12358_v12 }
0x145b   : > { %v7199_v14 = vmul.f32 -1.442695, %v5415_v46 }
0x145c   : > { %v7200_v23 = vmul.f32 -1.442695, %v5425_v40 }
0x145d   : > { %10943 = vpow2.f32 %v7199_v14 }
0x145e   : > { %10945 = vpow2.f32 %v7200_v23 }
0x1467   : > { %v10944_v56 = vpop.eup %10943 }
0x1468   : > { %v10946_v26 = vpop.eup %10945  ;;  %v5419_v42 = vadd.f32 1.0, %v10944_v56 }
0x1469   : > { %v5429_v58 = vadd.f32 1.0, %v10946_v26 }
0x146a   : > { %10947 = vrcp.f32 %v5419_v42 }
0x146b   : > { %10949 = vrcp.f32 %v5429_v58 }
0x1474   : > { %v10948_v50 = vpop.eup %10947 }
0x1475   : > { %v10950_v18 = vpop.eup %10949  ;;  %v5435_v4 = vmul.f32 %v10948_v50, %v5433_v24 }
0x1476   : > { %v5442_v2 = vmul.f32 %v10950_v18, %v5440_v15  ;;  %v5438_v0 = vsub.f32 1.0, %v10950_v18 }
0x1477   : > { %v5436_v20 = vadd.f32 %v5435_v4, %v12356_v34 }
0x1479   : > { %10951 = vtanh.f32 %v5436_v20 }
0x1483   : > { %v10952_v49 = vpop.eup %10951 }
0x1484   : > { %v5439_v54 = vmul.f32 %v10952_v49, %v5438_v0 }
0x1486   : > { %v12975_v19 = vadd.f32 %v5442_v2, %v5439_v54 }
0x1488   : > { %v5445_v63 = vrot.slane %v12975_v19, 5  ;;  %v5616_v15 = vrot.slane %v12975_v19, 7 }
0x148a   : > { %5512 = vmatmul.mubr.f32.vlgmr.msra.gmra.mrb[58].mxu1 %v5445_v63  ;;  %8247 = vmatmul.mubr.f32.vlgmr.msra.gmra.mrb[58].mxu0 %v5445_v63 }
0x148b   : > { %10156 = vmatpush1.bf16.msra.mxu1 %v12221_v13  ;;  %10187 = vmatpush3.bf16.msra.mxu0 %v12225_v6 }
0x148c   : > { %10158 = vmatprep.subr.bf16.mxu1 %v12223_v59  ;;  %10188 = vmatprep.subr.bf16.mxu0 %v11485_v39 }
0x148d   : > { %5687 = vmatprep.mubr.f32.mxu1 %v11487_v1  ;;  %8281 = vmatprep.mubr.msk.f32.mxu0 %vm11486_vm1, %v11487_v1 }
0x148f   : > { %10160 = vmatpush1.bf16.msra.mxu1 %v12231_v9  ;;  %10190 = vmatpush3.bf16.msra.mxu0 %v12250_v57 }
0x1490   : > { %10162 = vmatprep.subr.bf16.mxu1 %v12236_v10  ;;  %10191 = vmatprep.subr.bf16.mxu0 %v11485_v39 }
0x1493   : > { %10164 = vmatpush1.bf16.msra.mxu1 %v12243_v25  ;;  %10193 = vmatpush3.bf16.msra.mxu0 %v12263_v37 }
0x1494   : > { %10166 = vmatprep.subr.bf16.mxu1 %v12248_v44  ;;  %10194 = vmatprep.subr.bf16.mxu0 %v11485_v39 }
0x1497   : > { %10168 = vmatpush1.bf16.msra.mxu1 %v12256_v32  ;;  %10196 = vmatpush3.bf16.msra.mxu0 %v12275_v41 }
0x1498   : > { %10170 = vmatprep.subr.bf16.mxu1 %v12260_v33  ;;  %10197 = vmatprep.subr.bf16.mxu0 %v11485_v39 }
0x149b   : > { %10172 = vmatpush1.bf16.msra.mxu1 %v12269_v3  ;;  %10199 = vmatpush3.bf16.msra.mxu0 %v12285_v53 }
0x149c   : > { %10174 = vmatprep.subr.bf16.mxu1 %v12272_v47  ;;  %10200 = vmatprep.subr.bf16.mxu0 %v11485_v39 }
0x149f   : > { %10176 = vmatpush1.bf16.msra.mxu1 %v12279_v51  ;;  %10202 = vmatpush3.bf16.msra.mxu0 %v12295_v8 }
0x14a0   : > { %10178 = vmatprep.subr.bf16.mxu1 %v12282_v55  ;;  %10203 = vmatprep.subr.bf16.mxu0 %v11485_v39 }
0x14a3   : > { %10180 = vmatpush1.bf16.msra.mxu1 %v12289_v31  ;;  %10205 = vmatpush3.bf16.msra.mxu0 %v12303_v36 }
0x14a4   : > { %10182 = vmatprep.subr.bf16.mxu1 %v12292_v61  ;;  %10206 = vmatprep.subr.bf16.mxu0 %v11485_v39 }
0x14a7   : > { %10184 = vmatpush1.bf16.msra.mxu1 %v12299_v11  ;;  %10208 = vmatpush3.bf16.msra.mxu0 %v12308_v38 }
0x14a8   : > { %10210 = vmatprep.subr.bf16.mxu1 %v12217_v17  ;;  %10241 = vmatprep.subr.bf16.mxu0 %v11485_v39 }
0x155d   : > { %v5513_v5 = vpop.f32.mrb[58].mxu1  ;;  %v5584_v22 = vpop.f32.mrb[58].mxu0 }
0x155e   : > { %v5514_v35 = vadd.f32 %v5513_v5, %v12367_v45  ;;  %v5515_v60 = vpop.f32.mrb[59].mxu1  ;;  %v8248_v7 = vpop.f32.mrb[59].mxu0  ;;  %v5585_v62 = vadd.f32 %v5584_v22, %v12381_v43 }
0x155f   : > { %v5516_v27 = vadd.f32 %v5515_v60, %v12370_v52 }
0x1560   : > { %v5589_v16 = vrot.slane %v5514_v35, 2  ;;  %v5609_v24 = vrot.slane %v5585_v62, 2 }
0x1561   : > { %v5599_v21 = vrot.slane %v5516_v27, 2 }
0x1562   : > { %v5591_v46 = vadd.f32 %v5589_v16, %v12354_v29 }
0x1563   : > { %v5601_v40 = vadd.f32 %v5599_v21, %v12358_v12 }
0x1564   : > { %v7201_v14 = vmul.f32 -1.442695, %v5591_v46 }
0x1565   : > { %v7202_v23 = vmul.f32 -1.442695, %v5601_v40 }
0x1566   : > { %10953 = vpow2.f32 %v7201_v14 }
0x1567   : > { %10955 = vpow2.f32 %v7202_v23 }
0x1570   : > { %v10954_v56 = vpop.eup %10953 }
0x1571   : > { %v10956_v26 = vpop.eup %10955  ;;  %v5595_v42 = vadd.f32 1.0, %v10954_v56 }
0x1572   : > { %v5605_v58 = vadd.f32 1.0, %v10956_v26 }
0x1573   : > { %10957 = vrcp.f32 %v5595_v42 }
0x1574   : > { %10959 = vrcp.f32 %v5605_v58 }
0x157d   : > { %v10958_v50 = vpop.eup %10957 }
0x157e   : > { %v10960_v18 = vpop.eup %10959  ;;  %v5611_v4 = vmul.f32 %v10958_v50, %v5609_v24 }
0x157f   : > { %v5618_v2 = vmul.f32 %v10960_v18, %v5616_v15  ;;  %v5614_v0 = vsub.f32 1.0, %v10960_v18 }
0x1580   : > { %v5612_v20 = vadd.f32 %v5611_v4, %v12356_v34 }
0x1582   : > { %10961 = vtanh.f32 %v5612_v20 }
0x158c   : > { %v10962_v49 = vpop.eup %10961 }
0x158d   : > { %v5615_v54 = vmul.f32 %v10962_v49, %v5614_v0 }
0x158f   : > { %v13020_v63 = vadd.f32 %v5618_v2, %v5615_v54 }
0x1591   : > { %v5621_v5 = vrot.slane %v13020_v63, 6  ;;  %v5792_v15 = vrot.slane %v13020_v63, 7 }
0x1593   : > { %5688 = vmatmul.mubr.f32.vlgmr.msra.gmra.mrb[60].mxu1 %v5621_v5  ;;  %8282 = vmatmul.mubr.f32.vlgmr.msra.gmra.mrb[60].mxu0 %v5621_v5 }
0x1594   : > { %10212 = vmatpush1.bf16.msra.mxu1 %v12221_v13  ;;  %10243 = vmatpush3.bf16.msra.mxu0 %v12225_v6 }
0x1595   : > { %10214 = vmatprep.subr.bf16.mxu1 %v12223_v59  ;;  %10244 = vmatprep.subr.bf16.mxu0 %v11485_v39 }
0x1596   : > { %5863 = vmatprep.mubr.f32.mxu1 %v11487_v1  ;;  %8316 = vmatprep.mubr.msk.f32.mxu0 %vm11486_vm1, %v11487_v1 }
0x1598   : > { %10216 = vmatpush1.bf16.msra.mxu1 %v12231_v9  ;;  %10246 = vmatpush3.bf16.msra.mxu0 %v12250_v57 }
0x1599   : > { %10218 = vmatprep.subr.bf16.mxu1 %v12236_v10  ;;  %10247 = vmatprep.subr.bf16.mxu0 %v11485_v39 }
0x159c   : > { %10220 = vmatpush1.bf16.msra.mxu1 %v12243_v25  ;;  %10249 = vmatpush3.bf16.msra.mxu0 %v12263_v37 }
0x159d   : > { %10222 = vmatprep.subr.bf16.mxu1 %v12248_v44  ;;  %10250 = vmatprep.subr.bf16.mxu0 %v11485_v39 }
0x15a0   : > { %10224 = vmatpush1.bf16.msra.mxu1 %v12256_v32  ;;  %10252 = vmatpush3.bf16.msra.mxu0 %v12275_v41 }
0x15a1   : > { %10226 = vmatprep.subr.bf16.mxu1 %v12260_v33  ;;  %10253 = vmatprep.subr.bf16.mxu0 %v11485_v39 }
0x15a4   : > { %10228 = vmatpush1.bf16.msra.mxu1 %v12269_v3  ;;  %10255 = vmatpush3.bf16.msra.mxu0 %v12285_v53 }
0x15a5   : > { %10230 = vmatprep.subr.bf16.mxu1 %v12272_v47  ;;  %10256 = vmatprep.subr.bf16.mxu0 %v11485_v39 }
0x15a8   : > { %10232 = vmatpush1.bf16.msra.mxu1 %v12279_v51  ;;  %10258 = vmatpush3.bf16.msra.mxu0 %v12295_v8 }
0x15a9   : > { %10234 = vmatprep.subr.bf16.mxu1 %v12282_v55  ;;  %10259 = vmatprep.subr.bf16.mxu0 %v11485_v39 }
0x15ac   : > { %10236 = vmatpush1.bf16.msra.mxu1 %v12289_v31  ;;  %10261 = vmatpush3.bf16.msra.mxu0 %v12303_v36 }
0x15ad   : > { %10238 = vmatprep.subr.bf16.mxu1 %v12292_v61  ;;  %10262 = vmatprep.subr.bf16.mxu0 %v11485_v39 }
0x15b0   : > { %10240 = vmatpush1.bf16.msra.mxu1 %v12299_v11  ;;  %10264 = vmatpush3.bf16.msra.mxu0 %v12308_v38 }
0x15b1   : > { %10266 = vmatprep.subr.bf16.mxu1 %v12217_v17  ;;  %10297 = vmatprep.subr.bf16.mxu0 %v11485_v39 }
0x1666   : > { %v5689_v19 = vpop.f32.mrb[60].mxu1  ;;  %v5760_v22 = vpop.f32.mrb[60].mxu0 }
0x1667   : > { %v5690_v35 = vadd.f32 %v5689_v19, %v12367_v45  ;;  %v5691_v60 = vpop.f32.mrb[61].mxu1  ;;  %v8283_v7 = vpop.f32.mrb[61].mxu0  ;;  %v5761_v62 = vadd.f32 %v5760_v22, %v12381_v43 }
0x1668   : > { %v5692_v27 = vadd.f32 %v5691_v60, %v12370_v52 }
0x1669   : > { %v5765_v16 = vrot.slane %v5690_v35, 1  ;;  %v5785_v24 = vrot.slane %v5761_v62, 1 }
0x166a   : > { %v5775_v21 = vrot.slane %v5692_v27, 1 }
0x166b   : > { %v5767_v46 = vadd.f32 %v5765_v16, %v12354_v29 }
0x166c   : > { %v5777_v40 = vadd.f32 %v5775_v21, %v12358_v12 }
0x166d   : > { %v7203_v14 = vmul.f32 -1.442695, %v5767_v46 }
0x166e   : > { %v7204_v23 = vmul.f32 -1.442695, %v5777_v40 }
0x166f   : > { %10963 = vpow2.f32 %v7203_v14 }
0x1670   : > { %10965 = vpow2.f32 %v7204_v23 }
0x1679   : > { %v10964_v56 = vpop.eup %10963 }
0x167a   : > { %v10966_v26 = vpop.eup %10965  ;;  %v5771_v42 = vadd.f32 1.0, %v10964_v56 }
0x167b   : > { %v5781_v58 = vadd.f32 1.0, %v10966_v26 }
0x167c   : > { %10967 = vrcp.f32 %v5771_v42 }
0x167d   : > { %10969 = vrcp.f32 %v5781_v58 }
0x1686   : > { %v10968_v50 = vpop.eup %10967 }
0x1687   : > { %v10970_v18 = vpop.eup %10969  ;;  %v5787_v29 = vmul.f32 %v10968_v50, %v5785_v24 }
0x1688   : > { %v5794_v4 = vmul.f32 %v10970_v18, %v5792_v15  ;;  %v5790_v2 = vsub.f32 1.0, %v10970_v18 }
0x1689   : > { %v5788_v12 = vadd.f32 %v5787_v29, %v12356_v34 }
0x168b   : > { %10971 = vtanh.f32 %v5788_v12 }
0x1695   : > { %v10972_v20 = vpop.eup %10971 }
0x1696   : > { %v5791_v0 = vmul.f32 %v10972_v20, %v5790_v2 }
0x1698   : > { %v5795_v49 = vadd.f32 %v5794_v4, %v5791_v0 }
0x169a   : > { %v13065_v54 = vrot.slane %v5795_v49, 7 }
0x169c   : > { %5864 = vmatmul.mubr.f32.vlgmr.msra.gmra.mrb[62].mxu1 %v13065_v54  ;;  %8317 = vmatmul.mubr.f32.vlgmr.msra.gmra.mrb[62].mxu0 %v13065_v54 }
0x169d   : > { %10268 = vmatpush1.bf16.msra.mxu1 %v12221_v13  ;;  %10299 = vmatpush3.bf16.msra.mxu0 %v12225_v6 }
0x169e   : > { %10270 = vmatprep.subr.bf16.mxu1 %v12223_v59  ;;  %10300 = vmatprep.subr.bf16.mxu0 %v11485_v39 }
0x169f   : > { %6025 = vmatprep.mubr.f32.mxu1 %v11487_v1  ;;  %8351 = vmatprep.mubr.msk.f32.mxu0 %vm11486_vm1, %v11487_v1 }
0x16a1   : > { %10272 = vmatpush1.bf16.msra.mxu1 %v12231_v9  ;;  %10302 = vmatpush3.bf16.msra.mxu0 %v12250_v57 }
0x16a2   : > { %10274 = vmatprep.subr.bf16.mxu1 %v12236_v10  ;;  %10303 = vmatprep.subr.bf16.mxu0 %v11485_v39 }
0x16a5   : > { %10276 = vmatpush1.bf16.msra.mxu1 %v12243_v25  ;;  %10305 = vmatpush3.bf16.msra.mxu0 %v12263_v37 }
0x16a6   : > { %10278 = vmatprep.subr.bf16.mxu1 %v12248_v44  ;;  %10306 = vmatprep.subr.bf16.mxu0 %v11485_v39 }
0x16a9   : > { %10280 = vmatpush1.bf16.msra.mxu1 %v12256_v32  ;;  %10308 = vmatpush3.bf16.msra.mxu0 %v12275_v41 }
0x16aa   : > { %10282 = vmatprep.subr.bf16.mxu1 %v12260_v33  ;;  %10309 = vmatprep.subr.bf16.mxu0 %v11485_v39 }
0x16ad   : > { %10284 = vmatpush1.bf16.msra.mxu1 %v12269_v3  ;;  %10311 = vmatpush3.bf16.msra.mxu0 %v12285_v53 }
0x16ae   : > { %10286 = vmatprep.subr.bf16.mxu1 %v12272_v47  ;;  %10312 = vmatprep.subr.bf16.mxu0 %v11485_v39 }
0x16b1   : > { %10288 = vmatpush1.bf16.msra.mxu1 %v12279_v51  ;;  %10314 = vmatpush3.bf16.msra.mxu0 %v12295_v8 }
0x16b2   : > { %10290 = vmatprep.subr.bf16.mxu1 %v12282_v55  ;;  %10315 = vmatprep.subr.bf16.mxu0 %v11485_v39 }
0x16b5   : > { %10292 = vmatpush1.bf16.msra.mxu1 %v12289_v31  ;;  %10317 = vmatpush3.bf16.msra.mxu0 %v12303_v36 }
0x16b6   : > { %10294 = vmatprep.subr.bf16.mxu1 %v12292_v61  ;;  %10318 = vmatprep.subr.bf16.mxu0 %v11485_v39 }
0x16b9   : > { %10296 = vmatpush1.bf16.msra.mxu1 %v12299_v11  ;;  %10320 = vmatpush3.bf16.msra.mxu0 %v12308_v38 }
0x16ba   : > { %10322 = vmatprep.subr.bf16.mxu1 %v12217_v17  ;;  %10353 = vmatprep.subr.bf16.mxu0 %v11485_v39 }
0x176f   : > { %v5865_v34 = vpop.f32.mrb[62].mxu1  ;;  %v5936_v63 = vpop.f32.mrb[62].mxu0 }
0x1770   : > { %v5866_v5 = vadd.f32 %v5865_v34, %v12367_v45  ;;  %v5867_v19 = vpop.f32.mrb[63].mxu1  ;;  %v8318_v22 = vpop.f32.mrb[63].mxu0  ;;  %v5937_v23 = vadd.f32 %v5936_v63, %v12381_v43 }
0x1771   : > { %v5868_v35 = vadd.f32 %v5867_v19, %v12370_v52 }
0x1772   : > { %v5940_v60 = vadd.f32 %v5866_v5, %v12360_v48 }
0x1773   : > { %v5947_v27 = vadd.f32 %v5868_v35, %v12364_v28 }
0x1774   : > { %v7205_v7 = vmul.f32 -1.442695, %v5940_v60 }
0x1775   : > { %v7206_v16 = vmul.f32 -1.442695, %v5947_v27 }
0x1776   : > { %10973 = vpow2.f32 %v7205_v7 }
0x1777   : > { %10975 = vpow2.f32 %v7206_v16 }
0x1780   : > { %v10974_v21 = vpop.eup %10973 }
0x1781   : > { %v5944_v46 = vadd.f32 1.0, %v10974_v21  ;;  %v10976_v40 = vpop.eup %10975 }
0x1782   : > { %v5951_v14 = vadd.f32 1.0, %v10976_v40 }
0x1783   : > { %10977 = vrcp.f32 %v5944_v46 }
0x1784   : > { %10979 = vrcp.f32 %v5951_v14 }
0x178d   : > { %v10978_v56 = vpop.eup %10977 }
0x178e   : > { %v5954_v26 = vmul.f32 %v10978_v56, %v5937_v23  ;;  %v10980_v58 = vpop.eup %10979 }
0x178f   : > { %v5957_v62 = vsub.f32 1.0, %v10980_v58  ;;  %v5959_v15 = vmul.f32 %v10980_v58, %v13065_v54 }
0x1790   : > { %v5955_v42 = vadd.f32 %v5954_v26, %v12362_v30 }
0x1792   : > { %10981 = vtanh.f32 %v5955_v42 }
0x179c   : > { %v10982_v24 = vpop.eup %10981 }
0x179d   : > { %v5958_v50 = vmul.f32 %v10982_v24, %v5957_v62 }
0x179f   : > { %v13111_v18 = vadd.f32 %v5959_v15, %v5958_v50 }
0x17a1   : > { %6026 = vmatmul.mubr.f32.vlgmr.msra.gmra.mrb[64].mxu1 %v13111_v18  ;;  %8352 = vmatmul.mubr.f32.vlgmr.msra.gmra.mrb[64].mxu0 %v13111_v18  ;;  %v6131_v46 = vrot.slane %v13111_v18, 7 }
0x17a2   : > { %10324 = vmatpush1.bf16.msra.mxu1 %v12221_v13  ;;  %10355 = vmatpush3.bf16.msra.mxu0 %v12225_v6 }
0x17a3   : > { %10326 = vmatprep.subr.bf16.mxu1 %v12223_v59  ;;  %10356 = vmatprep.subr.bf16.mxu0 %v11485_v39 }
0x17a4   : > { %6202 = vmatprep.mubr.f32.mxu1 %v11487_v1  ;;  %8386 = vmatprep.mubr.msk.f32.mxu0 %vm11486_vm1, %v11487_v1 }
0x17a6   : > { %10328 = vmatpush1.bf16.msra.mxu1 %v12231_v9  ;;  %10358 = vmatpush3.bf16.msra.mxu0 %v12250_v57 }
0x17a7   : > { %10330 = vmatprep.subr.bf16.mxu1 %v12236_v10  ;;  %10359 = vmatprep.subr.bf16.mxu0 %v11485_v39 }
0x17aa   : > { %10332 = vmatpush1.bf16.msra.mxu1 %v12243_v25  ;;  %10361 = vmatpush3.bf16.msra.mxu0 %v12263_v37 }
0x17ab   : > { %10334 = vmatprep.subr.bf16.mxu1 %v12248_v44  ;;  %10362 = vmatprep.subr.bf16.mxu0 %v11485_v39 }
0x17ae   : > { %10336 = vmatpush1.bf16.msra.mxu1 %v12256_v32  ;;  %10364 = vmatpush3.bf16.msra.mxu0 %v12275_v41 }
0x17af   : > { %10338 = vmatprep.subr.bf16.mxu1 %v12260_v33  ;;  %10365 = vmatprep.subr.bf16.mxu0 %v11485_v39 }
0x17b2   : > { %10340 = vmatpush1.bf16.msra.mxu1 %v12269_v3  ;;  %10367 = vmatpush3.bf16.msra.mxu0 %v12285_v53 }
0x17b3   : > { %10342 = vmatprep.subr.bf16.mxu1 %v12272_v47  ;;  %10368 = vmatprep.subr.bf16.mxu0 %v11485_v39 }
0x17b6   : > { %10344 = vmatpush1.bf16.msra.mxu1 %v12279_v51  ;;  %10370 = vmatpush3.bf16.msra.mxu0 %v12295_v8 }
0x17b7   : > { %10346 = vmatprep.subr.bf16.mxu1 %v12282_v55  ;;  %10371 = vmatprep.subr.bf16.mxu0 %v11485_v39 }
0x17ba   : > { %10348 = vmatpush1.bf16.msra.mxu1 %v12289_v31  ;;  %10373 = vmatpush3.bf16.msra.mxu0 %v12303_v36 }
0x17bb   : > { %10350 = vmatprep.subr.bf16.mxu1 %v12292_v61  ;;  %10374 = vmatprep.subr.bf16.mxu0 %v11485_v39 }
0x17be   : > { %10352 = vmatpush1.bf16.msra.mxu1 %v12299_v11  ;;  %10376 = vmatpush3.bf16.msra.mxu0 %v12308_v38 }
0x17bf   : > { %10378 = vmatprep.subr.bf16.mxu1 %v12217_v17  ;;  %10409 = vmatprep.subr.bf16.mxu0 %v11485_v39 }
0x1874   : > { %v6027_v29 = vpop.f32.mrb[64].mxu1  ;;  %v6098_v4 = vpop.f32.mrb[64].mxu0 }
0x1875   : > { %v6028_v12 = vadd.f32 %v6027_v29, %v12367_v45  ;;  %v6029_v2 = vpop.f32.mrb[65].mxu1  ;;  %v8353_v20 = vpop.f32.mrb[65].mxu0  ;;  %v6099_v27 = vadd.f32 %v6098_v4, %v12381_v43 }
0x1876   : > { %v6030_v0 = vadd.f32 %v6029_v2, %v12370_v52 }
0x1877   : > { %v6103_v49 = vrot.slane %v6028_v12, 7  ;;  %v6123_v16 = vrot.slane %v6099_v27, 7 }
0x1878   : > { %v6113_v54 = vrot.slane %v6030_v0, 7 }
0x1879   : > { %v6105_v34 = vadd.f32 %v6103_v49, %v12360_v48 }
0x187a   : > { %v6115_v63 = vadd.f32 %v6113_v54, %v12364_v28 }
0x187b   : > { %v7207_v5 = vmul.f32 -1.442695, %v6105_v34 }
0x187c   : > { %v7208_v19 = vmul.f32 -1.442695, %v6115_v63 }
0x187d   : > { %10983 = vpow2.f32 %v7207_v5 }
0x187e   : > { %10985 = vpow2.f32 %v7208_v19 }
0x1887   : > { %v10984_v22 = vpop.eup %10983 }
0x1888   : > { %v10986_v35 = vpop.eup %10985  ;;  %v6109_v60 = vadd.f32 1.0, %v10984_v22 }
0x1889   : > { %v6119_v7 = vadd.f32 1.0, %v10986_v35 }
0x188a   : > { %10987 = vrcp.f32 %v6109_v60 }
0x188b   : > { %10989 = vrcp.f32 %v6119_v7 }
0x1894   : > { %v10988_v21 = vpop.eup %10987 }
0x1895   : > { %v10990_v40 = vpop.eup %10989  ;;  %v6125_v14 = vmul.f32 %v10988_v21, %v6123_v16 }
0x1896   : > { %v6133_v23 = vmul.f32 %v10990_v40, %v6131_v46  ;;  %v6128_v26 = vsub.f32 1.0, %v10990_v40 }
0x1897   : > { %v6126_v56 = vadd.f32 %v6125_v14, %v12362_v30 }
0x1899   : > { %10991 = vtanh.f32 %v6126_v56 }
0x18a3   : > { %v10992_v42 = vpop.eup %10991 }
0x18a4   : > { %v6129_v58 = vmul.f32 %v10992_v42, %v6128_v26 }
0x18a6   : > { %v13157_v62 = vadd.f32 %v6133_v23, %v6129_v58 }
0x18a8   : > { %v6136_v24 = vrot.slane %v13157_v62, 1  ;;  %v6307_v27 = vrot.slane %v13157_v62, 7 }
0x18aa   : > { %6203 = vmatmul.mubr.f32.vlgmr.msra.gmra.mrb[66].mxu1 %v6136_v24  ;;  %8387 = vmatmul.mubr.f32.vlgmr.msra.gmra.mrb[66].mxu0 %v6136_v24 }
0x18ab   : > { %10380 = vmatpush1.bf16.msra.mxu1 %v12221_v13  ;;  %10411 = vmatpush3.bf16.msra.mxu0 %v12225_v6 }
0x18ac   : > { %10382 = vmatprep.subr.bf16.mxu1 %v12223_v59  ;;  %10412 = vmatprep.subr.bf16.mxu0 %v11485_v39 }
0x18ad   : > { %6378 = vmatprep.mubr.f32.mxu1 %v11487_v1  ;;  %8421 = vmatprep.mubr.msk.f32.mxu0 %vm11486_vm1, %v11487_v1 }
0x18af   : > { %10384 = vmatpush1.bf16.msra.mxu1 %v12231_v9  ;;  %10414 = vmatpush3.bf16.msra.mxu0 %v12250_v57 }
0x18b0   : > { %10386 = vmatprep.subr.bf16.mxu1 %v12236_v10  ;;  %10415 = vmatprep.subr.bf16.mxu0 %v11485_v39 }
0x18b3   : > { %10388 = vmatpush1.bf16.msra.mxu1 %v12243_v25  ;;  %10417 = vmatpush3.bf16.msra.mxu0 %v12263_v37 }
0x18b4   : > { %10390 = vmatprep.subr.bf16.mxu1 %v12248_v44  ;;  %10418 = vmatprep.subr.bf16.mxu0 %v11485_v39 }
0x18b7   : > { %10392 = vmatpush1.bf16.msra.mxu1 %v12256_v32  ;;  %10420 = vmatpush3.bf16.msra.mxu0 %v12275_v41 }
0x18b8   : > { %10394 = vmatprep.subr.bf16.mxu1 %v12260_v33  ;;  %10421 = vmatprep.subr.bf16.mxu0 %v11485_v39 }
0x18bb   : > { %10396 = vmatpush1.bf16.msra.mxu1 %v12269_v3  ;;  %10423 = vmatpush3.bf16.msra.mxu0 %v12285_v53 }
0x18bc   : > { %10398 = vmatprep.subr.bf16.mxu1 %v12272_v47  ;;  %10424 = vmatprep.subr.bf16.mxu0 %v11485_v39 }
0x18bf   : > { %10400 = vmatpush1.bf16.msra.mxu1 %v12279_v51  ;;  %10426 = vmatpush3.bf16.msra.mxu0 %v12295_v8 }
0x18c0   : > { %10402 = vmatprep.subr.bf16.mxu1 %v12282_v55  ;;  %10427 = vmatprep.subr.bf16.mxu0 %v11485_v39 }
0x18c3   : > { %10404 = vmatpush1.bf16.msra.mxu1 %v12289_v31  ;;  %10429 = vmatpush3.bf16.msra.mxu0 %v12303_v36 }
0x18c4   : > { %10406 = vmatprep.subr.bf16.mxu1 %v12292_v61  ;;  %10430 = vmatprep.subr.bf16.mxu0 %v11485_v39 }
0x18c7   : > { %10408 = vmatpush1.bf16.msra.mxu1 %v12299_v11  ;;  %10432 = vmatpush3.bf16.msra.mxu0 %v12308_v38 }
0x18c8   : > { %10434 = vmatprep.subr.bf16.mxu1 %v12217_v17  ;;  %10465 = vmatprep.subr.bf16.mxu0 %v11485_v39 }
0x197d   : > { %v6204_v50 = vpop.f32.mrb[66].mxu1  ;;  %v6275_v15 = vpop.f32.mrb[66].mxu0 }
0x197e   : > { %v6205_v18 = vadd.f32 %v6204_v50, %v12367_v45  ;;  %v6206_v29 = vpop.f32.mrb[67].mxu1  ;;  %v8388_v4 = vpop.f32.mrb[67].mxu0  ;;  %v6276_v35 = vadd.f32 %v6275_v15, %v12381_v43 }
0x197f   : > { %v6207_v12 = vadd.f32 %v6206_v29, %v12370_v52 }
0x1980   : > { %v6280_v2 = vrot.slane %v6205_v18, 6  ;;  %v6300_v60 = vrot.slane %v6276_v35, 6 }
0x1981   : > { %v6290_v20 = vrot.slane %v6207_v12, 6 }
0x1982   : > { %v6282_v0 = vadd.f32 %v6280_v2, %v12360_v48 }
0x1983   : > { %v6292_v49 = vadd.f32 %v6290_v20, %v12364_v28 }
0x1984   : > { %v7209_v54 = vmul.f32 -1.442695, %v6282_v0 }
0x1985   : > { %v7210_v34 = vmul.f32 -1.442695, %v6292_v49 }
0x1986   : > { %10993 = vpow2.f32 %v7209_v54 }
0x1987   : > { %10995 = vpow2.f32 %v7210_v34 }
0x1990   : > { %v10994_v63 = vpop.eup %10993 }
0x1991   : > { %v10996_v5 = vpop.eup %10995  ;;  %v6286_v19 = vadd.f32 1.0, %v10994_v63 }
0x1992   : > { %v6296_v22 = vadd.f32 1.0, %v10996_v5 }
0x1993   : > { %10997 = vrcp.f32 %v6286_v19 }
0x1994   : > { %10999 = vrcp.f32 %v6296_v22 }
0x199d   : > { %v10998_v7 = vpop.eup %10997 }
0x199e   : > { %v11000_v16 = vpop.eup %10999  ;;  %v6302_v21 = vmul.f32 %v10998_v7, %v6300_v60 }
0x199f   : > { %v6309_v46 = vmul.f32 %v11000_v16, %v6307_v27  ;;  %v6305_v14 = vsub.f32 1.0, %v11000_v16 }
0x19a0   : > { %v6303_v40 = vadd.f32 %v6302_v21, %v12362_v30 }
0x19a2   : > { %11001 = vtanh.f32 %v6303_v40 }
0x19ac   : > { %v11002_v23 = vpop.eup %11001 }
0x19ad   : > { %v6306_v56 = vmul.f32 %v11002_v23, %v6305_v14 }
0x19af   : > { %v13202_v26 = vadd.f32 %v6309_v46, %v6306_v56 }
0x19b1   : > { %v6312_v42 = vrot.slane %v13202_v26, 2  ;;  %v6483_v22 = vrot.slane %v13202_v26, 7 }
0x19b3   : > { %6379 = vmatmul.mubr.f32.vlgmr.msra.gmra.mrb[68].mxu1 %v6312_v42  ;;  %8422 = vmatmul.mubr.f32.vlgmr.msra.gmra.mrb[68].mxu0 %v6312_v42 }
0x19b4   : > { %10436 = vmatpush1.bf16.msra.mxu1 %v12221_v13  ;;  %10467 = vmatpush3.bf16.msra.mxu0 %v12225_v6 }
0x19b5   : > { %10438 = vmatprep.subr.bf16.mxu1 %v12223_v59  ;;  %10468 = vmatprep.subr.bf16.mxu0 %v11485_v39 }
0x19b6   : > { %6554 = vmatprep.mubr.f32.mxu1 %v11487_v1  ;;  %8456 = vmatprep.mubr.msk.f32.mxu0 %vm11486_vm1, %v11487_v1 }
0x19b8   : > { %10440 = vmatpush1.bf16.msra.mxu1 %v12231_v9  ;;  %10470 = vmatpush3.bf16.msra.mxu0 %v12250_v57 }
0x19b9   : > { %10442 = vmatprep.subr.bf16.mxu1 %v12236_v10  ;;  %10471 = vmatprep.subr.bf16.mxu0 %v11485_v39 }
0x19bc   : > { %10444 = vmatpush1.bf16.msra.mxu1 %v12243_v25  ;;  %10473 = vmatpush3.bf16.msra.mxu0 %v12263_v37 }
0x19bd   : > { %10446 = vmatprep.subr.bf16.mxu1 %v12248_v44  ;;  %10474 = vmatprep.subr.bf16.mxu0 %v11485_v39 }
0x19c0   : > { %10448 = vmatpush1.bf16.msra.mxu1 %v12256_v32  ;;  %10476 = vmatpush3.bf16.msra.mxu0 %v12275_v41 }
0x19c1   : > { %10450 = vmatprep.subr.bf16.mxu1 %v12260_v33  ;;  %10477 = vmatprep.subr.bf16.mxu0 %v11485_v39 }
0x19c4   : > { %10452 = vmatpush1.bf16.msra.mxu1 %v12269_v3  ;;  %10479 = vmatpush3.bf16.msra.mxu0 %v12285_v53 }
0x19c5   : > { %10454 = vmatprep.subr.bf16.mxu1 %v12272_v47  ;;  %10480 = vmatprep.subr.bf16.mxu0 %v11485_v39 }
0x19c8   : > { %10456 = vmatpush1.bf16.msra.mxu1 %v12279_v51  ;;  %10482 = vmatpush3.bf16.msra.mxu0 %v12295_v8 }
0x19c9   : > { %10458 = vmatprep.subr.bf16.mxu1 %v12282_v55  ;;  %10483 = vmatprep.subr.bf16.mxu0 %v11485_v39 }
0x19cc   : > { %10460 = vmatpush1.bf16.msra.mxu1 %v12289_v31  ;;  %10485 = vmatpush3.bf16.msra.mxu0 %v12303_v36 }
0x19cd   : > { %10462 = vmatprep.subr.bf16.mxu1 %v12292_v61  ;;  %10486 = vmatprep.subr.bf16.mxu0 %v11485_v39 }
0x19d0   : > { %10464 = vmatpush1.bf16.msra.mxu1 %v12299_v11  ;;  %10488 = vmatpush3.bf16.msra.mxu0 %v12308_v38 }
0x19d1   : > { %10490 = vmatprep.subr.bf16.mxu1 %v12217_v17  ;;  %10521 = vmatprep.subr.bf16.mxu0 %v11485_v39 }
0x1a86   : > { %v6380_v58 = vpop.f32.mrb[68].mxu1  ;;  %v6451_v62 = vpop.f32.mrb[68].mxu0 }
0x1a87   : > { %v6381_v24 = vadd.f32 %v6380_v58, %v12367_v45  ;;  %v6382_v50 = vpop.f32.mrb[69].mxu1  ;;  %v8423_v15 = vpop.f32.mrb[69].mxu0  ;;  %v6452_v63 = vadd.f32 %v6451_v62, %v12381_v43 }
0x1a88   : > { %v6383_v18 = vadd.f32 %v6382_v50, %v12370_v52  ;;  %v6840_v50 = vld [vmem:[%s13421_s13 + $0x8] sm:$0xff] }
0x1a89   : > { %v6456_v29 = vrot.slane %v6381_v24, 5  ;;  %v6476_v5 = vrot.slane %v6452_v63, 5  ;;  %v6839_v24 = vld [vmem:[%s13421_s13] sm:$0xff]  ;;  %v6849_v63 = vld [vmem:[%s13421_s13 + $0x50] sm:$0xff] }
0x1a8a   : > { %v6466_v4 = vrot.slane %v6383_v18, 5  ;;  %v10546_v15 = vpack.c.bf16 %v6840_v50, %v6839_v24  ;;  %v6841_v18 = vld [vmem:[%s13421_s13 + $0x10] sm:$0xff] }
0x1a8b   : > { %v6458_v12 = vadd.f32 %v6456_v29, %v12360_v48 }
0x1a8c   : > { %v6468_v2 = vadd.f32 %v6466_v4, %v12364_v28  ;;  %v6843_v4 = vld [vmem:[%s13421_s13 + $0x20] sm:$0xff] }
0x1a8d   : > { %v7211_v20 = vmul.f32 -1.442695, %v6458_v12  ;;  %v6844_v12 = vld [vmem:[%s13421_s13 + $0x28] sm:$0xff] }
0x1a8e   : > { %v7212_v0 = vmul.f32 -1.442695, %v6468_v2  ;;  %v10552_v2 = vpack.c.bf16 %v6844_v12, %v6843_v4 }
0x1a8f   : > { %11003 = vpow2.f32 %v7211_v20  ;;  %v6845_v20 = vld [vmem:[%s13421_s13 + $0x30] sm:$0xff] }
0x1a90   : > { %11005 = vpow2.f32 %v7212_v0  ;;  %v6846_v0 = vld [vmem:[%s13421_s13 + $0x38] sm:$0xff] }
0x1a99   : > { %v11004_v17 = vpop.eup %11003 }
0x1a9a   : > { %v11006_v49 = vpop.eup %11005  ;;  %v6462_v54 = vadd.f32 1.0, %v11004_v17  ;;  %v10555_v17 = vpack.c.bf16 %v6846_v0, %v6845_v20 }
0x1a9b   : > { %v6472_v34 = vadd.f32 1.0, %v11006_v49  ;;  %v6847_v49 = vld [vmem:[%s13421_s13 + $0x40] sm:$0xff] }
0x1a9c   : > { %11007 = vrcp.f32 %v6462_v54  ;;  %v6848_v54 = vld [vmem:[%s13421_s13 + $0x48] sm:$0xff] }
0x1a9d   : > { %11009 = vrcp.f32 %v6472_v34  ;;  %v10558_v34 = vpack.c.bf16 %v6848_v54, %v6847_v49 }
0x1aa6   : > { %v11008_v19 = vpop.eup %11007 }
0x1aa7   : > { %v11010_v35 = vpop.eup %11009  ;;  %v6478_v60 = vmul.f32 %v11008_v19, %v6476_v5  ;;  %v6850_v5 = vld [vmem:[%s13421_s13 + $0x58] sm:$0xff] }
0x1aa8   : > { %v6485_v7 = vmul.f32 %v11010_v35, %v6483_v22  ;;  %v6481_v16 = vsub.f32 1.0, %v11010_v35  ;;  %v10561_v19 = vpack.c.bf16 %v6850_v5, %v6849_v63  ;;  %v6851_v22 = vld [vmem:[%s13421_s13 + $0x60] sm:$0xff]  ;;  %v6852_v35 = vld [vmem:[%s13421_s13 + $0x68] sm:$0xff] }
0x1aa9   : > { %v6479_v27 = vadd.f32 %v6478_v60, %v12362_v30  ;;  %v10564_v60 = vpack.c.bf16 %v6852_v35, %v6851_v22 }
0x1aab   : > { %11011 = vtanh.f32 %v6479_v27  ;;  %v6854_v27 = vld [vmem:[%s13421_s13 + $0x78] sm:$0xff] }
0x1ab5   : > { %v11012_v21 = vpop.eup %11011 }
0x1ab6   : > { %v6482_v46 = vmul.f32 %v11012_v21, %v6481_v16 }
0x1ab8   : > { %v13247_v40 = vadd.f32 %v6485_v7, %v6482_v46  ;;  %v6853_v7 = vld [vmem:[%s13421_s13 + $0x70] sm:$0xff] }
0x1ab9   : > { %v10567_v16 = vpack.c.bf16 %v6854_v27, %v6853_v7 }
0x1aba   : > { %v6488_v14 = vrot.slane %v13247_v40, 3 }
0x1abc   : > { %6555 = vmatmul.mubr.f32.vlgmr.msra.gmra.mrb[70].mxu1 %v6488_v14  ;;  %8457 = vmatmul.mubr.f32.vlgmr.msra.gmra.mrb[70].mxu0 %v6488_v14 }
0x1abd   : > { %10492 = vmatpush1.bf16.msra.mxu1 %v12221_v13  ;;  %10523 = vmatpush3.bf16.msra.mxu0 %v12225_v6 }
0x1abe   : > { %10494 = vmatprep.subr.bf16.mxu1 %v12223_v59  ;;  %10524 = vmatprep.subr.bf16.mxu0 %v11485_v39 }
0x1abf   : > { %6730 = vmatprep.mubr.f32.mxu1 %v11487_v1  ;;  %8491 = vmatprep.mubr.msk.f32.mxu0 %vm11486_vm1, %v11487_v1 }
0x1ac1   : > { %10496 = vmatpush1.bf16.msra.mxu1 %v12231_v9  ;;  %10526 = vmatpush3.bf16.msra.mxu0 %v12250_v57 }
0x1ac2   : > { %10498 = vmatprep.subr.bf16.mxu1 %v12236_v10  ;;  %10527 = vmatprep.subr.bf16.mxu0 %v11485_v39 }
0x1ac5   : > { %10500 = vmatpush1.bf16.msra.mxu1 %v12243_v25  ;;  %10529 = vmatpush3.bf16.msra.mxu0 %v12263_v37 }
0x1ac6   : > { %10502 = vmatprep.subr.bf16.mxu1 %v12248_v44  ;;  %10530 = vmatprep.subr.bf16.mxu0 %v11485_v39 }
0x1ac9   : > { %10504 = vmatpush1.bf16.msra.mxu1 %v12256_v32  ;;  %10532 = vmatpush3.bf16.msra.mxu0 %v12275_v41 }
0x1aca   : > { %10506 = vmatprep.subr.bf16.mxu1 %v12260_v33  ;;  %10533 = vmatprep.subr.bf16.mxu0 %v11485_v39 }
0x1acd   : > { %10508 = vmatpush1.bf16.msra.mxu1 %v12269_v3  ;;  %10535 = vmatpush3.bf16.msra.mxu0 %v12285_v53 }
0x1ace   : > { %10510 = vmatprep.subr.bf16.mxu1 %v12272_v47  ;;  %10536 = vmatprep.subr.bf16.mxu0 %v11485_v39 }
0x1ad1   : > { %10512 = vmatpush1.bf16.msra.mxu1 %v12279_v51  ;;  %10538 = vmatpush3.bf16.msra.mxu0 %v12295_v8  ;;  %v6659_v8 = vrot.slane %v13247_v40, 7 }
0x1ad2   : > { %10514 = vmatprep.subr.bf16.mxu1 %v12282_v55  ;;  %10539 = vmatprep.subr.bf16.mxu0 %v11485_v39 }
0x1ad5   : > { %10516 = vmatpush1.bf16.msra.mxu1 %v12289_v31  ;;  %10541 = vmatpush3.bf16.msra.mxu0 %v12303_v36 }
0x1ad6   : > { %10518 = vmatprep.subr.bf16.mxu1 %v12292_v61  ;;  %10542 = vmatprep.subr.bf16.mxu0 %v11485_v39 }
0x1ad9   : > { %10520 = vmatpush1.bf16.msra.mxu1 %v12299_v11  ;;  %10544 = vmatpush3.bf16.msra.mxu0 %v12308_v38 }
0x1ada   : > { %10545 = vmatprep.subr.bf16.mxu1 %v11485_v39 }
0x1b8f   : > { %v6556_v13 = vpop.f32.mrb[70].mxu1  ;;  %v6627_v59 = vpop.f32.mrb[70].mxu0 }
0x1b90   : > { %v6557_v6 = vadd.f32 %v6556_v13, %v12367_v45  ;;  %v6558_v9 = vpop.f32.mrb[71].mxu1  ;;  %v8458_v10 = vpop.f32.mrb[71].mxu0  ;;  %v6628_v53 = vadd.f32 %v6627_v59, %v12381_v43 }
0x1b91   : > { %v6559_v25 = vadd.f32 %v6558_v9, %v12370_v52 }
0x1b92   : > { %v6632_v44 = vrot.slane %v6557_v6, 4  ;;  %v6652_v31 = vrot.slane %v6628_v53, 4 }
0x1b93   : > { %v6642_v57 = vrot.slane %v6559_v25, 4 }
0x1b94   : > { %v6634_v32 = vadd.f32 %v6632_v44, %v12360_v48 }
0x1b95   : > { %v6644_v33 = vadd.f32 %v6642_v57, %v12364_v28 }
0x1b96   : > { %v7213_v37 = vmul.f32 -1.442695, %v6634_v32 }
0x1b97   : > { %v7214_v3 = vmul.f32 -1.442695, %v6644_v33 }
0x1b98   : > { %11013 = vpow2.f32 %v7213_v37 }
0x1b99   : > { %11015 = vpow2.f32 %v7214_v3 }
0x1ba2   : > { %v11014_v47 = vpop.eup %11013 }
0x1ba3   : > { %v11016_v41 = vpop.eup %11015  ;;  %v6638_v51 = vadd.f32 1.0, %v11014_v47 }
0x1ba4   : > { %v6648_v55 = vadd.f32 1.0, %v11016_v41 }
0x1ba5   : > { %11017 = vrcp.f32 %v6638_v51 }
0x1ba6   : > { %11019 = vrcp.f32 %v6648_v55 }
0x1baf   : > { %v11018_v61 = vpop.eup %11017 }
0x1bb0   : > { %v11020_v11 = vpop.eup %11019  ;;  %v6654_v36 = vmul.f32 %v11018_v61, %v6652_v31 }
0x1bb1   : > { %v6661_v38 = vmul.f32 %v11020_v11, %v6659_v8  ;;  %v6657_v56 = vsub.f32 1.0, %v11020_v11  ;;  %v6855_v11 = vld [vmem:[#allocation20] sm:$0x1] }
0x1bb2   : > { %v6655_v23 = vadd.f32 %v6654_v36, %v12362_v30 }
0x1bb4   : > { %11021 = vtanh.f32 %v6655_v23 }
0x1bbe   : > { %v11022_v26 = vpop.eup %11021 }
0x1bbf   : > { %v6658_v42 = vmul.f32 %v11022_v26, %v6657_v56 }
0x1bc1   : > { %v13291_v58 = vadd.f32 %v6661_v38, %v6658_v42 }
0x1bc3   : > { %v6664_v62 = vrot.slane %v13291_v58, 4  ;;  %v6835_v47 = vrot.slane %v13291_v58, 7 }
0x1bc5   : > { %6731 = vmatmul.mubr.f32.vlgmr.msra.gmra.mrb[72].mxu1 %v6664_v62  ;;  %8492 = vmatmul.mubr.f32.vlgmr.msra.gmra.mrb[72].mxu0 %v6664_v62 }
0x1bc6   : > { %8526 = vmatprep.mubr.msk.f32.mxu1 %vm11486_vm1, %v11487_v1  ;;  %10547 = vmatpush3.bf16.msra.mxu1 %v10546_v15  ;;  %v6842_v1 = vld [vmem:[%s13421_s13 + $0x18] sm:$0xff] }
0x1bc7   : > { %10548 = vmatprep.subr.bf16.mxu1 %v11485_v39  ;;  %v10549_v29 = vpack.c.bf16 %v6842_v1, %v6841_v18 }
0x1bca   : > { %10550 = vmatpush3.bf16.msra.mxu1 %v10549_v29 }
0x1bcb   : > { %10551 = vmatprep.subr.bf16.mxu1 %v11485_v39 }
0x1bce   : > { %10553 = vmatpush3.bf16.msra.mxu1 %v10552_v2 }
0x1bcf   : > { %10554 = vmatprep.subr.bf16.mxu1 %v11485_v39 }
0x1bd2   : > { %10556 = vmatpush3.bf16.msra.mxu1 %v10555_v17 }
0x1bd3   : > { %10557 = vmatprep.subr.bf16.mxu1 %v11485_v39 }
0x1bd6   : > { %10559 = vmatpush3.bf16.msra.mxu1 %v10558_v34 }
0x1bd7   : > { %10560 = vmatprep.subr.bf16.mxu1 %v11485_v39 }
0x1bda   : > { %10562 = vmatpush3.bf16.msra.mxu1 %v10561_v19 }
0x1bdb   : > { %10563 = vmatprep.subr.bf16.mxu1 %v11485_v39 }
0x1bde   : > { %10565 = vmatpush3.bf16.msra.mxu1 %v10564_v60 }
0x1bdf   : > { %10566 = vmatprep.subr.bf16.mxu1 %v11485_v39 }
0x1be2   : > { %10568 = vmatpush3.bf16.msra.mxu1 %v10567_v16 }
0x1c98   : > { %v6732_v21 = vpop.f32.mrb[72].mxu1  ;;  %v6803_v46 = vpop.f32.mrb[72].mxu0 }
0x1c99   : > { %v6733_v40 = vadd.f32 %v6732_v21, %v12367_v45  ;;  %v6734_v14 = vpop.f32.mrb[73].mxu1  ;;  %v8493_v13 = vpop.f32.mrb[73].mxu0  ;;  %v6804_v45 = vadd.f32 %v6803_v46, %v12381_v43 }
0x1c9a   : > { %v6735_v59 = vadd.f32 %v6734_v14, %v12370_v52 }
0x1c9b   : > { %v6808_v6 = vrot.slane %v6733_v40, 3  ;;  %v6828_v3 = vrot.slane %v6804_v45, 3 }
0x1c9c   : > { %v6818_v9 = vrot.slane %v6735_v59, 3 }
0x1c9d   : > { %v6810_v10 = vadd.f32 %v6808_v6, %v12360_v48 }
0x1c9e   : > { %v6820_v25 = vadd.f32 %v6818_v9, %v12364_v28 }
0x1c9f   : > { %v7215_v44 = vmul.f32 -1.442695, %v6810_v10 }
0x1ca0   : > { %v7216_v57 = vmul.f32 -1.442695, %v6820_v25 }
0x1ca1   : > { %11023 = vpow2.f32 %v7215_v44 }
0x1ca2   : > { %11025 = vpow2.f32 %v7216_v57 }
0x1cab   : > { %v11024_v39 = vpop.eup %11023 }
0x1cac   : > { %v11026_v32 = vpop.eup %11025  ;;  %v6814_v33 = vadd.f32 1.0, %v11024_v39 }
0x1cad   : > { %v6824_v37 = vadd.f32 1.0, %v11026_v32 }
0x1cae   : > { %11027 = vrcp.f32 %v6814_v33 }
0x1caf   : > { %11029 = vrcp.f32 %v6824_v37 }
0x1cb8   : > { %v11028_v52 = vpop.eup %11027 }
0x1cb9   : > { %v11030_v41 = vpop.eup %11029  ;;  %v6830_v48 = vmul.f32 %v11028_v52, %v6828_v3 }
0x1cba   : > { %v6837_v51 = vmul.f32 %v11030_v41, %v6835_v47  ;;  %v6833_v55 = vsub.f32 1.0, %v11030_v41 }
0x1cbb   : > { %v6831_v28 = vadd.f32 %v6830_v48, %v12362_v30 }
0x1cbd   : > { %11031 = vtanh.f32 %v6831_v28 }
0x1cc7   : > { %v11032_v53 = vpop.eup %11031 }
0x1cc8   : > { %v6834_v31 = vmul.f32 %v11032_v53, %v6833_v55 }
0x1cca   : > { %v6838_v61 = vadd.f32 %v6837_v51, %v6834_v31 }
0x1ccc   : > { %v6857_v8 = vrot.slane %v6838_v61, 5 }
0x1cce   : > { %8527 = vmatmul.mubr.f32.vlgmr.msra.gmra.mrb[74].mxu1 %v6857_v8 }
0x1da1   : > { %v6925_v36 = vpop.f32.mrb[74].mxu1 }
0x1da2   : > { %v6926_v43 = vadd.f32 %v6925_v36, %v6855_v11  ;;  %v8528_v38 = vpop.f32.mrb[75].mxu1 }
0x1da4   : > { %v6930_v23 = vsel %vm6929_vm3, %v6926_v43, -inf }
0x1da5   : > { %6931 = vmax.xlane.f32.xlu0 %v6930_v23 }
0x1e32   : > { %v6932_v56 = vpop.xlane.xlu0 %6931 }
0x1e33   : > { %v6933_v26 = vsub.f32 %v6926_v43, %v6932_v56 }
0x1e35   : > { %v6934_v30 = vmul.f32 1.442695, %v6933_v26 }
0x1e37   : > { %11033 = vpow2.f32 %v6934_v30 }
0x1e41   : > { %v11034_v42 = vpop.eup %11033 }
0x1e42   : > { %v6936_v58 = vsel %vm6929_vm3, %v11034_v42, 0.0 }
0x1e43   : > { %6937 = vadd.xlane.f32.xlu0 %v6936_v58 }
0x1ed0   : > { %v6938_v62 = vpop.xlane.xlu0 %6937 }
0x1ed1   : > { %11035 = vrcp.f32 %v6938_v62 }
0x1edb   : > { %v11036_v24 = vpop.eup %11035 }
0x1edc   : > { %v6940_v50 = vmul.f32 %v11036_v24, %v11034_v42 }
0x1ede   : > { %6941 = vst.msk [vmem:[%s647_s29] sm:$0x1] %vm6929_vm3, %v6940_v50 }
0x1edf   : > { %11386 = shalt.err (!%p11383_p3)
}
0x1ee0   : > { %s11387_s26 = scalar_lea.hbm %s13365_s4, 16  ;;  %s11391_s20 = scalar_lea.hbm %s13476_s7, 32 }
0x1ee1   : > { %p11388_p4 = scmp.ne.s32.totalorder %s13365_s4, %s11387_s26  ;;  %p11392_p11 = scmp.lt.u32.totalorder %s13365_s4, %s13476_s7 }
0x1ee2   : > { %p11393_p13 = scmp.lt.u32.totalorder %s11391_s20, %s11387_s26  ;;  %p11395_p0 = scmp.lt.u32.totalorder %s11387_s26, %s13365_s4 }
0x1ee3   : > { %p11389_p7 = pnand %p11388_p4, %p13477_p6 }
0x1ee4   : > { %p11394_p1 = por %p11393_p13, %p11392_p11 }
0x1ee5   : > { %p11390_p8 = pneg %p11389_p7 }
0x1ee6   : > { %p11396_p5 = por %p11395_p0, %p11394_p1 }
0x1ee8   : > { %p11397_p9 = pnand %p11396_p5, %p11390_p8 }
0x1eea   : > { %11400 = shalt.err (!%p11397_p9)
}
0x1eeb   : > { %10690 = dma.vmem_to_hbm [thread:$0]  (%p13477_p6), %s13367_s16, 16, %s13365_s4, %s6943_s28  }
0x1eec PF: > { %s13478_s27 = sld [smem:[#allocation34_spill]]  ;;  %s13479_s17 = sld [smem:[#allocation31_spill]] }
0x1eed   : > { %s13480_s29 = sld [smem:[#allocation38_spill]] }
0x1ef2   : > { %p10757_p12 = scmp.ge.s32.totalorder %s13478_s27, 2  ;;  %s6967_s18 = sand.u32 1, %s13479_s17  }
0x1ef3   : > { %p13481_p10 = scmp.ne.s32.totalorder %s13480_s29, 0  ;;  %s6968_s1 = scalar_lea.sflag [#allocation4], %s6967_s18 }
0x1ef5   : > { %p10730_p2 = pnand %p10757_p12, %p13481_p10 }
0x1ef7   : > { %11446 = dma.done.wait (!%p10730_p2), %s6968_s1, 16  }
0x1ef8   : > { %11448 = vsyncadd (!%p10730_p2), %s6968_s1, 4294967280  ;;  %s13482_s21 = sld [smem:[#allocation35_spill]]  ;;  %s13483_s18 = sld [smem:[#allocation32_spill]] }
0x1ef9   : > { %s13484_s19 = sld [smem:[#allocation33_spill]]  ;;  %s13485_s20 = sld [smem:[#allocation36_spill]] }
0x1efe   : > { %p32_p3 = scmp.ge.s32.totalorder %s13482_s21, 4  }
0x1f00   :  { %34 = sbr.rel (!%p32_p3) target bundleno = 16 (0x10), region = 164 }
0x1f07   :  { %6972 = vsyncpa [#allocation3], 1 }
0x1f08   :  { %6974 = vsyncpa [#allocation3 + $0x1], 1 }
0x1f09   :  { %6975 = vsyncpa [#allocation6], 1 }
0x1f0a   :  { %6976 = vsyncpa [#allocation9], 1 }
0x1f0b   :  { %6977 = vsyncpa [#allocation12], 1 }
0x1f0c   :  { %6978 = vsyncpa [#allocation15], 1 }
0x1f0d   :  { %6979 = vsyncpa [#allocation18], 1 }
0x1f0e   :  { %6980 = vsyncpa [#allocation21], 1 }
0x1f0f   :  { %6981 = vsyncpa [#allocation4], 1 }
0x1f10   :  { %6983 = vsyncpa [#allocation4 + $0x1], 1 }

</bundles_post_ra>
